<compile_context>
chip_gen: v6e
topology: v6e:2x2x1
jax: 0.10.0
libtpu: 0.0.40
codegen_flags: <defaults>
</compile_context>

<pallas_src>
import functools

import jax
import jax.numpy as jnp
from jax.experimental import pallas as pl
from jax.experimental.pallas import tpu as pltpu

LEAKY_SLOPE = 0.2
BN_EPS = 1e-5  # nn.BatchNorm2d default


def _round_up(x, m):
    return (x + m - 1) // m * m


def _cdiv(a, b):
    return -(-a // b)


# ----------------------------------------------------------------------------
# Pallas kernel: tiled GEMM, bf16 operands -> f32 accumulation (VMEM scratch
# when K is tiled), fused epilogue: optional bias, optional LeakyReLU,
# optional per-column batch statistics (sum, sum_sq), cast to output dtype.
# ----------------------------------------------------------------------------
def _gemm_kernel(*refs, nk, has_bias, emit_stats, act):
    a_ref, b_ref = refs[0], refs[1]
    idx = 2
    bias_ref = None
    if has_bias:
        bias_ref = refs[idx]
        idx += 1
    o_ref = refs[idx]
    idx += 1
    sum_ref = sq_ref = None
    if emit_stats:
        sum_ref, sq_ref = refs[idx], refs[idx + 1]
        idx += 2
    acc_ref = refs[idx] if nk > 1 else None

    def epilogue(y):                       # y: f32 (tm, tn)
        if has_bias:
            y = y + bias_ref[...]
        if act == "leaky":
            y = jnp.where(y >= 0.0, y, LEAKY_SLOPE * y)
        if emit_stats:
            # Zero-padded M rows of A give y == 0 here (no bias on stats
            # layers, asserted in the wrapper) so they contribute nothing.
            sum_ref[...] = jnp.sum(y, axis=0)[None, None, :]
            sq_ref[...] = jnp.sum(y * y, axis=0)[None, None, :]
        o_ref[...] = y.astype(o_ref.dtype)

    part = jnp.dot(a_ref[...], b_ref[...], preferred_element_type=jnp.float32)

    if nk == 1:
        epilogue(part)
    else:
        k = pl.program_id(2)

        @pl.when(k == 0)                   # write first partial (no zero-init)
        def _():
            acc_ref[...] = part

        @pl.when(k > 0)
        def _():
            acc_ref[...] += part

        @pl.when(k == nk - 1)
        def _():
            epilogue(acc_ref[...])


def gemm_fused(a, b, bias=None, act=None, emit_stats=False,
               out_dtype=jnp.float32, tm_max=512, tn_max=512, tk_max=2048):
    """out = act(a @ b + bias); optionally also per-column (sum, sum_sq) of out.

    Operands are cast to bf16 for the MXU; accumulation, epilogue and the BN
    statistics stay f32. `out` is cast to `out_dtype` inside the kernel so
    memory-bound layers stream bf16 instead of f32.
    """
    M, K = a.shape
    K2, N = b.shape
    assert K == K2
    # Zero-padded M rows would otherwise contribute `bias` to the column stats.
    assert not (bias is not None and emit_stats)

    M8 = _round_up(max(M, 8), 8)
    Np = _round_up(N, 128)

    # K tiling: one full-K step when it fits; otherwise near-equal 256-aligned
    # chunks (never pad K up to a full tk_max multiple).
    if K <= tk_max:
        nk, tk = 1, K
    else:
        nk = _cdiv(K, tk_max)
        tk = _round_up(_cdiv(K, nk), 256)
    Kp = nk * tk

    # M tiling: small-K layers are step-overhead / store bound -> bigger tm.
    tm = min(1024 if K <= 256 else tm_max, M8)
    # N tiling: largest of (tn_max, 256, 128) that divides the padded width.
    tn = 128
    for cand in (tn_max, 256, 128):
        if Np % cand == 0:
            tn = cand
            break
    nm, nn = _cdiv(M8, tm), Np // tn

    # v7x megacore: keep >= 2 blocks on the parallel axes whenever possible,
    # otherwise one of the two TensorCores idles (no effect on v5e / v6e).
    if nm * nn == 1:
        if Np >= 256:
            tn, nn = 128, Np // 128
        elif M8 >= 16:
            tm = _round_up(_cdiv(M8, 2), 8)
            nm = _cdiv(M8, tm)
    Mp = nm * tm

    a_bf = a.astype(jnp.bfloat16)
    if (Mp, Kp) != (M, K):
        a_bf = jnp.zeros((Mp, Kp), jnp.bfloat16).at[:M, :K].set(a_bf)
    b_bf = b.astype(jnp.bfloat16)
    if (Kp, Np) != (K, N):
        b_bf = jnp.zeros((Kp, Np), jnp.bfloat16).at[:K, :N].set(b_bf)

    inputs = [a_bf, b_bf]
    in_specs = [
        pl.BlockSpec((tm, tk), lambda i, j, k: (i, k)),
        pl.BlockSpec((tk, tn), lambda i, j, k: (k, j)),
    ]
    if bias is not None:
        bias_p = jnp.zeros((1, Np), jnp.float32).at[0, :N].set(
            bias.astype(jnp.float32))
        inputs.append(bias_p)
        in_specs.append(pl.BlockSpec((1, tn), lambda i, j, k: (0, j)))

    out_shapes = [jax.ShapeDtypeStruct((Mp, Np), out_dtype)]
    out_specs = [pl.BlockSpec((tm, tn), lambda i, j, k: (i, j))]
    if emit_stats:
        out_shapes += [jax.ShapeDtypeStruct((nm, 1, Np), jnp.float32)] * 2
        out_specs += [pl.BlockSpec((1, 1, tn), lambda i, j, k: (i, 0, j))] * 2

    scratch_shapes = (
        (pltpu.VMEM((tm, tn), jnp.float32),) if nk > 1 else ())

    results = pl.pallas_call(
        functools.partial(_gemm_kernel, nk=nk, has_bias=bias is not None,
                          emit_stats=emit_stats, act=act),
        out_shape=out_shapes,
        grid=(nm, nn, nk),
        in_specs=in_specs,
        out_specs=out_specs,
        scratch_shapes=scratch_shapes,
        compiler_params=pltpu.CompilerParams(
            dimension_semantics=("parallel", "parallel", "arbitrary"),
            # 512x512 tiles with tk=2048, double-buffered, use ~10-11 MiB;
            # v5e's scoped-VMEM default is 16 MiB -> raise the limit explicitly
            # (32 MiB fits the scoped defaults / physical VMEM of every gen).
            vmem_limit_bytes=32 * 1024 * 1024),
    )(*inputs)

    out = results[0]
    if (Mp, Np) != (M, N):
        out = out[:M, :N]
    stats = None
    if emit_stats:
        col_sum = jnp.sum(results[1][:, 0, :N], axis=0)   # tiny (nm, N) reduce
        col_sq = jnp.sum(results[2][:, 0, :N], axis=0)
        stats = (col_sum, col_sq)
    return out, stats


# ----------------------------------------------------------------------------
# Conv2d glue: NHWC im2col in plain JAX (lane-contiguous, C last), GEMM in Pallas
# ----------------------------------------------------------------------------
def im2col_nhwc(x, kh, kw, sh, sw, ph, pw):
    """x: [B, H, W, C] -> patches [B*Ho*Wo, kh*kw*C] (feature order kh, kw, C)."""
    B, H, W, C = x.shape
    xp = jnp.pad(x, ((0, 0), (ph, ph), (pw, pw), (0, 0)))
    Ho = (H + 2 * ph - kh) // sh + 1
    Wo = (W + 2 * pw - kw) // sw + 1
    cols = []
    for i in range(kh):
        for j in range(kw):
            cols.append(xp[:, i:i + sh * Ho:sh, j:j + sw * Wo:sw, :])
    p = jnp.stack(cols, axis=3)                         # [B, Ho, Wo, kh*kw, C]
    return p.reshape(B * Ho * Wo, kh * kw * C), Ho, Wo


def conv_gemm(x_nhwc, w, *, bias=None, stride=(1, 1), pad=(0, 0),
              act=None, emit_stats=False, out_dtype=jnp.float32):
    """Conv2d as im2col + fused Pallas GEMM. x is NHWC, w is PyTorch OIHW."""
    B = x_nhwc.shape[0]
    Cout, Cin, kh, kw = w.shape
    patches, Ho, Wo = im2col_nhwc(x_nhwc, kh, kw, stride[0], stride[1],
                                  pad[0], pad[1])
    wmat = jnp.transpose(w, (2, 3, 1, 0)).reshape(kh * kw * Cin, Cout)
    out, stats = gemm_fused(patches, wmat, bias=bias, act=act,
                            emit_stats=emit_stats, out_dtype=out_dtype)
    return out, stats, (B, Ho, Wo, Cout)


# ----------------------------------------------------------------------------
# BatchNorm (training-mode batch stats) folded to scale/shift + LeakyReLU.
# Applied in plain JAX so XLA fuses it into the NEXT conv's im2col patch build
# (raw bf16 conv output read once, no separate (M, C) pass). An in-kernel
# A-operand prologue would corrupt the next conv's zero padding, so it is not
# used.
# ----------------------------------------------------------------------------
def bn_fold(col_sum, col_sq, m_rows, gamma, beta):
    mean = col_sum / m_rows
    var = jnp.maximum(col_sq / m_rows - mean * mean, 0.0)   # biased variance
    scale = gamma * jax.lax.rsqrt(var + BN_EPS)
    shift = beta - mean * scale
    return scale, shift


def apply_bn_leaky(h_raw, scale, shift):
    y = h_raw.astype(jnp.float32) * scale + shift
    return jnp.where(y >= 0.0, y, LEAKY_SLOPE * y).astype(jnp.bfloat16)


# ----------------------------------------------------------------------------
# Parameter init (deterministic, mirroring weights_init shapes/distributions)
# ----------------------------------------------------------------------------
def init_params(key, n_class=10, nc=1, dim=128, nf=64):
    keys = jax.random.split(key, 12)
    p = {}
    # c1: Conv2d(nc, nf, 4, 2, 1, bias=False)   weight ~ N(0, 0.02)
    p["c1_w"] = 0.02 * jax.random.normal(keys[0], (nf, nc, 4, 4), jnp.float32)

    def dcgan(kw_, kg_, nin, nout, name):
        # Conv bias not materialized: training-mode BatchNorm subtracts the
        # per-channel batch mean, which cancels any constant bias exactly.
        p[name + "_w"] = 0.02 * jax.random.normal(kw_, (nout, nin, 4, 4), jnp.float32)
        p[name + "_gamma"] = 1.0 + 0.02 * jax.random.normal(kg_, (nout,), jnp.float32)
        p[name + "_beta"] = jnp.zeros((nout,), jnp.float32)

    dcgan(keys[1], keys[2], nf, nf * 2, "c2")
    dcgan(keys[3], keys[4], nf * 2, nf * 4, "c3")
    dcgan(keys[5], keys[6], nf * 4, nf * 8, "c4")
    dcgan(keys[7], keys[8], nf * 8, nf * 8, "c5")
    # c6: Conv2d(nf*8, dim, (4,3), (1,1), (0,1)) with bias
    p["c6_w"] = 0.02 * jax.random.normal(keys[9], (dim, nf * 8, 4, 3), jnp.float32)
    p["c6_b"] = jnp.zeros((dim,), jnp.float32)
    # fc: Linear(dim, n_class): weight ~ U(-0.1, 0.1), bias = 0
    p["fc_w"] = jax.random.uniform(keys[10], (n_class, dim), jnp.float32, -0.1, 0.1)
    p["fc_b"] = jnp.zeros((n_class,), jnp.float32)
    return p


# ----------------------------------------------------------------------------
# ClassifierContent.forward
# ----------------------------------------------------------------------------
def classifier_content_forward(p, x):
    # NCHW (PyTorch layout) -> NHWC once, cast to bf16 before the first im2col.
    h = jnp.transpose(x, (0, 2, 3, 1)).astype(jnp.bfloat16)

    # c1: Conv2d(nc, nf, 4, 2, 1, bias=False) + LeakyReLU(0.2)  (fused epilogue)
    y, _, shp = conv_gemm(h, p["c1_w"], stride=(2, 2), pad=(1, 1),
                          act="leaky", out_dtype=jnp.bfloat16)
    h = y.reshape(shp)

    # c2..c5: Conv2d(4,2,1) + BatchNorm2d (training-mode batch stats) + LeakyReLU(0.2)
    for name in ("c2", "c3", "c4", "c5"):
        y, (col_sum, col_sq), shp = conv_gemm(
            h, p[name + "_w"], stride=(2, 2), pad=(1, 1),
            emit_stats=True, out_dtype=jnp.bfloat16)
        m_rows = shp[0] * shp[1] * shp[2]
        scale, shift = bn_fold(col_sum, col_sq, m_rows,
                               p[name + "_gamma"], p[name + "_beta"])
        # Fused by XLA into the next layer's im2col patch build.
        h = apply_bn_leaky(y.reshape(shp), scale, shift)

    # c6: Conv2d(nf*8, dim, (4,3), (1,1), (0,1)) with bias, no activation
    y, _, shp = conv_gemm(h, p["c6_w"], bias=p["c6_b"], stride=(1, 1),
                          pad=(0, 1), out_dtype=jnp.float32)
    B, Ho, Wo, Cout = shp
    if Ho * Wo == 1:
        h6 = y.reshape(B, Cout)
    else:
        # Match PyTorch's NCHW flatten order if spatial were > 1x1.
        h6 = y.reshape(shp).transpose(0, 3, 1, 2).reshape(B, -1)

    # fc: Linear(dim, n_class) + Sigmoid — tiny, kept in plain JAX.
    logits = h6.astype(jnp.float32) @ p["fc_w"].T + p["fc_b"]
    return jax.nn.sigmoid(logits)


if __name__ == "__main__":
    key = jax.random.PRNGKey(0)
    pkey, xkey = jax.random.split(key)

    n_class, nc, dim = 10, 1, 128
    params = init_params(pkey, n_class=n_class, nc=nc, dim=dim)

    # Smallest NCHW input whose five stride-2 convs + the (4,3) valid-H conv
    # flatten to exactly `dim` features before fc (SC09-style 128x32 spectrogram).
    x = jax.random.normal(xkey, (2, nc, 128, 32), jnp.float32)

    fwd = jax.jit(classifier_content_forward)
    out = jax.block_until_ready(fwd(params, x))

    assert out.shape == (2, n_class), out.shape
    assert bool(jnp.all(jnp.isfinite(out)))
    assert bool(jnp.all((out >= 0.0) & (out <= 1.0)))  # sigmoid range
    print("KERNEL_OK")
</pallas_src>

<mosaic_0001>
module attributes {stable_mosaic.version = 11 : i64} {
  func.func @_gemm_kernel(%arg0: i32, %arg1: i32, %arg2: i32, %arg3: memref<1024x16xbf16, #tpu.memory_space<vmem>>, %arg4: memref<16x128xbf16, #tpu.memory_space<vmem>>, %arg5: memref<1024x128xbf16, #tpu.memory_space<vmem>>) attributes {dimension_semantics = [#tpu.dimension_semantics<parallel>, #tpu.dimension_semantics<parallel>, #tpu.dimension_semantics<arbitrary>], iteration_bounds = array<i64: 2, 1, 1>, scalar_prefetch = 0 : i64, scratch_operands = 0 : i64, tpu.core_type = #tpu.core_type<tc>, window_params = [{transform_indices = @transform_0, window_bounds = array<i64: 1024, 16>}, {transform_indices = @transform_1, window_bounds = array<i64: 16, 128>}, {transform_indices = @transform_2, window_bounds = array<i64: 1024, 128>}]} {
    %c0 = arith.constant 0 : index
    %c0_0 = arith.constant 0 : index
    %0 = vector.load %arg3[%c0, %c0_0] : memref<1024x16xbf16, #tpu.memory_space<vmem>>, vector<1024x16xbf16>
    %c0_1 = arith.constant 0 : index
    %c0_2 = arith.constant 0 : index
    %1 = vector.load %arg4[%c0_1, %c0_2] : memref<16x128xbf16, #tpu.memory_space<vmem>>, vector<16x128xbf16>
    %cst = arith.constant dense<0.000000e+00> : vector<1024x128xf32>
    %2 = tpu.matmul %0, %1, %cst {dimension_numbers = #tpu.dot_dimension_numbers<[1], [0], [0], [1], [0, 0, 1, 1], [], []>} : vector<1024x16xbf16>, vector<16x128xbf16>, vector<1024x128xf32> -> vector<1024x128xf32>
    %cst_3 = arith.constant 0.000000e+00 : f32
    %3 = vector.broadcast %cst_3 : f32 to vector<1024x128xf32>
    %4 = arith.cmpf oge, %2, %3 : vector<1024x128xf32>
    %cst_4 = arith.constant 2.000000e-01 : f32
    %5 = vector.broadcast %cst_4 : f32 to vector<1024x128xf32>
    %6 = arith.mulf %5, %2 : vector<1024x128xf32>
    %7 = arith.select %4, %2, %6 : vector<1024x128xi1>, vector<1024x128xf32>
    %8 = arith.truncf %7 : vector<1024x128xf32> to vector<1024x128xbf16>
    %c0_5 = arith.constant 0 : index
    %c0_6 = arith.constant 0 : index
    %9 = vector.load %arg5[%c0_5, %c0_6] : memref<1024x128xbf16, #tpu.memory_space<vmem>>, vector<1024x128xbf16>
    tpu.vector_store %arg5[%c0_5, %c0_6], %8 {strides = array<i32>} : memref<1024x128xbf16, #tpu.memory_space<vmem>>, vector<1024x128xbf16>,
    return
  }
  func.func @transform_0(%arg0: i32, %arg1: i32, %arg2: i32) -> (i32, i32) {
    %c0_i32 = arith.constant 0 : i32
    return %arg0, %arg2 : i32, i32
  }
  func.func @transform_1(%arg0: i32, %arg1: i32, %arg2: i32) -> (i32, i32) {
    %c0_i32 = arith.constant 0 : i32
    return %arg2, %arg1 : i32, i32
  }
  func.func @transform_2(%arg0: i32, %arg1: i32, %arg2: i32) -> (i32, i32) {
    %c0_i32 = arith.constant 0 : i32
    return %arg0, %arg1 : i32, i32
  }
}

module attributes {stable_mosaic.version = 11 : i64} {
  func.func @_gemm_kernel(%arg0: i32, %arg1: i32, %arg2: i32, %arg3: memref<256x1024xbf16, #tpu.memory_space<vmem>>, %arg4: memref<1024x128xbf16, #tpu.memory_space<vmem>>, %arg5: memref<256x128xbf16, #tpu.memory_space<vmem>>, %arg6: memref<1x1x128xf32, #tpu.memory_space<vmem>>, %arg7: memref<1x1x128xf32, #tpu.memory_space<vmem>>) attributes {dimension_semantics = [#tpu.dimension_semantics<parallel>, #tpu.dimension_semantics<parallel>, #tpu.dimension_semantics<arbitrary>], iteration_bounds = array<i64: 2, 1, 1>, scalar_prefetch = 0 : i64, scratch_operands = 0 : i64, tpu.core_type = #tpu.core_type<tc>, window_params = [{transform_indices = @transform_0, window_bounds = array<i64: 256, 1024>}, {transform_indices = @transform_1, window_bounds = array<i64: 1024, 128>}, {transform_indices = @transform_2, window_bounds = array<i64: 256, 128>}, {transform_indices = @transform_3, window_bounds = array<i64: 1, 1, 128>}, {transform_indices = @transform_4, window_bounds = array<i64: 1, 1, 128>}]} {
    %c0 = arith.constant 0 : index
    %c0_0 = arith.constant 0 : index
    %0 = vector.load %arg3[%c0, %c0_0] : memref<256x1024xbf16, #tpu.memory_space<vmem>>, vector<256x1024xbf16>
    %c0_1 = arith.constant 0 : index
    %c0_2 = arith.constant 0 : index
    %1 = vector.load %arg4[%c0_1, %c0_2] : memref<1024x128xbf16, #tpu.memory_space<vmem>>, vector<1024x128xbf16>
    %cst = arith.constant dense<0.000000e+00> : vector<256x128xf32>
    %2 = tpu.matmul %0, %1, %cst {dimension_numbers = #tpu.dot_dimension_numbers<[1], [0], [0], [1], [0, 0, 1, 1], [], []>} : vector<256x1024xbf16>, vector<1024x128xbf16>, vector<256x128xf32> -> vector<256x128xf32>
    %cst_3 = arith.constant dense<0.000000e+00> : vector<128xf32>
    %3 = vector.multi_reduction <add>, %2, %cst_3 [0] : vector<256x128xf32> to vector<128xf32>
    %4 = vector.shape_cast %3 : vector<128xf32> to vector<1x1x128xf32>
    %c0_4 = arith.constant 0 : index
    %c0_5 = arith.constant 0 : index
    %c0_6 = arith.constant 0 : index
    %5 = vector.load %arg6[%c0_4, %c0_5, %c0_6] : memref<1x1x128xf32, #tpu.memory_space<vmem>>, vector<1x1x128xf32>
    tpu.vector_store %arg6[%c0_4, %c0_5, %c0_6], %4 {strides = array<i32>} : memref<1x1x128xf32, #tpu.memory_space<vmem>>, vector<1x1x128xf32>,
    %6 = arith.mulf %2, %2 : vector<256x128xf32>
    %cst_7 = arith.constant dense<0.000000e+00> : vector<128xf32>
    %7 = vector.multi_reduction <add>, %6, %cst_7 [0] : vector<256x128xf32> to vector<128xf32>
    %8 = vector.shape_cast %7 : vector<128xf32> to vector<1x1x128xf32>
    %c0_8 = arith.constant 0 : index
    %c0_9 = arith.constant 0 : index
    %c0_10 = arith.constant 0 : index
    %9 = vector.load %arg7[%c0_8, %c0_9, %c0_10] : memref<1x1x128xf32, #tpu.memory_space<vmem>>, vector<1x1x128xf32>
    tpu.vector_store %arg7[%c0_8, %c0_9, %c0_10], %8 {strides = array<i32>} : memref<1x1x128xf32, #tpu.memory_space<vmem>>, vector<1x1x128xf32>,
    %10 = arith.truncf %2 : vector<256x128xf32> to vector<256x128xbf16>
    %c0_11 = arith.constant 0 : index
    %c0_12 = arith.constant 0 : index
    %11 = vector.load %arg5[%c0_11, %c0_12] : memref<256x128xbf16, #tpu.memory_space<vmem>>, vector<256x128xbf16>
    tpu.vector_store %arg5[%c0_11, %c0_12], %10 {strides = array<i32>} : memref<256x128xbf16, #tpu.memory_space<vmem>>, vector<256x128xbf16>,
    return
  }
  func.func @transform_0(%arg0: i32, %arg1: i32, %arg2: i32) -> (i32, i32) {
    %c0_i32 = arith.constant 0 : i32
    return %arg0, %arg2 : i32, i32
  }
  func.func @transform_1(%arg0: i32, %arg1: i32, %arg2: i32) -> (i32, i32) {
    %c0_i32 = arith.constant 0 : i32
    return %arg2, %arg1 : i32, i32
  }
  func.func @transform_2(%arg0: i32, %arg1: i32, %arg2: i32) -> (i32, i32) {
    %c0_i32 = arith.constant 0 : i32
    return %arg0, %arg1 : i32, i32
  }
  func.func @transform_3(%arg0: i32, %arg1: i32, %arg2: i32) -> (i32, i32, i32) {
    %c0_i32 = arith.constant 0 : i32
    %c0_i32_0 = arith.constant 0 : i32
    return %arg0, %c0_i32, %arg1 : i32, i32, i32
  }
  func.func @transform_4(%arg0: i32, %arg1: i32, %arg2: i32) -> (i32, i32, i32) {
    %c0_i32 = arith.constant 0 : i32
    %c0_i32_0 = arith.constant 0 : i32
    return %arg0, %c0_i32, %arg1 : i32, i32, i32
  }
}

module attributes {stable_mosaic.version = 11 : i64} {
  func.func @_gemm_kernel(%arg0: i32, %arg1: i32, %arg2: i32, %arg3: memref<128x2048xbf16, #tpu.memory_space<vmem>>, %arg4: memref<2048x128xbf16, #tpu.memory_space<vmem>>, %arg5: memref<128x128xbf16, #tpu.memory_space<vmem>>, %arg6: memref<1x1x128xf32, #tpu.memory_space<vmem>>, %arg7: memref<1x1x128xf32, #tpu.memory_space<vmem>>) attributes {dimension_semantics = [#tpu.dimension_semantics<parallel>, #tpu.dimension_semantics<parallel>, #tpu.dimension_semantics<arbitrary>], iteration_bounds = array<i64: 1, 2, 1>, scalar_prefetch = 0 : i64, scratch_operands = 0 : i64, tpu.core_type = #tpu.core_type<tc>, window_params = [{transform_indices = @transform_0, window_bounds = array<i64: 128, 2048>}, {transform_indices = @transform_1, window_bounds = array<i64: 2048, 128>}, {transform_indices = @transform_2, window_bounds = array<i64: 128, 128>}, {transform_indices = @transform_3, window_bounds = array<i64: 1, 1, 128>}, {transform_indices = @transform_4, window_bounds = array<i64: 1, 1, 128>}]} {
    %c0 = arith.constant 0 : index
    %c0_0 = arith.constant 0 : index
    %0 = vector.load %arg3[%c0, %c0_0] : memref<128x2048xbf16, #tpu.memory_space<vmem>>, vector<128x2048xbf16>
    %c0_1 = arith.constant 0 : index
    %c0_2 = arith.constant 0 : index
    %1 = vector.load %arg4[%c0_1, %c0_2] : memref<2048x128xbf16, #tpu.memory_space<vmem>>, vector<2048x128xbf16>
    %cst = arith.constant dense<0.000000e+00> : vector<128x128xf32>
    %2 = tpu.matmul %0, %1, %cst {dimension_numbers = #tpu.dot_dimension_numbers<[1], [0], [0], [1], [0, 0, 1, 1], [], []>} : vector<128x2048xbf16>, vector<2048x128xbf16>, vector<128x128xf32> -> vector<128x128xf32>
    %cst_3 = arith.constant dense<0.000000e+00> : vector<128xf32>
    %3 = vector.multi_reduction <add>, %2, %cst_3 [0] : vector<128x128xf32> to vector<128xf32>
    %4 = vector.shape_cast %3 : vector<128xf32> to vector<1x1x128xf32>
    %c0_4 = arith.constant 0 : index
    %c0_5 = arith.constant 0 : index
    %c0_6 = arith.constant 0 : index
    %5 = vector.load %arg6[%c0_4, %c0_5, %c0_6] : memref<1x1x128xf32, #tpu.memory_space<vmem>>, vector<1x1x128xf32>
    tpu.vector_store %arg6[%c0_4, %c0_5, %c0_6], %4 {strides = array<i32>} : memref<1x1x128xf32, #tpu.memory_space<vmem>>, vector<1x1x128xf32>,
    %6 = arith.mulf %2, %2 : vector<128x128xf32>
    %cst_7 = arith.constant dense<0.000000e+00> : vector<128xf32>
    %7 = vector.multi_reduction <add>, %6, %cst_7 [0] : vector<128x128xf32> to vector<128xf32>
    %8 = vector.shape_cast %7 : vector<128xf32> to vector<1x1x128xf32>
    %c0_8 = arith.constant 0 : index
    %c0_9 = arith.constant 0 : index
    %c0_10 = arith.constant 0 : index
    %9 = vector.load %arg7[%c0_8, %c0_9, %c0_10] : memref<1x1x128xf32, #tpu.memory_space<vmem>>, vector<1x1x128xf32>
    tpu.vector_store %arg7[%c0_8, %c0_9, %c0_10], %8 {strides = array<i32>} : memref<1x1x128xf32, #tpu.memory_space<vmem>>, vector<1x1x128xf32>,
    %10 = arith.truncf %2 : vector<128x128xf32> to vector<128x128xbf16>
    %c0_11 = arith.constant 0 : index
    %c0_12 = arith.constant 0 : index
    %11 = vector.load %arg5[%c0_11, %c0_12] : memref<128x128xbf16, #tpu.memory_space<vmem>>, vector<128x128xbf16>
    tpu.vector_store %arg5[%c0_11, %c0_12], %10 {strides = array<i32>} : memref<128x128xbf16, #tpu.memory_space<vmem>>, vector<128x128xbf16>,
    return
  }
  func.func @transform_0(%arg0: i32, %arg1: i32, %arg2: i32) -> (i32, i32) {
    %c0_i32 = arith.constant 0 : i32
    return %arg0, %arg2 : i32, i32
  }
  func.func @transform_1(%arg0: i32, %arg1: i32, %arg2: i32) -> (i32, i32) {
    %c0_i32 = arith.constant 0 : i32
    return %arg2, %arg1 : i32, i32
  }
  func.func @transform_2(%arg0: i32, %arg1: i32, %arg2: i32) -> (i32, i32) {
    %c0_i32 = arith.constant 0 : i32
    return %arg0, %arg1 : i32, i32
  }
  func.func @transform_3(%arg0: i32, %arg1: i32, %arg2: i32) -> (i32, i32, i32) {
    %c0_i32 = arith.constant 0 : i32
    %c0_i32_0 = arith.constant 0 : i32
    return %arg0, %c0_i32, %arg1 : i32, i32, i32
  }
  func.func @transform_4(%arg0: i32, %arg1: i32, %arg2: i32) -> (i32, i32, i32) {
    %c0_i32 = arith.constant 0 : i32
    %c0_i32_0 = arith.constant 0 : i32
    return %arg0, %c0_i32, %arg1 : i32, i32, i32
  }
}

module attributes {stable_mosaic.version = 11 : i64} {
  func.func @_gemm_kernel(%arg0: i32, %arg1: i32, %arg2: i32, %arg3: memref<32x2048xbf16, #tpu.memory_space<vmem>>, %arg4: memref<2048x128xbf16, #tpu.memory_space<vmem>>, %arg5: memref<32x128xbf16, #tpu.memory_space<vmem>>, %arg6: memref<1x1x128xf32, #tpu.memory_space<vmem>>, %arg7: memref<1x1x128xf32, #tpu.memory_space<vmem>>, %arg8: memref<32x128xf32, #tpu.memory_space<vmem>>) attributes {dimension_semantics = [#tpu.dimension_semantics<parallel>, #tpu.dimension_semantics<parallel>, #tpu.dimension_semantics<arbitrary>], iteration_bounds = array<i64: 1, 4, 2>, scalar_prefetch = 0 : i64, scratch_operands = 1 : i64, tpu.core_type = #tpu.core_type<tc>, window_params = [{transform_indices = @transform_0, window_bounds = array<i64: 32, 2048>}, {transform_indices = @transform_1, window_bounds = array<i64: 2048, 128>}, {transform_indices = @transform_2, window_bounds = array<i64: 32, 128>}, {transform_indices = @transform_3, window_bounds = array<i64: 1, 1, 128>}, {transform_indices = @transform_4, window_bounds = array<i64: 1, 1, 128>}]} {
    %c0 = arith.constant 0 : index
    %c0_0 = arith.constant 0 : index
    %0 = vector.load %arg3[%c0, %c0_0] : memref<32x2048xbf16, #tpu.memory_space<vmem>>, vector<32x2048xbf16>
    %c0_1 = arith.constant 0 : index
    %c0_2 = arith.constant 0 : index
    %1 = vector.load %arg4[%c0_1, %c0_2] : memref<2048x128xbf16, #tpu.memory_space<vmem>>, vector<2048x128xbf16>
    %cst = arith.constant dense<0.000000e+00> : vector<32x128xf32>
    %2 = tpu.matmul %0, %1, %cst {dimension_numbers = #tpu.dot_dimension_numbers<[1], [0], [0], [1], [0, 0, 1, 1], [], []>} : vector<32x2048xbf16>, vector<2048x128xbf16>, vector<32x128xf32> -> vector<32x128xf32>
    %c0_i32 = arith.constant 0 : i32
    %3 = arith.cmpi eq, %arg2, %c0_i32 : i32
    %4 = arith.extui %3 : i1 to i32
    %c0_i32_3 = arith.constant 0 : i32
    %5 = arith.cmpi ne, %4, %c0_i32_3 : i32
    scf.if %5 {
      %c0_7 = arith.constant 0 : index
      %c0_8 = arith.constant 0 : index
      %12 = vector.load %arg8[%c0_7, %c0_8] : memref<32x128xf32, #tpu.memory_space<vmem>>, vector<32x128xf32>
      tpu.vector_store %arg8[%c0_7, %c0_8], %2 {strides = array<i32>} : memref<32x128xf32, #tpu.memory_space<vmem>>, vector<32x128xf32>,
    } else {
    }
    %c0_i32_4 = arith.constant 0 : i32
    %6 = arith.cmpi sgt, %arg2, %c0_i32_4 : i32
    %7 = arith.extui %6 : i1 to i32
    %c0_i32_5 = arith.constant 0 : i32
    %8 = arith.cmpi ne, %7, %c0_i32_5 : i32
    scf.if %8 {
      %c0_7 = arith.constant 0 : index
      %c0_8 = arith.constant 0 : index
      %12 = vector.load %arg8[%c0_7, %c0_8] : memref<32x128xf32, #tpu.memory_space<vmem>>, vector<32x128xf32>
      %13 = arith.addf %12, %2 : vector<32x128xf32>
      %c0_9 = arith.constant 0 : index
      %c0_10 = arith.constant 0 : index
      %14 = vector.load %arg8[%c0_9, %c0_10] : memref<32x128xf32, #tpu.memory_space<vmem>>, vector<32x128xf32>
      tpu.vector_store %arg8[%c0_9, %c0_10], %13 {strides = array<i32>} : memref<32x128xf32, #tpu.memory_space<vmem>>, vector<32x128xf32>,
    } else {
    }
    %c1_i32 = arith.constant 1 : i32
    %9 = arith.cmpi eq, %arg2, %c1_i32 : i32
    %10 = arith.extui %9 : i1 to i32
    %c0_i32_6 = arith.constant 0 : i32
    %11 = arith.cmpi ne, %10, %c0_i32_6 : i32
    scf.if %11 {
      %c0_7 = arith.constant 0 : index
      %c0_8 = arith.constant 0 : index
      %12 = vector.load %arg8[%c0_7, %c0_8] : memref<32x128xf32, #tpu.memory_space<vmem>>, vector<32x128xf32>
      %cst_9 = arith.constant dense<0.000000e+00> : vector<128xf32>
      %13 = vector.multi_reduction <add>, %12, %cst_9 [0] : vector<32x128xf32> to vector<128xf32>
      %14 = vector.shape_cast %13 : vector<128xf32> to vector<1x1x128xf32>
      %c0_10 = arith.constant 0 : index
      %c0_11 = arith.constant 0 : index
      %c0_12 = arith.constant 0 : index
      %15 = vector.load %arg6[%c0_10, %c0_11, %c0_12] : memref<1x1x128xf32, #tpu.memory_space<vmem>>, vector<1x1x128xf32>
      tpu.vector_store %arg6[%c0_10, %c0_11, %c0_12], %14 {strides = array<i32>} : memref<1x1x128xf32, #tpu.memory_space<vmem>>, vector<1x1x128xf32>,
      %16 = arith.mulf %12, %12 : vector<32x128xf32>
      %cst_13 = arith.constant dense<0.000000e+00> : vector<128xf32>
      %17 = vector.multi_reduction <add>, %16, %cst_13 [0] : vector<32x128xf32> to vector<128xf32>
      %18 = vector.shape_cast %17 : vector<128xf32> to vector<1x1x128xf32>
      %c0_14 = arith.constant 0 : index
      %c0_15 = arith.constant 0 : index
      %c0_16 = arith.constant 0 : index
      %19 = vector.load %arg7[%c0_14, %c0_15, %c0_16] : memref<1x1x128xf32, #tpu.memory_space<vmem>>, vector<1x1x128xf32>
      tpu.vector_store %arg7[%c0_14, %c0_15, %c0_16], %18 {strides = array<i32>} : memref<1x1x128xf32, #tpu.memory_space<vmem>>, vector<1x1x128xf32>,
      %20 = arith.truncf %12 : vector<32x128xf32> to vector<32x128xbf16>
      %c0_17 = arith.constant 0 : index
      %c0_18 = arith.constant 0 : index
      %21 = vector.load %arg5[%c0_17, %c0_18] : memref<32x128xbf16, #tpu.memory_space<vmem>>, vector<32x128xbf16>
      tpu.vector_store %arg5[%c0_17, %c0_18], %20 {strides = array<i32>} : memref<32x128xbf16, #tpu.memory_space<vmem>>, vector<32x128xbf16>,
    } else {
    }
    return
  }
  func.func @transform_0(%arg0: i32, %arg1: i32, %arg2: i32) -> (i32, i32) {
    %c0_i32 = arith.constant 0 : i32
    return %arg0, %arg2 : i32, i32
  }
  func.func @transform_1(%arg0: i32, %arg1: i32, %arg2: i32) -> (i32, i32) {
    %c0_i32 = arith.constant 0 : i32
    return %arg2, %arg1 : i32, i32
  }
  func.func @transform_2(%arg0: i32, %arg1: i32, %arg2: i32) -> (i32, i32) {
    %c0_i32 = arith.constant 0 : i32
    return %arg0, %arg1 : i32, i32
  }
  func.func @transform_3(%arg0: i32, %arg1: i32, %arg2: i32) -> (i32, i32, i32) {
    %c0_i32 = arith.constant 0 : i32
    %c0_i32_0 = arith.constant 0 : i32
    return %arg0, %c0_i32, %arg1 : i32, i32, i32
  }
  func.func @transform_4(%arg0: i32, %arg1: i32, %arg2: i32) -> (i32, i32, i32) {
    %c0_i32 = arith.constant 0 : i32
    %c0_i32_0 = arith.constant 0 : i32
    return %arg0, %c0_i32, %arg1 : i32, i32, i32
  }
}

module attributes {stable_mosaic.version = 11 : i64} {
  func.func @_gemm_kernel(%arg0: i32, %arg1: i32, %arg2: i32, %arg3: memref<8x2048xbf16, #tpu.memory_space<vmem>>, %arg4: memref<2048x128xbf16, #tpu.memory_space<vmem>>, %arg5: memref<8x128xbf16, #tpu.memory_space<vmem>>, %arg6: memref<1x1x128xf32, #tpu.memory_space<vmem>>, %arg7: memref<1x1x128xf32, #tpu.memory_space<vmem>>, %arg8: memref<8x128xf32, #tpu.memory_space<vmem>>) attributes {dimension_semantics = [#tpu.dimension_semantics<parallel>, #tpu.dimension_semantics<parallel>, #tpu.dimension_semantics<arbitrary>], iteration_bounds = array<i64: 1, 4, 4>, scalar_prefetch = 0 : i64, scratch_operands = 1 : i64, tpu.core_type = #tpu.core_type<tc>, window_params = [{transform_indices = @transform_0, window_bounds = array<i64: 8, 2048>}, {transform_indices = @transform_1, window_bounds = array<i64: 2048, 128>}, {transform_indices = @transform_2, window_bounds = array<i64: 8, 128>}, {transform_indices = @transform_3, window_bounds = array<i64: 1, 1, 128>}, {transform_indices = @transform_4, window_bounds = array<i64: 1, 1, 128>}]} {
    %c0 = arith.constant 0 : index
    %c0_0 = arith.constant 0 : index
    %0 = vector.load %arg3[%c0, %c0_0] : memref<8x2048xbf16, #tpu.memory_space<vmem>>, vector<8x2048xbf16>
    %c0_1 = arith.constant 0 : index
    %c0_2 = arith.constant 0 : index
    %1 = vector.load %arg4[%c0_1, %c0_2] : memref<2048x128xbf16, #tpu.memory_space<vmem>>, vector<2048x128xbf16>
    %cst = arith.constant dense<0.000000e+00> : vector<8x128xf32>
    %2 = tpu.matmul %0, %1, %cst {dimension_numbers = #tpu.dot_dimension_numbers<[1], [0], [0], [1], [0, 0, 1, 1], [], []>} : vector<8x2048xbf16>, vector<2048x128xbf16>, vector<8x128xf32> -> vector<8x128xf32>
    %c0_i32 = arith.constant 0 : i32
    %3 = arith.cmpi eq, %arg2, %c0_i32 : i32
    %4 = arith.extui %3 : i1 to i32
    %c0_i32_3 = arith.constant 0 : i32
    %5 = arith.cmpi ne, %4, %c0_i32_3 : i32
    scf.if %5 {
      %c0_7 = arith.constant 0 : index
      %c0_8 = arith.constant 0 : index
      %12 = vector.load %arg8[%c0_7, %c0_8] : memref<8x128xf32, #tpu.memory_space<vmem>>, vector<8x128xf32>
      tpu.vector_store %arg8[%c0_7, %c0_8], %2 {strides = array<i32>} : memref<8x128xf32, #tpu.memory_space<vmem>>, vector<8x128xf32>,
    } else {
    }
    %c0_i32_4 = arith.constant 0 : i32
    %6 = arith.cmpi sgt, %arg2, %c0_i32_4 : i32
    %7 = arith.extui %6 : i1 to i32
    %c0_i32_5 = arith.constant 0 : i32
    %8 = arith.cmpi ne, %7, %c0_i32_5 : i32
    scf.if %8 {
      %c0_7 = arith.constant 0 : index
      %c0_8 = arith.constant 0 : index
      %12 = vector.load %arg8[%c0_7, %c0_8] : memref<8x128xf32, #tpu.memory_space<vmem>>, vector<8x128xf32>
      %13 = arith.addf %12, %2 : vector<8x128xf32>
      %c0_9 = arith.constant 0 : index
      %c0_10 = arith.constant 0 : index
      %14 = vector.load %arg8[%c0_9, %c0_10] : memref<8x128xf32, #tpu.memory_space<vmem>>, vector<8x128xf32>
      tpu.vector_store %arg8[%c0_9, %c0_10], %13 {strides = array<i32>} : memref<8x128xf32, #tpu.memory_space<vmem>>, vector<8x128xf32>,
    } else {
    }
    %c3_i32 = arith.constant 3 : i32
    %9 = arith.cmpi eq, %arg2, %c3_i32 : i32
    %10 = arith.extui %9 : i1 to i32
    %c0_i32_6 = arith.constant 0 : i32
    %11 = arith.cmpi ne, %10, %c0_i32_6 : i32
    scf.if %11 {
      %c0_7 = arith.constant 0 : index
      %c0_8 = arith.constant 0 : index
      %12 = vector.load %arg8[%c0_7, %c0_8] : memref<8x128xf32, #tpu.memory_space<vmem>>, vector<8x128xf32>
      %cst_9 = arith.constant dense<0.000000e+00> : vector<128xf32>
      %13 = vector.multi_reduction <add>, %12, %cst_9 [0] : vector<8x128xf32> to vector<128xf32>
      %14 = vector.shape_cast %13 : vector<128xf32> to vector<1x1x128xf32>
      %c0_10 = arith.constant 0 : index
      %c0_11 = arith.constant 0 : index
      %c0_12 = arith.constant 0 : index
      %15 = vector.load %arg6[%c0_10, %c0_11, %c0_12] : memref<1x1x128xf32, #tpu.memory_space<vmem>>, vector<1x1x128xf32>
      tpu.vector_store %arg6[%c0_10, %c0_11, %c0_12], %14 {strides = array<i32>} : memref<1x1x128xf32, #tpu.memory_space<vmem>>, vector<1x1x128xf32>,
      %16 = arith.mulf %12, %12 : vector<8x128xf32>
      %cst_13 = arith.constant dense<0.000000e+00> : vector<128xf32>
      %17 = vector.multi_reduction <add>, %16, %cst_13 [0] : vector<8x128xf32> to vector<128xf32>
      %18 = vector.shape_cast %17 : vector<128xf32> to vector<1x1x128xf32>
      %c0_14 = arith.constant 0 : index
      %c0_15 = arith.constant 0 : index
      %c0_16 = arith.constant 0 : index
      %19 = vector.load %arg7[%c0_14, %c0_15, %c0_16] : memref<1x1x128xf32, #tpu.memory_space<vmem>>, vector<1x1x128xf32>
      tpu.vector_store %arg7[%c0_14, %c0_15, %c0_16], %18 {strides = array<i32>} : memref<1x1x128xf32, #tpu.memory_space<vmem>>, vector<1x1x128xf32>,
      %20 = arith.truncf %12 : vector<8x128xf32> to vector<8x128xbf16>
      %c0_17 = arith.constant 0 : index
      %c0_18 = arith.constant 0 : index
      %21 = vector.load %arg5[%c0_17, %c0_18] : memref<8x128xbf16, #tpu.memory_space<vmem>>, vector<8x128xbf16>
      tpu.vector_store %arg5[%c0_17, %c0_18], %20 {strides = array<i32>} : memref<8x128xbf16, #tpu.memory_space<vmem>>, vector<8x128xbf16>,
    } else {
    }
    return
  }
  func.func @transform_0(%arg0: i32, %arg1: i32, %arg2: i32) -> (i32, i32) {
    %c0_i32 = arith.constant 0 : i32
    return %arg0, %arg2 : i32, i32
  }
  func.func @transform_1(%arg0: i32, %arg1: i32, %arg2: i32) -> (i32, i32) {
    %c0_i32 = arith.constant 0 : i32
    return %arg2, %arg1 : i32, i32
  }
  func.func @transform_2(%arg0: i32, %arg1: i32, %arg2: i32) -> (i32, i32) {
    %c0_i32 = arith.constant 0 : i32
    return %arg0, %arg1 : i32, i32
  }
  func.func @transform_3(%arg0: i32, %arg1: i32, %arg2: i32) -> (i32, i32, i32) {
    %c0_i32 = arith.constant 0 : i32
    %c0_i32_0 = arith.constant 0 : i32
    return %arg0, %c0_i32, %arg1 : i32, i32, i32
  }
  func.func @transform_4(%arg0: i32, %arg1: i32, %arg2: i32) -> (i32, i32, i32) {
    %c0_i32 = arith.constant 0 : i32
    %c0_i32_0 = arith.constant 0 : i32
    return %arg0, %c0_i32, %arg1 : i32, i32, i32
  }
}

module attributes {stable_mosaic.version = 11 : i64} {
  func.func @_gemm_kernel(%arg0: i32, %arg1: i32, %arg2: i32, %arg3: memref<8x2048xbf16, #tpu.memory_space<vmem>>, %arg4: memref<2048x128xbf16, #tpu.memory_space<vmem>>, %arg5: memref<1x128xf32, #tpu.memory_space<vmem>>, %arg6: memref<8x128xf32, #tpu.memory_space<vmem>>, %arg7: memref<8x128xf32, #tpu.memory_space<vmem>>) attributes {dimension_semantics = [#tpu.dimension_semantics<parallel>, #tpu.dimension_semantics<parallel>, #tpu.dimension_semantics<arbitrary>], iteration_bounds = array<i64: 1, 1, 3>, scalar_prefetch = 0 : i64, scratch_operands = 1 : i64, tpu.core_type = #tpu.core_type<tc>, window_params = [{transform_indices = @transform_0, window_bounds = array<i64: 8, 2048>}, {transform_indices = @transform_1, window_bounds = array<i64: 2048, 128>}, {transform_indices = @transform_2, window_bounds = array<i64: 1, 128>}, {transform_indices = @transform_3, window_bounds = array<i64: 8, 128>}]} {
    %c0 = arith.constant 0 : index
    %c0_0 = arith.constant 0 : index
    %0 = vector.load %arg3[%c0, %c0_0] : memref<8x2048xbf16, #tpu.memory_space<vmem>>, vector<8x2048xbf16>
    %c0_1 = arith.constant 0 : index
    %c0_2 = arith.constant 0 : index
    %1 = vector.load %arg4[%c0_1, %c0_2] : memref<2048x128xbf16, #tpu.memory_space<vmem>>, vector<2048x128xbf16>
    %cst = arith.constant dense<0.000000e+00> : vector<8x128xf32>
    %2 = tpu.matmul %0, %1, %cst {dimension_numbers = #tpu.dot_dimension_numbers<[1], [0], [0], [1], [0, 0, 1, 1], [], []>} : vector<8x2048xbf16>, vector<2048x128xbf16>, vector<8x128xf32> -> vector<8x128xf32>
    %c0_i32 = arith.constant 0 : i32
    %3 = arith.cmpi eq, %arg2, %c0_i32 : i32
    %4 = arith.extui %3 : i1 to i32
    %c0_i32_3 = arith.constant 0 : i32
    %5 = arith.cmpi ne, %4, %c0_i32_3 : i32
    scf.if %5 {
      %c0_7 = arith.constant 0 : index
      %c0_8 = arith.constant 0 : index
      %12 = vector.load %arg7[%c0_7, %c0_8] : memref<8x128xf32, #tpu.memory_space<vmem>>, vector<8x128xf32>
      tpu.vector_store %arg7[%c0_7, %c0_8], %2 {strides = array<i32>} : memref<8x128xf32, #tpu.memory_space<vmem>>, vector<8x128xf32>,
    } else {
    }
    %c0_i32_4 = arith.constant 0 : i32
    %6 = arith.cmpi sgt, %arg2, %c0_i32_4 : i32
    %7 = arith.extui %6 : i1 to i32
    %c0_i32_5 = arith.constant 0 : i32
    %8 = arith.cmpi ne, %7, %c0_i32_5 : i32
    scf.if %8 {
      %c0_7 = arith.constant 0 : index
      %c0_8 = arith.constant 0 : index
      %12 = vector.load %arg7[%c0_7, %c0_8] : memref<8x128xf32, #tpu.memory_space<vmem>>, vector<8x128xf32>
      %13 = arith.addf %12, %2 : vector<8x128xf32>
      %c0_9 = arith.constant 0 : index
      %c0_10 = arith.constant 0 : index
      %14 = vector.load %arg7[%c0_9, %c0_10] : memref<8x128xf32, #tpu.memory_space<vmem>>, vector<8x128xf32>
      tpu.vector_store %arg7[%c0_9, %c0_10], %13 {strides = array<i32>} : memref<8x128xf32, #tpu.memory_space<vmem>>, vector<8x128xf32>,
    } else {
    }
    %c2_i32 = arith.constant 2 : i32
    %9 = arith.cmpi eq, %arg2, %c2_i32 : i32
    %10 = arith.extui %9 : i1 to i32
    %c0_i32_6 = arith.constant 0 : i32
    %11 = arith.cmpi ne, %10, %c0_i32_6 : i32
    scf.if %11 {
      %c0_7 = arith.constant 0 : index
      %c0_8 = arith.constant 0 : index
      %12 = vector.load %arg7[%c0_7, %c0_8] : memref<8x128xf32, #tpu.memory_space<vmem>>, vector<8x128xf32>
      %c0_9 = arith.constant 0 : index
      %c0_10 = arith.constant 0 : index
      %13 = vector.load %arg5[%c0_9, %c0_10] : memref<1x128xf32, #tpu.memory_space<vmem>>, vector<1x128xf32>
      %14 = vector.broadcast %13 : vector<1x128xf32> to vector<8x128xf32>
      %15 = arith.addf %12, %14 : vector<8x128xf32>
      %c0_11 = arith.constant 0 : index
      %c0_12 = arith.constant 0 : index
      %16 = vector.load %arg6[%c0_11, %c0_12] : memref<8x128xf32, #tpu.memory_space<vmem>>, vector<8x128xf32>
      tpu.vector_store %arg6[%c0_11, %c0_12], %15 {strides = array<i32>} : memref<8x128xf32, #tpu.memory_space<vmem>>, vector<8x128xf32>,
    } else {
    }
    return
  }
  func.func @transform_0(%arg0: i32, %arg1: i32, %arg2: i32) -> (i32, i32) {
    %c0_i32 = arith.constant 0 : i32
    return %arg0, %arg2 : i32, i32
  }
  func.func @transform_1(%arg0: i32, %arg1: i32, %arg2: i32) -> (i32, i32) {
    %c0_i32 = arith.constant 0 : i32
    return %arg2, %arg1 : i32, i32
  }
  func.func @transform_2(%arg0: i32, %arg1: i32, %arg2: i32) -> (i32, i32) {
    %c0_i32 = arith.constant 0 : i32
    %c0_i32_0 = arith.constant 0 : i32
    return %c0_i32, %arg1 : i32, i32
  }
  func.func @transform_3(%arg0: i32, %arg1: i32, %arg2: i32) -> (i32, i32) {
    %c0_i32 = arith.constant 0 : i32
    return %arg0, %arg1 : i32, i32
  }
}

</mosaic_0001>

<bundles_post_ra>
// kernel: classifier_content_forward.6
= control target key start
LH: loop header
LB: loop body
LE: loop exit
PB: predicated region body
PF: predicated region fallthrough
CT: control target
= control target key end

     0   :  { %s3641_s9 = smov 0   ;;  %s3643_s10 = smov 0   ;;  %s3883_s0 = inlined_call_operand.vmem [shape: bf16[2048,16], index: 0, kind: input, shape index: {}]   ;;  %s3884_s1 = inlined_call_operand.vmem [shape: bf16[16,128], index: 1, kind: input, shape index: {}]   ;;  %s3885_s2 = inlined_call_operand.vmem [shape: bf16[2048,128], index: 2, kind: output, shape index: {}]  }
   0x1   :  { %s3645_s11 = smov 0  }
   0x2 LB: > { %s31_s12 = sadd.s32 1, %s3620_s10  ;;  %p2541_p0 = scmp.ge.s32.totalorder %s3624_s11, 1  ;;  %s3624_s11 = sphi %s3645_s11, %s12_s11   ;;  %s3620_s10 = sphi %s3643_s10, %s3887_s10   ;;  %s3616_s9 = sphi %s3641_s9, %s3886_s9  }
   0x3   : > { %p33_p1 = scmp.ge.s32.totalorder %s31_s12, 2  ;;  %p155_p2 = scmp.lt.s32.totalorder %s3624_s11, 3 }
   0x5   : > { %s3889_s12 = smov (%p33_p1, %s31_s12), 0  ;;  %p156_p3 = pnand %p2541_p0, %p155_p2 }
   0x6   : > { %s2542_s15 = sshll.u32 (!%p156_p3), %s3616_s9, 7 }
   0x7   : > { %159 = sbr.rel (%p156_p3) target bundleno = 343 (0x157), region = 28  ;;  %p192_p4 = scmp.lt.s32.totalorder (!%p156_p3), %s2542_s15, 255 }
   0xc   : > { %v3537_v0 = vld [vmem:[%s3884_s1] sm:$0xff]   ;;  %s3891_s15 = smov (!%p192_p4, %s2542_s15), 255  ;;  %vm675_vm0 = vcmask 130048  }
   0xd   : > { %3381 = vmatprep.subr.bf16.mxu0 %v3537_v0  ;;  %3511 = vmatprep.subr.bf16.mxu1 %v3537_v0  ;;  %s2543_s16 = sshll.u32 %s3891_s15, 2 }
   0xe   : > { %3382 = vmatpush3.bf16.msra.mxu0 %v3537_v0  ;;  %3512 = vmatpush3.bf16.msra.mxu1 %v3537_v0  ;;  %s3670_s19 = scalar_lea.vmem %s3883_s0, %s2543_s16  ;;  %s3805_s22 = scalar_lea.vmem %s3885_s2, %s2543_s16 }
   0xf   : > { %v3538_v1 = vld [vmem:[%s3670_s19] sm:$0xff]   ;;  %v3540_v3 = vld [vmem:[%s3670_s19 + $0x8] sm:$0xff]   ;;  %v3542_v5 = vld [vmem:[%s3670_s19 + $0x10] sm:$0xff]  }
  0x10   : > { %v3539_v2 = vld [vmem:[%s3670_s19 + $0x100] sm:$0xff]   ;;  %3383 = vmatprep.mubr.msk.bf16.mxu0 %vm675_vm0, %v3538_v1  ;;  %v3541_v4 = vld [vmem:[%s3670_s19 + $0x108] sm:$0xff]   ;;  %v3543_v6 = vld [vmem:[%s3670_s19 + $0x110] sm:$0xff]  }
  0x11   : > { %3447 = vmatprep.mubr.msk.bf16.mxu1 %vm675_vm0, %v3539_v2  ;;  %3384 = vmatmul.mubr.msk.bf16.vlgmr.msra.gmra.mxu0 %vm675_vm0, %v3540_v3  ;;  %v3544_v7 = vld [vmem:[%s3670_s19 + $0x18] sm:$0xff]   ;;  %v3546_v9 = vld [vmem:[%s3670_s19 + $0x20] sm:$0xff]   ;;  %v3548_v11 = vld [vmem:[%s3670_s19 + $0x28] sm:$0xff]  }
  0x12   : > { %3448 = vmatmul.mubr.msk.bf16.vlgmr.msra.gmra.mxu1 %vm675_vm0, %v3541_v4  ;;  %3387 = vmatprep.mubr.msk.bf16.mxu0 %vm675_vm0, %v3542_v5  ;;  %v3545_v8 = vld [vmem:[%s3670_s19 + $0x118] sm:$0xff]   ;;  %v3547_v10 = vld [vmem:[%s3670_s19 + $0x120] sm:$0xff]   ;;  %v3549_v12 = vld [vmem:[%s3670_s19 + $0x128] sm:$0xff]  }
  0x13   : > { %3451 = vmatprep.mubr.msk.bf16.mxu1 %vm675_vm0, %v3543_v6  ;;  %v3550_v13 = vld [vmem:[%s3670_s19 + $0x30] sm:$0xff]   ;;  %v3552_v15 = vld [vmem:[%s3670_s19 + $0x38] sm:$0xff]   ;;  %v3554_v17 = vld [vmem:[%s3670_s19 + $0x40] sm:$0xff]  }
  0x14   : > { %v3551_v14 = vld [vmem:[%s3670_s19 + $0x130] sm:$0xff]   ;;  %v3553_v16 = vld [vmem:[%s3670_s19 + $0x138] sm:$0xff]   ;;  %v3555_v18 = vld [vmem:[%s3670_s19 + $0x140] sm:$0xff]  }
  0x15   : > { %v3556_v19 = vld [vmem:[%s3670_s19 + $0x48] sm:$0xff]   ;;  %v3558_v21 = vld [vmem:[%s3670_s19 + $0x50] sm:$0xff]   ;;  %v3560_v23 = vld [vmem:[%s3670_s19 + $0x58] sm:$0xff]  }
  0x16   : > { %v3557_v20 = vld [vmem:[%s3670_s19 + $0x148] sm:$0xff]   ;;  %v3559_v22 = vld [vmem:[%s3670_s19 + $0x150] sm:$0xff]   ;;  %v3561_v24 = vld [vmem:[%s3670_s19 + $0x158] sm:$0xff]  }
  0x17   : > { %v3562_v25 = vld [vmem:[%s3670_s19 + $0x60] sm:$0xff]   ;;  %v3564_v27 = vld [vmem:[%s3670_s19 + $0x68] sm:$0xff]   ;;  %v3566_v29 = vld [vmem:[%s3670_s19 + $0x70] sm:$0xff]  }
  0x18   : > { %v3563_v26 = vld [vmem:[%s3670_s19 + $0x160] sm:$0xff]   ;;  %v3565_v28 = vld [vmem:[%s3670_s19 + $0x168] sm:$0xff]   ;;  %v3567_v30 = vld [vmem:[%s3670_s19 + $0x170] sm:$0xff]  }
  0x19   : > { %3388 = vmatmul.mubr.msk.bf16.gmra.mxu0 %vm675_vm0, %v3544_v7  ;;  %v3568_v31 = vld [vmem:[%s3670_s19 + $0x78] sm:$0xff]   ;;  %v3570_v33 = vld [vmem:[%s3670_s19 + $0x80] sm:$0xff]   ;;  %v3572_v35 = vld [vmem:[%s3670_s19 + $0x88] sm:$0xff]  }
  0x1a   : > { %3452 = vmatmul.mubr.msk.bf16.gmra.mxu1 %vm675_vm0, %v3545_v8  ;;  %3391 = vmatprep.mubr.msk.bf16.mxu0 %vm675_vm0, %v3546_v9  ;;  %v3569_v32 = vld [vmem:[%s3670_s19 + $0x178] sm:$0xff]   ;;  %v3571_v34 = vld [vmem:[%s3670_s19 + $0x180] sm:$0xff]   ;;  %v3573_v36 = vld [vmem:[%s3670_s19 + $0x188] sm:$0xff]  }
  0x1b   : > { %3455 = vmatprep.mubr.msk.bf16.mxu1 %vm675_vm0, %v3547_v10  ;;  %v3574_v37 = vld [vmem:[%s3670_s19 + $0x90] sm:$0xff]   ;;  %v3576_v39 = vld [vmem:[%s3670_s19 + $0x98] sm:$0xff]   ;;  %v3578_v41 = vld [vmem:[%s3670_s19 + $0xa0] sm:$0xff]  }
  0x1c   : > { %v3575_v38 = vld [vmem:[%s3670_s19 + $0x190] sm:$0xff]   ;;  %v3577_v40 = vld [vmem:[%s3670_s19 + $0x198] sm:$0xff]   ;;  %v3579_v42 = vld [vmem:[%s3670_s19 + $0x1a0] sm:$0xff]  }
  0x1d   : > { %v3580_v43 = vld [vmem:[%s3670_s19 + $0xa8] sm:$0xff]   ;;  %v3582_v45 = vld [vmem:[%s3670_s19 + $0xb0] sm:$0xff]   ;;  %v3584_v47 = vld [vmem:[%s3670_s19 + $0xb8] sm:$0xff]  }
  0x1e   : > { %v3581_v44 = vld [vmem:[%s3670_s19 + $0x1a8] sm:$0xff]   ;;  %v3583_v46 = vld [vmem:[%s3670_s19 + $0x1b0] sm:$0xff]   ;;  %v3585_v48 = vld [vmem:[%s3670_s19 + $0x1b8] sm:$0xff]  }
  0x1f   : > { %v3586_v49 = vld [vmem:[%s3670_s19 + $0xc0] sm:$0xff]   ;;  %v3588_v51 = vld [vmem:[%s3670_s19 + $0xc8] sm:$0xff]   ;;  %v3590_v53 = vld [vmem:[%s3670_s19 + $0xd0] sm:$0xff]  }
  0x20   : > { %v3587_v50 = vld [vmem:[%s3670_s19 + $0x1c0] sm:$0xff]   ;;  %v3589_v52 = vld [vmem:[%s3670_s19 + $0x1c8] sm:$0xff]   ;;  %v3591_v54 = vld [vmem:[%s3670_s19 + $0x1d0] sm:$0xff]  }
  0x21   : > { %3392 = vmatmul.mubr.msk.bf16.gmra.mxu0 %vm675_vm0, %v3548_v11  ;;  %v3592_v55 = vld [vmem:[%s3670_s19 + $0xd8] sm:$0xff]   ;;  %v3594_v57 = vld [vmem:[%s3670_s19 + $0xe0] sm:$0xff]   ;;  %v3596_v59 = vld [vmem:[%s3670_s19 + $0xe8] sm:$0xff]  }
  0x22   : > { %3456 = vmatmul.mubr.msk.bf16.gmra.mxu1 %vm675_vm0, %v3549_v12  ;;  %3395 = vmatprep.mubr.msk.bf16.mxu0 %vm675_vm0, %v3550_v13  ;;  %v3593_v56 = vld [vmem:[%s3670_s19 + $0x1d8] sm:$0xff]   ;;  %v3595_v58 = vld [vmem:[%s3670_s19 + $0x1e0] sm:$0xff]   ;;  %v3597_v60 = vld [vmem:[%s3670_s19 + $0x1e8] sm:$0xff]  }
  0x23   : > { %3459 = vmatprep.mubr.msk.bf16.mxu1 %vm675_vm0, %v3551_v14  ;;  %v3598_v61 = vld [vmem:[%s3670_s19 + $0xf0] sm:$0xff]   ;;  %v3600_v63 = vld [vmem:[%s3670_s19 + $0xf8] sm:$0xff]  }
  0x24   : > { %v3599_v62 = vld [vmem:[%s3670_s19 + $0x1f0] sm:$0xff]   ;;  %v3601_v0 = vld [vmem:[%s3670_s19 + $0x1f8] sm:$0xff]  }
  0x29   : > { %3396 = vmatmul.mubr.msk.bf16.gmra.mxu0 %vm675_vm0, %v3552_v15 }
  0x2a   : > { %3460 = vmatmul.mubr.msk.bf16.gmra.mxu1 %vm675_vm0, %v3553_v16  ;;  %3399 = vmatprep.mubr.msk.bf16.mxu0 %vm675_vm0, %v3554_v17 }
  0x2b   : > { %3463 = vmatprep.mubr.msk.bf16.mxu1 %vm675_vm0, %v3555_v18 }
  0x31   : > { %3400 = vmatmul.mubr.msk.bf16.gmra.mxu0 %vm675_vm0, %v3556_v19 }
  0x32   : > { %3464 = vmatmul.mubr.msk.bf16.gmra.mxu1 %vm675_vm0, %v3557_v20  ;;  %3403 = vmatprep.mubr.msk.bf16.mxu0 %vm675_vm0, %v3558_v21 }
  0x33   : > { %3467 = vmatprep.mubr.msk.bf16.mxu1 %vm675_vm0, %v3559_v22 }
  0x39   : > { %3404 = vmatmul.mubr.msk.bf16.gmra.mxu0 %vm675_vm0, %v3560_v23 }
  0x3a   : > { %3468 = vmatmul.mubr.msk.bf16.gmra.mxu1 %vm675_vm0, %v3561_v24  ;;  %3407 = vmatprep.mubr.msk.bf16.mxu0 %vm675_vm0, %v3562_v25 }
  0x3b   : > { %3471 = vmatprep.mubr.msk.bf16.mxu1 %vm675_vm0, %v3563_v26 }
  0x41   : > { %3408 = vmatmul.mubr.msk.bf16.gmra.mxu0 %vm675_vm0, %v3564_v27 }
  0x42   : > { %3472 = vmatmul.mubr.msk.bf16.gmra.mxu1 %vm675_vm0, %v3565_v28  ;;  %3411 = vmatprep.mubr.msk.bf16.mxu0 %vm675_vm0, %v3566_v29 }
  0x43   : > { %3475 = vmatprep.mubr.msk.bf16.mxu1 %vm675_vm0, %v3567_v30 }
  0x49   : > { %3412 = vmatmul.mubr.msk.bf16.gmra.mxu0 %vm675_vm0, %v3568_v31 }
  0x4a   : > { %3476 = vmatmul.mubr.msk.bf16.gmra.mxu1 %vm675_vm0, %v3569_v32  ;;  %3415 = vmatprep.mubr.msk.bf16.mxu0 %vm675_vm0, %v3570_v33 }
  0x4b   : > { %3479 = vmatprep.mubr.msk.bf16.mxu1 %vm675_vm0, %v3571_v34 }
  0x51   : > { %3416 = vmatmul.mubr.msk.bf16.gmra.mxu0 %vm675_vm0, %v3572_v35 }
  0x52   : > { %3480 = vmatmul.mubr.msk.bf16.gmra.mxu1 %vm675_vm0, %v3573_v36  ;;  %3419 = vmatprep.mubr.msk.bf16.mxu0 %vm675_vm0, %v3574_v37 }
  0x53   : > { %3483 = vmatprep.mubr.msk.bf16.mxu1 %vm675_vm0, %v3575_v38 }
  0x59   : > { %3420 = vmatmul.mubr.msk.bf16.gmra.mxu0 %vm675_vm0, %v3576_v39 }
  0x5a   : > { %3484 = vmatmul.mubr.msk.bf16.gmra.mxu1 %vm675_vm0, %v3577_v40  ;;  %3423 = vmatprep.mubr.msk.bf16.mxu0 %vm675_vm0, %v3578_v41 }
  0x5b   : > { %3487 = vmatprep.mubr.msk.bf16.mxu1 %vm675_vm0, %v3579_v42 }
  0x61   : > { %3424 = vmatmul.mubr.msk.bf16.gmra.mxu0 %vm675_vm0, %v3580_v43 }
  0x62   : > { %3488 = vmatmul.mubr.msk.bf16.gmra.mxu1 %vm675_vm0, %v3581_v44  ;;  %3427 = vmatprep.mubr.msk.bf16.mxu0 %vm675_vm0, %v3582_v45 }
  0x63   : > { %3491 = vmatprep.mubr.msk.bf16.mxu1 %vm675_vm0, %v3583_v46 }
  0x69   : > { %3428 = vmatmul.mubr.msk.bf16.gmra.mxu0 %vm675_vm0, %v3584_v47 }
  0x6a   : > { %3492 = vmatmul.mubr.msk.bf16.gmra.mxu1 %vm675_vm0, %v3585_v48  ;;  %3431 = vmatprep.mubr.msk.bf16.mxu0 %vm675_vm0, %v3586_v49 }
  0x6b   : > { %3495 = vmatprep.mubr.msk.bf16.mxu1 %vm675_vm0, %v3587_v50 }
  0x71   : > { %3432 = vmatmul.mubr.msk.bf16.gmra.mxu0 %vm675_vm0, %v3588_v51 }
  0x72   : > { %3496 = vmatmul.mubr.msk.bf16.gmra.mxu1 %vm675_vm0, %v3589_v52  ;;  %3435 = vmatprep.mubr.msk.bf16.mxu0 %vm675_vm0, %v3590_v53 }
  0x73   : > { %3499 = vmatprep.mubr.msk.bf16.mxu1 %vm675_vm0, %v3591_v54 }
  0x79   : > { %3436 = vmatmul.mubr.msk.bf16.gmra.mxu0 %vm675_vm0, %v3592_v55 }
  0x7a   : > { %3500 = vmatmul.mubr.msk.bf16.gmra.mxu1 %vm675_vm0, %v3593_v56  ;;  %3439 = vmatprep.mubr.msk.bf16.mxu0 %vm675_vm0, %v3594_v57 }
  0x7b   : > { %3503 = vmatprep.mubr.msk.bf16.mxu1 %vm675_vm0, %v3595_v58 }
  0x81   : > { %3440 = vmatmul.mubr.msk.bf16.gmra.mxu0 %vm675_vm0, %v3596_v59 }
  0x82   : > { %3504 = vmatmul.mubr.msk.bf16.gmra.mxu1 %vm675_vm0, %v3597_v60  ;;  %3443 = vmatprep.mubr.msk.bf16.mxu0 %vm675_vm0, %v3598_v61 }
  0x83   : > { %3507 = vmatprep.mubr.msk.bf16.mxu1 %vm675_vm0, %v3599_v62 }
  0x89   : > { %3444 = vmatmul.mubr.msk.bf16.gmra.mxu0 %vm675_vm0, %v3600_v63 }
  0x8a   : > { %3508 = vmatmul.mubr.msk.bf16.gmra.mxu1 %vm675_vm0, %v3601_v0 }
  0xd1   : > { %v3385_v1 = vpop.f32.mrf.mxu0 }
  0xd2   : > { %v1543_v2 = vmul.f32 0.2, %v3385_v1  ;;  %v3449_v3 = vpop.f32.mrf.mxu1  ;;  %vm1415_vm1 = vcmp.ge.f32.partialorder %v3385_v1, 0.0 }
  0xd3   : > { %v1607_v4 = vmul.f32 0.2, %v3449_v3  ;;  %v902_v5 = vpop.f32.mrf.mxu0  ;;  %vm1479_vm2 = vcmp.ge.f32.partialorder %v3449_v3, 0.0 }
  0xd4   : > { %v1541_v6 = vmul.f32 0.2, %v902_v5  ;;  %v1158_v7 = vpop.f32.mrf.mxu1  ;;  %vm1413_vm3 = vcmp.ge.f32.partialorder %v902_v5, 0.0  ;;  %v1671_v9 = vsel %vm1415_vm1, %v3385_v1, %v1543_v2 }
  0xd5   : > { %v3386_v8 = vpop.f32.mrf.mxu0  ;;  %v1605_v10 = vmul.f32 0.2, %v1158_v7  ;;  %v1735_v13 = vsel %vm1479_vm2, %v3449_v3, %v1607_v4  ;;  %vm1477_vm5 = vcmp.ge.f32.partialorder %v1158_v7, 0.0 }
  0xd6   : > { %vm1416_vm4 = vcmp.ge.f32.partialorder %v3386_v8, 0.0  ;;  %v1544_v11 = vmul.f32 0.2, %v3386_v8  ;;  %v3450_v12 = vpop.f32.mrf.mxu1  ;;  %v1669_v16 = vsel %vm1413_vm3, %v902_v5, %v1541_v6 }
  0xd7   : > { %vm1480_vm6 = vcmp.ge.f32.partialorder %v3450_v12, 0.0  ;;  %v1608_v14 = vmul.f32 0.2, %v3450_v12  ;;  %v905_v15 = vpop.f32.mrf.mxu0  ;;  %v1733_v24 = vsel %vm1477_vm5, %v1158_v7, %v1605_v10 }
  0xd8   : > { %v1672_v17 = vsel %vm1416_vm4, %v3386_v8, %v1544_v11  ;;  %vm1414_vm7 = vcmp.ge.f32.partialorder %v905_v15, 0.0  ;;  %v1542_v18 = vmul.f32 0.2, %v905_v15  ;;  %v1161_v19 = vpop.f32.mrf.mxu1 }
  0xd9   : > { %v2941_v20 = vpack.c.bf16 %v1672_v17, %v1671_v9  ;;  %v1736_v21 = vsel %vm1480_vm6, %v3450_v12, %v1608_v14  ;;  %vm1478_vm8 = vcmp.ge.f32.partialorder %v1161_v19, 0.0  ;;  %v1606_v22 = vmul.f32 0.2, %v1161_v19  ;;  %v3389_v23 = vpop.f32.mrf.mxu0 }
  0xda   : > { %v3101_v25 = vpack.c.bf16 %v1736_v21, %v1735_v13  ;;  %v1670_v26 = vsel %vm1414_vm7, %v905_v15, %v1542_v18  ;;  %v1547_v27 = vmul.f32 0.2, %v3389_v23  ;;  %v3453_v28 = vpop.f32.mrf.mxu1  ;;  %vm1419_vm9 = vcmp.ge.f32.partialorder %v3389_v23, 0.0 }
  0xdb   : > { %3253 = vst [vmem:[%s3805_s22 + $0x8] sm:$0xff] %v2941_v20   ;;  %v2936_v29 = vpack.c.bf16 %v1670_v26, %v1669_v16  ;;  %v1734_v30 = vsel %vm1478_vm8, %v1161_v19, %v1606_v22  ;;  %v1611_v31 = vmul.f32 0.2, %v3453_v28  ;;  %v918_v32 = vpop.f32.mrf.mxu0  ;;  %vm1483_vm10 = vcmp.ge.f32.partialorder %v3453_v28, 0.0 }
  0xdc   : > { %3285 = vst [vmem:[%s3805_s22 + $0x108] sm:$0xff] %v3101_v25   ;;  %v3096_v33 = vpack.c.bf16 %v1734_v30, %v1733_v24  ;;  %v1545_v34 = vmul.f32 0.2, %v918_v32  ;;  %v1174_v35 = vpop.f32.mrf.mxu1  ;;  %vm1417_vm11 = vcmp.ge.f32.partialorder %v918_v32, 0.0  ;;  %v1675_v37 = vsel %vm1419_vm9, %v3389_v23, %v1547_v27 }
  0xdd   : > { %2937 = vst [vmem:[%s3805_s22] sm:$0xff] %v2936_v29   ;;  %v3390_v36 = vpop.f32.mrf.mxu0  ;;  %v1609_v38 = vmul.f32 0.2, %v1174_v35  ;;  %v1739_v41 = vsel %vm1483_vm10, %v3453_v28, %v1611_v31  ;;  %vm1481_vm13 = vcmp.ge.f32.partialorder %v1174_v35, 0.0 }
  0xde   : > { %3284 = vst [vmem:[%s3805_s22 + $0x100] sm:$0xff] %v3096_v33   ;;  %vm1420_vm12 = vcmp.ge.f32.partialorder %v3390_v36, 0.0  ;;  %v1548_v39 = vmul.f32 0.2, %v3390_v36  ;;  %v3454_v40 = vpop.f32.mrf.mxu1  ;;  %v1673_v44 = vsel %vm1417_vm11, %v918_v32, %v1545_v34 }
  0xdf   : > { %vm1484_vm14 = vcmp.ge.f32.partialorder %v3454_v40, 0.0  ;;  %v1612_v42 = vmul.f32 0.2, %v3454_v40  ;;  %v921_v43 = vpop.f32.mrf.mxu0  ;;  %v1737_v52 = vsel %vm1481_vm13, %v1174_v35, %v1609_v38 }
  0xe0   : > { %v1676_v45 = vsel %vm1420_vm12, %v3390_v36, %v1548_v39  ;;  %vm1418_vm15 = vcmp.ge.f32.partialorder %v921_v43, 0.0  ;;  %v1546_v46 = vmul.f32 0.2, %v921_v43  ;;  %v1177_v47 = vpop.f32.mrf.mxu1 }
  0xe1   : > { %v2951_v48 = vpack.c.bf16 %v1676_v45, %v1675_v37  ;;  %v1740_v49 = vsel %vm1484_vm14, %v3454_v40, %v1612_v42  ;;  %vm1482_vm0 = vcmp.ge.f32.partialorder %v1177_v47, 0.0  ;;  %v1610_v50 = vmul.f32 0.2, %v1177_v47  ;;  %v3393_v51 = vpop.f32.mrf.mxu0 }
  0xe2   : > { %v3111_v53 = vpack.c.bf16 %v1740_v49, %v1739_v41  ;;  %v1674_v54 = vsel %vm1418_vm15, %v921_v43, %v1546_v46  ;;  %v1551_v55 = vmul.f32 0.2, %v3393_v51  ;;  %v3457_v56 = vpop.f32.mrf.mxu1  ;;  %vm1423_vm1 = vcmp.ge.f32.partialorder %v3393_v51, 0.0 }
  0xe3   : > { %3255 = vst [vmem:[%s3805_s22 + $0x18] sm:$0xff] %v2951_v48   ;;  %v2946_v57 = vpack.c.bf16 %v1674_v54, %v1673_v44  ;;  %v1738_v58 = vsel %vm1482_vm0, %v1177_v47, %v1610_v50  ;;  %v1615_v59 = vmul.f32 0.2, %v3457_v56  ;;  %v934_v60 = vpop.f32.mrf.mxu0  ;;  %vm1487_vm2 = vcmp.ge.f32.partialorder %v3457_v56, 0.0 }
  0xe4   : > { %3287 = vst [vmem:[%s3805_s22 + $0x118] sm:$0xff] %v3111_v53   ;;  %v3106_v61 = vpack.c.bf16 %v1738_v58, %v1737_v52  ;;  %v1549_v62 = vmul.f32 0.2, %v934_v60  ;;  %v1190_v63 = vpop.f32.mrf.mxu1  ;;  %vm1421_vm3 = vcmp.ge.f32.partialorder %v934_v60, 0.0  ;;  %v1679_v1 = vsel %vm1423_vm1, %v3393_v51, %v1551_v55 }
  0xe5   : > { %3254 = vst [vmem:[%s3805_s22 + $0x10] sm:$0xff] %v2946_v57   ;;  %v3394_v0 = vpop.f32.mrf.mxu0  ;;  %v1613_v2 = vmul.f32 0.2, %v1190_v63  ;;  %v1743_v5 = vsel %vm1487_vm2, %v3457_v56, %v1615_v59  ;;  %vm1485_vm5 = vcmp.ge.f32.partialorder %v1190_v63, 0.0 }
  0xe6   : > { %3286 = vst [vmem:[%s3805_s22 + $0x110] sm:$0xff] %v3106_v61   ;;  %vm1424_vm4 = vcmp.ge.f32.partialorder %v3394_v0, 0.0  ;;  %v1552_v3 = vmul.f32 0.2, %v3394_v0  ;;  %v3458_v4 = vpop.f32.mrf.mxu1  ;;  %v1677_v8 = vsel %vm1421_vm3, %v934_v60, %v1549_v62 }
  0xe7   : > { %vm1488_vm6 = vcmp.ge.f32.partialorder %v3458_v4, 0.0  ;;  %v1616_v6 = vmul.f32 0.2, %v3458_v4  ;;  %v937_v7 = vpop.f32.mrf.mxu0  ;;  %v1741_v16 = vsel %vm1485_vm5, %v1190_v63, %v1613_v2 }
  0xe8   : > { %v1680_v9 = vsel %vm1424_vm4, %v3394_v0, %v1552_v3  ;;  %vm1422_vm7 = vcmp.ge.f32.partialorder %v937_v7, 0.0  ;;  %v1550_v10 = vmul.f32 0.2, %v937_v7  ;;  %v1193_v11 = vpop.f32.mrf.mxu1 }
  0xe9   : > { %v2961_v12 = vpack.c.bf16 %v1680_v9, %v1679_v1  ;;  %v1744_v13 = vsel %vm1488_vm6, %v3458_v4, %v1616_v6  ;;  %vm1486_vm8 = vcmp.ge.f32.partialorder %v1193_v11, 0.0  ;;  %v1614_v14 = vmul.f32 0.2, %v1193_v11  ;;  %v3397_v15 = vpop.f32.mrf.mxu0 }
  0xea   : > { %v3121_v17 = vpack.c.bf16 %v1744_v13, %v1743_v5  ;;  %v1678_v18 = vsel %vm1422_vm7, %v937_v7, %v1550_v10  ;;  %v1555_v19 = vmul.f32 0.2, %v3397_v15  ;;  %v3461_v20 = vpop.f32.mrf.mxu1  ;;  %vm1427_vm9 = vcmp.ge.f32.partialorder %v3397_v15, 0.0 }
  0xeb   : > { %3257 = vst [vmem:[%s3805_s22 + $0x28] sm:$0xff] %v2961_v12   ;;  %v2956_v21 = vpack.c.bf16 %v1678_v18, %v1677_v8  ;;  %v1742_v22 = vsel %vm1486_vm8, %v1193_v11, %v1614_v14  ;;  %v1619_v23 = vmul.f32 0.2, %v3461_v20  ;;  %v950_v24 = vpop.f32.mrf.mxu0  ;;  %vm1491_vm10 = vcmp.ge.f32.partialorder %v3461_v20, 0.0 }
  0xec   : > { %3289 = vst [vmem:[%s3805_s22 + $0x128] sm:$0xff] %v3121_v17   ;;  %v3116_v25 = vpack.c.bf16 %v1742_v22, %v1741_v16  ;;  %v1553_v26 = vmul.f32 0.2, %v950_v24  ;;  %v1206_v27 = vpop.f32.mrf.mxu1  ;;  %vm1425_vm11 = vcmp.ge.f32.partialorder %v950_v24, 0.0  ;;  %v1683_v29 = vsel %vm1427_vm9, %v3397_v15, %v1555_v19 }
  0xed   : > { %3256 = vst [vmem:[%s3805_s22 + $0x20] sm:$0xff] %v2956_v21   ;;  %v3398_v28 = vpop.f32.mrf.mxu0  ;;  %v1617_v30 = vmul.f32 0.2, %v1206_v27  ;;  %v1747_v33 = vsel %vm1491_vm10, %v3461_v20, %v1619_v23  ;;  %vm1489_vm13 = vcmp.ge.f32.partialorder %v1206_v27, 0.0 }
  0xee   : > { %3288 = vst [vmem:[%s3805_s22 + $0x120] sm:$0xff] %v3116_v25   ;;  %vm1428_vm12 = vcmp.ge.f32.partialorder %v3398_v28, 0.0  ;;  %v1556_v31 = vmul.f32 0.2, %v3398_v28  ;;  %v3462_v32 = vpop.f32.mrf.mxu1  ;;  %v1681_v36 = vsel %vm1425_vm11, %v950_v24, %v1553_v26 }
  0xef   : > { %vm1492_vm14 = vcmp.ge.f32.partialorder %v3462_v32, 0.0  ;;  %v1620_v34 = vmul.f32 0.2, %v3462_v32  ;;  %v953_v35 = vpop.f32.mrf.mxu0  ;;  %v1745_v44 = vsel %vm1489_vm13, %v1206_v27, %v1617_v30 }
  0xf0   : > { %v1684_v37 = vsel %vm1428_vm12, %v3398_v28, %v1556_v31  ;;  %vm1426_vm15 = vcmp.ge.f32.partialorder %v953_v35, 0.0  ;;  %v1554_v38 = vmul.f32 0.2, %v953_v35  ;;  %v1209_v39 = vpop.f32.mrf.mxu1 }
  0xf1   : > { %v2971_v40 = vpack.c.bf16 %v1684_v37, %v1683_v29  ;;  %v1748_v41 = vsel %vm1492_vm14, %v3462_v32, %v1620_v34  ;;  %vm1490_vm0 = vcmp.ge.f32.partialorder %v1209_v39, 0.0  ;;  %v1618_v42 = vmul.f32 0.2, %v1209_v39  ;;  %v3401_v43 = vpop.f32.mrf.mxu0 }
  0xf2   : > { %v3131_v45 = vpack.c.bf16 %v1748_v41, %v1747_v33  ;;  %v1682_v46 = vsel %vm1426_vm15, %v953_v35, %v1554_v38  ;;  %v1559_v47 = vmul.f32 0.2, %v3401_v43  ;;  %v3465_v48 = vpop.f32.mrf.mxu1  ;;  %vm1431_vm1 = vcmp.ge.f32.partialorder %v3401_v43, 0.0 }
  0xf3   : > { %3259 = vst [vmem:[%s3805_s22 + $0x38] sm:$0xff] %v2971_v40   ;;  %v2966_v49 = vpack.c.bf16 %v1682_v46, %v1681_v36  ;;  %v1746_v50 = vsel %vm1490_vm0, %v1209_v39, %v1618_v42  ;;  %v1623_v51 = vmul.f32 0.2, %v3465_v48  ;;  %v966_v52 = vpop.f32.mrf.mxu0  ;;  %vm1495_vm2 = vcmp.ge.f32.partialorder %v3465_v48, 0.0 }
  0xf4   : > { %3291 = vst [vmem:[%s3805_s22 + $0x138] sm:$0xff] %v3131_v45   ;;  %v3126_v53 = vpack.c.bf16 %v1746_v50, %v1745_v44  ;;  %v1557_v54 = vmul.f32 0.2, %v966_v52  ;;  %v1222_v55 = vpop.f32.mrf.mxu1  ;;  %vm1429_vm3 = vcmp.ge.f32.partialorder %v966_v52, 0.0  ;;  %v1687_v57 = vsel %vm1431_vm1, %v3401_v43, %v1559_v47 }
  0xf5   : > { %3258 = vst [vmem:[%s3805_s22 + $0x30] sm:$0xff] %v2966_v49   ;;  %v3402_v56 = vpop.f32.mrf.mxu0  ;;  %v1621_v58 = vmul.f32 0.2, %v1222_v55  ;;  %v1751_v61 = vsel %vm1495_vm2, %v3465_v48, %v1623_v51  ;;  %vm1493_vm5 = vcmp.ge.f32.partialorder %v1222_v55, 0.0 }
  0xf6   : > { %3290 = vst [vmem:[%s3805_s22 + $0x130] sm:$0xff] %v3126_v53   ;;  %vm1432_vm4 = vcmp.ge.f32.partialorder %v3402_v56, 0.0  ;;  %v1560_v59 = vmul.f32 0.2, %v3402_v56  ;;  %v3466_v60 = vpop.f32.mrf.mxu1  ;;  %v1685_v0 = vsel %vm1429_vm3, %v966_v52, %v1557_v54 }
  0xf7   : > { %vm1496_vm6 = vcmp.ge.f32.partialorder %v3466_v60, 0.0  ;;  %v1624_v62 = vmul.f32 0.2, %v3466_v60  ;;  %v969_v63 = vpop.f32.mrf.mxu0  ;;  %v1749_v8 = vsel %vm1493_vm5, %v1222_v55, %v1621_v58 }
  0xf8   : > { %v1688_v1 = vsel %vm1432_vm4, %v3402_v56, %v1560_v59  ;;  %vm1430_vm7 = vcmp.ge.f32.partialorder %v969_v63, 0.0  ;;  %v1558_v2 = vmul.f32 0.2, %v969_v63  ;;  %v1225_v3 = vpop.f32.mrf.mxu1 }
  0xf9   : > { %v2981_v4 = vpack.c.bf16 %v1688_v1, %v1687_v57  ;;  %v1752_v5 = vsel %vm1496_vm6, %v3466_v60, %v1624_v62  ;;  %vm1494_vm8 = vcmp.ge.f32.partialorder %v1225_v3, 0.0  ;;  %v1622_v6 = vmul.f32 0.2, %v1225_v3  ;;  %v3405_v7 = vpop.f32.mrf.mxu0 }
  0xfa   : > { %v3141_v9 = vpack.c.bf16 %v1752_v5, %v1751_v61  ;;  %v1686_v10 = vsel %vm1430_vm7, %v969_v63, %v1558_v2  ;;  %v1563_v11 = vmul.f32 0.2, %v3405_v7  ;;  %v3469_v12 = vpop.f32.mrf.mxu1  ;;  %vm1435_vm9 = vcmp.ge.f32.partialorder %v3405_v7, 0.0 }
  0xfb   : > { %3261 = vst [vmem:[%s3805_s22 + $0x48] sm:$0xff] %v2981_v4   ;;  %v2976_v13 = vpack.c.bf16 %v1686_v10, %v1685_v0  ;;  %v1750_v14 = vsel %vm1494_vm8, %v1225_v3, %v1622_v6  ;;  %v1627_v15 = vmul.f32 0.2, %v3469_v12  ;;  %v982_v16 = vpop.f32.mrf.mxu0  ;;  %vm1499_vm10 = vcmp.ge.f32.partialorder %v3469_v12, 0.0 }
  0xfc   : > { %3293 = vst [vmem:[%s3805_s22 + $0x148] sm:$0xff] %v3141_v9   ;;  %v3136_v17 = vpack.c.bf16 %v1750_v14, %v1749_v8  ;;  %v1561_v18 = vmul.f32 0.2, %v982_v16  ;;  %v1238_v19 = vpop.f32.mrf.mxu1  ;;  %vm1433_vm11 = vcmp.ge.f32.partialorder %v982_v16, 0.0  ;;  %v1691_v21 = vsel %vm1435_vm9, %v3405_v7, %v1563_v11 }
  0xfd   : > { %3260 = vst [vmem:[%s3805_s22 + $0x40] sm:$0xff] %v2976_v13   ;;  %v3406_v20 = vpop.f32.mrf.mxu0  ;;  %v1625_v22 = vmul.f32 0.2, %v1238_v19  ;;  %v1755_v25 = vsel %vm1499_vm10, %v3469_v12, %v1627_v15  ;;  %vm1497_vm13 = vcmp.ge.f32.partialorder %v1238_v19, 0.0 }
  0xfe   : > { %3292 = vst [vmem:[%s3805_s22 + $0x140] sm:$0xff] %v3136_v17   ;;  %vm1436_vm12 = vcmp.ge.f32.partialorder %v3406_v20, 0.0  ;;  %v1564_v23 = vmul.f32 0.2, %v3406_v20  ;;  %v3470_v24 = vpop.f32.mrf.mxu1  ;;  %v1689_v28 = vsel %vm1433_vm11, %v982_v16, %v1561_v18 }
  0xff   : > { %vm1500_vm14 = vcmp.ge.f32.partialorder %v3470_v24, 0.0  ;;  %v1628_v26 = vmul.f32 0.2, %v3470_v24  ;;  %v985_v27 = vpop.f32.mrf.mxu0  ;;  %v1753_v36 = vsel %vm1497_vm13, %v1238_v19, %v1625_v22 }
 0x100   : > { %v1692_v29 = vsel %vm1436_vm12, %v3406_v20, %v1564_v23  ;;  %vm1434_vm15 = vcmp.ge.f32.partialorder %v985_v27, 0.0  ;;  %v1562_v30 = vmul.f32 0.2, %v985_v27  ;;  %v1241_v31 = vpop.f32.mrf.mxu1 }
 0x101   : > { %v2991_v32 = vpack.c.bf16 %v1692_v29, %v1691_v21  ;;  %v1756_v33 = vsel %vm1500_vm14, %v3470_v24, %v1628_v26  ;;  %vm1498_vm0 = vcmp.ge.f32.partialorder %v1241_v31, 0.0  ;;  %v1626_v34 = vmul.f32 0.2, %v1241_v31  ;;  %v3409_v35 = vpop.f32.mrf.mxu0 }
 0x102   : > { %v3151_v37 = vpack.c.bf16 %v1756_v33, %v1755_v25  ;;  %v1690_v38 = vsel %vm1434_vm15, %v985_v27, %v1562_v30  ;;  %v1567_v39 = vmul.f32 0.2, %v3409_v35  ;;  %v3473_v40 = vpop.f32.mrf.mxu1  ;;  %vm1439_vm1 = vcmp.ge.f32.partialorder %v3409_v35, 0.0 }
 0x103   : > { %3263 = vst [vmem:[%s3805_s22 + $0x58] sm:$0xff] %v2991_v32   ;;  %v2986_v41 = vpack.c.bf16 %v1690_v38, %v1689_v28  ;;  %v1754_v42 = vsel %vm1498_vm0, %v1241_v31, %v1626_v34  ;;  %v1631_v43 = vmul.f32 0.2, %v3473_v40  ;;  %v998_v44 = vpop.f32.mrf.mxu0  ;;  %vm1503_vm2 = vcmp.ge.f32.partialorder %v3473_v40, 0.0 }
 0x104   : > { %3295 = vst [vmem:[%s3805_s22 + $0x158] sm:$0xff] %v3151_v37   ;;  %v3146_v45 = vpack.c.bf16 %v1754_v42, %v1753_v36  ;;  %v1565_v46 = vmul.f32 0.2, %v998_v44  ;;  %v1254_v47 = vpop.f32.mrf.mxu1  ;;  %vm1437_vm3 = vcmp.ge.f32.partialorder %v998_v44, 0.0  ;;  %v1695_v49 = vsel %vm1439_vm1, %v3409_v35, %v1567_v39 }
 0x105   : > { %3262 = vst [vmem:[%s3805_s22 + $0x50] sm:$0xff] %v2986_v41   ;;  %v3410_v48 = vpop.f32.mrf.mxu0  ;;  %v1629_v50 = vmul.f32 0.2, %v1254_v47  ;;  %v1759_v53 = vsel %vm1503_vm2, %v3473_v40, %v1631_v43  ;;  %vm1501_vm5 = vcmp.ge.f32.partialorder %v1254_v47, 0.0 }
 0x106   : > { %3294 = vst [vmem:[%s3805_s22 + $0x150] sm:$0xff] %v3146_v45   ;;  %vm1440_vm4 = vcmp.ge.f32.partialorder %v3410_v48, 0.0  ;;  %v1568_v51 = vmul.f32 0.2, %v3410_v48  ;;  %v3474_v52 = vpop.f32.mrf.mxu1  ;;  %v1693_v56 = vsel %vm1437_vm3, %v998_v44, %v1565_v46 }
 0x107   : > { %vm1504_vm6 = vcmp.ge.f32.partialorder %v3474_v52, 0.0  ;;  %v1632_v54 = vmul.f32 0.2, %v3474_v52  ;;  %v1001_v55 = vpop.f32.mrf.mxu0  ;;  %v1757_v0 = vsel %vm1501_vm5, %v1254_v47, %v1629_v50 }
 0x108   : > { %v1696_v57 = vsel %vm1440_vm4, %v3410_v48, %v1568_v51  ;;  %vm1438_vm7 = vcmp.ge.f32.partialorder %v1001_v55, 0.0  ;;  %v1566_v58 = vmul.f32 0.2, %v1001_v55  ;;  %v1257_v59 = vpop.f32.mrf.mxu1 }
 0x109   : > { %v3001_v60 = vpack.c.bf16 %v1696_v57, %v1695_v49  ;;  %v1760_v61 = vsel %vm1504_vm6, %v3474_v52, %v1632_v54  ;;  %vm1502_vm8 = vcmp.ge.f32.partialorder %v1257_v59, 0.0  ;;  %v1630_v62 = vmul.f32 0.2, %v1257_v59  ;;  %v3413_v63 = vpop.f32.mrf.mxu0 }
 0x10a   : > { %v3161_v1 = vpack.c.bf16 %v1760_v61, %v1759_v53  ;;  %v1694_v2 = vsel %vm1438_vm7, %v1001_v55, %v1566_v58  ;;  %v1571_v3 = vmul.f32 0.2, %v3413_v63  ;;  %v3477_v4 = vpop.f32.mrf.mxu1  ;;  %vm1443_vm9 = vcmp.ge.f32.partialorder %v3413_v63, 0.0 }
 0x10b   : > { %3265 = vst [vmem:[%s3805_s22 + $0x68] sm:$0xff] %v3001_v60   ;;  %v2996_v5 = vpack.c.bf16 %v1694_v2, %v1693_v56  ;;  %v1758_v6 = vsel %vm1502_vm8, %v1257_v59, %v1630_v62  ;;  %v1635_v7 = vmul.f32 0.2, %v3477_v4  ;;  %v1014_v8 = vpop.f32.mrf.mxu0  ;;  %vm1507_vm10 = vcmp.ge.f32.partialorder %v3477_v4, 0.0 }
 0x10c   : > { %3297 = vst [vmem:[%s3805_s22 + $0x168] sm:$0xff] %v3161_v1   ;;  %v3156_v9 = vpack.c.bf16 %v1758_v6, %v1757_v0  ;;  %v1569_v10 = vmul.f32 0.2, %v1014_v8  ;;  %v1270_v11 = vpop.f32.mrf.mxu1  ;;  %vm1441_vm11 = vcmp.ge.f32.partialorder %v1014_v8, 0.0  ;;  %v1699_v13 = vsel %vm1443_vm9, %v3413_v63, %v1571_v3 }
 0x10d   : > { %3264 = vst [vmem:[%s3805_s22 + $0x60] sm:$0xff] %v2996_v5   ;;  %v3414_v12 = vpop.f32.mrf.mxu0  ;;  %v1633_v14 = vmul.f32 0.2, %v1270_v11  ;;  %v1763_v17 = vsel %vm1507_vm10, %v3477_v4, %v1635_v7  ;;  %vm1505_vm13 = vcmp.ge.f32.partialorder %v1270_v11, 0.0 }
 0x10e   : > { %3296 = vst [vmem:[%s3805_s22 + $0x160] sm:$0xff] %v3156_v9   ;;  %vm1444_vm12 = vcmp.ge.f32.partialorder %v3414_v12, 0.0  ;;  %v1572_v15 = vmul.f32 0.2, %v3414_v12  ;;  %v3478_v16 = vpop.f32.mrf.mxu1  ;;  %v1697_v20 = vsel %vm1441_vm11, %v1014_v8, %v1569_v10 }
 0x10f   : > { %vm1508_vm14 = vcmp.ge.f32.partialorder %v3478_v16, 0.0  ;;  %v1636_v18 = vmul.f32 0.2, %v3478_v16  ;;  %v1017_v19 = vpop.f32.mrf.mxu0  ;;  %v1761_v28 = vsel %vm1505_vm13, %v1270_v11, %v1633_v14 }
 0x110   : > { %v1700_v21 = vsel %vm1444_vm12, %v3414_v12, %v1572_v15  ;;  %vm1442_vm15 = vcmp.ge.f32.partialorder %v1017_v19, 0.0  ;;  %v1570_v22 = vmul.f32 0.2, %v1017_v19  ;;  %v1273_v23 = vpop.f32.mrf.mxu1 }
 0x111   : > { %v3011_v24 = vpack.c.bf16 %v1700_v21, %v1699_v13  ;;  %v1764_v25 = vsel %vm1508_vm14, %v3478_v16, %v1636_v18  ;;  %vm1506_vm0 = vcmp.ge.f32.partialorder %v1273_v23, 0.0  ;;  %v1634_v26 = vmul.f32 0.2, %v1273_v23  ;;  %v3417_v27 = vpop.f32.mrf.mxu0 }
 0x112   : > { %v3171_v29 = vpack.c.bf16 %v1764_v25, %v1763_v17  ;;  %v1698_v30 = vsel %vm1442_vm15, %v1017_v19, %v1570_v22  ;;  %v1575_v31 = vmul.f32 0.2, %v3417_v27  ;;  %v3481_v32 = vpop.f32.mrf.mxu1  ;;  %vm1447_vm1 = vcmp.ge.f32.partialorder %v3417_v27, 0.0 }
 0x113   : > { %3267 = vst [vmem:[%s3805_s22 + $0x78] sm:$0xff] %v3011_v24   ;;  %v3006_v33 = vpack.c.bf16 %v1698_v30, %v1697_v20  ;;  %v1762_v34 = vsel %vm1506_vm0, %v1273_v23, %v1634_v26  ;;  %v1639_v35 = vmul.f32 0.2, %v3481_v32  ;;  %v1030_v36 = vpop.f32.mrf.mxu0  ;;  %vm1511_vm2 = vcmp.ge.f32.partialorder %v3481_v32, 0.0 }
 0x114   : > { %3299 = vst [vmem:[%s3805_s22 + $0x178] sm:$0xff] %v3171_v29   ;;  %v3166_v37 = vpack.c.bf16 %v1762_v34, %v1761_v28  ;;  %v1573_v38 = vmul.f32 0.2, %v1030_v36  ;;  %v1286_v39 = vpop.f32.mrf.mxu1  ;;  %vm1445_vm3 = vcmp.ge.f32.partialorder %v1030_v36, 0.0  ;;  %v1703_v41 = vsel %vm1447_vm1, %v3417_v27, %v1575_v31 }
 0x115   : > { %3266 = vst [vmem:[%s3805_s22 + $0x70] sm:$0xff] %v3006_v33   ;;  %v3418_v40 = vpop.f32.mrf.mxu0  ;;  %v1637_v42 = vmul.f32 0.2, %v1286_v39  ;;  %v1767_v45 = vsel %vm1511_vm2, %v3481_v32, %v1639_v35  ;;  %vm1509_vm5 = vcmp.ge.f32.partialorder %v1286_v39, 0.0 }
 0x116   : > { %3298 = vst [vmem:[%s3805_s22 + $0x170] sm:$0xff] %v3166_v37   ;;  %vm1448_vm4 = vcmp.ge.f32.partialorder %v3418_v40, 0.0  ;;  %v1576_v43 = vmul.f32 0.2, %v3418_v40  ;;  %v3482_v44 = vpop.f32.mrf.mxu1  ;;  %v1701_v48 = vsel %vm1445_vm3, %v1030_v36, %v1573_v38 }
 0x117   : > { %vm1512_vm6 = vcmp.ge.f32.partialorder %v3482_v44, 0.0  ;;  %v1640_v46 = vmul.f32 0.2, %v3482_v44  ;;  %v1033_v47 = vpop.f32.mrf.mxu0  ;;  %v1765_v56 = vsel %vm1509_vm5, %v1286_v39, %v1637_v42 }
 0x118   : > { %v1704_v49 = vsel %vm1448_vm4, %v3418_v40, %v1576_v43  ;;  %vm1446_vm7 = vcmp.ge.f32.partialorder %v1033_v47, 0.0  ;;  %v1574_v50 = vmul.f32 0.2, %v1033_v47  ;;  %v1289_v51 = vpop.f32.mrf.mxu1 }
 0x119   : > { %v3021_v52 = vpack.c.bf16 %v1704_v49, %v1703_v41  ;;  %v1768_v53 = vsel %vm1512_vm6, %v3482_v44, %v1640_v46  ;;  %vm1510_vm8 = vcmp.ge.f32.partialorder %v1289_v51, 0.0  ;;  %v1638_v54 = vmul.f32 0.2, %v1289_v51  ;;  %v3421_v55 = vpop.f32.mrf.mxu0 }
 0x11a   : > { %v3181_v57 = vpack.c.bf16 %v1768_v53, %v1767_v45  ;;  %v1702_v58 = vsel %vm1446_vm7, %v1033_v47, %v1574_v50  ;;  %v1579_v59 = vmul.f32 0.2, %v3421_v55  ;;  %v3485_v60 = vpop.f32.mrf.mxu1  ;;  %vm1451_vm9 = vcmp.ge.f32.partialorder %v3421_v55, 0.0 }
 0x11b   : > { %3269 = vst [vmem:[%s3805_s22 + $0x88] sm:$0xff] %v3021_v52   ;;  %v3016_v61 = vpack.c.bf16 %v1702_v58, %v1701_v48  ;;  %v1766_v62 = vsel %vm1510_vm8, %v1289_v51, %v1638_v54  ;;  %v1643_v63 = vmul.f32 0.2, %v3485_v60  ;;  %v1046_v0 = vpop.f32.mrf.mxu0  ;;  %vm1515_vm10 = vcmp.ge.f32.partialorder %v3485_v60, 0.0 }
 0x11c   : > { %3301 = vst [vmem:[%s3805_s22 + $0x188] sm:$0xff] %v3181_v57   ;;  %v3176_v1 = vpack.c.bf16 %v1766_v62, %v1765_v56  ;;  %v1577_v2 = vmul.f32 0.2, %v1046_v0  ;;  %v1302_v3 = vpop.f32.mrf.mxu1  ;;  %vm1449_vm11 = vcmp.ge.f32.partialorder %v1046_v0, 0.0  ;;  %v1707_v5 = vsel %vm1451_vm9, %v3421_v55, %v1579_v59 }
 0x11d   : > { %3268 = vst [vmem:[%s3805_s22 + $0x80] sm:$0xff] %v3016_v61   ;;  %v3422_v4 = vpop.f32.mrf.mxu0  ;;  %v1641_v6 = vmul.f32 0.2, %v1302_v3  ;;  %v1771_v9 = vsel %vm1515_vm10, %v3485_v60, %v1643_v63  ;;  %vm1513_vm13 = vcmp.ge.f32.partialorder %v1302_v3, 0.0 }
 0x11e   : > { %3300 = vst [vmem:[%s3805_s22 + $0x180] sm:$0xff] %v3176_v1   ;;  %vm1452_vm12 = vcmp.ge.f32.partialorder %v3422_v4, 0.0  ;;  %v1580_v7 = vmul.f32 0.2, %v3422_v4  ;;  %v3486_v8 = vpop.f32.mrf.mxu1  ;;  %v1705_v12 = vsel %vm1449_vm11, %v1046_v0, %v1577_v2 }
 0x11f   : > { %vm1516_vm14 = vcmp.ge.f32.partialorder %v3486_v8, 0.0  ;;  %v1644_v10 = vmul.f32 0.2, %v3486_v8  ;;  %v1049_v11 = vpop.f32.mrf.mxu0  ;;  %v1769_v20 = vsel %vm1513_vm13, %v1302_v3, %v1641_v6 }
 0x120   : > { %v1708_v13 = vsel %vm1452_vm12, %v3422_v4, %v1580_v7  ;;  %vm1450_vm15 = vcmp.ge.f32.partialorder %v1049_v11, 0.0  ;;  %v1578_v14 = vmul.f32 0.2, %v1049_v11  ;;  %v1305_v15 = vpop.f32.mrf.mxu1 }
 0x121   : > { %v3031_v16 = vpack.c.bf16 %v1708_v13, %v1707_v5  ;;  %v1772_v17 = vsel %vm1516_vm14, %v3486_v8, %v1644_v10  ;;  %vm1514_vm0 = vcmp.ge.f32.partialorder %v1305_v15, 0.0  ;;  %v1642_v18 = vmul.f32 0.2, %v1305_v15  ;;  %v3425_v19 = vpop.f32.mrf.mxu0 }
 0x122   : > { %v3191_v21 = vpack.c.bf16 %v1772_v17, %v1771_v9  ;;  %v1706_v22 = vsel %vm1450_vm15, %v1049_v11, %v1578_v14  ;;  %v1583_v23 = vmul.f32 0.2, %v3425_v19  ;;  %v3489_v24 = vpop.f32.mrf.mxu1  ;;  %vm1455_vm1 = vcmp.ge.f32.partialorder %v3425_v19, 0.0 }
 0x123   : > { %3271 = vst [vmem:[%s3805_s22 + $0x98] sm:$0xff] %v3031_v16   ;;  %v3026_v25 = vpack.c.bf16 %v1706_v22, %v1705_v12  ;;  %v1770_v26 = vsel %vm1514_vm0, %v1305_v15, %v1642_v18  ;;  %v1647_v27 = vmul.f32 0.2, %v3489_v24  ;;  %v1062_v28 = vpop.f32.mrf.mxu0  ;;  %vm1519_vm2 = vcmp.ge.f32.partialorder %v3489_v24, 0.0 }
 0x124   : > { %3303 = vst [vmem:[%s3805_s22 + $0x198] sm:$0xff] %v3191_v21   ;;  %v3186_v29 = vpack.c.bf16 %v1770_v26, %v1769_v20  ;;  %v1581_v30 = vmul.f32 0.2, %v1062_v28  ;;  %v1318_v31 = vpop.f32.mrf.mxu1  ;;  %vm1453_vm3 = vcmp.ge.f32.partialorder %v1062_v28, 0.0  ;;  %v1711_v33 = vsel %vm1455_vm1, %v3425_v19, %v1583_v23 }
 0x125   : > { %3270 = vst [vmem:[%s3805_s22 + $0x90] sm:$0xff] %v3026_v25   ;;  %v3426_v32 = vpop.f32.mrf.mxu0  ;;  %v1645_v34 = vmul.f32 0.2, %v1318_v31  ;;  %v1775_v37 = vsel %vm1519_vm2, %v3489_v24, %v1647_v27  ;;  %vm1517_vm5 = vcmp.ge.f32.partialorder %v1318_v31, 0.0 }
 0x126   : > { %3302 = vst [vmem:[%s3805_s22 + $0x190] sm:$0xff] %v3186_v29   ;;  %vm1456_vm4 = vcmp.ge.f32.partialorder %v3426_v32, 0.0  ;;  %v1584_v35 = vmul.f32 0.2, %v3426_v32  ;;  %v3490_v36 = vpop.f32.mrf.mxu1  ;;  %v1709_v40 = vsel %vm1453_vm3, %v1062_v28, %v1581_v30 }
 0x127   : > { %vm1520_vm6 = vcmp.ge.f32.partialorder %v3490_v36, 0.0  ;;  %v1648_v38 = vmul.f32 0.2, %v3490_v36  ;;  %v1065_v39 = vpop.f32.mrf.mxu0  ;;  %v1773_v48 = vsel %vm1517_vm5, %v1318_v31, %v1645_v34 }
 0x128   : > { %v1712_v41 = vsel %vm1456_vm4, %v3426_v32, %v1584_v35  ;;  %vm1454_vm7 = vcmp.ge.f32.partialorder %v1065_v39, 0.0  ;;  %v1582_v42 = vmul.f32 0.2, %v1065_v39  ;;  %v1321_v43 = vpop.f32.mrf.mxu1 }
 0x129   : > { %v3041_v44 = vpack.c.bf16 %v1712_v41, %v1711_v33  ;;  %v1776_v45 = vsel %vm1520_vm6, %v3490_v36, %v1648_v38  ;;  %vm1518_vm8 = vcmp.ge.f32.partialorder %v1321_v43, 0.0  ;;  %v1646_v46 = vmul.f32 0.2, %v1321_v43  ;;  %v3429_v47 = vpop.f32.mrf.mxu0 }
 0x12a   : > { %v3201_v49 = vpack.c.bf16 %v1776_v45, %v1775_v37  ;;  %v1710_v50 = vsel %vm1454_vm7, %v1065_v39, %v1582_v42  ;;  %v1587_v51 = vmul.f32 0.2, %v3429_v47  ;;  %v3493_v52 = vpop.f32.mrf.mxu1  ;;  %vm1459_vm9 = vcmp.ge.f32.partialorder %v3429_v47, 0.0 }
 0x12b   : > { %3273 = vst [vmem:[%s3805_s22 + $0xa8] sm:$0xff] %v3041_v44   ;;  %v3036_v53 = vpack.c.bf16 %v1710_v50, %v1709_v40  ;;  %v1774_v54 = vsel %vm1518_vm8, %v1321_v43, %v1646_v46  ;;  %v1651_v55 = vmul.f32 0.2, %v3493_v52  ;;  %v1078_v56 = vpop.f32.mrf.mxu0  ;;  %vm1523_vm10 = vcmp.ge.f32.partialorder %v3493_v52, 0.0 }
 0x12c   : > { %3305 = vst [vmem:[%s3805_s22 + $0x1a8] sm:$0xff] %v3201_v49   ;;  %v3196_v57 = vpack.c.bf16 %v1774_v54, %v1773_v48  ;;  %v1585_v58 = vmul.f32 0.2, %v1078_v56  ;;  %v1334_v59 = vpop.f32.mrf.mxu1  ;;  %vm1457_vm11 = vcmp.ge.f32.partialorder %v1078_v56, 0.0  ;;  %v1715_v61 = vsel %vm1459_vm9, %v3429_v47, %v1587_v51 }
 0x12d   : > { %3272 = vst [vmem:[%s3805_s22 + $0xa0] sm:$0xff] %v3036_v53   ;;  %v3430_v60 = vpop.f32.mrf.mxu0  ;;  %v1649_v62 = vmul.f32 0.2, %v1334_v59  ;;  %v1779_v1 = vsel %vm1523_vm10, %v3493_v52, %v1651_v55  ;;  %vm1521_vm13 = vcmp.ge.f32.partialorder %v1334_v59, 0.0 }
 0x12e   : > { %3304 = vst [vmem:[%s3805_s22 + $0x1a0] sm:$0xff] %v3196_v57   ;;  %vm1460_vm12 = vcmp.ge.f32.partialorder %v3430_v60, 0.0  ;;  %v1588_v63 = vmul.f32 0.2, %v3430_v60  ;;  %v3494_v0 = vpop.f32.mrf.mxu1  ;;  %v1713_v4 = vsel %vm1457_vm11, %v1078_v56, %v1585_v58 }
 0x12f   : > { %vm1524_vm14 = vcmp.ge.f32.partialorder %v3494_v0, 0.0  ;;  %v1652_v2 = vmul.f32 0.2, %v3494_v0  ;;  %v1081_v3 = vpop.f32.mrf.mxu0  ;;  %v1777_v12 = vsel %vm1521_vm13, %v1334_v59, %v1649_v62 }
 0x130   : > { %v1716_v5 = vsel %vm1460_vm12, %v3430_v60, %v1588_v63  ;;  %vm1458_vm15 = vcmp.ge.f32.partialorder %v1081_v3, 0.0  ;;  %v1586_v6 = vmul.f32 0.2, %v1081_v3  ;;  %v1337_v7 = vpop.f32.mrf.mxu1 }
 0x131   : > { %v3051_v8 = vpack.c.bf16 %v1716_v5, %v1715_v61  ;;  %v1780_v9 = vsel %vm1524_vm14, %v3494_v0, %v1652_v2  ;;  %vm1522_vm0 = vcmp.ge.f32.partialorder %v1337_v7, 0.0  ;;  %v1650_v10 = vmul.f32 0.2, %v1337_v7  ;;  %v3433_v11 = vpop.f32.mrf.mxu0 }
 0x132   : > { %v3211_v13 = vpack.c.bf16 %v1780_v9, %v1779_v1  ;;  %v1714_v14 = vsel %vm1458_vm15, %v1081_v3, %v1586_v6  ;;  %v1591_v15 = vmul.f32 0.2, %v3433_v11  ;;  %v3497_v16 = vpop.f32.mrf.mxu1  ;;  %vm1463_vm1 = vcmp.ge.f32.partialorder %v3433_v11, 0.0 }
 0x133   : > { %3275 = vst [vmem:[%s3805_s22 + $0xb8] sm:$0xff] %v3051_v8   ;;  %v3046_v17 = vpack.c.bf16 %v1714_v14, %v1713_v4  ;;  %v1778_v18 = vsel %vm1522_vm0, %v1337_v7, %v1650_v10  ;;  %v1655_v19 = vmul.f32 0.2, %v3497_v16  ;;  %v1094_v20 = vpop.f32.mrf.mxu0  ;;  %vm1527_vm2 = vcmp.ge.f32.partialorder %v3497_v16, 0.0 }
 0x134   : > { %3307 = vst [vmem:[%s3805_s22 + $0x1b8] sm:$0xff] %v3211_v13   ;;  %v3206_v21 = vpack.c.bf16 %v1778_v18, %v1777_v12  ;;  %v1589_v22 = vmul.f32 0.2, %v1094_v20  ;;  %v1350_v23 = vpop.f32.mrf.mxu1  ;;  %vm1461_vm3 = vcmp.ge.f32.partialorder %v1094_v20, 0.0  ;;  %v1719_v25 = vsel %vm1463_vm1, %v3433_v11, %v1591_v15 }
 0x135   : > { %3274 = vst [vmem:[%s3805_s22 + $0xb0] sm:$0xff] %v3046_v17   ;;  %v3434_v24 = vpop.f32.mrf.mxu0  ;;  %v1653_v26 = vmul.f32 0.2, %v1350_v23  ;;  %v1783_v29 = vsel %vm1527_vm2, %v3497_v16, %v1655_v19  ;;  %vm1525_vm5 = vcmp.ge.f32.partialorder %v1350_v23, 0.0 }
 0x136   : > { %3306 = vst [vmem:[%s3805_s22 + $0x1b0] sm:$0xff] %v3206_v21   ;;  %vm1464_vm4 = vcmp.ge.f32.partialorder %v3434_v24, 0.0  ;;  %v1592_v27 = vmul.f32 0.2, %v3434_v24  ;;  %v3498_v28 = vpop.f32.mrf.mxu1  ;;  %v1717_v32 = vsel %vm1461_vm3, %v1094_v20, %v1589_v22 }
 0x137   : > { %vm1528_vm6 = vcmp.ge.f32.partialorder %v3498_v28, 0.0  ;;  %v1656_v30 = vmul.f32 0.2, %v3498_v28  ;;  %v1097_v31 = vpop.f32.mrf.mxu0  ;;  %v1781_v40 = vsel %vm1525_vm5, %v1350_v23, %v1653_v26 }
 0x138   : > { %v1720_v33 = vsel %vm1464_vm4, %v3434_v24, %v1592_v27  ;;  %vm1462_vm7 = vcmp.ge.f32.partialorder %v1097_v31, 0.0  ;;  %v1590_v34 = vmul.f32 0.2, %v1097_v31  ;;  %v1353_v35 = vpop.f32.mrf.mxu1 }
 0x139   : > { %v3061_v36 = vpack.c.bf16 %v1720_v33, %v1719_v25  ;;  %v1784_v37 = vsel %vm1528_vm6, %v3498_v28, %v1656_v30  ;;  %vm1526_vm8 = vcmp.ge.f32.partialorder %v1353_v35, 0.0  ;;  %v1654_v38 = vmul.f32 0.2, %v1353_v35  ;;  %v3437_v39 = vpop.f32.mrf.mxu0 }
 0x13a   : > { %v3221_v41 = vpack.c.bf16 %v1784_v37, %v1783_v29  ;;  %v1718_v42 = vsel %vm1462_vm7, %v1097_v31, %v1590_v34  ;;  %v1595_v43 = vmul.f32 0.2, %v3437_v39  ;;  %v3501_v44 = vpop.f32.mrf.mxu1  ;;  %vm1467_vm9 = vcmp.ge.f32.partialorder %v3437_v39, 0.0 }
 0x13b   : > { %3277 = vst [vmem:[%s3805_s22 + $0xc8] sm:$0xff] %v3061_v36   ;;  %v3056_v45 = vpack.c.bf16 %v1718_v42, %v1717_v32  ;;  %v1782_v46 = vsel %vm1526_vm8, %v1353_v35, %v1654_v38  ;;  %v1659_v47 = vmul.f32 0.2, %v3501_v44  ;;  %v1110_v48 = vpop.f32.mrf.mxu0  ;;  %vm1531_vm10 = vcmp.ge.f32.partialorder %v3501_v44, 0.0 }
 0x13c   : > { %3309 = vst [vmem:[%s3805_s22 + $0x1c8] sm:$0xff] %v3221_v41   ;;  %v3216_v49 = vpack.c.bf16 %v1782_v46, %v1781_v40  ;;  %vm1465_vm11 = vcmp.ge.f32.partialorder %v1110_v48, 0.0  ;;  %v1593_v50 = vmul.f32 0.2, %v1110_v48  ;;  %v1366_v51 = vpop.f32.mrf.mxu1  ;;  %v1723_v54 = vsel %vm1467_vm9, %v3437_v39, %v1595_v43 }
 0x13d   : > { %3276 = vst [vmem:[%s3805_s22 + $0xc0] sm:$0xff] %v3056_v45   ;;  %vm1529_vm12 = vcmp.ge.f32.partialorder %v1366_v51, 0.0  ;;  %v1657_v52 = vmul.f32 0.2, %v1366_v51  ;;  %v3438_v53 = vpop.f32.mrf.mxu0  ;;  %v1787_v57 = vsel %vm1531_vm10, %v3501_v44, %v1659_v47 }
 0x13e   : > { %3308 = vst [vmem:[%s3805_s22 + $0x1c0] sm:$0xff] %v3216_v49   ;;  %vm1468_vm13 = vcmp.ge.f32.partialorder %v3438_v53, 0.0  ;;  %v1596_v55 = vmul.f32 0.2, %v3438_v53  ;;  %v3502_v56 = vpop.f32.mrf.mxu1  ;;  %v1721_v58 = vsel %vm1465_vm11, %v1110_v48, %v1593_v50 }
 0x13f   : > { %vm1532_vm14 = vcmp.ge.f32.partialorder %v3502_v56, 0.0  ;;  %v1660_v59 = vmul.f32 0.2, %v3502_v56  ;;  %v1113_v60 = vpop.f32.mrf.mxu0  ;;  %v1785_v61 = vsel %vm1529_vm12, %v1366_v51, %v1657_v52 }
 0x140   : > { %v1724_v62 = vsel %vm1468_vm13, %v3438_v53, %v1596_v55  ;;  %vm1466_vm15 = vcmp.ge.f32.partialorder %v1113_v60, 0.0  ;;  %v1594_v63 = vmul.f32 0.2, %v1113_v60  ;;  %v1369_v0 = vpop.f32.mrf.mxu1 }
 0x141   : > { %v3071_v1 = vpack.c.bf16 %v1724_v62, %v1723_v54  ;;  %v1788_v2 = vsel %vm1532_vm14, %v3502_v56, %v1660_v59  ;;  %vm1530_vm0 = vcmp.ge.f32.partialorder %v1369_v0, 0.0  ;;  %v1658_v3 = vmul.f32 0.2, %v1369_v0  ;;  %v3441_v4 = vpop.f32.mrf.mxu0 }
 0x142   : > { %v3231_v5 = vpack.c.bf16 %v1788_v2, %v1787_v57  ;;  %v1722_v6 = vsel %vm1466_vm15, %v1113_v60, %v1594_v63  ;;  %vm1471_vm1 = vcmp.ge.f32.partialorder %v3441_v4, 0.0  ;;  %v1599_v7 = vmul.f32 0.2, %v3441_v4  ;;  %v3505_v8 = vpop.f32.mrf.mxu1 }
 0x143   : > { %3279 = vst [vmem:[%s3805_s22 + $0xd8] sm:$0xff] %v3071_v1   ;;  %v3066_v9 = vpack.c.bf16 %v1722_v6, %v1721_v58  ;;  %v1786_v10 = vsel %vm1530_vm0, %v1369_v0, %v1658_v3  ;;  %vm1535_vm2 = vcmp.ge.f32.partialorder %v3505_v8, 0.0  ;;  %v1663_v11 = vmul.f32 0.2, %v3505_v8  ;;  %v1126_v12 = vpop.f32.mrf.mxu0 }
 0x144   : > { %3311 = vst [vmem:[%s3805_s22 + $0x1d8] sm:$0xff] %v3231_v5   ;;  %v3226_v13 = vpack.c.bf16 %v1786_v10, %v1785_v61  ;;  %v1597_v14 = vmul.f32 0.2, %v1126_v12  ;;  %v1382_v15 = vpop.f32.mrf.mxu1  ;;  %vm1469_vm3 = vcmp.ge.f32.partialorder %v1126_v12, 0.0  ;;  %v1727_v17 = vsel %vm1471_vm1, %v3441_v4, %v1599_v7 }
 0x145   : > { %3278 = vst [vmem:[%s3805_s22 + $0xd0] sm:$0xff] %v3066_v9   ;;  %v3442_v16 = vpop.f32.mrf.mxu0  ;;  %v1791_v18 = vsel %vm1535_vm2, %v3505_v8, %v1663_v11  ;;  %vm1533_vm5 = vcmp.ge.f32.partialorder %v1382_v15, 0.0  ;;  %v1661_v21 = vmul.f32 0.2, %v1382_v15 }
 0x146   : > { %3310 = vst [vmem:[%s3805_s22 + $0x1d0] sm:$0xff] %v3226_v13   ;;  %vm1472_vm4 = vcmp.ge.f32.partialorder %v3442_v16, 0.0  ;;  %v1600_v19 = vmul.f32 0.2, %v3442_v16  ;;  %v3506_v20 = vpop.f32.mrf.mxu1  ;;  %v1725_v24 = vsel %vm1469_vm3, %v1126_v12, %v1597_v14 }
 0x147   : > { %vm1536_vm6 = vcmp.ge.f32.partialorder %v3506_v20, 0.0  ;;  %v1664_v22 = vmul.f32 0.2, %v3506_v20  ;;  %v1129_v23 = vpop.f32.mrf.mxu0  ;;  %v1789_v36 = vsel %vm1533_vm5, %v1382_v15, %v1661_v21 }
 0x148   : > { %v1728_v25 = vsel %vm1472_vm4, %v3442_v16, %v1600_v19  ;;  %vm1470_vm7 = vcmp.ge.f32.partialorder %v1129_v23, 0.0  ;;  %v1598_v26 = vmul.f32 0.2, %v1129_v23  ;;  %v1385_v27 = vpop.f32.mrf.mxu1 }
 0x149   : > { %v3081_v28 = vpack.c.bf16 %v1728_v25, %v1727_v17  ;;  %v1792_v29 = vsel %vm1536_vm6, %v3506_v20, %v1664_v22  ;;  %vm1534_vm8 = vcmp.ge.f32.partialorder %v1385_v27, 0.0  ;;  %v1662_v30 = vmul.f32 0.2, %v1385_v27  ;;  %v3445_v31 = vpop.f32.mrf.mxu0 }
 0x14a   : > { %v3241_v32 = vpack.c.bf16 %v1792_v29, %v1791_v18  ;;  %v1726_v33 = vsel %vm1470_vm7, %v1129_v23, %v1598_v26  ;;  %vm1475_vm9 = vcmp.ge.f32.partialorder %v3445_v31, 0.0  ;;  %v1603_v34 = vmul.f32 0.2, %v3445_v31  ;;  %v3509_v35 = vpop.f32.mrf.mxu1 }
 0x14b   : > { %3281 = vst [vmem:[%s3805_s22 + $0xe8] sm:$0xff] %v3081_v28   ;;  %v3076_v37 = vpack.c.bf16 %v1726_v33, %v1725_v24  ;;  %v1790_v38 = vsel %vm1534_vm8, %v1385_v27, %v1662_v30  ;;  %v1667_v39 = vmul.f32 0.2, %v3509_v35  ;;  %v1142_v40 = vpop.f32.mrf.mxu0  ;;  %vm1539_vm10 = vcmp.ge.f32.partialorder %v3509_v35, 0.0 }
 0x14c   : > { %3313 = vst [vmem:[%s3805_s22 + $0x1e8] sm:$0xff] %v3241_v32   ;;  %v3236_v41 = vpack.c.bf16 %v1790_v38, %v1789_v36  ;;  %v1398_v42 = vpop.f32.mrf.mxu1  ;;  %v1731_v43 = vsel %vm1475_vm9, %v3445_v31, %v1603_v34  ;;  %vm1473_vm11 = vcmp.ge.f32.partialorder %v1142_v40, 0.0  ;;  %v1601_v45 = vmul.f32 0.2, %v1142_v40 }
 0x14d   : > { %3280 = vst [vmem:[%s3805_s22 + $0xe0] sm:$0xff] %v3076_v37   ;;  %v3446_v44 = vpop.f32.mrf.mxu0  ;;  %v1795_v48 = vsel %vm1539_vm10, %v3509_v35, %v1667_v39  ;;  %v1665_v49 = vmul.f32 0.2, %v1398_v42  ;;  %vm1537_vm14 = vcmp.ge.f32.partialorder %v1398_v42, 0.0 }
 0x14e   : > { %3312 = vst [vmem:[%s3805_s22 + $0x1e0] sm:$0xff] %v3236_v41   ;;  %vm1476_vm12 = vcmp.ge.f32.partialorder %v3446_v44, 0.0  ;;  %v1604_v46 = vmul.f32 0.2, %v3446_v44  ;;  %v3510_v47 = vpop.f32.mrf.mxu1  ;;  %v1729_v58 = vsel %vm1473_vm11, %v1142_v40, %v1601_v45 }
 0x14f   : > { %vm1540_vm13 = vcmp.ge.f32.partialorder %v3510_v47, 0.0  ;;  %v1668_v50 = vmul.f32 0.2, %v3510_v47  ;;  %v1145_v51 = vpop.f32.mrf.mxu0  ;;  %v1793_v61 = vsel %vm1537_vm14, %v1398_v42, %v1665_v49 }
 0x150   : > { %v1732_v52 = vsel %vm1476_vm12, %v3446_v44, %v1604_v46  ;;  %vm1474_vm15 = vcmp.ge.f32.partialorder %v1145_v51, 0.0  ;;  %v1602_v53 = vmul.f32 0.2, %v1145_v51  ;;  %v1401_v54 = vpop.f32.mrf.mxu1 }
 0x151   : > { %v3091_v55 = vpack.c.bf16 %v1732_v52, %v1731_v43  ;;  %v1796_v56 = vsel %vm1540_vm13, %v3510_v47, %v1668_v50  ;;  %vm1538_vm0 = vcmp.ge.f32.partialorder %v1401_v54, 0.0  ;;  %v1666_v57 = vmul.f32 0.2, %v1401_v54 }
 0x152   : > { %v3251_v59 = vpack.c.bf16 %v1796_v56, %v1795_v48  ;;  %v1730_v60 = vsel %vm1474_vm15, %v1145_v51, %v1602_v53 }
 0x153   : > { %3283 = vst [vmem:[%s3805_s22 + $0xf8] sm:$0xff] %v3091_v55   ;;  %v3086_v62 = vpack.c.bf16 %v1730_v60, %v1729_v58  ;;  %v1794_v63 = vsel %vm1538_vm0, %v1401_v54, %v1666_v57 }
 0x154   : > { %3315 = vst [vmem:[%s3805_s22 + $0x1f8] sm:$0xff] %v3251_v59   ;;  %v3246_v0 = vpack.c.bf16 %v1794_v63, %v1793_v61 }
 0x155   : > { %3282 = vst [vmem:[%s3805_s22 + $0xf0] sm:$0xff] %v3086_v62  }
 0x156   : > { %3314 = vst [vmem:[%s3805_s22 + $0x1f0] sm:$0xff] %v3246_v0  }
 0x157 PF: > { %s12_s11 = sadd.s32 1, %s3624_s11   ;;  %s3886_s9 = smov %s3620_s10 }
 0x158   : > { %p9_p5 = scmp.ge.s32.totalorder %s12_s11, 4   ;;  %s3887_s10 = smov %s3889_s12 }
 0x15a   :  { %11 = sbr.rel (!%p9_p5) target bundleno = 2 (0x2), region = 61 }

// kernel: classifier_content_forward.7
= control target key start
LH: loop header
LB: loop body
LE: loop exit
PB: predicated region body
PF: predicated region fallthrough
CT: control target
= control target key end

     0   :  { %s3628_s15 = smov 0   ;;  %s3630_s16 = smov 0   ;;  %s4112_s0 = inlined_call_operand.vmem [shape: bf16[512,1024], index: 0, kind: input, shape index: {}]   ;;  %s4113_s1 = inlined_call_operand.vmem [shape: bf16[1024,128], index: 1, kind: input, shape index: {}]   ;;  %s4114_s2 = inlined_call_operand.vmem [shape: bf16[512,128], index: 2, kind: output, shape index: {0}]   ;;  %s4115_s3 = inlined_call_operand.vmem [shape: f32[2,1,128], index: 3, kind: output, shape index: {1}]   ;;  %s4116_s4 = inlined_call_operand.vmem [shape: f32[2,1,128], index: 4, kind: output, shape index: {2}]  }
   0x1   :  { %s3632_s17 = smov 0  }
   0x2 LB: > { %s34_s18 = sadd.s32 1, %s3597_s16  ;;  %p2683_p0 = scmp.ge.s32.totalorder %s3601_s17, 1  ;;  %s3601_s17 = sphi %s3632_s17, %s15_s17   ;;  %s3597_s16 = sphi %s3630_s16, %s4118_s16   ;;  %s3593_s15 = sphi %s3628_s15, %s4117_s15  }
   0x3   : > { %p36_p1 = scmp.ge.s32.totalorder %s34_s18, 2  ;;  %p217_p2 = scmp.lt.s32.totalorder %s3601_s17, 3 }
   0x5   : > { %s4120_s18 = smov (%p36_p1, %s34_s18), 0  ;;  %p218_p3 = pnand %p2683_p0, %p217_p2 }
   0x6   : > { %s2684_s29 = sshll.u32 (!%p218_p3), %s3593_s15, 5  ;;  %p301_p5 = scmp.lt.s32.totalorder (!%p218_p3), %s3593_s15, 1 }
   0x7   : > { %221 = sbr.rel (%p218_p3) target bundleno = 516 (0x204), region = 28  ;;  %p273_p4 = scmp.lt.s32.totalorder (!%p218_p3), %s2684_s29, 63 }
   0xc   : > { %v3515_v0 = vld [vmem:[%s4113_s1 + $0x78] sm:$0xff]   ;;  %v3519_v4 = vld [vmem:[%s4113_s1 + $0x70] sm:$0xff]   ;;  %v3523_v8 = vld [vmem:[%s4113_s1 + $0x68] sm:$0xff]   ;;  %s4122_s29 = smov (!%p273_p4, %s2684_s29), 63  ;;  %s4124_s15 = smov (!%p301_p5, %s3593_s15), 1 }
   0xd   : > { %v3516_v1 = vld [vmem:[%s4113_s1 + $0xf8] sm:$0xff]   ;;  %3043 = vmatprep.subr.bf16.mxu0 %v3515_v0  ;;  %v3520_v5 = vld [vmem:[%s4113_s1 + $0xf0] sm:$0xff]   ;;  %v3524_v9 = vld [vmem:[%s4113_s1 + $0xe8] sm:$0xff]   ;;  %s2915_s5 = sshll.u32 %s4122_s29, 5  ;;  %s306_s6 = scalar_lea.vmem %s4115_s3, %s4124_s15 }
   0xe   : > { %v3517_v2 = vld [vmem:[%s4113_s1 + $0x38] sm:$0xff]   ;;  %3155 = vmatprep.subr.bf16.mxu1 %v3516_v1  ;;  %v3521_v6 = vld [vmem:[%s4113_s1 + $0x30] sm:$0xff]   ;;  %v3525_v10 = vld [vmem:[%s4113_s1 + $0x28] sm:$0xff]   ;;  %s3745_s14 = scalar_lea.vmem %s4112_s0, %s2915_s5  ;;  %s312_s9 = scalar_lea.vmem %s4116_s4, %s4124_s15 }
   0xf   : > { %v3518_v3 = vld [vmem:[%s4113_s1 + $0xb8] sm:$0xff]   ;;  %3044 = vmatpush3.bf16.msra.mxu0 %v3517_v2  ;;  %v3522_v7 = vld [vmem:[%s4113_s1 + $0xb0] sm:$0xff]   ;;  %v3526_v11 = vld [vmem:[%s4113_s1 + $0xa8] sm:$0xff]  }
  0x10   : > { %3156 = vmatpush3.bf16.msra.mxu1 %v3518_v3  ;;  %3045 = vmatprep.subr.bf16.mxu0 %v3519_v4  ;;  %v3527_v12 = vld [vmem:[%s4113_s1 + $0x60] sm:$0xff]   ;;  %v3531_v16 = vld [vmem:[%s4113_s1 + $0x58] sm:$0xff]   ;;  %v3535_v20 = vld [vmem:[%s4113_s1 + $0x50] sm:$0xff]  }
  0x11   : > { %3157 = vmatprep.subr.bf16.mxu1 %v3520_v5  ;;  %v3528_v13 = vld [vmem:[%s4113_s1 + $0xe0] sm:$0xff]   ;;  %v3532_v17 = vld [vmem:[%s4113_s1 + $0xd8] sm:$0xff]   ;;  %v3536_v21 = vld [vmem:[%s4113_s1 + $0xd0] sm:$0xff]  }
  0x12   : > { %v3529_v14 = vld [vmem:[%s4113_s1 + $0x20] sm:$0xff]   ;;  %v3533_v18 = vld [vmem:[%s4113_s1 + $0x18] sm:$0xff]   ;;  %v3537_v22 = vld [vmem:[%s4113_s1 + $0x10] sm:$0xff]  }
  0x13   : > { %3046 = vmatpush3.bf16.msra.mxu0 %v3521_v6  ;;  %v3530_v15 = vld [vmem:[%s4113_s1 + $0xa0] sm:$0xff]   ;;  %v3534_v19 = vld [vmem:[%s4113_s1 + $0x98] sm:$0xff]   ;;  %v3538_v23 = vld [vmem:[%s4113_s1 + $0x90] sm:$0xff]  }
  0x14   : > { %3158 = vmatpush3.bf16.msra.mxu1 %v3522_v7  ;;  %3047 = vmatprep.subr.bf16.mxu0 %v3523_v8  ;;  %v3539_v24 = vld [vmem:[%s4113_s1 + $0x48] sm:$0xff]   ;;  %v3543_v28 = vld [vmem:[%s4113_s1 + $0x40] sm:$0xff]   ;;  %v3547_v40 = vld [vmem:[%s4113_s1 + $0x178] sm:$0xff]  }
  0x15   : > { %3159 = vmatprep.subr.bf16.mxu1 %v3524_v9  ;;  %v3540_v25 = vld [vmem:[%s4113_s1 + $0xc8] sm:$0xff]   ;;  %v3544_v29 = vld [vmem:[%s4113_s1 + $0xc0] sm:$0xff]   ;;  %v3548_v41 = vld [vmem:[%s4113_s1 + $0x138] sm:$0xff]  }
  0x16   : > { %v3541_v26 = vld [vmem:[%s4113_s1 + $0x8] sm:$0xff]   ;;  %v3545_v30 = vld [vmem:[%s4113_s1] sm:$0xff]   ;;  %v3549_v42 = vld [vmem:[%s4113_s1 + $0x1f8] sm:$0xff]  }
  0x17   : > { %3048 = vmatpush3.bf16.msra.mxu0 %v3525_v10  ;;  %v3542_v27 = vld [vmem:[%s4113_s1 + $0x88] sm:$0xff]   ;;  %v3546_v31 = vld [vmem:[%s4113_s1 + $0x80] sm:$0xff]   ;;  %v3550_v43 = vld [vmem:[%s4113_s1 + $0x1b8] sm:$0xff]  }
  0x18   : > { %3160 = vmatpush3.bf16.msra.mxu1 %v3526_v11  ;;  %3049 = vmatprep.subr.bf16.mxu0 %v3527_v12  ;;  %v314_v32 = vld [vmem:[%s3745_s14] sm:$0xff]  ;;  %v315_v34 = vld [vmem:[%s3745_s14 + $0x8] sm:$0xff]  ;;  %v3551_v55 = vld [vmem:[%s4113_s1 + $0x170] sm:$0xff]  }
  0x19   : > { %3161 = vmatprep.subr.bf16.mxu1 %v3528_v13  ;;  %v318_v33 = vld [vmem:[%s3745_s14 + $0x20] sm:$0xff]  ;;  %v319_v37 = vld [vmem:[%s3745_s14 + $0x28] sm:$0xff]  ;;  %v3552_v58 = vld [vmem:[%s4113_s1 + $0x130] sm:$0xff]  }
  0x1a   : > { %v2689_v35 = vcombine.low %v314_v32, %v318_v33  ;;  %v2690_v36 = vcombine.high %v314_v32, %v318_v33  ;;  %v2691_v38 = vcombine.low %v315_v34, %v319_v37  ;;  %v2692_v39 = vcombine.high %v315_v34, %v319_v37  ;;  %v322_v44 = vld [vmem:[%s3745_s14 + $0x40] sm:$0xff]  ;;  %v323_v47 = vld [vmem:[%s3745_s14 + $0x48] sm:$0xff]  ;;  %v3553_v60 = vld [vmem:[%s4113_s1 + $0x1f0] sm:$0xff]  }
  0x1b   : > { %3050 = vmatpush3.bf16.msra.mxu0 %v3529_v14  ;;  %v326_v45 = vld [vmem:[%s3745_s14 + $0x60] sm:$0xff]  ;;  %v327_v48 = vld [vmem:[%s3745_s14 + $0x68] sm:$0xff]  ;;  %v3554_v61 = vld [vmem:[%s4113_s1 + $0x1b0] sm:$0xff]  }
  0x1c   : > { %3162 = vmatpush3.bf16.msra.mxu1 %v3530_v15  ;;  %3051 = vmatprep.subr.bf16.mxu0 %v3531_v16  ;;  %v2698_v46 = vcombine.high %v322_v44, %v326_v45  ;;  %v330_v49 = vld [vmem:[%s3745_s14 + $0x80] sm:$0xff]  ;;  %v2700_v50 = vcombine.high %v323_v47, %v327_v48  ;;  %v331_v52 = vld [vmem:[%s3745_s14 + $0x88] sm:$0xff]  ;;  %v2697_v54 = vcombine.low %v322_v44, %v326_v45  ;;  %v3567_v34 = vld [vmem:[%s4113_s1 + $0x150] sm:$0xff]  }
  0x1d   : > { %3163 = vmatprep.subr.bf16.mxu1 %v3532_v17  ;;  %1626 = vmatprep.mubr.bf16.mxu0 %v2690_v36  ;;  %v334_v51 = vld [vmem:[%s3745_s14 + $0xa0] sm:$0xff]  ;;  %v335_v53 = vld [vmem:[%s3745_s14 + $0xa8] sm:$0xff]  ;;  %v2699_v56 = vcombine.low %v323_v47, %v327_v48  ;;  %v3568_v36 = vld [vmem:[%s4113_s1 + $0x110] sm:$0xff]  }
  0x1e   : > { %1787 = vmatprep.mubr.bf16.mxu1 %v2692_v39  ;;  %v2706_v57 = vcombine.high %v330_v49, %v334_v51  ;;  %v2708_v59 = vcombine.high %v331_v52, %v335_v53  ;;  %v338_v62 = vld [vmem:[%s3745_s14 + $0xc0] sm:$0xff]  ;;  %v339_v0 = vld [vmem:[%s3745_s14 + $0xc8] sm:$0xff]  ;;  %v2705_v3 = vcombine.low %v330_v49, %v334_v51  ;;  %v2707_v5 = vcombine.low %v331_v52, %v335_v53  ;;  %v3569_v37 = vld [vmem:[%s4113_s1 + $0x1d0] sm:$0xff]  }
  0x1f   : > { %3052 = vmatpush3.bf16.msra.mxu0 %v3533_v18  ;;  %v342_v63 = vld [vmem:[%s3745_s14 + $0xe0] sm:$0xff]  ;;  %v343_v1 = vld [vmem:[%s3745_s14 + $0xe8] sm:$0xff]  ;;  %v3570_v39 = vld [vmem:[%s4113_s1 + $0x190] sm:$0xff]  }
  0x20   : > { %3164 = vmatpush3.bf16.msra.mxu1 %v3534_v19  ;;  %3053 = vmatprep.subr.bf16.mxu0 %v3535_v20  ;;  %v3555_v2 = vld [vmem:[%s4113_s1 + $0x168] sm:$0xff]   ;;  %v2714_v6 = vcombine.high %v338_v62, %v342_v63  ;;  %v2716_v8 = vcombine.high %v339_v0, %v343_v1  ;;  %v346_v10 = vld [vmem:[%s3745_s14 + $0x100] sm:$0xff]  ;;  %v2713_v16 = vcombine.low %v338_v62, %v342_v63 }
  0x21   : > { %3165 = vmatprep.subr.bf16.mxu1 %v3536_v21  ;;  %v3556_v4 = vld [vmem:[%s4113_s1 + $0x128] sm:$0xff]   ;;  %v350_v11 = vld [vmem:[%s3745_s14 + $0x120] sm:$0xff]  ;;  %v2715_v18 = vcombine.low %v339_v0, %v343_v1 }
  0x22   : > { %v3557_v7 = vld [vmem:[%s4113_s1 + $0x1e8] sm:$0xff]   ;;  %v3559_v14 = vld [vmem:[%s4113_s1 + $0x160] sm:$0xff]   ;;  %v2722_v19 = vcombine.high %v346_v10, %v350_v11 }
  0x23   : > { %3054 = vmatpush3.bf16.msra.mxu0 %v3537_v22  ;;  %v3558_v9 = vld [vmem:[%s4113_s1 + $0x1a8] sm:$0xff]   ;;  %v3560_v15 = vld [vmem:[%s4113_s1 + $0x120] sm:$0xff]  }
  0x24   : > { %3166 = vmatpush3.bf16.msra.mxu1 %v3538_v23  ;;  %3055 = vmatprep.subr.bf16.mxu0 %v3539_v24  ;;  %v347_v12 = vld [vmem:[%s3745_s14 + $0x108] sm:$0xff]  ;;  %v3561_v17 = vld [vmem:[%s4113_s1 + $0x1e0] sm:$0xff]   ;;  %v3563_v24 = vld [vmem:[%s4113_s1 + $0x158] sm:$0xff]  }
  0x25   : > { %3167 = vmatprep.subr.bf16.mxu1 %v3540_v25  ;;  %v351_v13 = vld [vmem:[%s3745_s14 + $0x128] sm:$0xff]  ;;  %v3562_v20 = vld [vmem:[%s4113_s1 + $0x1a0] sm:$0xff]  }
  0x26   : > { %v2724_v21 = vcombine.high %v347_v12, %v351_v13  ;;  %v354_v22 = vld [vmem:[%s3745_s14 + $0x140] sm:$0xff]  ;;  %v355_v25 = vld [vmem:[%s3745_s14 + $0x148] sm:$0xff] }
  0x27   : > { %3056 = vmatpush3.bf16.msra.mxu0 %v3541_v26  ;;  %v358_v23 = vld [vmem:[%s3745_s14 + $0x160] sm:$0xff]  ;;  %v359_v26 = vld [vmem:[%s3745_s14 + $0x168] sm:$0xff] }
  0x28   : > { %3168 = vmatpush3.bf16.msra.mxu1 %v3542_v27  ;;  %3057 = vmatprep.subr.bf16.mxu0 %v3543_v28  ;;  %v3564_v27 = vld [vmem:[%s4113_s1 + $0x118] sm:$0xff]   ;;  %v2730_v32 = vcombine.high %v354_v22, %v358_v23  ;;  %v2732_v33 = vcombine.high %v355_v25, %v359_v26  ;;  %v3572_v47 = vld [vmem:[%s4113_s1 + $0x108] sm:$0xff]   ;;  %v374_v51 = vld [vmem:[%s3745_s14 + $0x1e0] sm:$0xff] }
  0x29   : > { %3169 = vmatprep.subr.bf16.mxu1 %v3544_v29  ;;  %v3565_v28 = vld [vmem:[%s4113_s1 + $0x1d8] sm:$0xff]   ;;  %v3573_v48 = vld [vmem:[%s4113_s1 + $0x1c8] sm:$0xff]   ;;  %v378_v62 = vld [vmem:[%s3745_s14 + $0x200] sm:$0xff] }
  0x2a   : > { %v3566_v29 = vld [vmem:[%s4113_s1 + $0x198] sm:$0xff]   ;;  %v3574_v49 = vld [vmem:[%s4113_s1 + $0x188] sm:$0xff]   ;;  %v382_v63 = vld [vmem:[%s3745_s14 + $0x220] sm:$0xff] }
  0x2b   : > { %3058 = vmatpush3.bf16.msra.mxu0 %v3545_v30  ;;  %v2721_v30 = vcombine.low %v346_v10, %v350_v11  ;;  %v371_v52 = vld [vmem:[%s3745_s14 + $0x1c8] sm:$0xff]  ;;  %v2753_v10 = vcombine.low %v378_v62, %v382_v63 }
  0x2c   : > { %3170 = vmatpush3.bf16.msra.mxu1 %v3546_v31  ;;  %3267 = vmatprep.subr.bf16.mxu0 %v3547_v40  ;;  %v2723_v31 = vcombine.low %v347_v12, %v351_v13  ;;  %v363_v40 = vld [vmem:[%s3745_s14 + $0x188] sm:$0xff] }
  0x2d   : > { %3379 = vmatprep.subr.bf16.mxu1 %v3549_v42  ;;  %v2729_v42 = vcombine.low %v354_v22, %v358_v23  ;;  %v375_v53 = vld [vmem:[%s3745_s14 + $0x1e8] sm:$0xff]  ;;  %v402_v22 = vld [vmem:[%s3745_s14 + $0x2c0] sm:$0xff] }
  0x2e   : > { %1627 = vmatmul.mubr.bf16.vlgmr.msra.gmra.mxu0 %v2689_v35  ;;  %v362_v35 = vld [vmem:[%s3745_s14 + $0x180] sm:$0xff]  ;;  %v379_v0 = vld [vmem:[%s3745_s14 + $0x208] sm:$0xff] }
  0x2f   : > { %1788 = vmatmul.mubr.bf16.vlgmr.msra.gmra.mxu1 %v2691_v38  ;;  %3268 = vmatpush3.bf16.msra.mxu0 %v3548_v41  ;;  %v366_v38 = vld [vmem:[%s3745_s14 + $0x1a0] sm:$0xff]  ;;  %v367_v41 = vld [vmem:[%s3745_s14 + $0x1a8] sm:$0xff] }
  0x30   : > { %3380 = vmatpush3.bf16.msra.mxu1 %v3550_v43  ;;  %1634 = vmatprep.mubr.bf16.mxu0 %v2698_v46  ;;  %v2731_v43 = vcombine.low %v355_v25, %v359_v26  ;;  %v2738_v44 = vcombine.high %v362_v35, %v366_v38  ;;  %v2740_v45 = vcombine.high %v363_v40, %v367_v41  ;;  %v3571_v46 = vld [vmem:[%s4113_s1 + $0x148] sm:$0xff]   ;;  %v406_v23 = vld [vmem:[%s3745_s14 + $0x2e0] sm:$0xff] }
  0x31   : > { %1795 = vmatprep.mubr.bf16.mxu1 %v2700_v50  ;;  %3269 = vmatprep.subr.bf16.mxu0 %v3551_v55  ;;  %v370_v50 = vld [vmem:[%s3745_s14 + $0x1c0] sm:$0xff]  ;;  %v383_v1 = vld [vmem:[%s3745_s14 + $0x228] sm:$0xff] }
  0x32   : > { %3381 = vmatprep.subr.bf16.mxu1 %v3553_v60  ;;  %v3575_v55 = vld [vmem:[%s4113_s1 + $0x140] sm:$0xff]   ;;  %v2755_v11 = vcombine.low %v379_v0, %v383_v1  ;;  %v407_v25 = vld [vmem:[%s3745_s14 + $0x2e8] sm:$0xff] }
  0x33   : > { %3270 = vmatpush3.bf16.msra.mxu0 %v3552_v58  ;;  %v3576_v58 = vld [vmem:[%s4113_s1 + $0x100] sm:$0xff]  }
  0x34   : > { %3382 = vmatpush3.bf16.msra.mxu1 %v3554_v61  ;;  %3271 = vmatprep.subr.bf16.mxu0 %v3555_v2  ;;  %v3577_v60 = vld [vmem:[%s4113_s1 + $0x1c0] sm:$0xff]   ;;  %v2745_v2 = vcombine.low %v370_v50, %v374_v51 }
  0x35   : > { %3383 = vmatprep.subr.bf16.mxu1 %v3557_v7  ;;  %v3578_v61 = vld [vmem:[%s4113_s1 + $0x180] sm:$0xff]  }
  0x36   : > { %1635 = vmatmul.mubr.bf16.gmra.mxu0 %v2697_v54  ;;  %v2737_v54 = vcombine.low %v362_v35, %v366_v38  ;;  %v390_v7 = vld [vmem:[%s3745_s14 + $0x260] sm:$0xff] }
  0x37   : > { %1796 = vmatmul.mubr.bf16.gmra.mxu1 %v2699_v56  ;;  %1642 = vmatprep.mubr.bf16.mxu0 %v2706_v57  ;;  %v2739_v56 = vcombine.low %v363_v40, %v367_v41  ;;  %v2746_v57 = vcombine.high %v370_v50, %v374_v51  ;;  %v418_v38 = vld [vmem:[%s3745_s14 + $0x340] sm:$0xff]  ;;  %v419_v40 = vld [vmem:[%s3745_s14 + $0x348] sm:$0xff] }
  0x38   : > { %1803 = vmatprep.mubr.bf16.mxu1 %v2708_v59  ;;  %3272 = vmatpush3.bf16.msra.mxu0 %v3556_v4  ;;  %v2748_v59 = vcombine.high %v371_v52, %v375_v53  ;;  %v2754_v4 = vcombine.high %v378_v62, %v382_v63  ;;  %v423_v41 = vld [vmem:[%s3745_s14 + $0x368] sm:$0xff]  ;;  %v316_v62 = vld [vmem:[%s3745_s14 + $0x10] sm:$0xff] }
  0x39   : > { %3384 = vmatpush3.bf16.msra.mxu1 %v3558_v9  ;;  %3273 = vmatprep.subr.bf16.mxu0 %v3559_v14  ;;  %v391_v9 = vld [vmem:[%s3745_s14 + $0x268] sm:$0xff]  ;;  %v394_v14 = vld [vmem:[%s3745_s14 + $0x280] sm:$0xff]  ;;  %v2795_v51 = vcombine.low %v419_v40, %v423_v41  ;;  %v320_v63 = vld [vmem:[%s3745_s14 + $0x30] sm:$0xff] }
  0x3a   : > { %3385 = vmatprep.subr.bf16.mxu1 %v3561_v17  ;;  %v399_v17 = vld [vmem:[%s3745_s14 + $0x2a8] sm:$0xff] }
  0x3c   : > { %3274 = vmatpush3.bf16.msra.mxu0 %v3560_v15  ;;  %v398_v15 = vld [vmem:[%s3745_s14 + $0x2a0] sm:$0xff] }
  0x3d   : > { %3386 = vmatpush3.bf16.msra.mxu1 %v3562_v20  ;;  %3275 = vmatprep.subr.bf16.mxu0 %v3563_v24  ;;  %v2770_v20 = vcombine.high %v394_v14, %v398_v15  ;;  %v403_v24 = vld [vmem:[%s3745_s14 + $0x2c8] sm:$0xff]  ;;  %v2769_v26 = vcombine.low %v394_v14, %v398_v15  ;;  %v332_v14 = vld [vmem:[%s3745_s14 + $0x90] sm:$0xff] }
  0x3e   : > { %1643 = vmatmul.mubr.bf16.gmra.mxu0 %v2705_v3  ;;  %3387 = vmatprep.subr.bf16.mxu1 %v3565_v28  ;;  %v2747_v3 = vcombine.low %v371_v52, %v375_v53  ;;  %v2778_v28 = vcombine.high %v402_v22, %v406_v23  ;;  %v2779_v35 = vcombine.low %v403_v24, %v407_v25  ;;  %v336_v15 = vld [vmem:[%s3745_s14 + $0xb0] sm:$0xff] }
  0x3f   : > { %1804 = vmatmul.mubr.bf16.gmra.mxu1 %v2707_v5  ;;  %1650 = vmatprep.mubr.bf16.mxu0 %v2714_v6  ;;  %v2756_v5 = vcombine.high %v379_v0, %v383_v1  ;;  %v386_v6 = vld [vmem:[%s3745_s14 + $0x240] sm:$0xff]  ;;  %v317_v0 = vld [vmem:[%s3745_s14 + $0x18] sm:$0xff] }
  0x40   : > { %1811 = vmatprep.mubr.bf16.mxu1 %v2716_v8  ;;  %3276 = vmatpush3.bf16.msra.mxu0 %v3564_v27  ;;  %v387_v8 = vld [vmem:[%s3745_s14 + $0x248] sm:$0xff]  ;;  %v2762_v12 = vcombine.high %v386_v6, %v390_v7  ;;  %v321_v1 = vld [vmem:[%s3745_s14 + $0x38] sm:$0xff] }
  0x41   : > { %3388 = vmatpush3.bf16.msra.mxu1 %v3566_v29  ;;  %3277 = vmatprep.subr.bf16.mxu0 %v3567_v34  ;;  %v2764_v13 = vcombine.high %v387_v8, %v391_v9  ;;  %v2780_v29 = vcombine.high %v403_v24, %v407_v25  ;;  %v2777_v34 = vcombine.low %v402_v22, %v406_v23  ;;  %v340_v22 = vld [vmem:[%s3745_s14 + $0xd0] sm:$0xff]  ;;  %v341_v24 = vld [vmem:[%s3745_s14 + $0xd8] sm:$0xff] }
  0x42   : > { %3389 = vmatprep.subr.bf16.mxu1 %v3569_v37  ;;  %v344_v23 = vld [vmem:[%s3745_s14 + $0xf0] sm:$0xff]  ;;  %v345_v25 = vld [vmem:[%s3745_s14 + $0xf8] sm:$0xff] }
  0x44   : > { %3278 = vmatpush3.bf16.msra.mxu0 %v3568_v36 }
  0x45   : > { %3390 = vmatpush3.bf16.msra.mxu1 %v3570_v39  ;;  %3279 = vmatprep.subr.bf16.mxu0 %v3571_v46  ;;  %v422_v39 = vld [vmem:[%s3745_s14 + $0x360] sm:$0xff] }
  0x46   : > { %1651 = vmatmul.mubr.bf16.gmra.mxu0 %v2713_v16  ;;  %3391 = vmatprep.subr.bf16.mxu1 %v3573_v48  ;;  %v395_v16 = vld [vmem:[%s3745_s14 + $0x288] sm:$0xff]  ;;  %v426_v46 = vld [vmem:[%s3745_s14 + $0x380] sm:$0xff]  ;;  %v2793_v50 = vcombine.low %v418_v38, %v422_v39 }
  0x47   : > { %1812 = vmatmul.mubr.bf16.gmra.mxu1 %v2715_v18  ;;  %1658 = vmatprep.mubr.bf16.mxu0 %v2722_v19  ;;  %v2761_v18 = vcombine.low %v386_v6, %v390_v7  ;;  %v2763_v19 = vcombine.low %v387_v8, %v391_v9  ;;  %v2771_v27 = vcombine.low %v395_v16, %v399_v17  ;;  %v427_v48 = vld [vmem:[%s3745_s14 + $0x388] sm:$0xff]  ;;  %v324_v6 = vld [vmem:[%s3745_s14 + $0x50] sm:$0xff]  ;;  %v325_v8 = vld [vmem:[%s3745_s14 + $0x58] sm:$0xff] }
  0x48   : > { %1819 = vmatprep.mubr.bf16.mxu1 %v2724_v21  ;;  %3280 = vmatpush3.bf16.msra.mxu0 %v3572_v47  ;;  %v2772_v21 = vcombine.high %v395_v16, %v399_v17  ;;  %v430_v47 = vld [vmem:[%s3745_s14 + $0x3a0] sm:$0xff]  ;;  %v328_v7 = vld [vmem:[%s3745_s14 + $0x70] sm:$0xff]  ;;  %v329_v9 = vld [vmem:[%s3745_s14 + $0x78] sm:$0xff] }
  0x49   : > { %3392 = vmatpush3.bf16.msra.mxu1 %v3574_v49  ;;  %3281 = vmatprep.subr.bf16.mxu0 %v3575_v55  ;;  %v431_v49 = vld [vmem:[%s3745_s14 + $0x3a8] sm:$0xff]  ;;  %v2802_v52 = vcombine.high %v426_v46, %v430_v47  ;;  %v438_v55 = vld [vmem:[%s3745_s14 + $0x3e0] sm:$0xff]  ;;  %v333_v16 = vld [vmem:[%s3745_s14 + $0x98] sm:$0xff] }
  0x4a   : > { %3393 = vmatprep.subr.bf16.mxu1 %v3577_v60  ;;  %v2804_v53 = vcombine.high %v427_v48, %v431_v49  ;;  %v337_v17 = vld [vmem:[%s3745_s14 + $0xb8] sm:$0xff] }
  0x4c   : > { %3282 = vmatpush3.bf16.msra.mxu0 %v3576_v58  ;;  %v2801_v58 = vcombine.low %v426_v46, %v430_v47  ;;  %v364_v46 = vld [vmem:[%s3745_s14 + $0x190] sm:$0xff] }
  0x4d   : > { %3394 = vmatpush3.bf16.msra.mxu1 %v3578_v61  ;;  %v368_v47 = vld [vmem:[%s3745_s14 + $0x1b0] sm:$0xff] }
  0x4e   : > { %1659 = vmatmul.mubr.bf16.gmra.mxu0 %v2721_v30  ;;  %v410_v30 = vld [vmem:[%s3745_s14 + $0x300] sm:$0xff] }
  0x4f   : > { %1820 = vmatmul.mubr.bf16.gmra.mxu1 %v2723_v31  ;;  %1666 = vmatprep.mubr.bf16.mxu0 %v2730_v32  ;;  %v414_v31 = vld [vmem:[%s3745_s14 + $0x320] sm:$0xff]  ;;  %v411_v32 = vld [vmem:[%s3745_s14 + $0x308] sm:$0xff] }
  0x50   : > { %1827 = vmatprep.mubr.bf16.mxu1 %v2732_v33  ;;  %v415_v33 = vld [vmem:[%s3745_s14 + $0x328] sm:$0xff]  ;;  %v2786_v36 = vcombine.high %v410_v30, %v414_v31 }
  0x51   : > { %v2788_v37 = vcombine.high %v411_v32, %v415_v33 }
  0x56   : > { %1667 = vmatmul.mubr.bf16.gmra.mxu0 %v2729_v42  ;;  %v2785_v42 = vcombine.low %v410_v30, %v414_v31  ;;  %v348_v30 = vld [vmem:[%s3745_s14 + $0x110] sm:$0xff] }
  0x57   : > { %1828 = vmatmul.mubr.bf16.gmra.mxu1 %v2731_v43  ;;  %1674 = vmatprep.mubr.bf16.mxu0 %v2738_v44  ;;  %v2787_v43 = vcombine.low %v411_v32, %v415_v33  ;;  %v2794_v44 = vcombine.high %v418_v38, %v422_v39  ;;  %v352_v31 = vld [vmem:[%s3745_s14 + $0x130] sm:$0xff]  ;;  %v349_v32 = vld [vmem:[%s3745_s14 + $0x118] sm:$0xff] }
  0x58   : > { %1835 = vmatprep.mubr.bf16.mxu1 %v2740_v45  ;;  %v2796_v45 = vcombine.high %v419_v40, %v423_v41  ;;  %v353_v33 = vld [vmem:[%s3745_s14 + $0x138] sm:$0xff]  ;;  %v356_v38 = vld [vmem:[%s3745_s14 + $0x150] sm:$0xff] }
  0x59   : > { %v360_v39 = vld [vmem:[%s3745_s14 + $0x170] sm:$0xff]  ;;  %v357_v40 = vld [vmem:[%s3745_s14 + $0x158] sm:$0xff] }
  0x5a   : > { %v361_v41 = vld [vmem:[%s3745_s14 + $0x178] sm:$0xff] }
  0x5e   : > { %1675 = vmatmul.mubr.bf16.gmra.mxu0 %v2737_v54  ;;  %v434_v54 = vld [vmem:[%s3745_s14 + $0x3c0] sm:$0xff] }
  0x5f   : > { %1836 = vmatmul.mubr.bf16.gmra.mxu1 %v2739_v56  ;;  %1682 = vmatprep.mubr.bf16.mxu0 %v2746_v57  ;;  %v435_v56 = vld [vmem:[%s3745_s14 + $0x3c8] sm:$0xff]  ;;  %v2810_v60 = vcombine.high %v434_v54, %v438_v55 }
  0x60   : > { %1843 = vmatprep.mubr.bf16.mxu1 %v2748_v59  ;;  %v439_v57 = vld [vmem:[%s3745_s14 + $0x3e8] sm:$0xff]  ;;  %v2803_v59 = vcombine.low %v427_v48, %v431_v49  ;;  %v365_v48 = vld [vmem:[%s3745_s14 + $0x198] sm:$0xff] }
  0x61   : > { %v2812_v61 = vcombine.high %v435_v56, %v439_v57  ;;  %v369_v49 = vld [vmem:[%s3745_s14 + $0x1b8] sm:$0xff] }
  0x66   : > { %1683 = vmatmul.mubr.bf16.gmra.mxu0 %v2745_v2  ;;  %v2809_v2 = vcombine.low %v434_v54, %v438_v55  ;;  %v372_v54 = vld [vmem:[%s3745_s14 + $0x1d0] sm:$0xff] }
  0x67   : > { %1844 = vmatmul.mubr.bf16.gmra.mxu1 %v2747_v3  ;;  %1690 = vmatprep.mubr.bf16.mxu0 %v2754_v4  ;;  %v2811_v3 = vcombine.low %v435_v56, %v439_v57  ;;  %v2694_v4 = vcombine.high %v316_v62, %v320_v63  ;;  %v376_v55 = vld [vmem:[%s3745_s14 + $0x1f0] sm:$0xff]  ;;  %v373_v56 = vld [vmem:[%s3745_s14 + $0x1d8] sm:$0xff] }
  0x68   : > { %1851 = vmatprep.mubr.bf16.mxu1 %v2756_v5  ;;  %v2696_v5 = vcombine.high %v317_v0, %v321_v1  ;;  %v377_v57 = vld [vmem:[%s3745_s14 + $0x1f8] sm:$0xff] }
  0x6e   : > { %1691 = vmatmul.mubr.bf16.gmra.mxu0 %v2753_v10  ;;  %v2693_v10 = vcombine.low %v316_v62, %v320_v63  ;;  %v380_v62 = vld [vmem:[%s3745_s14 + $0x210] sm:$0xff] }
  0x6f   : > { %1852 = vmatmul.mubr.bf16.gmra.mxu1 %v2755_v11  ;;  %1698 = vmatprep.mubr.bf16.mxu0 %v2762_v12  ;;  %v2695_v11 = vcombine.low %v317_v0, %v321_v1  ;;  %v2702_v12 = vcombine.high %v324_v6, %v328_v7  ;;  %v384_v63 = vld [vmem:[%s3745_s14 + $0x230] sm:$0xff]  ;;  %v381_v0 = vld [vmem:[%s3745_s14 + $0x218] sm:$0xff] }
  0x70   : > { %1859 = vmatprep.mubr.bf16.mxu1 %v2764_v13  ;;  %v2704_v13 = vcombine.high %v325_v8, %v329_v9  ;;  %v385_v1 = vld [vmem:[%s3745_s14 + $0x238] sm:$0xff] }
  0x76   : > { %1699 = vmatmul.mubr.bf16.gmra.mxu0 %v2761_v18  ;;  %v2701_v18 = vcombine.low %v324_v6, %v328_v7  ;;  %v388_v6 = vld [vmem:[%s3745_s14 + $0x250] sm:$0xff] }
  0x77   : > { %1860 = vmatmul.mubr.bf16.gmra.mxu1 %v2763_v19  ;;  %1706 = vmatprep.mubr.bf16.mxu0 %v2770_v20  ;;  %v2703_v19 = vcombine.low %v325_v8, %v329_v9  ;;  %v2710_v20 = vcombine.high %v332_v14, %v336_v15  ;;  %v392_v7 = vld [vmem:[%s3745_s14 + $0x270] sm:$0xff]  ;;  %v389_v8 = vld [vmem:[%s3745_s14 + $0x258] sm:$0xff] }
  0x78   : > { %1867 = vmatprep.mubr.bf16.mxu1 %v2772_v21  ;;  %v2712_v21 = vcombine.high %v333_v16, %v337_v17  ;;  %v393_v9 = vld [vmem:[%s3745_s14 + $0x278] sm:$0xff] }
  0x7e   : > { %1707 = vmatmul.mubr.bf16.gmra.mxu0 %v2769_v26  ;;  %v2709_v26 = vcombine.low %v332_v14, %v336_v15 }
  0x7f   : > { %1868 = vmatmul.mubr.bf16.gmra.mxu1 %v2771_v27  ;;  %1714 = vmatprep.mubr.bf16.mxu0 %v2778_v28  ;;  %v2711_v27 = vcombine.low %v333_v16, %v337_v17  ;;  %v2718_v28 = vcombine.high %v340_v22, %v344_v23  ;;  %v396_v17 = vld [vmem:[%s3745_s14 + $0x290] sm:$0xff] }
  0x80   : > { %1875 = vmatprep.mubr.bf16.mxu1 %v2780_v29  ;;  %v2720_v29 = vcombine.high %v341_v24, %v345_v25 }
  0x86   : > { %1715 = vmatmul.mubr.bf16.gmra.mxu0 %v2777_v34  ;;  %v2717_v34 = vcombine.low %v340_v22, %v344_v23  ;;  %v401_v22 = vld [vmem:[%s3745_s14 + $0x2b8] sm:$0xff] }
  0x87   : > { %1876 = vmatmul.mubr.bf16.gmra.mxu1 %v2779_v35  ;;  %1722 = vmatprep.mubr.bf16.mxu0 %v2786_v36  ;;  %v2719_v35 = vcombine.low %v341_v24, %v345_v25  ;;  %v2726_v36 = vcombine.high %v348_v30, %v352_v31  ;;  %v2765_v25 = vcombine.low %v388_v6, %v392_v7 }
  0x88   : > { %1883 = vmatprep.mubr.bf16.mxu1 %v2788_v37  ;;  %v2728_v37 = vcombine.high %v349_v32, %v353_v33 }
  0x8e   : > { %1723 = vmatmul.mubr.bf16.gmra.mxu0 %v2785_v42  ;;  %v2725_v42 = vcombine.low %v348_v30, %v352_v31 }
  0x8f   : > { %1884 = vmatmul.mubr.bf16.gmra.mxu1 %v2787_v43  ;;  %1730 = vmatprep.mubr.bf16.mxu0 %v2794_v44  ;;  %v2727_v43 = vcombine.low %v349_v32, %v353_v33  ;;  %v2734_v44 = vcombine.high %v356_v38, %v360_v39 }
  0x90   : > { %1891 = vmatprep.mubr.bf16.mxu1 %v2796_v45  ;;  %v2736_v45 = vcombine.high %v357_v40, %v361_v41 }
  0x96   : > { %1731 = vmatmul.mubr.bf16.gmra.mxu0 %v2793_v50  ;;  %v2733_v50 = vcombine.low %v356_v38, %v360_v39  ;;  %v404_v39 = vld [vmem:[%s3745_s14 + $0x2d0] sm:$0xff] }
  0x97   : > { %1892 = vmatmul.mubr.bf16.gmra.mxu1 %v2795_v51  ;;  %1738 = vmatprep.mubr.bf16.mxu0 %v2802_v52  ;;  %v2735_v51 = vcombine.low %v357_v40, %v361_v41  ;;  %v2742_v52 = vcombine.high %v364_v46, %v368_v47  ;;  %v408_v40 = vld [vmem:[%s3745_s14 + $0x2f0] sm:$0xff] }
  0x98   : > { %1899 = vmatprep.mubr.bf16.mxu1 %v2804_v53  ;;  %v2744_v53 = vcombine.high %v365_v48, %v369_v49 }
  0x9e   : > { %1739 = vmatmul.mubr.bf16.gmra.mxu0 %v2801_v58  ;;  %v2741_v58 = vcombine.low %v364_v46, %v368_v47 }
  0x9f   : > { %1900 = vmatmul.mubr.bf16.gmra.mxu1 %v2803_v59  ;;  %1746 = vmatprep.mubr.bf16.mxu0 %v2810_v60  ;;  %v2743_v59 = vcombine.low %v365_v48, %v369_v49  ;;  %v2750_v60 = vcombine.high %v372_v54, %v376_v55 }
  0xa0   : > { %1907 = vmatprep.mubr.bf16.mxu1 %v2812_v61  ;;  %v2752_v61 = vcombine.high %v373_v56, %v377_v57 }
  0xa6   : > { %1747 = vmatmul.mubr.bf16.gmra.mxu0 %v2809_v2  ;;  %v2749_v2 = vcombine.low %v372_v54, %v376_v55 }
  0xa7   : > { %1908 = vmatmul.mubr.bf16.gmra.mxu1 %v2811_v3  ;;  %1948 = vmatprep.mubr.bf16.mxu0 %v2694_v4  ;;  %v2751_v3 = vcombine.low %v373_v56, %v377_v57  ;;  %v2758_v4 = vcombine.high %v380_v62, %v384_v63 }
  0xa8   : > { %2109 = vmatprep.mubr.bf16.mxu1 %v2696_v5  ;;  %v2760_v5 = vcombine.high %v381_v0, %v385_v1 }
  0xae   : > { %1949 = vmatmul.mubr.bf16.vlgmr.msra.gmra.mxu0 %v2693_v10  ;;  %v2757_v10 = vcombine.low %v380_v62, %v384_v63  ;;  %v416_v62 = vld [vmem:[%s3745_s14 + $0x330] sm:$0xff] }
  0xaf   : > { %2110 = vmatmul.mubr.bf16.vlgmr.msra.gmra.mxu1 %v2695_v11  ;;  %1956 = vmatprep.mubr.bf16.mxu0 %v2702_v12  ;;  %v2759_v11 = vcombine.low %v381_v0, %v385_v1  ;;  %v2766_v12 = vcombine.high %v388_v6, %v392_v7  ;;  %v413_v1 = vld [vmem:[%s3745_s14 + $0x318] sm:$0xff] }
  0xb0   : > { %2117 = vmatprep.mubr.bf16.mxu1 %v2704_v13  ;;  %v2768_v13 = vcombine.high %v389_v8, %v393_v9 }
  0xb6   : > { %1957 = vmatmul.mubr.bf16.gmra.mxu0 %v2701_v18  ;;  %v400_v18 = vld [vmem:[%s3745_s14 + $0x2b0] sm:$0xff] }
  0xb7   : > { %2118 = vmatmul.mubr.bf16.gmra.mxu1 %v2703_v19  ;;  %1964 = vmatprep.mubr.bf16.mxu0 %v2710_v20  ;;  %v2773_v47 = vcombine.low %v396_v17, %v400_v18 }
  0xb8   : > { %2125 = vmatprep.mubr.bf16.mxu1 %v2712_v21  ;;  %v397_v21 = vld [vmem:[%s3745_s14 + $0x298] sm:$0xff] }
  0xb9   : > { %v2776_v31 = vcombine.high %v397_v21, %v401_v22  ;;  %v2775_v49 = vcombine.low %v397_v21, %v401_v22 }
  0xbe   : > { %1965 = vmatmul.mubr.bf16.gmra.mxu0 %v2709_v26 }
  0xbf   : > { %2126 = vmatmul.mubr.bf16.gmra.mxu1 %v2711_v27  ;;  %1972 = vmatprep.mubr.bf16.mxu0 %v2718_v28  ;;  %v2767_v27 = vcombine.low %v389_v8, %v393_v9  ;;  %v2774_v28 = vcombine.high %v396_v17, %v400_v18 }
  0xc0   : > { %2133 = vmatprep.mubr.bf16.mxu1 %v2720_v29 }
  0xc6   : > { %1973 = vmatmul.mubr.bf16.gmra.mxu0 %v2717_v34 }
  0xc7   : > { %2134 = vmatmul.mubr.bf16.gmra.mxu1 %v2719_v35  ;;  %1980 = vmatprep.mubr.bf16.mxu0 %v2726_v36 }
  0xc8   : > { %2141 = vmatprep.mubr.bf16.mxu1 %v2728_v37 }
  0xce   : > { %1981 = vmatmul.mubr.bf16.gmra.mxu0 %v2725_v42 }
  0xcf   : > { %2142 = vmatmul.mubr.bf16.gmra.mxu1 %v2727_v43  ;;  %1988 = vmatprep.mubr.bf16.mxu0 %v2734_v44  ;;  %v405_v43 = vld [vmem:[%s3745_s14 + $0x2d8] sm:$0xff] }
  0xd0   : > { %2149 = vmatprep.mubr.bf16.mxu1 %v2736_v45  ;;  %v409_v44 = vld [vmem:[%s3745_s14 + $0x2f8] sm:$0xff] }
  0xd1   : > { %v2783_v7 = vcombine.low %v405_v43, %v409_v44 }
  0xd6   : > { %1989 = vmatmul.mubr.bf16.gmra.mxu0 %v2733_v50  ;;  %v2782_v50 = vcombine.high %v404_v39, %v408_v40 }
  0xd7   : > { %2150 = vmatmul.mubr.bf16.gmra.mxu1 %v2735_v51  ;;  %1996 = vmatprep.mubr.bf16.mxu0 %v2742_v52 }
  0xd8   : > { %2157 = vmatprep.mubr.bf16.mxu1 %v2744_v53  ;;  %v2784_v53 = vcombine.high %v405_v43, %v409_v44  ;;  %v428_v43 = vld [vmem:[%s3745_s14 + $0x390] sm:$0xff] }
  0xd9   : > { %v432_v44 = vld [vmem:[%s3745_s14 + $0x3b0] sm:$0xff] }
  0xde   : > { %1997 = vmatmul.mubr.bf16.gmra.mxu0 %v2741_v58 }
  0xdf   : > { %2158 = vmatmul.mubr.bf16.gmra.mxu1 %v2743_v59  ;;  %2004 = vmatprep.mubr.bf16.mxu0 %v2750_v60 }
  0xe0   : > { %2165 = vmatprep.mubr.bf16.mxu1 %v2752_v61  ;;  %v412_v61 = vld [vmem:[%s3745_s14 + $0x310] sm:$0xff] }
  0xe1   : > { %v2790_v8 = vcombine.high %v412_v61, %v416_v62 }
  0xe6   : > { %2005 = vmatmul.mubr.bf16.gmra.mxu0 %v2749_v2  ;;  %v417_v2 = vld [vmem:[%s3745_s14 + $0x338] sm:$0xff] }
  0xe7   : > { %2166 = vmatmul.mubr.bf16.gmra.mxu1 %v2751_v3  ;;  %2012 = vmatprep.mubr.bf16.mxu0 %v2758_v4 }
  0xe8   : > { %2173 = vmatprep.mubr.bf16.mxu1 %v2760_v5  ;;  %v2781_v5 = vcombine.low %v404_v39, %v408_v40 }
  0xee   : > { %v3059_v14 = vpop.f32.mrf.mxu0  ;;  %2013 = vmatmul.mubr.bf16.gmra.mxu0 %v2757_v10 }
  0xef   : > { %v3171_v15 = vpop.f32.mrf.mxu1  ;;  %2174 = vmatmul.mubr.bf16.gmra.mxu1 %v2759_v11  ;;  %2020 = vmatprep.mubr.bf16.mxu0 %v2766_v12  ;;  %v2792_v11 = vcombine.high %v413_v1, %v417_v2 }
  0xf0   : > { %v3060_v16 = vpop.f32.mrf.mxu0  ;;  %2181 = vmatprep.mubr.bf16.mxu1 %v2768_v13 }
  0xf1   : > { %v3061_v19 = vadd.f32 %v3060_v16, %v3059_v14  ;;  %v3172_v20 = vpop.f32.mrf.mxu1 }
  0xf2   : > { %v3173_v23 = vadd.f32 %v3172_v20, %v3171_v15  ;;  %v3062_v24 = vpop.f32.mrf.mxu0  ;;  %v424_v20 = vld [vmem:[%s3745_s14 + $0x370] sm:$0xff] }
  0xf3   : > { %v3174_v26 = vpop.f32.mrf.mxu1 }
  0xf4   : > { %v3957_v29 = vadd.f32 %v3173_v23, %v3061_v19  ;;  %v3063_v30 = vpop.f32.mrf.mxu0  ;;  %v420_v19 = vld [vmem:[%s3745_s14 + $0x350] sm:$0xff]  ;;  %v421_v23 = vld [vmem:[%s3745_s14 + $0x358] sm:$0xff] }
  0xf5   : > { %v3064_v32 = vadd.f32 %v3063_v30, %v3062_v24  ;;  %v3175_v33 = vpop.f32.mrf.mxu1  ;;  %v425_v24 = vld [vmem:[%s3745_s14 + $0x378] sm:$0xff]  ;;  %v2791_v30 = vcombine.low %v413_v1, %v417_v2 }
  0xf6   : > { %v3176_v34 = vadd.f32 %v3175_v33, %v3174_v26  ;;  %v3065_v35 = vpop.f32.mrf.mxu0  ;;  %2021 = vmatmul.mubr.bf16.gmra.mxu0 %v2765_v25 }
  0xf7   : > { %v3177_v36 = vpop.f32.mrf.mxu1  ;;  %2182 = vmatmul.mubr.bf16.gmra.mxu1 %v2767_v27  ;;  %2028 = vmatprep.mubr.bf16.mxu0 %v2774_v28  ;;  %v2789_v27 = vcombine.low %v412_v61, %v416_v62 }
  0xf8   : > { %v3959_v37 = vadd.f32 %v3176_v34, %v3064_v32  ;;  %v3066_v38 = vpop.f32.mrf.mxu0  ;;  %2189 = vmatprep.mubr.bf16.mxu1 %v2776_v31  ;;  %v2798_v31 = vcombine.high %v420_v19, %v424_v20  ;;  %v2800_v34 = vcombine.high %v421_v23, %v425_v24 }
  0xf9   : > { %v3067_v41 = vadd.f32 %v3066_v38, %v3065_v35  ;;  %v3178_v42 = vpop.f32.mrf.mxu1 }
  0xfa   : > { %v3179_v45 = vadd.f32 %v3178_v42, %v3177_v36  ;;  %v3068_v46 = vpop.f32.mrf.mxu0 }
  0xfb   : > { %v3180_v48 = vpop.f32.mrf.mxu1 }
  0xfc   : > { %v3965_v51 = vadd.f32 %v3179_v45, %v3067_v41  ;;  %v3069_v52 = vpop.f32.mrf.mxu0 }
  0xfd   : > { %v3070_v54 = vadd.f32 %v3069_v52, %v3068_v46  ;;  %v3181_v55 = vpop.f32.mrf.mxu1  ;;  %v2797_v52 = vcombine.low %v420_v19, %v424_v20 }
  0xfe   : > { %v3182_v56 = vadd.f32 %v3181_v55, %v3180_v48  ;;  %v3071_v57 = vpop.f32.mrf.mxu0  ;;  %2029 = vmatmul.mubr.bf16.gmra.mxu0 %v2773_v47  ;;  %v429_v47 = vld [vmem:[%s3745_s14 + $0x398] sm:$0xff]  ;;  %v2806_v55 = vcombine.high %v428_v43, %v432_v44 }
  0xff   : > { %v3183_v58 = vpop.f32.mrf.mxu1  ;;  %2190 = vmatmul.mubr.bf16.gmra.mxu1 %v2775_v49  ;;  %2036 = vmatprep.mubr.bf16.mxu0 %v2782_v50  ;;  %v433_v48 = vld [vmem:[%s3745_s14 + $0x3b8] sm:$0xff] }
 0x100   : > { %v3967_v59 = vadd.f32 %v3182_v56, %v3070_v54  ;;  %v3072_v60 = vpop.f32.mrf.mxu0  ;;  %2197 = vmatprep.mubr.bf16.mxu1 %v2784_v53  ;;  %v2799_v54 = vcombine.low %v421_v23, %v425_v24 }
 0x101   : > { %v3073_v63 = vadd.f32 %v3072_v60, %v3071_v57  ;;  %v3184_v0 = vpop.f32.mrf.mxu1 }
 0x102   : > { %v3185_v3 = vadd.f32 %v3184_v0, %v3183_v58  ;;  %v3074_v4 = vpop.f32.mrf.mxu0  ;;  %v2808_v58 = vcombine.high %v429_v47, %v433_v48 }
 0x103   : > { %v3186_v6 = vpop.f32.mrf.mxu1 }
 0x104   : > { %v3973_v9 = vadd.f32 %v3185_v3, %v3073_v63  ;;  %v3075_v10 = vpop.f32.mrf.mxu0  ;;  %v436_v3 = vld [vmem:[%s3745_s14 + $0x3d0] sm:$0xff] }
 0x105   : > { %v3076_v12 = vadd.f32 %v3075_v10, %v3074_v4  ;;  %v3187_v13 = vpop.f32.mrf.mxu1  ;;  %v440_v4 = vld [vmem:[%s3745_s14 + $0x3f0] sm:$0xff] }
 0x106   : > { %v3188_v14 = vadd.f32 %v3187_v13, %v3186_v6  ;;  %v3077_v15 = vpop.f32.mrf.mxu0  ;;  %2037 = vmatmul.mubr.bf16.gmra.mxu0 %v2781_v5 }
 0x107   : > { %v3189_v16 = vpop.f32.mrf.mxu1  ;;  %2198 = vmatmul.mubr.bf16.gmra.mxu1 %v2783_v7  ;;  %2044 = vmatprep.mubr.bf16.mxu0 %v2790_v8  ;;  %v437_v7 = vld [vmem:[%s3745_s14 + $0x3d8] sm:$0xff] }
 0x108   : > { %v3975_v17 = vadd.f32 %v3188_v14, %v3076_v12  ;;  %v3078_v18 = vpop.f32.mrf.mxu0  ;;  %2205 = vmatprep.mubr.bf16.mxu1 %v2792_v11  ;;  %v441_v8 = vld [vmem:[%s3745_s14 + $0x3f8] sm:$0xff]  ;;  %v2805_v12 = vcombine.low %v428_v43, %v432_v44  ;;  %v2807_v14 = vcombine.low %v429_v47, %v433_v48  ;;  %s2688_s14 = sshll.u32 %s4122_s29, 2 }
 0x109   : > { %v3079_v21 = vadd.f32 %v3078_v18, %v3077_v15  ;;  %v3190_v22 = vpop.f32.mrf.mxu1  ;;  %v2814_v15 = vcombine.high %v436_v3, %v440_v4  ;;  %v2816_v19 = vcombine.high %v437_v7, %v441_v8  ;;  %s4047_s30 = scalar_lea.vmem %s4114_s2, %s2688_s14 }
 0x10a   : > { %v3191_v25 = vadd.f32 %v3190_v22, %v3189_v16  ;;  %v3080_v26 = vpop.f32.mrf.mxu0 }
 0x10b   : > { %v3192_v28 = vpop.f32.mrf.mxu1 }
 0x10c   : > { %v3981_v32 = vadd.f32 %v3191_v25, %v3079_v21  ;;  %v3081_v33 = vpop.f32.mrf.mxu0 }
 0x10d   : > { %v3082_v35 = vadd.f32 %v3081_v33, %v3080_v26  ;;  %v3193_v36 = vpop.f32.mrf.mxu1  ;;  %v2813_v33 = vcombine.low %v436_v3, %v440_v4 }
 0x10e   : > { %v3194_v38 = vadd.f32 %v3193_v36, %v3192_v28  ;;  %v3083_v39 = vpop.f32.mrf.mxu0  ;;  %2045 = vmatmul.mubr.bf16.gmra.mxu0 %v2789_v27 }
 0x10f   : > { %v3195_v40 = vpop.f32.mrf.mxu1  ;;  %2206 = vmatmul.mubr.bf16.gmra.mxu1 %v2791_v30  ;;  %2052 = vmatprep.mubr.bf16.mxu0 %v2798_v31 }
 0x110   : > { %v3983_v41 = vadd.f32 %v3194_v38, %v3082_v35  ;;  %v3084_v42 = vpop.f32.mrf.mxu0  ;;  %2213 = vmatprep.mubr.bf16.mxu1 %v2800_v34  ;;  %v2815_v35 = vcombine.low %v437_v7, %v441_v8 }
 0x111   : > { %v3085_v45 = vadd.f32 %v3084_v42, %v3083_v39  ;;  %v3196_v46 = vpop.f32.mrf.mxu1 }
 0x112   : > { %v3197_v49 = vadd.f32 %v3196_v46, %v3195_v40  ;;  %v3086_v50 = vpop.f32.mrf.mxu0 }
 0x113   : > { %v3198_v53 = vpop.f32.mrf.mxu1 }
 0x114   : > { %v3989_v56 = vadd.f32 %v3197_v49, %v3085_v45  ;;  %v3087_v57 = vpop.f32.mrf.mxu0 }
 0x115   : > { %v3088_v60 = vadd.f32 %v3087_v57, %v3086_v50  ;;  %v3199_v61 = vpop.f32.mrf.mxu1 }
 0x116   : > { %v3200_v62 = vadd.f32 %v3199_v61, %v3198_v53  ;;  %v3089_v63 = vpop.f32.mrf.mxu0  ;;  %2053 = vmatmul.mubr.bf16.gmra.mxu0 %v2797_v52 }
 0x117   : > { %v3201_v0 = vpop.f32.mrf.mxu1  ;;  %2214 = vmatmul.mubr.bf16.gmra.mxu1 %v2799_v54  ;;  %2060 = vmatprep.mubr.bf16.mxu0 %v2806_v55 }
 0x118   : > { %v3991_v1 = vadd.f32 %v3200_v62, %v3088_v60  ;;  %v3090_v2 = vpop.f32.mrf.mxu0  ;;  %2221 = vmatprep.mubr.bf16.mxu1 %v2808_v58 }
 0x119   : > { %v3091_v5 = vadd.f32 %v3090_v2, %v3089_v63  ;;  %v3202_v6 = vpop.f32.mrf.mxu1 }
 0x11a   : > { %v3203_v10 = vadd.f32 %v3202_v6, %v3201_v0  ;;  %v3092_v11 = vpop.f32.mrf.mxu0 }
 0x11b   : > { %v3204_v13 = vpop.f32.mrf.mxu1 }
 0x11c   : > { %v3997_v16 = vadd.f32 %v3203_v10, %v3091_v5  ;;  %v3093_v18 = vpop.f32.mrf.mxu0 }
 0x11d   : > { %v3094_v20 = vadd.f32 %v3093_v18, %v3092_v11  ;;  %v3205_v21 = vpop.f32.mrf.mxu1 }
 0x11e   : > { %v3206_v22 = vadd.f32 %v3205_v21, %v3204_v13  ;;  %v3095_v23 = vpop.f32.mrf.mxu0  ;;  %2061 = vmatmul.mubr.bf16.gmra.mxu0 %v2805_v12 }
 0x11f   : > { %v3207_v24 = vpop.f32.mrf.mxu1  ;;  %2222 = vmatmul.mubr.bf16.gmra.mxu1 %v2807_v14  ;;  %2068 = vmatprep.mubr.bf16.mxu0 %v2814_v15 }
 0x120   : > { %v3999_v25 = vadd.f32 %v3206_v22, %v3094_v20  ;;  %v3096_v26 = vpop.f32.mrf.mxu0  ;;  %2229 = vmatprep.mubr.bf16.mxu1 %v2816_v19 }
 0x121   : > { %v3097_v27 = vadd.f32 %v3096_v26, %v3095_v23  ;;  %v3208_v28 = vpop.f32.mrf.mxu1 }
 0x122   : > { %v3209_v30 = vadd.f32 %v3208_v28, %v3207_v24  ;;  %v3098_v31 = vpop.f32.mrf.mxu0 }
 0x123   : > { %v3210_v34 = vpop.f32.mrf.mxu1 }
 0x124   : > { %v4001_v36 = vadd.f32 %v3209_v30, %v3097_v27  ;;  %v3099_v38 = vpop.f32.mrf.mxu0 }
 0x125   : > { %v3100_v39 = vadd.f32 %v3099_v38, %v3098_v31  ;;  %v3211_v40 = vpop.f32.mrf.mxu1 }
 0x126   : > { %v3212_v42 = vadd.f32 %v3211_v40, %v3210_v34  ;;  %v3101_v43 = vpop.f32.mrf.mxu0  ;;  %2069 = vmatmul.mubr.bf16.gmra.mxu0 %v2813_v33 }
 0x127   : > { %v3213_v44 = vpop.f32.mrf.mxu1  ;;  %2230 = vmatmul.mubr.bf16.gmra.mxu1 %v2815_v35 }
 0x128   : > { %v4003_v45 = vadd.f32 %v3212_v42, %v3100_v39  ;;  %v3102_v46 = vpop.f32.mrf.mxu0 }
 0x129   : > { %v3103_v47 = vadd.f32 %v3102_v46, %v3101_v43  ;;  %v3214_v48 = vpop.f32.mrf.mxu1 }
 0x12a   : > { %v3215_v49 = vadd.f32 %v3214_v48, %v3213_v44  ;;  %v3104_v50 = vpop.f32.mrf.mxu0 }
 0x12b   : > { %v3216_v52 = vpop.f32.mrf.mxu1 }
 0x12c   : > { %v4005_v53 = vadd.f32 %v3215_v49, %v3103_v47  ;;  %v3105_v54 = vpop.f32.mrf.mxu0 }
 0x12d   : > { %v3106_v55 = vadd.f32 %v3105_v54, %v3104_v50  ;;  %v3217_v57 = vpop.f32.mrf.mxu1 }
 0x12e   : > { %v3218_v58 = vadd.f32 %v3217_v57, %v3216_v52  ;;  %v3107_v60 = vpop.f32.mrf.mxu0 }
 0x12f   : > { %v3219_v61 = vpop.f32.mrf.mxu1 }
 0x130   : > { %v4007_v62 = vadd.f32 %v3218_v58, %v3106_v55  ;;  %v3108_v63 = vpop.f32.mrf.mxu0 }
 0x131   : > { %v3109_v0 = vadd.f32 %v3108_v63, %v3107_v60  ;;  %v3220_v2 = vpop.f32.mrf.mxu1 }
 0x132   : > { %v3221_v3 = vadd.f32 %v3220_v2, %v3219_v61  ;;  %v3110_v4 = vpop.f32.mrf.mxu0 }
 0x133   : > { %v3222_v5 = vpop.f32.mrf.mxu1 }
 0x134   : > { %v4009_v6 = vadd.f32 %v3221_v3, %v3109_v0  ;;  %v3111_v7 = vpop.f32.mrf.mxu0 }
 0x135   : > { %v3112_v8 = vadd.f32 %v3111_v7, %v3110_v4  ;;  %v3223_v10 = vpop.f32.mrf.mxu1 }
 0x136   : > { %v3224_v11 = vadd.f32 %v3223_v10, %v3222_v5  ;;  %v3113_v12 = vpop.f32.mrf.mxu0 }
 0x137   : > { %v3225_v13 = vpop.f32.mrf.mxu1 }
 0x138   : > { %v4011_v14 = vadd.f32 %v3224_v11, %v3112_v8  ;;  %v3114_v15 = vpop.f32.mrf.mxu0 }
 0x139   : > { %v3115_v18 = vadd.f32 %v3114_v15, %v3113_v12  ;;  %v3226_v19 = vpop.f32.mrf.mxu1 }
 0x13a   : > { %v3227_v20 = vadd.f32 %v3226_v19, %v3225_v13  ;;  %v3116_v21 = vpop.f32.mrf.mxu0 }
 0x13b   : > { %v3228_v22 = vpop.f32.mrf.mxu1 }
 0x13c   : > { %v4013_v23 = vadd.f32 %v3227_v20, %v3115_v18  ;;  %v3117_v24 = vpop.f32.mrf.mxu0 }
 0x13d   : > { %v3118_v26 = vadd.f32 %v3117_v24, %v3116_v21  ;;  %v3229_v27 = vpop.f32.mrf.mxu1 }
 0x13e   : > { %v3230_v28 = vadd.f32 %v3229_v27, %v3228_v22  ;;  %v3119_v30 = vpop.f32.mrf.mxu0 }
 0x13f   : > { %v3231_v31 = vpop.f32.mrf.mxu1 }
 0x140   : > { %v4015_v33 = vadd.f32 %v3230_v28, %v3118_v26  ;;  %v3120_v34 = vpop.f32.mrf.mxu0 }
 0x141   : > { %v3121_v35 = vadd.f32 %v3120_v34, %v3119_v30  ;;  %v3232_v38 = vpop.f32.mrf.mxu1 }
 0x142   : > { %v3233_v39 = vadd.f32 %v3232_v38, %v3231_v31  ;;  %v3122_v40 = vpop.f32.mrf.mxu0 }
 0x143   : > { %v3234_v42 = vpop.f32.mrf.mxu1 }
 0x144   : > { %v4017_v43 = vadd.f32 %v3233_v39, %v3121_v35  ;;  %v3123_v44 = vpop.f32.mrf.mxu0 }
 0x145   : > { %v3124_v46 = vadd.f32 %v3123_v44, %v3122_v40  ;;  %v3235_v47 = vpop.f32.mrf.mxu1 }
 0x146   : > { %v3236_v48 = vadd.f32 %v3235_v47, %v3234_v42  ;;  %v3125_v49 = vpop.f32.mrf.mxu0 }
 0x147   : > { %v3237_v50 = vpop.f32.mrf.mxu1 }
 0x148   : > { %v4019_v52 = vadd.f32 %v3236_v48, %v3124_v46  ;;  %v3126_v54 = vpop.f32.mrf.mxu0 }
 0x149   : > { %v3127_v55 = vadd.f32 %v3126_v54, %v3125_v49  ;;  %v3238_v57 = vpop.f32.mrf.mxu1 }
 0x14a   : > { %v3239_v58 = vadd.f32 %v3238_v57, %v3237_v50  ;;  %v3128_v60 = vpop.f32.mrf.mxu0 }
 0x14b   : > { %v3240_v61 = vpop.f32.mrf.mxu1 }
 0x14c   : > { %v4021_v63 = vadd.f32 %v3239_v58, %v3127_v55  ;;  %v3129_v0 = vpop.f32.mrf.mxu0 }
 0x14d   : > { %v3130_v2 = vadd.f32 %v3129_v0, %v3128_v60  ;;  %v3241_v3 = vpop.f32.mrf.mxu1 }
 0x14e   : > { %v3242_v4 = vadd.f32 %v3241_v3, %v3240_v61  ;;  %v3131_v5 = vpop.f32.mrf.mxu0 }
 0x14f   : > { %v3243_v7 = vpop.f32.mrf.mxu1 }
 0x150   : > { %v4023_v8 = vadd.f32 %v3242_v4, %v3130_v2  ;;  %v3132_v10 = vpop.f32.mrf.mxu0 }
 0x151   : > { %v3133_v11 = vadd.f32 %v3132_v10, %v3131_v5  ;;  %v3244_v12 = vpop.f32.mrf.mxu1 }
 0x152   : > { %v3245_v13 = vadd.f32 %v3244_v12, %v3243_v7  ;;  %v3134_v15 = vpop.f32.mrf.mxu0 }
 0x153   : > { %v3246_v18 = vpop.f32.mrf.mxu1 }
 0x154   : > { %v4025_v19 = vadd.f32 %v3245_v13, %v3133_v11  ;;  %v3135_v20 = vpop.f32.mrf.mxu0 }
 0x155   : > { %v3136_v21 = vadd.f32 %v3135_v20, %v3134_v15  ;;  %v3247_v22 = vpop.f32.mrf.mxu1 }
 0x156   : > { %v3248_v24 = vadd.f32 %v3247_v22, %v3246_v18  ;;  %v3137_v26 = vpop.f32.mrf.mxu0 }
 0x157   : > { %v3249_v27 = vpop.f32.mrf.mxu1 }
 0x158   : > { %v4027_v28 = vadd.f32 %v3248_v24, %v3136_v21  ;;  %v3138_v30 = vpop.f32.mrf.mxu0 }
 0x159   : > { %v3139_v31 = vadd.f32 %v3138_v30, %v3137_v26  ;;  %v3250_v34 = vpop.f32.mrf.mxu1 }
 0x15a   : > { %v3251_v35 = vadd.f32 %v3250_v34, %v3249_v27  ;;  %v3140_v38 = vpop.f32.mrf.mxu0 }
 0x15b   : > { %v3252_v39 = vpop.f32.mrf.mxu1 }
 0x15c   : > { %v4029_v40 = vadd.f32 %v3251_v35, %v3139_v31  ;;  %v3141_v42 = vpop.f32.mrf.mxu0 }
 0x15d   : > { %v3142_v44 = vadd.f32 %v3141_v42, %v3140_v38  ;;  %v3253_v46 = vpop.f32.mrf.mxu1 }
 0x15e   : > { %v3254_v47 = vadd.f32 %v3253_v46, %v3252_v39  ;;  %v3143_v48 = vpop.f32.mrf.mxu0 }
 0x15f   : > { %v3255_v49 = vpop.f32.mrf.mxu1 }
 0x160   : > { %v4031_v50 = vadd.f32 %v3254_v47, %v3142_v44  ;;  %v3144_v54 = vpop.f32.mrf.mxu0 }
 0x161   : > { %v3145_v55 = vadd.f32 %v3144_v54, %v3143_v48  ;;  %v3256_v57 = vpop.f32.mrf.mxu1 }
 0x162   : > { %v3257_v58 = vadd.f32 %v3256_v57, %v3255_v49  ;;  %v3146_v60 = vpop.f32.mrf.mxu0 }
 0x163   : > { %v3258_v61 = vpop.f32.mrf.mxu1 }
 0x164   : > { %v4033_v0 = vadd.f32 %v3257_v58, %v3145_v55  ;;  %v3147_v2 = vpop.f32.mrf.mxu0 }
 0x165   : > { %v3148_v3 = vadd.f32 %v3147_v2, %v3146_v60  ;;  %v3259_v4 = vpop.f32.mrf.mxu1 }
 0x166   : > { %v3260_v5 = vadd.f32 %v3259_v4, %v3258_v61  ;;  %v3149_v7 = vpop.f32.mrf.mxu0 }
 0x167   : > { %v3261_v10 = vpop.f32.mrf.mxu1 }
 0x168   : > { %v4035_v11 = vadd.f32 %v3260_v5, %v3148_v3  ;;  %v3150_v12 = vpop.f32.mrf.mxu0 }
 0x169   : > { %v3151_v13 = vadd.f32 %v3150_v12, %v3149_v7  ;;  %v3262_v15 = vpop.f32.mrf.mxu1 }
 0x16a   : > { %v3263_v18 = vadd.f32 %v3262_v15, %v3261_v10  ;;  %v3152_v20 = vpop.f32.mrf.mxu0 }
 0x16b   : > { %v3264_v21 = vpop.f32.mrf.mxu1 }
 0x16c   : > { %v4037_v22 = vadd.f32 %v3263_v18, %v3151_v13  ;;  %v3153_v24 = vpop.f32.mrf.mxu0 }
 0x16d   : > { %v3154_v26 = vadd.f32 %v3153_v24, %v3152_v20  ;;  %v3265_v27 = vpop.f32.mrf.mxu1 }
 0x16e   : > { %v3266_v30 = vadd.f32 %v3265_v27, %v3264_v21  ;;  %v3283_v31 = vpop.f32.mrf.mxu0 }
 0x16f   : > { %v3395_v34 = vpop.f32.mrf.mxu1 }
 0x170   : > { %v4039_v35 = vadd.f32 %v3266_v30, %v3154_v26  ;;  %v3284_v38 = vpop.f32.mrf.mxu0 }
 0x171   : > { %v3285_v39 = vadd.f32 %v3284_v38, %v3283_v31  ;;  %v3396_v42 = vpop.f32.mrf.mxu1 }
 0x172   : > { %v3286_v44 = vpop.f32.mrf.mxu0  ;;  %v3397_v48 = vadd.f32 %v3396_v42, %v3395_v34 }
 0x173   : > { %v1951_v46 = vadd.f32 %v3285_v39, %v3957_v29  ;;  %v3398_v47 = vpop.f32.mrf.mxu1 }
 0x174   : > { %v3287_v49 = vpop.f32.mrf.mxu0 }
 0x175   : > { %v3288_v54 = vadd.f32 %v3287_v49, %v3286_v44  ;;  %v3399_v55 = vpop.f32.mrf.mxu1  ;;  %v2112_v57 = vadd.f32 %v3397_v48, %v1951_v46 }
 0x176   : > { %v3289_v58 = vpop.f32.mrf.mxu0  ;;  %v3400_v61 = vadd.f32 %v3399_v55, %v3398_v47 }
 0x177   : > { %v1954_v60 = vadd.f32 %v3288_v54, %v3959_v37  ;;  %v3401_v2 = vpop.f32.mrf.mxu1  ;;  %v2276_v10 = vmul.f32 %v2112_v57, %v2112_v57 }
 0x178   : > { %v3290_v3 = vpop.f32.mrf.mxu0 }
 0x179   : > { %v2115_v4 = vadd.f32 %v3400_v61, %v1954_v60  ;;  %v3291_v5 = vadd.f32 %v3290_v3, %v3289_v58  ;;  %v3402_v7 = vpop.f32.mrf.mxu1 }
 0x17a   : > { %v3403_v29 = vadd.f32 %v3402_v7, %v3401_v2  ;;  %v3292_v12 = vpop.f32.mrf.mxu0 }
 0x17b   : > { %v2238_v13 = vadd.f32 %v2115_v4, %v2112_v57  ;;  %v2277_v15 = vmul.f32 %v2115_v4, %v2115_v4  ;;  %v2951_v18 = vpack.c.bf16 %v2115_v4, %v2112_v57  ;;  %v1959_v37 = vadd.f32 %v3291_v5, %v3965_v51  ;;  %v3404_v20 = vpop.f32.mrf.mxu1 }
 0x17c   : > { %v3293_v21 = vpop.f32.mrf.mxu0 }
 0x17d   : > { %v2308_v24 = vadd.f32 %v2277_v15, %v2276_v10  ;;  %2952 = vst [vmem:[%s4047_s30] sm:$0xff] %v2951_v18   ;;  %v2120_v26 = vadd.f32 %v3403_v29, %v1959_v37  ;;  %v3294_v27 = vadd.f32 %v3293_v21, %v3292_v12  ;;  %v3405_v30 = vpop.f32.mrf.mxu1 }
 0x17e   : > { %v3295_v31 = vpop.f32.mrf.mxu0  ;;  %v3406_v42 = vadd.f32 %v3405_v30, %v3404_v20 }
 0x17f   : > { %v2239_v34 = vadd.f32 %v2238_v13, %v2120_v26  ;;  %v2278_v38 = vmul.f32 %v2120_v26, %v2120_v26  ;;  %v1962_v39 = vadd.f32 %v3294_v27, %v3967_v59  ;;  %v3407_v44 = vpop.f32.mrf.mxu1 }
 0x180   : > { %v3296_v46 = vpop.f32.mrf.mxu0 }
 0x181   : > { %v2309_v47 = vadd.f32 %v2308_v24, %v2278_v38  ;;  %v2123_v48 = vadd.f32 %v3406_v42, %v1962_v39  ;;  %v3297_v49 = vadd.f32 %v3296_v46, %v3295_v31  ;;  %v3408_v51 = vpop.f32.mrf.mxu1 }
 0x182   : > { %v3409_v54 = vadd.f32 %v3408_v51, %v3407_v44  ;;  %v3298_v55 = vpop.f32.mrf.mxu0 }
 0x183   : > { %v2240_v57 = vadd.f32 %v2239_v34, %v2123_v48  ;;  %v2279_v58 = vmul.f32 %v2123_v48, %v2123_v48  ;;  %v2956_v60 = vpack.c.bf16 %v2123_v48, %v2120_v26  ;;  %v1967_v61 = vadd.f32 %v3297_v49, %v3973_v9  ;;  %v3410_v2 = vpop.f32.mrf.mxu1 }
 0x184   : > { %v3299_v3 = vpop.f32.mrf.mxu0 }
 0x185   : > { %v2310_v4 = vadd.f32 %v2309_v47, %v2279_v58  ;;  %3028 = vst [vmem:[%s4047_s30 + $0x8] sm:$0xff] %v2956_v60   ;;  %v2128_v59 = vadd.f32 %v3409_v54, %v1967_v61  ;;  %v3300_v5 = vadd.f32 %v3299_v3, %v3298_v55  ;;  %v3411_v7 = vpop.f32.mrf.mxu1 }
 0x186   : > { %v3301_v10 = vpop.f32.mrf.mxu0  ;;  %v3412_v15 = vadd.f32 %v3411_v7, %v3410_v2 }
 0x187   : > { %v2241_v29 = vadd.f32 %v2240_v57, %v2128_v59  ;;  %v2280_v12 = vmul.f32 %v2128_v59, %v2128_v59  ;;  %v1970_v13 = vadd.f32 %v3300_v5, %v3975_v17  ;;  %v3413_v18 = vpop.f32.mrf.mxu1 }
 0x188   : > { %v3302_v37 = vpop.f32.mrf.mxu0 }
 0x189   : > { %v2311_v20 = vadd.f32 %v2310_v4, %v2280_v12  ;;  %v2131_v21 = vadd.f32 %v3412_v15, %v1970_v13  ;;  %v3303_v24 = vadd.f32 %v3302_v37, %v3301_v10  ;;  %v3414_v9 = vpop.f32.mrf.mxu1 }
 0x18a   : > { %v3415_v26 = vadd.f32 %v3414_v9, %v3413_v18  ;;  %v3304_v27 = vpop.f32.mrf.mxu0 }
 0x18b   : > { %v2242_v30 = vadd.f32 %v2241_v29, %v2131_v21  ;;  %v2281_v31 = vmul.f32 %v2131_v21, %v2131_v21  ;;  %v2961_v34 = vpack.c.bf16 %v2131_v21, %v2128_v59  ;;  %v1975_v38 = vadd.f32 %v3303_v24, %v3981_v32  ;;  %v3416_v39 = vpop.f32.mrf.mxu1 }
 0x18c   : > { %v3305_v42 = vpop.f32.mrf.mxu0 }
 0x18d   : > { %v2312_v44 = vadd.f32 %v2311_v20, %v2281_v31  ;;  %3029 = vst [vmem:[%s4047_s30 + $0x10] sm:$0xff] %v2961_v34   ;;  %v2136_v17 = vadd.f32 %v3415_v26, %v1975_v38  ;;  %v3306_v46 = vadd.f32 %v3305_v42, %v3304_v27  ;;  %v3417_v47 = vpop.f32.mrf.mxu1 }
 0x18e   : > { %v3307_v48 = vpop.f32.mrf.mxu0  ;;  %v3418_v55 = vadd.f32 %v3417_v47, %v3416_v39 }
 0x18f   : > { %v2243_v49 = vadd.f32 %v2242_v30, %v2136_v17  ;;  %v2282_v51 = vmul.f32 %v2136_v17, %v2136_v17  ;;  %v1978_v54 = vadd.f32 %v3306_v46, %v3983_v41  ;;  %v3419_v57 = vpop.f32.mrf.mxu1 }
 0x190   : > { %v3308_v58 = vpop.f32.mrf.mxu0 }
 0x191   : > { %v2313_v60 = vadd.f32 %v2312_v44, %v2282_v51  ;;  %v2139_v61 = vadd.f32 %v3418_v55, %v1978_v54  ;;  %v3309_v2 = vadd.f32 %v3308_v58, %v3307_v48  ;;  %v3420_v32 = vpop.f32.mrf.mxu1 }
 0x192   : > { %v3421_v3 = vadd.f32 %v3420_v32, %v3419_v57  ;;  %v3310_v4 = vpop.f32.mrf.mxu0 }
 0x193   : > { %v2244_v59 = vadd.f32 %v2243_v49, %v2139_v61  ;;  %v2283_v5 = vmul.f32 %v2139_v61, %v2139_v61  ;;  %v2966_v7 = vpack.c.bf16 %v2139_v61, %v2136_v17  ;;  %v1983_v10 = vadd.f32 %v3309_v2, %v3989_v56  ;;  %v3422_v29 = vpop.f32.mrf.mxu1 }
 0x194   : > { %v3311_v12 = vpop.f32.mrf.mxu0 }
 0x195   : > { %v2314_v13 = vadd.f32 %v2313_v60, %v2283_v5  ;;  %3030 = vst [vmem:[%s4047_s30 + $0x18] sm:$0xff] %v2966_v7   ;;  %v2144_v41 = vadd.f32 %v3421_v3, %v1983_v10  ;;  %v3312_v15 = vadd.f32 %v3311_v12, %v3310_v4  ;;  %v3423_v18 = vpop.f32.mrf.mxu1 }
 0x196   : > { %v3313_v37 = vpop.f32.mrf.mxu0  ;;  %v3424_v9 = vadd.f32 %v3423_v18, %v3422_v29 }
 0x197   : > { %v2245_v20 = vadd.f32 %v2244_v59, %v2144_v41  ;;  %v2284_v21 = vmul.f32 %v2144_v41, %v2144_v41  ;;  %v1986_v24 = vadd.f32 %v3312_v15, %v3991_v1  ;;  %v3425_v26 = vpop.f32.mrf.mxu1 }
 0x198   : > { %v3314_v27 = vpop.f32.mrf.mxu0 }
 0x199   : > { %v2315_v30 = vadd.f32 %v2314_v13, %v2284_v21  ;;  %v2147_v31 = vadd.f32 %v3424_v9, %v1986_v24  ;;  %v3315_v34 = vadd.f32 %v3314_v27, %v3313_v37  ;;  %v3426_v56 = vpop.f32.mrf.mxu1 }
 0x19a   : > { %v3427_v38 = vadd.f32 %v3426_v56, %v3425_v26  ;;  %v3316_v39 = vpop.f32.mrf.mxu0 }
 0x19b   : > { %v2246_v42 = vadd.f32 %v2245_v20, %v2147_v31  ;;  %v2285_v44 = vmul.f32 %v2147_v31, %v2147_v31  ;;  %v2971_v17 = vpack.c.bf16 %v2147_v31, %v2144_v41  ;;  %v1991_v46 = vadd.f32 %v3315_v34, %v3997_v16  ;;  %v3428_v47 = vpop.f32.mrf.mxu1 }
 0x19c   : > { %v3317_v48 = vpop.f32.mrf.mxu0 }
 0x19d   : > { %v2316_v49 = vadd.f32 %v2315_v30, %v2285_v44  ;;  %3031 = vst [vmem:[%s4047_s30 + $0x20] sm:$0xff] %v2971_v17   ;;  %v2152_v1 = vadd.f32 %v3427_v38, %v1991_v46  ;;  %v3318_v51 = vadd.f32 %v3317_v48, %v3316_v39  ;;  %v3429_v54 = vpop.f32.mrf.mxu1 }
 0x19e   : > { %v3319_v55 = vpop.f32.mrf.mxu0  ;;  %v3430_v61 = vadd.f32 %v3429_v54, %v3428_v47 }
 0x19f   : > { %v2247_v57 = vadd.f32 %v2246_v42, %v2152_v1  ;;  %v2286_v58 = vmul.f32 %v2152_v1, %v2152_v1  ;;  %v1994_v60 = vadd.f32 %v3318_v51, %v3999_v25  ;;  %v3431_v2 = vpop.f32.mrf.mxu1 }
 0x1a0   : > { %v3320_v32 = vpop.f32.mrf.mxu0 }
 0x1a1   : > { %v2317_v3 = vadd.f32 %v2316_v49, %v2286_v58  ;;  %v2155_v4 = vadd.f32 %v3430_v61, %v1994_v60  ;;  %v3321_v59 = vadd.f32 %v3320_v32, %v3319_v55  ;;  %v3432_v16 = vpop.f32.mrf.mxu1 }
 0x1a2   : > { %v3433_v5 = vadd.f32 %v3432_v16, %v3431_v2  ;;  %v3322_v7 = vpop.f32.mrf.mxu0 }
 0x1a3   : > { %v2248_v10 = vadd.f32 %v2247_v57, %v2155_v4  ;;  %v2287_v29 = vmul.f32 %v2155_v4, %v2155_v4  ;;  %v2976_v12 = vpack.c.bf16 %v2155_v4, %v2152_v1  ;;  %v1999_v13 = vadd.f32 %v3321_v59, %v4001_v36  ;;  %v3434_v41 = vpop.f32.mrf.mxu1 }
 0x1a4   : > { %v3323_v15 = vpop.f32.mrf.mxu0 }
 0x1a5   : > { %v2318_v18 = vadd.f32 %v2317_v3, %v2287_v29  ;;  %3032 = vst [vmem:[%s4047_s30 + $0x28] sm:$0xff] %v2976_v12   ;;  %v2160_v25 = vadd.f32 %v3433_v5, %v1999_v13  ;;  %v3324_v37 = vadd.f32 %v3323_v15, %v3322_v7  ;;  %v3435_v20 = vpop.f32.mrf.mxu1 }
 0x1a6   : > { %v3325_v21 = vpop.f32.mrf.mxu0  ;;  %v3436_v27 = vadd.f32 %v3435_v20, %v3434_v41 }
 0x1a7   : > { %v2249_v24 = vadd.f32 %v2248_v10, %v2160_v25  ;;  %v2288_v9 = vmul.f32 %v2160_v25, %v2160_v25  ;;  %v2002_v26 = vadd.f32 %v3324_v37, %v4003_v45  ;;  %v3437_v30 = vpop.f32.mrf.mxu1 }
 0x1a8   : > { %v3326_v31 = vpop.f32.mrf.mxu0 }
 0x1a9   : > { %v2319_v34 = vadd.f32 %v2318_v18, %v2288_v9  ;;  %v2163_v56 = vadd.f32 %v3436_v27, %v2002_v26  ;;  %v3327_v38 = vadd.f32 %v3326_v31, %v3325_v21  ;;  %v3438_v36 = vpop.f32.mrf.mxu1 }
 0x1aa   : > { %v3439_v39 = vadd.f32 %v3438_v36, %v3437_v30  ;;  %v3328_v42 = vpop.f32.mrf.mxu0 }
 0x1ab   : > { %v2250_v44 = vadd.f32 %v2249_v24, %v2163_v56  ;;  %v2289_v17 = vmul.f32 %v2163_v56, %v2163_v56  ;;  %v2981_v46 = vpack.c.bf16 %v2163_v56, %v2160_v25  ;;  %v2007_v47 = vadd.f32 %v3327_v38, %v4005_v53  ;;  %v3440_v48 = vpop.f32.mrf.mxu1 }
 0x1ac   : > { %v3329_v49 = vpop.f32.mrf.mxu0 }
 0x1ad   : > { %v2320_v1 = vadd.f32 %v2319_v34, %v2289_v17  ;;  %3033 = vst [vmem:[%s4047_s30 + $0x30] sm:$0xff] %v2981_v46   ;;  %v2168_v45 = vadd.f32 %v3439_v39, %v2007_v47  ;;  %v3330_v51 = vadd.f32 %v3329_v49, %v3328_v42  ;;  %v3441_v54 = vpop.f32.mrf.mxu1 }
 0x1ae   : > { %v3331_v55 = vpop.f32.mrf.mxu0  ;;  %v3442_v61 = vadd.f32 %v3441_v54, %v3440_v48 }
 0x1af   : > { %v2251_v57 = vadd.f32 %v2250_v44, %v2168_v45  ;;  %v2290_v58 = vmul.f32 %v2168_v45, %v2168_v45  ;;  %v2010_v60 = vadd.f32 %v3330_v51, %v4007_v62  ;;  %v3443_v2 = vpop.f32.mrf.mxu1 }
 0x1b0   : > { %v3332_v32 = vpop.f32.mrf.mxu0 }
 0x1b1   : > { %v2321_v3 = vadd.f32 %v2320_v1, %v2290_v58  ;;  %v2171_v4 = vadd.f32 %v3442_v61, %v2010_v60  ;;  %v3333_v59 = vadd.f32 %v3332_v32, %v3331_v55  ;;  %v3444_v53 = vpop.f32.mrf.mxu1 }
 0x1b2   : > { %v3445_v16 = vadd.f32 %v3444_v53, %v3443_v2  ;;  %v3334_v5 = vpop.f32.mrf.mxu0 }
 0x1b3   : > { %v2252_v7 = vadd.f32 %v2251_v57, %v2171_v4  ;;  %v2291_v10 = vmul.f32 %v2171_v4, %v2171_v4  ;;  %v2986_v29 = vpack.c.bf16 %v2171_v4, %v2168_v45  ;;  %v2015_v12 = vadd.f32 %v3333_v59, %v4009_v6  ;;  %v3446_v13 = vpop.f32.mrf.mxu1 }
 0x1b4   : > { %v3335_v41 = vpop.f32.mrf.mxu0 }
 0x1b5   : > { %v2322_v15 = vadd.f32 %v2321_v3, %v2291_v10  ;;  %3034 = vst [vmem:[%s4047_s30 + $0x38] sm:$0xff] %v2986_v29   ;;  %v2176_v62 = vadd.f32 %v3445_v16, %v2015_v12  ;;  %v3336_v18 = vadd.f32 %v3335_v41, %v3334_v5  ;;  %v3447_v25 = vpop.f32.mrf.mxu1 }
 0x1b6   : > { %v3337_v37 = vpop.f32.mrf.mxu0  ;;  %v3448_v9 = vadd.f32 %v3447_v25, %v3446_v13 }
 0x1b7   : > { %v2253_v20 = vadd.f32 %v2252_v7, %v2176_v62  ;;  %v2292_v21 = vmul.f32 %v2176_v62, %v2176_v62  ;;  %v2018_v24 = vadd.f32 %v3336_v18, %v4011_v14  ;;  %v3449_v26 = vpop.f32.mrf.mxu1 }
 0x1b8   : > { %v3338_v27 = vpop.f32.mrf.mxu0 }
 0x1b9   : > { %v2323_v30 = vadd.f32 %v2322_v15, %v2292_v21  ;;  %v2179_v31 = vadd.f32 %v3448_v9, %v2018_v24  ;;  %v3339_v34 = vadd.f32 %v3338_v27, %v3337_v37  ;;  %v3450_v6 = vpop.f32.mrf.mxu1 }
 0x1ba   : > { %v3451_v56 = vadd.f32 %v3450_v6, %v3449_v26  ;;  %v3340_v38 = vpop.f32.mrf.mxu0 }
 0x1bb   : > { %v2254_v36 = vadd.f32 %v2253_v20, %v2179_v31  ;;  %v2293_v39 = vmul.f32 %v2179_v31, %v2179_v31  ;;  %v2991_v42 = vpack.c.bf16 %v2179_v31, %v2176_v62  ;;  %v2023_v44 = vadd.f32 %v3339_v34, %v4013_v23  ;;  %v3452_v17 = vpop.f32.mrf.mxu1 }
 0x1bc   : > { %v3341_v46 = vpop.f32.mrf.mxu0 }
 0x1bd   : > { %v2324_v47 = vadd.f32 %v2323_v30, %v2293_v39  ;;  %3035 = vst [vmem:[%s4047_s30 + $0x40] sm:$0xff] %v2991_v42   ;;  %v2184_v14 = vadd.f32 %v3451_v56, %v2023_v44  ;;  %v3342_v48 = vadd.f32 %v3341_v46, %v3340_v38  ;;  %v3453_v49 = vpop.f32.mrf.mxu1 }
 0x1be   : > { %v3343_v1 = vpop.f32.mrf.mxu0  ;;  %v3454_v55 = vadd.f32 %v3453_v49, %v3452_v17 }
 0x1bf   : > { %v2255_v45 = vadd.f32 %v2254_v36, %v2184_v14  ;;  %v2294_v51 = vmul.f32 %v2184_v14, %v2184_v14  ;;  %v2026_v54 = vadd.f32 %v3342_v48, %v4015_v33  ;;  %v3455_v57 = vpop.f32.mrf.mxu1 }
 0x1c0   : > { %v3344_v58 = vpop.f32.mrf.mxu0 }
 0x1c1   : > { %v2325_v60 = vadd.f32 %v2324_v47, %v2294_v51  ;;  %v2187_v61 = vadd.f32 %v3454_v55, %v2026_v54  ;;  %v3345_v2 = vadd.f32 %v3344_v58, %v3343_v1  ;;  %v3456_v23 = vpop.f32.mrf.mxu1 }
 0x1c2   : > { %v3457_v32 = vadd.f32 %v3456_v23, %v3455_v57  ;;  %v3346_v3 = vpop.f32.mrf.mxu0 }
 0x1c3   : > { %v2256_v4 = vadd.f32 %v2255_v45, %v2187_v61  ;;  %v2295_v59 = vmul.f32 %v2187_v61, %v2187_v61  ;;  %v2996_v53 = vpack.c.bf16 %v2187_v61, %v2184_v14  ;;  %v2031_v16 = vadd.f32 %v3345_v2, %v4017_v43  ;;  %v3458_v5 = vpop.f32.mrf.mxu1 }
 0x1c4   : > { %v3347_v7 = vpop.f32.mrf.mxu0 }
 0x1c5   : > { %v2326_v10 = vadd.f32 %v2325_v60, %v2295_v59  ;;  %3036 = vst [vmem:[%s4047_s30 + $0x48] sm:$0xff] %v2996_v53   ;;  %v2192_v33 = vadd.f32 %v3457_v32, %v2031_v16  ;;  %v3348_v29 = vadd.f32 %v3347_v7, %v3346_v3  ;;  %v3459_v12 = vpop.f32.mrf.mxu1 }
 0x1c6   : > { %v3349_v13 = vpop.f32.mrf.mxu0  ;;  %v3460_v18 = vadd.f32 %v3459_v12, %v3458_v5 }
 0x1c7   : > { %v2257_v41 = vadd.f32 %v2256_v4, %v2192_v33  ;;  %v2296_v15 = vmul.f32 %v2192_v33, %v2192_v33  ;;  %v2034_v62 = vadd.f32 %v3348_v29, %v4019_v52  ;;  %v3461_v25 = vpop.f32.mrf.mxu1 }
 0x1c8   : > { %v3350_v37 = vpop.f32.mrf.mxu0 }
 0x1c9   : > { %v2327_v20 = vadd.f32 %v2326_v10, %v2296_v15  ;;  %v2195_v21 = vadd.f32 %v3460_v18, %v2034_v62  ;;  %v3351_v24 = vadd.f32 %v3350_v37, %v3349_v13  ;;  %v3462_v43 = vpop.f32.mrf.mxu1 }
 0x1ca   : > { %v3463_v9 = vadd.f32 %v3462_v43, %v3461_v25  ;;  %v3352_v26 = vpop.f32.mrf.mxu0 }
 0x1cb   : > { %v2258_v27 = vadd.f32 %v2257_v41, %v2195_v21  ;;  %v2297_v30 = vmul.f32 %v2195_v21, %v2195_v21  ;;  %v3001_v31 = vpack.c.bf16 %v2195_v21, %v2192_v33  ;;  %v2039_v34 = vadd.f32 %v3351_v24, %v4021_v63  ;;  %v3464_v6 = vpop.f32.mrf.mxu1 }
 0x1cc   : > { %v3353_v56 = vpop.f32.mrf.mxu0 }
 0x1cd   : > { %v2328_v38 = vadd.f32 %v2327_v20, %v2297_v30  ;;  %3037 = vst [vmem:[%s4047_s30 + $0x50] sm:$0xff] %v3001_v31   ;;  %v2200_v52 = vadd.f32 %v3463_v9, %v2039_v34  ;;  %v3354_v36 = vadd.f32 %v3353_v56, %v3352_v26  ;;  %v3465_v39 = vpop.f32.mrf.mxu1 }
 0x1ce   : > { %v3355_v42 = vpop.f32.mrf.mxu0  ;;  %v3466_v47 = vadd.f32 %v3465_v39, %v3464_v6 }
 0x1cf   : > { %v2259_v44 = vadd.f32 %v2258_v27, %v2200_v52  ;;  %v2298_v17 = vmul.f32 %v2200_v52, %v2200_v52  ;;  %v2042_v46 = vadd.f32 %v3354_v36, %v4023_v8  ;;  %v3467_v14 = vpop.f32.mrf.mxu1 }
 0x1d0   : > { %v3356_v48 = vpop.f32.mrf.mxu0 }
 0x1d1   : > { %v2329_v49 = vadd.f32 %v2328_v38, %v2298_v17  ;;  %v2203_v1 = vadd.f32 %v3466_v47, %v2042_v46  ;;  %v3357_v45 = vadd.f32 %v3356_v48, %v3355_v42  ;;  %v3468_v63 = vpop.f32.mrf.mxu1 }
 0x1d2   : > { %v3469_v51 = vadd.f32 %v3468_v63, %v3467_v14  ;;  %v3358_v54 = vpop.f32.mrf.mxu0 }
 0x1d3   : > { %v2260_v55 = vadd.f32 %v2259_v44, %v2203_v1  ;;  %v2299_v57 = vmul.f32 %v2203_v1, %v2203_v1  ;;  %v3006_v58 = vpack.c.bf16 %v2203_v1, %v2200_v52  ;;  %v2047_v60 = vadd.f32 %v3357_v45, %v4025_v19  ;;  %v3470_v61 = vpop.f32.mrf.mxu1 }
 0x1d4   : > { %v3359_v2 = vpop.f32.mrf.mxu0 }
 0x1d5   : > { %v2330_v23 = vadd.f32 %v2329_v49, %v2299_v57  ;;  %3038 = vst [vmem:[%s4047_s30 + $0x58] sm:$0xff] %v3006_v58   ;;  %v2208_v8 = vadd.f32 %v3469_v51, %v2047_v60  ;;  %v3360_v32 = vadd.f32 %v3359_v2, %v3358_v54  ;;  %v3471_v3 = vpop.f32.mrf.mxu1 }
 0x1d6   : > { %v3361_v4 = vpop.f32.mrf.mxu0  ;;  %v3472_v5 = vadd.f32 %v3471_v3, %v3470_v61 }
 0x1d7   : > { %v2261_v59 = vadd.f32 %v2260_v55, %v2208_v8  ;;  %v2300_v53 = vmul.f32 %v2208_v8, %v2208_v8  ;;  %v2050_v16 = vadd.f32 %v3360_v32, %v4027_v28  ;;  %v3473_v7 = vpop.f32.mrf.mxu1 }
 0x1d8   : > { %v3362_v10 = vpop.f32.mrf.mxu0 }
 0x1d9   : > { %v2331_v33 = vadd.f32 %v2330_v23, %v2300_v53  ;;  %v2211_v29 = vadd.f32 %v3472_v5, %v2050_v16  ;;  %v3363_v12 = vadd.f32 %v3362_v10, %v3361_v4  ;;  %v3474_v19 = vpop.f32.mrf.mxu1 }
 0x1da   : > { %v3475_v13 = vadd.f32 %v3474_v19, %v3473_v7  ;;  %v3364_v41 = vpop.f32.mrf.mxu0 }
 0x1db   : > { %v2262_v15 = vadd.f32 %v2261_v59, %v2211_v29  ;;  %v2301_v62 = vmul.f32 %v2211_v29, %v2211_v29  ;;  %v3011_v18 = vpack.c.bf16 %v2211_v29, %v2208_v8  ;;  %v2055_v25 = vadd.f32 %v3363_v12, %v4029_v40  ;;  %v3476_v37 = vpop.f32.mrf.mxu1 }
 0x1dc   : > { %v3365_v20 = vpop.f32.mrf.mxu0 }
 0x1dd   : > { %v2332_v21 = vadd.f32 %v2331_v33, %v2301_v62  ;;  %3039 = vst [vmem:[%s4047_s30 + $0x60] sm:$0xff] %v3011_v18   ;;  %v2216_v28 = vadd.f32 %v3475_v13, %v2055_v25  ;;  %v3366_v24 = vadd.f32 %v3365_v20, %v3364_v41  ;;  %v3477_v43 = vpop.f32.mrf.mxu1 }
 0x1de   : > { %v3367_v9 = vpop.f32.mrf.mxu0  ;;  %v3478_v31 = vadd.f32 %v3477_v43, %v3476_v37 }
 0x1df   : > { %v2263_v26 = vadd.f32 %v2262_v15, %v2216_v28  ;;  %v2302_v27 = vmul.f32 %v2216_v28, %v2216_v28  ;;  %v2058_v30 = vadd.f32 %v3366_v24, %v4031_v50  ;;  %v3479_v34 = vpop.f32.mrf.mxu1 }
 0x1e0   : > { %v3368_v6 = vpop.f32.mrf.mxu0 }
 0x1e1   : > { %v2333_v56 = vadd.f32 %v2332_v21, %v2302_v27  ;;  %v2219_v38 = vadd.f32 %v3478_v31, %v2058_v30  ;;  %v3369_v52 = vadd.f32 %v3368_v6, %v3367_v9  ;;  %v3480_v40 = vpop.f32.mrf.mxu1 }
 0x1e2   : > { %v3481_v36 = vadd.f32 %v3480_v40, %v3479_v34  ;;  %v3370_v39 = vpop.f32.mrf.mxu0 }
 0x1e3   : > { %v2264_v42 = vadd.f32 %v2263_v26, %v2219_v38  ;;  %v2303_v44 = vmul.f32 %v2219_v38, %v2219_v38  ;;  %v3016_v17 = vpack.c.bf16 %v2219_v38, %v2216_v28  ;;  %v2063_v46 = vadd.f32 %v3369_v52, %v4033_v0  ;;  %v3482_v47 = vpop.f32.mrf.mxu1 }
 0x1e4   : > { %v3371_v14 = vpop.f32.mrf.mxu0 }
 0x1e5   : > { %v2334_v48 = vadd.f32 %v2333_v56, %v2303_v44  ;;  %3040 = vst [vmem:[%s4047_s30 + $0x68] sm:$0xff] %v3016_v17   ;;  %v2224_v50 = vadd.f32 %v3481_v36, %v2063_v46  ;;  %v3372_v49 = vadd.f32 %v3371_v14, %v3370_v39  ;;  %v3483_v1 = vpop.f32.mrf.mxu1 }
 0x1e6   : > { %v3373_v45 = vpop.f32.mrf.mxu0  ;;  %v3484_v55 = vadd.f32 %v3483_v1, %v3482_v47 }
 0x1e7   : > { %v2265_v63 = vadd.f32 %v2264_v42, %v2224_v50  ;;  %v2304_v51 = vmul.f32 %v2224_v50, %v2224_v50  ;;  %v2066_v54 = vadd.f32 %v3372_v49, %v4035_v11  ;;  %v3485_v57 = vpop.f32.mrf.mxu1 }
 0x1e8   : > { %v3374_v58 = vpop.f32.mrf.mxu0 }
 0x1e9   : > { %v2335_v60 = vadd.f32 %v2334_v48, %v2304_v51  ;;  %v2227_v61 = vadd.f32 %v3484_v55, %v2066_v54  ;;  %v3375_v2 = vadd.f32 %v3374_v58, %v3373_v45  ;;  %v3486_v0 = vpop.f32.mrf.mxu1 }
 0x1ea   : > { %v3487_v23 = vadd.f32 %v3486_v0, %v3485_v57  ;;  %v3376_v8 = vpop.f32.mrf.mxu0 }
 0x1eb   : > { %v2266_v32 = vadd.f32 %v2265_v63, %v2227_v61  ;;  %v2305_v3 = vmul.f32 %v2227_v61, %v2227_v61  ;;  %v3021_v4 = vpack.c.bf16 %v2227_v61, %v2224_v50  ;;  %v2071_v59 = vadd.f32 %v3375_v2, %v4037_v22  ;;  %v3488_v53 = vpop.f32.mrf.mxu1 }
 0x1ec   : > { %v3377_v16 = vpop.f32.mrf.mxu0 }
 0x1ed   : > { %v2336_v5 = vadd.f32 %v2335_v60, %v2305_v3  ;;  %3041 = vst [vmem:[%s4047_s30 + $0x70] sm:$0xff] %v3021_v4   ;;  %v2232_v11 = vadd.f32 %v3487_v23, %v2071_v59  ;;  %v3378_v7 = vadd.f32 %v3377_v16, %v3376_v8  ;;  %v3489_v10 = vpop.f32.mrf.mxu1 }
 0x1ee   : > { %v3490_v19 = vadd.f32 %v3489_v10, %v3488_v53 }
 0x1ef   : > { %v2267_v33 = vadd.f32 %v2266_v32, %v2232_v11  ;;  %v2306_v29 = vmul.f32 %v2232_v11, %v2232_v11  ;;  %v2074_v12 = vadd.f32 %v3378_v7, %v4039_v35 }
 0x1f1   : > { %v2337_v13 = vadd.f32 %v2336_v5, %v2306_v29  ;;  %v2235_v41 = vadd.f32 %v3490_v19, %v2074_v12 }
 0x1f3   : > { %v2268_v15 = vadd.f32 %v2267_v33, %v2235_v41  ;;  %v2307_v62 = vmul.f32 %v2235_v41, %v2235_v41  ;;  %v3026_v22 = vpack.c.bf16 %v2235_v41, %v2232_v11 }
 0x1f5   : > { %v2269_v18 = vrot.slane %v2268_v15, 4  ;;  %v2338_v25 = vadd.f32 %v2337_v13, %v2307_v62  ;;  %3042 = vst [vmem:[%s4047_s30 + $0x78] sm:$0xff] %v3026_v22  }
 0x1f7   : > { %v2270_v37 = vadd.f32 %v2269_v18, %v2268_v15  ;;  %v2339_v20 = vrot.slane %v2338_v25, 4 }
 0x1f9   : > { %v2271_v21 = vrot.slane %v2270_v37, 2  ;;  %v2340_v28 = vadd.f32 %v2339_v20, %v2338_v25 }
 0x1fb   : > { %v2272_v24 = vadd.f32 %v2271_v21, %v2270_v37  ;;  %v2341_v43 = vrot.slane %v2340_v28, 2 }
 0x1fd   : > { %v2273_v9 = vrot.slane %v2272_v24, 1  ;;  %v2342_v26 = vadd.f32 %v2341_v43, %v2340_v28 }
 0x1ff   : > { %v2274_v35 = vadd.f32 %v2273_v9, %v2272_v24  ;;  %v2343_v27 = vrot.slane %v2342_v26, 1 }
 0x201   : > { %2275 = vst [vmem:[%s306_s6] sm:$0x1] %v2274_v35  ;;  %v2344_v30 = vadd.f32 %v2343_v27, %v2342_v26 }
 0x203   : > { %2345 = vst [vmem:[%s312_s9] sm:$0x1] %v2344_v30 }
 0x204 PF: > { %s15_s17 = sadd.s32 1, %s3601_s17   ;;  %s4117_s15 = smov %s3597_s16 }
 0x205   : > { %p12_p6 = scmp.ge.s32.totalorder %s15_s17, 4   ;;  %s4118_s16 = smov %s4120_s18 }
 0x207   :  { %14 = sbr.rel (!%p12_p6) target bundleno = 2 (0x2), region = 85 }

// kernel: classifier_content_forward.8
= control target key start
LH: loop header
LB: loop body
LE: loop exit
PB: predicated region body
PF: predicated region fallthrough
CT: control target
= control target key end

     0   :  { %s5452_s15 = smov 0   ;;  %s5454_s16 = smov 0   ;;  %s6824_s0 = inlined_call_operand.vmem [shape: bf16[128,2048], index: 0, kind: input, shape index: {}]   ;;  %s6825_s1 = inlined_call_operand.vmem [shape: bf16[2048,256], index: 1, kind: input, shape index: {}]   ;;  %s6826_s2 = inlined_call_operand.vmem [shape: bf16[128,256], index: 2, kind: output, shape index: {0}]   ;;  %s6827_s3 = inlined_call_operand.vmem [shape: f32[1,1,256], index: 3, kind: output, shape index: {1}]   ;;  %s6828_s4 = inlined_call_operand.vmem [shape: f32[1,1,256], index: 4, kind: output, shape index: {2}]  }
   0x1   :  { %s5456_s17 = smov 0   ;;  %s5458_s18 = smov 0  }
   0x2   :  { %s5460_s19 = smov 0  }
   0x3 LB: > { %s30_s20 = sadd.s32 1, %s5421_s18  ;;  %s4358_s21 = sadd.s32 4294967295, %s5425_s19   ;;  %s5425_s19 = sphi %s5460_s19, %s15_s19   ;;  %s5421_s18 = sphi %s5458_s18, %s6835_s18   ;;  %s5417_s17 = sphi %s5456_s17, %s6834_s17   ;;  %s5413_s16 = sphi %s5454_s16, %s6833_s16   ;;  %s5409_s15 = sphi %s5452_s15, %s6832_s15  }
   0x4   : > { %p32_p0 = scmp.ge.s32.totalorder %s30_s20, 2  ;;  %p78_p1 = scmp.ne.s32.totalorder %s5413_s16, %s5409_s15 }
   0x5   : > { %p79_p2 = scmp.eq.s32.totalorder %s5425_s19, 0  ;;  %p110_p4 = scmp.eq.s32.totalorder %s4358_s21, 1 }
   0x6   : > { %s6837_s20 = smov (%p32_p0, %s30_s20), 0  ;;  %s71_s23 = sadd.s32 1, %s5413_s16 }
   0x7   : > { %p80_p3 = por %p79_p2, %p78_p1  ;;  %s67_s22 = ssub.s32 %s5421_s18, %s6837_s20 }
   0x8   : > { %p69_p5 = scmp.eq.s32.totalorder %s67_s22, 0  ;;  %p5487_p6 = por %p110_p4, %p78_p1 }
   0x9   : > { %p4362_p7 = scmp.ge.s32.totalorder %s5425_s19, 2 }
   0xa   : > { %s5492_s25 = scalar_select %p69_p5, %s5413_s16, %s71_s23  }
   0xb   : > { %203 = sbr.rel (%p4362_p7) target bundleno = 190 (0xbe), region = 20 }
  0x10   : > { %206 = sbr.rel (!%p80_p3) target bundleno = 190 (0xbe), region = 24  ;;  %s208_s26 = sand.u32 (%p80_p3), 1, %s5413_s16  }
  0x11   : > { %s4364_s27 = sshll.u32 (%p80_p3), %s5421_s18, 2  ;;  %s4363_s28 = sshll.u32 (%p80_p3), %s208_s26, 10 }
  0x12   : > { %s5500_s5 = scalar_lea.vmem (%p80_p3), %s6825_s1, %s4364_s27  ;;  %s5504_s6 = scalar_lea.vmem (%p80_p3), [#allocation2], %s4363_s28 }
  0x13   : > { %v232_v0 = vld [vmem:[%s5500_s5] sm:$0xf] (%p80_p3)  ;;  %v234_v1 = vld [vmem:[%s5500_s5 + $0x8] sm:$0xf] (%p80_p3)  ;;  %v236_v2 = vld [vmem:[%s5500_s5 + $0x10] sm:$0xf] (%p80_p3) }
  0x14   : > { %233 = vst [vmem:[%s5504_s6] sm:$0xf] (%p80_p3), %v232_v0  ;;  %235 = vst [vmem:[%s5504_s6 + $0x4] sm:$0xf] (%p80_p3), %v234_v1  ;;  %v238_v3 = vld [vmem:[%s5500_s5 + $0x18] sm:$0xf] (%p80_p3) }
  0x15   : > { %v240_v4 = vld [vmem:[%s5500_s5 + $0x20] sm:$0xf]  ;;  %237 = vst [vmem:[%s5504_s6 + $0x8] sm:$0xf] %v236_v2  ;;  %239 = vst [vmem:[%s5504_s6 + $0xc] sm:$0xf] %v238_v3 }
  0x16   : > { %241 = vst [vmem:[%s5504_s6 + $0x10] sm:$0xf] %v240_v4  ;;  %v242_v5 = vld [vmem:[%s5500_s5 + $0x28] sm:$0xf]  ;;  %v244_v6 = vld [vmem:[%s5500_s5 + $0x30] sm:$0xf] }
  0x17   : > { %v246_v7 = vld [vmem:[%s5500_s5 + $0x38] sm:$0xf]  ;;  %243 = vst [vmem:[%s5504_s6 + $0x14] sm:$0xf] %v242_v5  ;;  %245 = vst [vmem:[%s5504_s6 + $0x18] sm:$0xf] %v244_v6 }
  0x18   : > { %247 = vst [vmem:[%s5504_s6 + $0x1c] sm:$0xf] %v246_v7  ;;  %v248_v8 = vld [vmem:[%s5500_s5 + $0x40] sm:$0xf]  ;;  %v250_v9 = vld [vmem:[%s5500_s5 + $0x48] sm:$0xf] }
  0x19   : > { %v252_v10 = vld [vmem:[%s5500_s5 + $0x50] sm:$0xf]  ;;  %249 = vst [vmem:[%s5504_s6 + $0x20] sm:$0xf] %v248_v8  ;;  %251 = vst [vmem:[%s5504_s6 + $0x24] sm:$0xf] %v250_v9 }
  0x1a   : > { %253 = vst [vmem:[%s5504_s6 + $0x28] sm:$0xf] %v252_v10  ;;  %v254_v11 = vld [vmem:[%s5500_s5 + $0x58] sm:$0xf]  ;;  %v256_v12 = vld [vmem:[%s5500_s5 + $0x60] sm:$0xf] }
  0x1b   : > { %v258_v13 = vld [vmem:[%s5500_s5 + $0x68] sm:$0xf]  ;;  %255 = vst [vmem:[%s5504_s6 + $0x2c] sm:$0xf] %v254_v11  ;;  %257 = vst [vmem:[%s5504_s6 + $0x30] sm:$0xf] %v256_v12 }
  0x1c   : > { %259 = vst [vmem:[%s5504_s6 + $0x34] sm:$0xf] %v258_v13  ;;  %v260_v14 = vld [vmem:[%s5500_s5 + $0x70] sm:$0xf]  ;;  %v262_v15 = vld [vmem:[%s5500_s5 + $0x78] sm:$0xf] }
  0x1d   : > { %v264_v16 = vld [vmem:[%s5500_s5 + $0x80] sm:$0xf]  ;;  %261 = vst [vmem:[%s5504_s6 + $0x38] sm:$0xf] %v260_v14  ;;  %263 = vst [vmem:[%s5504_s6 + $0x3c] sm:$0xf] %v262_v15 }
  0x1e   : > { %265 = vst [vmem:[%s5504_s6 + $0x40] sm:$0xf] %v264_v16  ;;  %v266_v17 = vld [vmem:[%s5500_s5 + $0x88] sm:$0xf]  ;;  %v268_v18 = vld [vmem:[%s5500_s5 + $0x90] sm:$0xf] }
  0x1f   : > { %v270_v19 = vld [vmem:[%s5500_s5 + $0x98] sm:$0xf]  ;;  %267 = vst [vmem:[%s5504_s6 + $0x44] sm:$0xf] %v266_v17  ;;  %269 = vst [vmem:[%s5504_s6 + $0x48] sm:$0xf] %v268_v18 }
  0x20   : > { %271 = vst [vmem:[%s5504_s6 + $0x4c] sm:$0xf] %v270_v19  ;;  %v272_v20 = vld [vmem:[%s5500_s5 + $0xa0] sm:$0xf]  ;;  %v274_v21 = vld [vmem:[%s5500_s5 + $0xa8] sm:$0xf] }
  0x21   : > { %v276_v22 = vld [vmem:[%s5500_s5 + $0xb0] sm:$0xf]  ;;  %273 = vst [vmem:[%s5504_s6 + $0x50] sm:$0xf] %v272_v20  ;;  %275 = vst [vmem:[%s5504_s6 + $0x54] sm:$0xf] %v274_v21 }
  0x22   : > { %277 = vst [vmem:[%s5504_s6 + $0x58] sm:$0xf] %v276_v22  ;;  %v278_v23 = vld [vmem:[%s5500_s5 + $0xb8] sm:$0xf]  ;;  %v280_v24 = vld [vmem:[%s5500_s5 + $0xc0] sm:$0xf] }
  0x23   : > { %v282_v25 = vld [vmem:[%s5500_s5 + $0xc8] sm:$0xf]  ;;  %279 = vst [vmem:[%s5504_s6 + $0x5c] sm:$0xf] %v278_v23  ;;  %281 = vst [vmem:[%s5504_s6 + $0x60] sm:$0xf] %v280_v24 }
  0x24   : > { %283 = vst [vmem:[%s5504_s6 + $0x64] sm:$0xf] %v282_v25  ;;  %v284_v26 = vld [vmem:[%s5500_s5 + $0xd0] sm:$0xf]  ;;  %v286_v27 = vld [vmem:[%s5500_s5 + $0xd8] sm:$0xf] }
  0x25   : > { %v288_v28 = vld [vmem:[%s5500_s5 + $0xe0] sm:$0xf]  ;;  %285 = vst [vmem:[%s5504_s6 + $0x68] sm:$0xf] %v284_v26  ;;  %287 = vst [vmem:[%s5504_s6 + $0x6c] sm:$0xf] %v286_v27 }
  0x26   : > { %289 = vst [vmem:[%s5504_s6 + $0x70] sm:$0xf] %v288_v28  ;;  %v290_v29 = vld [vmem:[%s5500_s5 + $0xe8] sm:$0xf]  ;;  %v292_v30 = vld [vmem:[%s5500_s5 + $0xf0] sm:$0xf] }
  0x27   : > { %v294_v31 = vld [vmem:[%s5500_s5 + $0xf8] sm:$0xf]  ;;  %291 = vst [vmem:[%s5504_s6 + $0x74] sm:$0xf] %v290_v29  ;;  %293 = vst [vmem:[%s5504_s6 + $0x78] sm:$0xf] %v292_v30 }
  0x28   : > { %295 = vst [vmem:[%s5504_s6 + $0x7c] sm:$0xf] %v294_v31  ;;  %v296_v32 = vld [vmem:[%s5500_s5 + $0x100] sm:$0xf]  ;;  %v298_v33 = vld [vmem:[%s5500_s5 + $0x108] sm:$0xf] }
  0x29   : > { %v300_v34 = vld [vmem:[%s5500_s5 + $0x110] sm:$0xf]  ;;  %297 = vst [vmem:[%s5504_s6 + $0x80] sm:$0xf] %v296_v32  ;;  %299 = vst [vmem:[%s5504_s6 + $0x84] sm:$0xf] %v298_v33 }
  0x2a   : > { %301 = vst [vmem:[%s5504_s6 + $0x88] sm:$0xf] %v300_v34  ;;  %v302_v35 = vld [vmem:[%s5500_s5 + $0x118] sm:$0xf]  ;;  %v304_v36 = vld [vmem:[%s5500_s5 + $0x120] sm:$0xf] }
  0x2b   : > { %v306_v37 = vld [vmem:[%s5500_s5 + $0x128] sm:$0xf]  ;;  %303 = vst [vmem:[%s5504_s6 + $0x8c] sm:$0xf] %v302_v35  ;;  %305 = vst [vmem:[%s5504_s6 + $0x90] sm:$0xf] %v304_v36 }
  0x2c   : > { %307 = vst [vmem:[%s5504_s6 + $0x94] sm:$0xf] %v306_v37  ;;  %v308_v38 = vld [vmem:[%s5500_s5 + $0x130] sm:$0xf]  ;;  %v310_v39 = vld [vmem:[%s5500_s5 + $0x138] sm:$0xf] }
  0x2d   : > { %v312_v40 = vld [vmem:[%s5500_s5 + $0x140] sm:$0xf]  ;;  %309 = vst [vmem:[%s5504_s6 + $0x98] sm:$0xf] %v308_v38  ;;  %311 = vst [vmem:[%s5504_s6 + $0x9c] sm:$0xf] %v310_v39 }
  0x2e   : > { %313 = vst [vmem:[%s5504_s6 + $0xa0] sm:$0xf] %v312_v40  ;;  %v314_v41 = vld [vmem:[%s5500_s5 + $0x148] sm:$0xf]  ;;  %v316_v42 = vld [vmem:[%s5500_s5 + $0x150] sm:$0xf] }
  0x2f   : > { %v318_v43 = vld [vmem:[%s5500_s5 + $0x158] sm:$0xf]  ;;  %315 = vst [vmem:[%s5504_s6 + $0xa4] sm:$0xf] %v314_v41  ;;  %317 = vst [vmem:[%s5504_s6 + $0xa8] sm:$0xf] %v316_v42 }
  0x30   : > { %319 = vst [vmem:[%s5504_s6 + $0xac] sm:$0xf] %v318_v43  ;;  %v320_v44 = vld [vmem:[%s5500_s5 + $0x160] sm:$0xf]  ;;  %v322_v45 = vld [vmem:[%s5500_s5 + $0x168] sm:$0xf] }
  0x31   : > { %v324_v46 = vld [vmem:[%s5500_s5 + $0x170] sm:$0xf]  ;;  %321 = vst [vmem:[%s5504_s6 + $0xb0] sm:$0xf] %v320_v44  ;;  %323 = vst [vmem:[%s5504_s6 + $0xb4] sm:$0xf] %v322_v45 }
  0x32   : > { %325 = vst [vmem:[%s5504_s6 + $0xb8] sm:$0xf] %v324_v46  ;;  %v326_v47 = vld [vmem:[%s5500_s5 + $0x178] sm:$0xf]  ;;  %v328_v48 = vld [vmem:[%s5500_s5 + $0x180] sm:$0xf] }
  0x33   : > { %v330_v49 = vld [vmem:[%s5500_s5 + $0x188] sm:$0xf]  ;;  %327 = vst [vmem:[%s5504_s6 + $0xbc] sm:$0xf] %v326_v47  ;;  %329 = vst [vmem:[%s5504_s6 + $0xc0] sm:$0xf] %v328_v48 }
  0x34   : > { %331 = vst [vmem:[%s5504_s6 + $0xc4] sm:$0xf] %v330_v49  ;;  %v332_v50 = vld [vmem:[%s5500_s5 + $0x190] sm:$0xf]  ;;  %v334_v51 = vld [vmem:[%s5500_s5 + $0x198] sm:$0xf] }
  0x35   : > { %v336_v52 = vld [vmem:[%s5500_s5 + $0x1a0] sm:$0xf]  ;;  %333 = vst [vmem:[%s5504_s6 + $0xc8] sm:$0xf] %v332_v50  ;;  %335 = vst [vmem:[%s5504_s6 + $0xcc] sm:$0xf] %v334_v51 }
  0x36   : > { %337 = vst [vmem:[%s5504_s6 + $0xd0] sm:$0xf] %v336_v52  ;;  %v338_v53 = vld [vmem:[%s5500_s5 + $0x1a8] sm:$0xf]  ;;  %v340_v54 = vld [vmem:[%s5500_s5 + $0x1b0] sm:$0xf] }
  0x37   : > { %v342_v55 = vld [vmem:[%s5500_s5 + $0x1b8] sm:$0xf]  ;;  %339 = vst [vmem:[%s5504_s6 + $0xd4] sm:$0xf] %v338_v53  ;;  %341 = vst [vmem:[%s5504_s6 + $0xd8] sm:$0xf] %v340_v54 }
  0x38   : > { %343 = vst [vmem:[%s5504_s6 + $0xdc] sm:$0xf] %v342_v55  ;;  %v344_v56 = vld [vmem:[%s5500_s5 + $0x1c0] sm:$0xf]  ;;  %v346_v57 = vld [vmem:[%s5500_s5 + $0x1c8] sm:$0xf] }
  0x39   : > { %v348_v58 = vld [vmem:[%s5500_s5 + $0x1d0] sm:$0xf]  ;;  %345 = vst [vmem:[%s5504_s6 + $0xe0] sm:$0xf] %v344_v56  ;;  %347 = vst [vmem:[%s5504_s6 + $0xe4] sm:$0xf] %v346_v57 }
  0x3a   : > { %349 = vst [vmem:[%s5504_s6 + $0xe8] sm:$0xf] %v348_v58  ;;  %v350_v59 = vld [vmem:[%s5500_s5 + $0x1d8] sm:$0xf]  ;;  %v352_v60 = vld [vmem:[%s5500_s5 + $0x1e0] sm:$0xf] }
  0x3b   : > { %v354_v61 = vld [vmem:[%s5500_s5 + $0x1e8] sm:$0xf]  ;;  %351 = vst [vmem:[%s5504_s6 + $0xec] sm:$0xf] %v350_v59  ;;  %353 = vst [vmem:[%s5504_s6 + $0xf0] sm:$0xf] %v352_v60 }
  0x3c   : > { %355 = vst [vmem:[%s5504_s6 + $0xf4] sm:$0xf] %v354_v61  ;;  %v356_v62 = vld [vmem:[%s5500_s5 + $0x1f0] sm:$0xf]  ;;  %v358_v63 = vld [vmem:[%s5500_s5 + $0x1f8] sm:$0xf] }
  0x3d   : > { %v360_v0 = vld [vmem:[%s5500_s5 + $0x200] sm:$0xf]  ;;  %357 = vst [vmem:[%s5504_s6 + $0xf8] sm:$0xf] %v356_v62  ;;  %359 = vst [vmem:[%s5504_s6 + $0xfc] sm:$0xf] %v358_v63 }
  0x3e   : > { %361 = vst [vmem:[%s5504_s6 + $0x100] sm:$0xf] %v360_v0  ;;  %v362_v1 = vld [vmem:[%s5500_s5 + $0x208] sm:$0xf]  ;;  %v364_v2 = vld [vmem:[%s5500_s5 + $0x210] sm:$0xf] }
  0x3f   : > { %v366_v3 = vld [vmem:[%s5500_s5 + $0x218] sm:$0xf]  ;;  %363 = vst [vmem:[%s5504_s6 + $0x104] sm:$0xf] %v362_v1  ;;  %365 = vst [vmem:[%s5504_s6 + $0x108] sm:$0xf] %v364_v2 }
  0x40   : > { %367 = vst [vmem:[%s5504_s6 + $0x10c] sm:$0xf] %v366_v3  ;;  %v368_v4 = vld [vmem:[%s5500_s5 + $0x220] sm:$0xf]  ;;  %v370_v5 = vld [vmem:[%s5500_s5 + $0x228] sm:$0xf] }
  0x41   : > { %v372_v6 = vld [vmem:[%s5500_s5 + $0x230] sm:$0xf]  ;;  %369 = vst [vmem:[%s5504_s6 + $0x110] sm:$0xf] %v368_v4  ;;  %371 = vst [vmem:[%s5504_s6 + $0x114] sm:$0xf] %v370_v5 }
  0x42   : > { %373 = vst [vmem:[%s5504_s6 + $0x118] sm:$0xf] %v372_v6  ;;  %v374_v7 = vld [vmem:[%s5500_s5 + $0x238] sm:$0xf]  ;;  %v376_v8 = vld [vmem:[%s5500_s5 + $0x240] sm:$0xf] }
  0x43   : > { %v378_v9 = vld [vmem:[%s5500_s5 + $0x248] sm:$0xf]  ;;  %375 = vst [vmem:[%s5504_s6 + $0x11c] sm:$0xf] %v374_v7  ;;  %377 = vst [vmem:[%s5504_s6 + $0x120] sm:$0xf] %v376_v8 }
  0x44   : > { %379 = vst [vmem:[%s5504_s6 + $0x124] sm:$0xf] %v378_v9  ;;  %v380_v10 = vld [vmem:[%s5500_s5 + $0x250] sm:$0xf]  ;;  %v382_v11 = vld [vmem:[%s5500_s5 + $0x258] sm:$0xf] }
  0x45   : > { %v384_v12 = vld [vmem:[%s5500_s5 + $0x260] sm:$0xf]  ;;  %381 = vst [vmem:[%s5504_s6 + $0x128] sm:$0xf] %v380_v10  ;;  %383 = vst [vmem:[%s5504_s6 + $0x12c] sm:$0xf] %v382_v11 }
  0x46   : > { %385 = vst [vmem:[%s5504_s6 + $0x130] sm:$0xf] %v384_v12  ;;  %v386_v13 = vld [vmem:[%s5500_s5 + $0x268] sm:$0xf]  ;;  %v388_v14 = vld [vmem:[%s5500_s5 + $0x270] sm:$0xf] }
  0x47   : > { %v390_v15 = vld [vmem:[%s5500_s5 + $0x278] sm:$0xf]  ;;  %387 = vst [vmem:[%s5504_s6 + $0x134] sm:$0xf] %v386_v13  ;;  %389 = vst [vmem:[%s5504_s6 + $0x138] sm:$0xf] %v388_v14 }
  0x48   : > { %391 = vst [vmem:[%s5504_s6 + $0x13c] sm:$0xf] %v390_v15  ;;  %v392_v16 = vld [vmem:[%s5500_s5 + $0x280] sm:$0xf]  ;;  %v394_v17 = vld [vmem:[%s5500_s5 + $0x288] sm:$0xf] }
  0x49   : > { %v396_v18 = vld [vmem:[%s5500_s5 + $0x290] sm:$0xf]  ;;  %393 = vst [vmem:[%s5504_s6 + $0x140] sm:$0xf] %v392_v16  ;;  %395 = vst [vmem:[%s5504_s6 + $0x144] sm:$0xf] %v394_v17 }
  0x4a   : > { %397 = vst [vmem:[%s5504_s6 + $0x148] sm:$0xf] %v396_v18  ;;  %v398_v19 = vld [vmem:[%s5500_s5 + $0x298] sm:$0xf]  ;;  %v400_v20 = vld [vmem:[%s5500_s5 + $0x2a0] sm:$0xf] }
  0x4b   : > { %v402_v21 = vld [vmem:[%s5500_s5 + $0x2a8] sm:$0xf]  ;;  %399 = vst [vmem:[%s5504_s6 + $0x14c] sm:$0xf] %v398_v19  ;;  %401 = vst [vmem:[%s5504_s6 + $0x150] sm:$0xf] %v400_v20 }
  0x4c   : > { %403 = vst [vmem:[%s5504_s6 + $0x154] sm:$0xf] %v402_v21  ;;  %v404_v22 = vld [vmem:[%s5500_s5 + $0x2b0] sm:$0xf]  ;;  %v406_v23 = vld [vmem:[%s5500_s5 + $0x2b8] sm:$0xf] }
  0x4d   : > { %v408_v24 = vld [vmem:[%s5500_s5 + $0x2c0] sm:$0xf]  ;;  %405 = vst [vmem:[%s5504_s6 + $0x158] sm:$0xf] %v404_v22  ;;  %407 = vst [vmem:[%s5504_s6 + $0x15c] sm:$0xf] %v406_v23 }
  0x4e   : > { %409 = vst [vmem:[%s5504_s6 + $0x160] sm:$0xf] %v408_v24  ;;  %v410_v25 = vld [vmem:[%s5500_s5 + $0x2c8] sm:$0xf]  ;;  %v412_v26 = vld [vmem:[%s5500_s5 + $0x2d0] sm:$0xf] }
  0x4f   : > { %v414_v27 = vld [vmem:[%s5500_s5 + $0x2d8] sm:$0xf]  ;;  %411 = vst [vmem:[%s5504_s6 + $0x164] sm:$0xf] %v410_v25  ;;  %413 = vst [vmem:[%s5504_s6 + $0x168] sm:$0xf] %v412_v26 }
  0x50   : > { %415 = vst [vmem:[%s5504_s6 + $0x16c] sm:$0xf] %v414_v27  ;;  %v416_v28 = vld [vmem:[%s5500_s5 + $0x2e0] sm:$0xf]  ;;  %v418_v29 = vld [vmem:[%s5500_s5 + $0x2e8] sm:$0xf] }
  0x51   : > { %v420_v30 = vld [vmem:[%s5500_s5 + $0x2f0] sm:$0xf]  ;;  %417 = vst [vmem:[%s5504_s6 + $0x170] sm:$0xf] %v416_v28  ;;  %419 = vst [vmem:[%s5504_s6 + $0x174] sm:$0xf] %v418_v29 }
  0x52   : > { %421 = vst [vmem:[%s5504_s6 + $0x178] sm:$0xf] %v420_v30  ;;  %v422_v31 = vld [vmem:[%s5500_s5 + $0x2f8] sm:$0xf]  ;;  %v424_v32 = vld [vmem:[%s5500_s5 + $0x300] sm:$0xf] }
  0x53   : > { %v426_v33 = vld [vmem:[%s5500_s5 + $0x308] sm:$0xf]  ;;  %423 = vst [vmem:[%s5504_s6 + $0x17c] sm:$0xf] %v422_v31  ;;  %425 = vst [vmem:[%s5504_s6 + $0x180] sm:$0xf] %v424_v32 }
  0x54   : > { %427 = vst [vmem:[%s5504_s6 + $0x184] sm:$0xf] %v426_v33  ;;  %v428_v34 = vld [vmem:[%s5500_s5 + $0x310] sm:$0xf]  ;;  %v430_v35 = vld [vmem:[%s5500_s5 + $0x318] sm:$0xf] }
  0x55   : > { %v432_v36 = vld [vmem:[%s5500_s5 + $0x320] sm:$0xf]  ;;  %429 = vst [vmem:[%s5504_s6 + $0x188] sm:$0xf] %v428_v34  ;;  %431 = vst [vmem:[%s5504_s6 + $0x18c] sm:$0xf] %v430_v35 }
  0x56   : > { %433 = vst [vmem:[%s5504_s6 + $0x190] sm:$0xf] %v432_v36  ;;  %v434_v37 = vld [vmem:[%s5500_s5 + $0x328] sm:$0xf]  ;;  %v436_v38 = vld [vmem:[%s5500_s5 + $0x330] sm:$0xf] }
  0x57   : > { %v438_v39 = vld [vmem:[%s5500_s5 + $0x338] sm:$0xf]  ;;  %435 = vst [vmem:[%s5504_s6 + $0x194] sm:$0xf] %v434_v37  ;;  %437 = vst [vmem:[%s5504_s6 + $0x198] sm:$0xf] %v436_v38 }
  0x58   : > { %439 = vst [vmem:[%s5504_s6 + $0x19c] sm:$0xf] %v438_v39  ;;  %v440_v40 = vld [vmem:[%s5500_s5 + $0x340] sm:$0xf]  ;;  %v442_v41 = vld [vmem:[%s5500_s5 + $0x348] sm:$0xf] }
  0x59   : > { %v444_v42 = vld [vmem:[%s5500_s5 + $0x350] sm:$0xf]  ;;  %441 = vst [vmem:[%s5504_s6 + $0x1a0] sm:$0xf] %v440_v40  ;;  %443 = vst [vmem:[%s5504_s6 + $0x1a4] sm:$0xf] %v442_v41 }
  0x5a   : > { %445 = vst [vmem:[%s5504_s6 + $0x1a8] sm:$0xf] %v444_v42  ;;  %v446_v43 = vld [vmem:[%s5500_s5 + $0x358] sm:$0xf]  ;;  %v448_v44 = vld [vmem:[%s5500_s5 + $0x360] sm:$0xf] }
  0x5b   : > { %v450_v45 = vld [vmem:[%s5500_s5 + $0x368] sm:$0xf]  ;;  %447 = vst [vmem:[%s5504_s6 + $0x1ac] sm:$0xf] %v446_v43  ;;  %449 = vst [vmem:[%s5504_s6 + $0x1b0] sm:$0xf] %v448_v44 }
  0x5c   : > { %451 = vst [vmem:[%s5504_s6 + $0x1b4] sm:$0xf] %v450_v45  ;;  %v452_v46 = vld [vmem:[%s5500_s5 + $0x370] sm:$0xf]  ;;  %v454_v47 = vld [vmem:[%s5500_s5 + $0x378] sm:$0xf] }
  0x5d   : > { %v456_v48 = vld [vmem:[%s5500_s5 + $0x380] sm:$0xf]  ;;  %453 = vst [vmem:[%s5504_s6 + $0x1b8] sm:$0xf] %v452_v46  ;;  %455 = vst [vmem:[%s5504_s6 + $0x1bc] sm:$0xf] %v454_v47 }
  0x5e   : > { %457 = vst [vmem:[%s5504_s6 + $0x1c0] sm:$0xf] %v456_v48  ;;  %v458_v49 = vld [vmem:[%s5500_s5 + $0x388] sm:$0xf]  ;;  %v460_v50 = vld [vmem:[%s5500_s5 + $0x390] sm:$0xf] }
  0x5f   : > { %v462_v51 = vld [vmem:[%s5500_s5 + $0x398] sm:$0xf]  ;;  %459 = vst [vmem:[%s5504_s6 + $0x1c4] sm:$0xf] %v458_v49  ;;  %461 = vst [vmem:[%s5504_s6 + $0x1c8] sm:$0xf] %v460_v50 }
  0x60   : > { %463 = vst [vmem:[%s5504_s6 + $0x1cc] sm:$0xf] %v462_v51  ;;  %v464_v52 = vld [vmem:[%s5500_s5 + $0x3a0] sm:$0xf]  ;;  %v466_v53 = vld [vmem:[%s5500_s5 + $0x3a8] sm:$0xf] }
  0x61   : > { %v468_v54 = vld [vmem:[%s5500_s5 + $0x3b0] sm:$0xf]  ;;  %465 = vst [vmem:[%s5504_s6 + $0x1d0] sm:$0xf] %v464_v52  ;;  %467 = vst [vmem:[%s5504_s6 + $0x1d4] sm:$0xf] %v466_v53 }
  0x62   : > { %469 = vst [vmem:[%s5504_s6 + $0x1d8] sm:$0xf] %v468_v54  ;;  %v470_v55 = vld [vmem:[%s5500_s5 + $0x3b8] sm:$0xf]  ;;  %v472_v56 = vld [vmem:[%s5500_s5 + $0x3c0] sm:$0xf] }
  0x63   : > { %v474_v57 = vld [vmem:[%s5500_s5 + $0x3c8] sm:$0xf]  ;;  %471 = vst [vmem:[%s5504_s6 + $0x1dc] sm:$0xf] %v470_v55  ;;  %473 = vst [vmem:[%s5504_s6 + $0x1e0] sm:$0xf] %v472_v56 }
  0x64   : > { %475 = vst [vmem:[%s5504_s6 + $0x1e4] sm:$0xf] %v474_v57  ;;  %v476_v58 = vld [vmem:[%s5500_s5 + $0x3d0] sm:$0xf]  ;;  %v478_v59 = vld [vmem:[%s5500_s5 + $0x3d8] sm:$0xf] }
  0x65   : > { %v480_v60 = vld [vmem:[%s5500_s5 + $0x3e0] sm:$0xf]  ;;  %477 = vst [vmem:[%s5504_s6 + $0x1e8] sm:$0xf] %v476_v58  ;;  %479 = vst [vmem:[%s5504_s6 + $0x1ec] sm:$0xf] %v478_v59 }
  0x66   : > { %481 = vst [vmem:[%s5504_s6 + $0x1f0] sm:$0xf] %v480_v60  ;;  %v482_v61 = vld [vmem:[%s5500_s5 + $0x3e8] sm:$0xf]  ;;  %v484_v62 = vld [vmem:[%s5500_s5 + $0x3f0] sm:$0xf] }
  0x67   : > { %v486_v63 = vld [vmem:[%s5500_s5 + $0x3f8] sm:$0xf]  ;;  %483 = vst [vmem:[%s5504_s6 + $0x1f4] sm:$0xf] %v482_v61  ;;  %485 = vst [vmem:[%s5504_s6 + $0x1f8] sm:$0xf] %v484_v62 }
  0x68   : > { %487 = vst [vmem:[%s5504_s6 + $0x1fc] sm:$0xf] %v486_v63  ;;  %v488_v0 = vld [vmem:[%s5500_s5 + $0x400] sm:$0xf]  ;;  %v490_v1 = vld [vmem:[%s5500_s5 + $0x408] sm:$0xf] }
  0x69   : > { %v492_v2 = vld [vmem:[%s5500_s5 + $0x410] sm:$0xf]  ;;  %489 = vst [vmem:[%s5504_s6 + $0x200] sm:$0xf] %v488_v0  ;;  %491 = vst [vmem:[%s5504_s6 + $0x204] sm:$0xf] %v490_v1 }
  0x6a   : > { %493 = vst [vmem:[%s5504_s6 + $0x208] sm:$0xf] %v492_v2  ;;  %v494_v3 = vld [vmem:[%s5500_s5 + $0x418] sm:$0xf]  ;;  %v496_v4 = vld [vmem:[%s5500_s5 + $0x420] sm:$0xf] }
  0x6b   : > { %v498_v5 = vld [vmem:[%s5500_s5 + $0x428] sm:$0xf]  ;;  %495 = vst [vmem:[%s5504_s6 + $0x20c] sm:$0xf] %v494_v3  ;;  %497 = vst [vmem:[%s5504_s6 + $0x210] sm:$0xf] %v496_v4 }
  0x6c   : > { %499 = vst [vmem:[%s5504_s6 + $0x214] sm:$0xf] %v498_v5  ;;  %v500_v6 = vld [vmem:[%s5500_s5 + $0x430] sm:$0xf]  ;;  %v502_v7 = vld [vmem:[%s5500_s5 + $0x438] sm:$0xf] }
  0x6d   : > { %v504_v8 = vld [vmem:[%s5500_s5 + $0x440] sm:$0xf]  ;;  %501 = vst [vmem:[%s5504_s6 + $0x218] sm:$0xf] %v500_v6  ;;  %503 = vst [vmem:[%s5504_s6 + $0x21c] sm:$0xf] %v502_v7 }
  0x6e   : > { %505 = vst [vmem:[%s5504_s6 + $0x220] sm:$0xf] %v504_v8  ;;  %v506_v9 = vld [vmem:[%s5500_s5 + $0x448] sm:$0xf]  ;;  %v508_v10 = vld [vmem:[%s5500_s5 + $0x450] sm:$0xf] }
  0x6f   : > { %v510_v11 = vld [vmem:[%s5500_s5 + $0x458] sm:$0xf]  ;;  %507 = vst [vmem:[%s5504_s6 + $0x224] sm:$0xf] %v506_v9  ;;  %509 = vst [vmem:[%s5504_s6 + $0x228] sm:$0xf] %v508_v10 }
  0x70   : > { %511 = vst [vmem:[%s5504_s6 + $0x22c] sm:$0xf] %v510_v11  ;;  %v512_v12 = vld [vmem:[%s5500_s5 + $0x460] sm:$0xf]  ;;  %v514_v13 = vld [vmem:[%s5500_s5 + $0x468] sm:$0xf] }
  0x71   : > { %v516_v14 = vld [vmem:[%s5500_s5 + $0x470] sm:$0xf]  ;;  %513 = vst [vmem:[%s5504_s6 + $0x230] sm:$0xf] %v512_v12  ;;  %515 = vst [vmem:[%s5504_s6 + $0x234] sm:$0xf] %v514_v13 }
  0x72   : > { %517 = vst [vmem:[%s5504_s6 + $0x238] sm:$0xf] %v516_v14  ;;  %v518_v15 = vld [vmem:[%s5500_s5 + $0x478] sm:$0xf]  ;;  %v520_v16 = vld [vmem:[%s5500_s5 + $0x480] sm:$0xf] }
  0x73   : > { %v522_v17 = vld [vmem:[%s5500_s5 + $0x488] sm:$0xf]  ;;  %519 = vst [vmem:[%s5504_s6 + $0x23c] sm:$0xf] %v518_v15  ;;  %521 = vst [vmem:[%s5504_s6 + $0x240] sm:$0xf] %v520_v16 }
  0x74   : > { %523 = vst [vmem:[%s5504_s6 + $0x244] sm:$0xf] %v522_v17  ;;  %v524_v18 = vld [vmem:[%s5500_s5 + $0x490] sm:$0xf]  ;;  %v526_v19 = vld [vmem:[%s5500_s5 + $0x498] sm:$0xf] }
  0x75   : > { %v528_v20 = vld [vmem:[%s5500_s5 + $0x4a0] sm:$0xf]  ;;  %525 = vst [vmem:[%s5504_s6 + $0x248] sm:$0xf] %v524_v18  ;;  %527 = vst [vmem:[%s5504_s6 + $0x24c] sm:$0xf] %v526_v19 }
  0x76   : > { %529 = vst [vmem:[%s5504_s6 + $0x250] sm:$0xf] %v528_v20  ;;  %v530_v21 = vld [vmem:[%s5500_s5 + $0x4a8] sm:$0xf]  ;;  %v532_v22 = vld [vmem:[%s5500_s5 + $0x4b0] sm:$0xf] }
  0x77   : > { %v534_v23 = vld [vmem:[%s5500_s5 + $0x4b8] sm:$0xf]  ;;  %531 = vst [vmem:[%s5504_s6 + $0x254] sm:$0xf] %v530_v21  ;;  %533 = vst [vmem:[%s5504_s6 + $0x258] sm:$0xf] %v532_v22 }
  0x78   : > { %535 = vst [vmem:[%s5504_s6 + $0x25c] sm:$0xf] %v534_v23  ;;  %v536_v24 = vld [vmem:[%s5500_s5 + $0x4c0] sm:$0xf]  ;;  %v538_v25 = vld [vmem:[%s5500_s5 + $0x4c8] sm:$0xf] }
  0x79   : > { %v540_v26 = vld [vmem:[%s5500_s5 + $0x4d0] sm:$0xf]  ;;  %537 = vst [vmem:[%s5504_s6 + $0x260] sm:$0xf] %v536_v24  ;;  %539 = vst [vmem:[%s5504_s6 + $0x264] sm:$0xf] %v538_v25 }
  0x7a   : > { %541 = vst [vmem:[%s5504_s6 + $0x268] sm:$0xf] %v540_v26  ;;  %v542_v27 = vld [vmem:[%s5500_s5 + $0x4d8] sm:$0xf]  ;;  %v544_v28 = vld [vmem:[%s5500_s5 + $0x4e0] sm:$0xf] }
  0x7b   : > { %v546_v29 = vld [vmem:[%s5500_s5 + $0x4e8] sm:$0xf]  ;;  %543 = vst [vmem:[%s5504_s6 + $0x26c] sm:$0xf] %v542_v27  ;;  %545 = vst [vmem:[%s5504_s6 + $0x270] sm:$0xf] %v544_v28 }
  0x7c   : > { %547 = vst [vmem:[%s5504_s6 + $0x274] sm:$0xf] %v546_v29  ;;  %v548_v30 = vld [vmem:[%s5500_s5 + $0x4f0] sm:$0xf]  ;;  %v550_v31 = vld [vmem:[%s5500_s5 + $0x4f8] sm:$0xf] }
  0x7d   : > { %v552_v32 = vld [vmem:[%s5500_s5 + $0x500] sm:$0xf]  ;;  %549 = vst [vmem:[%s5504_s6 + $0x278] sm:$0xf] %v548_v30  ;;  %551 = vst [vmem:[%s5504_s6 + $0x27c] sm:$0xf] %v550_v31 }
  0x7e   : > { %553 = vst [vmem:[%s5504_s6 + $0x280] sm:$0xf] %v552_v32  ;;  %v554_v33 = vld [vmem:[%s5500_s5 + $0x508] sm:$0xf]  ;;  %v556_v34 = vld [vmem:[%s5500_s5 + $0x510] sm:$0xf] }
  0x7f   : > { %v558_v35 = vld [vmem:[%s5500_s5 + $0x518] sm:$0xf]  ;;  %555 = vst [vmem:[%s5504_s6 + $0x284] sm:$0xf] %v554_v33  ;;  %557 = vst [vmem:[%s5504_s6 + $0x288] sm:$0xf] %v556_v34 }
  0x80   : > { %559 = vst [vmem:[%s5504_s6 + $0x28c] sm:$0xf] %v558_v35  ;;  %v560_v36 = vld [vmem:[%s5500_s5 + $0x520] sm:$0xf]  ;;  %v562_v37 = vld [vmem:[%s5500_s5 + $0x528] sm:$0xf] }
  0x81   : > { %v564_v38 = vld [vmem:[%s5500_s5 + $0x530] sm:$0xf]  ;;  %561 = vst [vmem:[%s5504_s6 + $0x290] sm:$0xf] %v560_v36  ;;  %563 = vst [vmem:[%s5504_s6 + $0x294] sm:$0xf] %v562_v37 }
  0x82   : > { %565 = vst [vmem:[%s5504_s6 + $0x298] sm:$0xf] %v564_v38  ;;  %v566_v39 = vld [vmem:[%s5500_s5 + $0x538] sm:$0xf]  ;;  %v568_v40 = vld [vmem:[%s5500_s5 + $0x540] sm:$0xf] }
  0x83   : > { %v570_v41 = vld [vmem:[%s5500_s5 + $0x548] sm:$0xf]  ;;  %567 = vst [vmem:[%s5504_s6 + $0x29c] sm:$0xf] %v566_v39  ;;  %569 = vst [vmem:[%s5504_s6 + $0x2a0] sm:$0xf] %v568_v40 }
  0x84   : > { %571 = vst [vmem:[%s5504_s6 + $0x2a4] sm:$0xf] %v570_v41  ;;  %v572_v42 = vld [vmem:[%s5500_s5 + $0x550] sm:$0xf]  ;;  %v574_v43 = vld [vmem:[%s5500_s5 + $0x558] sm:$0xf] }
  0x85   : > { %v576_v44 = vld [vmem:[%s5500_s5 + $0x560] sm:$0xf]  ;;  %573 = vst [vmem:[%s5504_s6 + $0x2a8] sm:$0xf] %v572_v42  ;;  %575 = vst [vmem:[%s5504_s6 + $0x2ac] sm:$0xf] %v574_v43 }
  0x86   : > { %577 = vst [vmem:[%s5504_s6 + $0x2b0] sm:$0xf] %v576_v44  ;;  %v578_v45 = vld [vmem:[%s5500_s5 + $0x568] sm:$0xf]  ;;  %v580_v46 = vld [vmem:[%s5500_s5 + $0x570] sm:$0xf] }
  0x87   : > { %v582_v47 = vld [vmem:[%s5500_s5 + $0x578] sm:$0xf]  ;;  %579 = vst [vmem:[%s5504_s6 + $0x2b4] sm:$0xf] %v578_v45  ;;  %581 = vst [vmem:[%s5504_s6 + $0x2b8] sm:$0xf] %v580_v46 }
  0x88   : > { %583 = vst [vmem:[%s5504_s6 + $0x2bc] sm:$0xf] %v582_v47  ;;  %v584_v48 = vld [vmem:[%s5500_s5 + $0x580] sm:$0xf]  ;;  %v586_v49 = vld [vmem:[%s5500_s5 + $0x588] sm:$0xf] }
  0x89   : > { %v588_v50 = vld [vmem:[%s5500_s5 + $0x590] sm:$0xf]  ;;  %585 = vst [vmem:[%s5504_s6 + $0x2c0] sm:$0xf] %v584_v48  ;;  %587 = vst [vmem:[%s5504_s6 + $0x2c4] sm:$0xf] %v586_v49 }
  0x8a   : > { %589 = vst [vmem:[%s5504_s6 + $0x2c8] sm:$0xf] %v588_v50  ;;  %v590_v51 = vld [vmem:[%s5500_s5 + $0x598] sm:$0xf]  ;;  %v592_v52 = vld [vmem:[%s5500_s5 + $0x5a0] sm:$0xf] }
  0x8b   : > { %v594_v53 = vld [vmem:[%s5500_s5 + $0x5a8] sm:$0xf]  ;;  %591 = vst [vmem:[%s5504_s6 + $0x2cc] sm:$0xf] %v590_v51  ;;  %593 = vst [vmem:[%s5504_s6 + $0x2d0] sm:$0xf] %v592_v52 }
  0x8c   : > { %595 = vst [vmem:[%s5504_s6 + $0x2d4] sm:$0xf] %v594_v53  ;;  %v596_v54 = vld [vmem:[%s5500_s5 + $0x5b0] sm:$0xf]  ;;  %v598_v55 = vld [vmem:[%s5500_s5 + $0x5b8] sm:$0xf] }
  0x8d   : > { %v600_v56 = vld [vmem:[%s5500_s5 + $0x5c0] sm:$0xf]  ;;  %597 = vst [vmem:[%s5504_s6 + $0x2d8] sm:$0xf] %v596_v54  ;;  %599 = vst [vmem:[%s5504_s6 + $0x2dc] sm:$0xf] %v598_v55 }
  0x8e   : > { %601 = vst [vmem:[%s5504_s6 + $0x2e0] sm:$0xf] %v600_v56  ;;  %v602_v57 = vld [vmem:[%s5500_s5 + $0x5c8] sm:$0xf]  ;;  %v604_v58 = vld [vmem:[%s5500_s5 + $0x5d0] sm:$0xf] }
  0x8f   : > { %v606_v59 = vld [vmem:[%s5500_s5 + $0x5d8] sm:$0xf]  ;;  %603 = vst [vmem:[%s5504_s6 + $0x2e4] sm:$0xf] %v602_v57  ;;  %605 = vst [vmem:[%s5504_s6 + $0x2e8] sm:$0xf] %v604_v58 }
  0x90   : > { %607 = vst [vmem:[%s5504_s6 + $0x2ec] sm:$0xf] %v606_v59  ;;  %v608_v60 = vld [vmem:[%s5500_s5 + $0x5e0] sm:$0xf]  ;;  %v610_v61 = vld [vmem:[%s5500_s5 + $0x5e8] sm:$0xf] }
  0x91   : > { %v612_v62 = vld [vmem:[%s5500_s5 + $0x5f0] sm:$0xf]  ;;  %609 = vst [vmem:[%s5504_s6 + $0x2f0] sm:$0xf] %v608_v60  ;;  %611 = vst [vmem:[%s5504_s6 + $0x2f4] sm:$0xf] %v610_v61 }
  0x92   : > { %613 = vst [vmem:[%s5504_s6 + $0x2f8] sm:$0xf] %v612_v62  ;;  %v614_v63 = vld [vmem:[%s5500_s5 + $0x5f8] sm:$0xf]  ;;  %v616_v0 = vld [vmem:[%s5500_s5 + $0x600] sm:$0xf] }
  0x93   : > { %v618_v1 = vld [vmem:[%s5500_s5 + $0x608] sm:$0xf]  ;;  %615 = vst [vmem:[%s5504_s6 + $0x2fc] sm:$0xf] %v614_v63  ;;  %617 = vst [vmem:[%s5504_s6 + $0x300] sm:$0xf] %v616_v0 }
  0x94   : > { %619 = vst [vmem:[%s5504_s6 + $0x304] sm:$0xf] %v618_v1  ;;  %v620_v2 = vld [vmem:[%s5500_s5 + $0x610] sm:$0xf]  ;;  %v622_v3 = vld [vmem:[%s5500_s5 + $0x618] sm:$0xf] }
  0x95   : > { %v624_v4 = vld [vmem:[%s5500_s5 + $0x620] sm:$0xf]  ;;  %621 = vst [vmem:[%s5504_s6 + $0x308] sm:$0xf] %v620_v2  ;;  %623 = vst [vmem:[%s5504_s6 + $0x30c] sm:$0xf] %v622_v3 }
  0x96   : > { %625 = vst [vmem:[%s5504_s6 + $0x310] sm:$0xf] %v624_v4  ;;  %v626_v5 = vld [vmem:[%s5500_s5 + $0x628] sm:$0xf]  ;;  %v628_v6 = vld [vmem:[%s5500_s5 + $0x630] sm:$0xf] }
  0x97   : > { %v630_v7 = vld [vmem:[%s5500_s5 + $0x638] sm:$0xf]  ;;  %627 = vst [vmem:[%s5504_s6 + $0x314] sm:$0xf] %v626_v5  ;;  %629 = vst [vmem:[%s5504_s6 + $0x318] sm:$0xf] %v628_v6 }
  0x98   : > { %631 = vst [vmem:[%s5504_s6 + $0x31c] sm:$0xf] %v630_v7  ;;  %v632_v8 = vld [vmem:[%s5500_s5 + $0x640] sm:$0xf]  ;;  %v634_v9 = vld [vmem:[%s5500_s5 + $0x648] sm:$0xf] }
  0x99   : > { %v636_v10 = vld [vmem:[%s5500_s5 + $0x650] sm:$0xf]  ;;  %633 = vst [vmem:[%s5504_s6 + $0x320] sm:$0xf] %v632_v8  ;;  %635 = vst [vmem:[%s5504_s6 + $0x324] sm:$0xf] %v634_v9 }
  0x9a   : > { %637 = vst [vmem:[%s5504_s6 + $0x328] sm:$0xf] %v636_v10  ;;  %v638_v11 = vld [vmem:[%s5500_s5 + $0x658] sm:$0xf]  ;;  %v640_v12 = vld [vmem:[%s5500_s5 + $0x660] sm:$0xf] }
  0x9b   : > { %v642_v13 = vld [vmem:[%s5500_s5 + $0x668] sm:$0xf]  ;;  %639 = vst [vmem:[%s5504_s6 + $0x32c] sm:$0xf] %v638_v11  ;;  %641 = vst [vmem:[%s5504_s6 + $0x330] sm:$0xf] %v640_v12 }
  0x9c   : > { %643 = vst [vmem:[%s5504_s6 + $0x334] sm:$0xf] %v642_v13  ;;  %v644_v14 = vld [vmem:[%s5500_s5 + $0x670] sm:$0xf]  ;;  %v646_v15 = vld [vmem:[%s5500_s5 + $0x678] sm:$0xf] }
  0x9d   : > { %v648_v16 = vld [vmem:[%s5500_s5 + $0x680] sm:$0xf]  ;;  %645 = vst [vmem:[%s5504_s6 + $0x338] sm:$0xf] %v644_v14  ;;  %647 = vst [vmem:[%s5504_s6 + $0x33c] sm:$0xf] %v646_v15 }
  0x9e   : > { %649 = vst [vmem:[%s5504_s6 + $0x340] sm:$0xf] %v648_v16  ;;  %v650_v17 = vld [vmem:[%s5500_s5 + $0x688] sm:$0xf]  ;;  %v652_v18 = vld [vmem:[%s5500_s5 + $0x690] sm:$0xf] }
  0x9f   : > { %v654_v19 = vld [vmem:[%s5500_s5 + $0x698] sm:$0xf]  ;;  %651 = vst [vmem:[%s5504_s6 + $0x344] sm:$0xf] %v650_v17  ;;  %653 = vst [vmem:[%s5504_s6 + $0x348] sm:$0xf] %v652_v18 }
  0xa0   : > { %655 = vst [vmem:[%s5504_s6 + $0x34c] sm:$0xf] %v654_v19  ;;  %v656_v20 = vld [vmem:[%s5500_s5 + $0x6a0] sm:$0xf]  ;;  %v658_v21 = vld [vmem:[%s5500_s5 + $0x6a8] sm:$0xf] }
  0xa1   : > { %v660_v22 = vld [vmem:[%s5500_s5 + $0x6b0] sm:$0xf]  ;;  %657 = vst [vmem:[%s5504_s6 + $0x350] sm:$0xf] %v656_v20  ;;  %659 = vst [vmem:[%s5504_s6 + $0x354] sm:$0xf] %v658_v21 }
  0xa2   : > { %661 = vst [vmem:[%s5504_s6 + $0x358] sm:$0xf] %v660_v22  ;;  %v662_v23 = vld [vmem:[%s5500_s5 + $0x6b8] sm:$0xf]  ;;  %v664_v24 = vld [vmem:[%s5500_s5 + $0x6c0] sm:$0xf] }
  0xa3   : > { %v666_v25 = vld [vmem:[%s5500_s5 + $0x6c8] sm:$0xf]  ;;  %663 = vst [vmem:[%s5504_s6 + $0x35c] sm:$0xf] %v662_v23  ;;  %665 = vst [vmem:[%s5504_s6 + $0x360] sm:$0xf] %v664_v24 }
  0xa4   : > { %667 = vst [vmem:[%s5504_s6 + $0x364] sm:$0xf] %v666_v25  ;;  %v668_v26 = vld [vmem:[%s5500_s5 + $0x6d0] sm:$0xf]  ;;  %v670_v27 = vld [vmem:[%s5500_s5 + $0x6d8] sm:$0xf] }
  0xa5   : > { %v672_v28 = vld [vmem:[%s5500_s5 + $0x6e0] sm:$0xf]  ;;  %669 = vst [vmem:[%s5504_s6 + $0x368] sm:$0xf] %v668_v26  ;;  %671 = vst [vmem:[%s5504_s6 + $0x36c] sm:$0xf] %v670_v27 }
  0xa6   : > { %673 = vst [vmem:[%s5504_s6 + $0x370] sm:$0xf] %v672_v28  ;;  %v674_v29 = vld [vmem:[%s5500_s5 + $0x6e8] sm:$0xf]  ;;  %v676_v30 = vld [vmem:[%s5500_s5 + $0x6f0] sm:$0xf] }
  0xa7   : > { %v678_v31 = vld [vmem:[%s5500_s5 + $0x6f8] sm:$0xf]  ;;  %675 = vst [vmem:[%s5504_s6 + $0x374] sm:$0xf] %v674_v29  ;;  %677 = vst [vmem:[%s5504_s6 + $0x378] sm:$0xf] %v676_v30 }
  0xa8   : > { %679 = vst [vmem:[%s5504_s6 + $0x37c] sm:$0xf] %v678_v31  ;;  %v680_v32 = vld [vmem:[%s5500_s5 + $0x700] sm:$0xf]  ;;  %v682_v33 = vld [vmem:[%s5500_s5 + $0x708] sm:$0xf] }
  0xa9   : > { %v684_v34 = vld [vmem:[%s5500_s5 + $0x710] sm:$0xf]  ;;  %681 = vst [vmem:[%s5504_s6 + $0x380] sm:$0xf] %v680_v32  ;;  %683 = vst [vmem:[%s5504_s6 + $0x384] sm:$0xf] %v682_v33 }
  0xaa   : > { %685 = vst [vmem:[%s5504_s6 + $0x388] sm:$0xf] %v684_v34  ;;  %v686_v35 = vld [vmem:[%s5500_s5 + $0x718] sm:$0xf]  ;;  %v688_v36 = vld [vmem:[%s5500_s5 + $0x720] sm:$0xf] }
  0xab   : > { %v690_v37 = vld [vmem:[%s5500_s5 + $0x728] sm:$0xf]  ;;  %687 = vst [vmem:[%s5504_s6 + $0x38c] sm:$0xf] %v686_v35  ;;  %689 = vst [vmem:[%s5504_s6 + $0x390] sm:$0xf] %v688_v36 }
  0xac   : > { %691 = vst [vmem:[%s5504_s6 + $0x394] sm:$0xf] %v690_v37  ;;  %v692_v38 = vld [vmem:[%s5500_s5 + $0x730] sm:$0xf]  ;;  %v694_v39 = vld [vmem:[%s5500_s5 + $0x738] sm:$0xf] }
  0xad   : > { %v696_v40 = vld [vmem:[%s5500_s5 + $0x740] sm:$0xf]  ;;  %693 = vst [vmem:[%s5504_s6 + $0x398] sm:$0xf] %v692_v38  ;;  %695 = vst [vmem:[%s5504_s6 + $0x39c] sm:$0xf] %v694_v39 }
  0xae   : > { %697 = vst [vmem:[%s5504_s6 + $0x3a0] sm:$0xf] %v696_v40  ;;  %v698_v41 = vld [vmem:[%s5500_s5 + $0x748] sm:$0xf]  ;;  %v700_v42 = vld [vmem:[%s5500_s5 + $0x750] sm:$0xf] }
  0xaf   : > { %v702_v43 = vld [vmem:[%s5500_s5 + $0x758] sm:$0xf]  ;;  %699 = vst [vmem:[%s5504_s6 + $0x3a4] sm:$0xf] %v698_v41  ;;  %701 = vst [vmem:[%s5504_s6 + $0x3a8] sm:$0xf] %v700_v42 }
  0xb0   : > { %703 = vst [vmem:[%s5504_s6 + $0x3ac] sm:$0xf] %v702_v43  ;;  %v704_v44 = vld [vmem:[%s5500_s5 + $0x760] sm:$0xf]  ;;  %v706_v45 = vld [vmem:[%s5500_s5 + $0x768] sm:$0xf] }
  0xb1   : > { %v708_v46 = vld [vmem:[%s5500_s5 + $0x770] sm:$0xf]  ;;  %705 = vst [vmem:[%s5504_s6 + $0x3b0] sm:$0xf] %v704_v44  ;;  %707 = vst [vmem:[%s5504_s6 + $0x3b4] sm:$0xf] %v706_v45 }
  0xb2   : > { %709 = vst [vmem:[%s5504_s6 + $0x3b8] sm:$0xf] %v708_v46  ;;  %v710_v47 = vld [vmem:[%s5500_s5 + $0x778] sm:$0xf]  ;;  %v712_v48 = vld [vmem:[%s5500_s5 + $0x780] sm:$0xf] }
  0xb3   : > { %v714_v49 = vld [vmem:[%s5500_s5 + $0x788] sm:$0xf]  ;;  %711 = vst [vmem:[%s5504_s6 + $0x3bc] sm:$0xf] %v710_v47  ;;  %713 = vst [vmem:[%s5504_s6 + $0x3c0] sm:$0xf] %v712_v48 }
  0xb4   : > { %715 = vst [vmem:[%s5504_s6 + $0x3c4] sm:$0xf] %v714_v49  ;;  %v716_v50 = vld [vmem:[%s5500_s5 + $0x790] sm:$0xf]  ;;  %v718_v51 = vld [vmem:[%s5500_s5 + $0x798] sm:$0xf] }
  0xb5   : > { %v720_v52 = vld [vmem:[%s5500_s5 + $0x7a0] sm:$0xf]  ;;  %717 = vst [vmem:[%s5504_s6 + $0x3c8] sm:$0xf] %v716_v50  ;;  %719 = vst [vmem:[%s5504_s6 + $0x3cc] sm:$0xf] %v718_v51 }
  0xb6   : > { %721 = vst [vmem:[%s5504_s6 + $0x3d0] sm:$0xf] %v720_v52  ;;  %v722_v53 = vld [vmem:[%s5500_s5 + $0x7a8] sm:$0xf]  ;;  %v724_v54 = vld [vmem:[%s5500_s5 + $0x7b0] sm:$0xf] }
  0xb7   : > { %v726_v55 = vld [vmem:[%s5500_s5 + $0x7b8] sm:$0xf]  ;;  %723 = vst [vmem:[%s5504_s6 + $0x3d4] sm:$0xf] %v722_v53  ;;  %725 = vst [vmem:[%s5504_s6 + $0x3d8] sm:$0xf] %v724_v54 }
  0xb8   : > { %727 = vst [vmem:[%s5504_s6 + $0x3dc] sm:$0xf] %v726_v55  ;;  %v728_v56 = vld [vmem:[%s5500_s5 + $0x7c0] sm:$0xf]  ;;  %v730_v57 = vld [vmem:[%s5500_s5 + $0x7c8] sm:$0xf] }
  0xb9   : > { %v732_v58 = vld [vmem:[%s5500_s5 + $0x7d0] sm:$0xf]  ;;  %729 = vst [vmem:[%s5504_s6 + $0x3e0] sm:$0xf] %v728_v56  ;;  %731 = vst [vmem:[%s5504_s6 + $0x3e4] sm:$0xf] %v730_v57 }
  0xba   : > { %733 = vst [vmem:[%s5504_s6 + $0x3e8] sm:$0xf] %v732_v58  ;;  %v734_v59 = vld [vmem:[%s5500_s5 + $0x7d8] sm:$0xf]  ;;  %v736_v60 = vld [vmem:[%s5500_s5 + $0x7e0] sm:$0xf] }
  0xbb   : > { %v738_v61 = vld [vmem:[%s5500_s5 + $0x7e8] sm:$0xf]  ;;  %735 = vst [vmem:[%s5504_s6 + $0x3ec] sm:$0xf] %v734_v59  ;;  %737 = vst [vmem:[%s5504_s6 + $0x3f0] sm:$0xf] %v736_v60 }
  0xbc   : > { %739 = vst [vmem:[%s5504_s6 + $0x3f4] sm:$0xf] %v738_v61  ;;  %v740_v62 = vld [vmem:[%s5500_s5 + $0x7f0] sm:$0xf]  ;;  %v742_v63 = vld [vmem:[%s5500_s5 + $0x7f8] sm:$0xf] }
  0xbd   : > { %741 = vst [vmem:[%s5504_s6 + $0x3f8] sm:$0xf] %v740_v62  ;;  %743 = vst [vmem:[%s5504_s6 + $0x3fc] sm:$0xf] %v742_v63 }
  0xbe PF: > { %p4365_p8 = scmp.ge.s32.totalorder %s5425_s19, 1  ;;  %p1278_p9 = scmp.lt.s32.totalorder %s5425_s19, 3 }
  0xc0   : > { %p1279_p10 = pnand %p4365_p8, %p1278_p9 }
  0xc2   : > { %1282 = sbr.rel (%p1279_p10) target bundleno = 706 (0x2c2), region = 65 }
  0xc7   : > { %s1285_s7 = sand.u32 1, %s5409_s15   ;;  %v6022_v0 = vld [vmem:[%s6824_s0] sm:$0xff]  ;;  %v6032_v2 = vld [vmem:[%s6824_s0 + $0x8] sm:$0xff]  ;;  %p1349_p11 = scmp.lt.s32.totalorder %s5417_s17, 1 }
  0xc8   : > { %v6027_v1 = vld [vmem:[%s6824_s0 + $0x40] sm:$0xff]  ;;  %s4366_s14 = sshll.u32 %s1285_s7, 10  ;;  %v6041_v4 = vld [vmem:[%s6824_s0 + $0x48] sm:$0xff]  ;;  %s4367_s29 = sshll.u32 %s1285_s7, 6 }
  0xc9   : > { %v4369_v3 = vcombine.high %v6022_v0, %v6027_v1  ;;  %v4371_v5 = vcombine.high %v6032_v2, %v6041_v4  ;;  %s6045_s23 = scalar_lea.vmem [#allocation2], %s4366_s14  ;;  %v1378_v35 = vld [vmem:[%s6824_s0 + $0x80] sm:$0xff]  ;;  %v1379_v38 = vld [vmem:[%s6824_s0 + $0x88] sm:$0xff]  ;;  %v4368_v42 = vcombine.low %v6022_v0, %v6027_v1  ;;  %v4370_v43 = vcombine.low %v6032_v2, %v6041_v4  ;;  %s6735_s15 = scalar_lea.vmem [#allocation3], %s4367_s29 }
  0xca   : > { %v5259_v6 = vld [vmem:[%s6045_s23 + $0x78] sm:$0xff]   ;;  %v5263_v10 = vld [vmem:[%s6045_s23 + $0x70] sm:$0xff]   ;;  %v5267_v14 = vld [vmem:[%s6045_s23 + $0x68] sm:$0xff]   ;;  %s1350_s7 = scalar_select %p1349_p11, %s5417_s17, 1 }
  0xcb   : > { %3186 = vmatprep.mubr.bf16.mxu0 %v4369_v3  ;;  %v5260_v7 = vld [vmem:[%s6045_s23 + $0xf8] sm:$0xff]   ;;  %3283 = vmatprep.mubr.bf16.mxu1 %v4371_v5  ;;  %v5264_v11 = vld [vmem:[%s6045_s23 + $0xf0] sm:$0xff]   ;;  %v5268_v15 = vld [vmem:[%s6045_s23 + $0xe8] sm:$0xff]   ;;  %s4641_s11 = sshll.u32 (%p5487_p6), %s5417_s17, 2 }
  0xcc   : > { %4707 = vmatprep.subr.bf16.mxu0 %v5259_v6  ;;  %v5261_v8 = vld [vmem:[%s6045_s23 + $0x38] sm:$0xff]   ;;  %4771 = vmatprep.subr.bf16.mxu1 %v5260_v7  ;;  %v5265_v12 = vld [vmem:[%s6045_s23 + $0x30] sm:$0xff]   ;;  %v5269_v16 = vld [vmem:[%s6045_s23 + $0x28] sm:$0xff]   ;;  %s1353_s6 = scalar_lea.vmem %s6827_s3, %s1350_s7  ;;  %s1360_s10 = scalar_lea.vmem %s6828_s4, %s1350_s7 }
  0xcd   : > { %v5262_v9 = vld [vmem:[%s6045_s23 + $0xb8] sm:$0xff]   ;;  %4708 = vmatpush3.bf16.msra.mxu0 %v5261_v8  ;;  %v5266_v13 = vld [vmem:[%s6045_s23 + $0xb0] sm:$0xff]   ;;  %v5270_v17 = vld [vmem:[%s6045_s23 + $0xa8] sm:$0xff]   ;;  %s4095_s13 = scalar_lea.vmem (%p5487_p6), %s6826_s2, %s4641_s11 }
  0xce   : > { %4772 = vmatpush3.bf16.msra.mxu1 %v5262_v9  ;;  %4709 = vmatprep.subr.bf16.mxu0 %v5263_v10  ;;  %v5271_v18 = vld [vmem:[%s6045_s23 + $0x60] sm:$0xff]   ;;  %v5275_v22 = vld [vmem:[%s6045_s23 + $0x58] sm:$0xff]   ;;  %v5279_v26 = vld [vmem:[%s6045_s23 + $0x50] sm:$0xff]  }
  0xcf   : > { %4773 = vmatprep.subr.bf16.mxu1 %v5264_v11  ;;  %v5272_v19 = vld [vmem:[%s6045_s23 + $0xe0] sm:$0xff]   ;;  %v5276_v23 = vld [vmem:[%s6045_s23 + $0xd8] sm:$0xff]   ;;  %v5280_v27 = vld [vmem:[%s6045_s23 + $0xd0] sm:$0xff]  }
  0xd0   : > { %v5273_v20 = vld [vmem:[%s6045_s23 + $0x20] sm:$0xff]   ;;  %v5277_v24 = vld [vmem:[%s6045_s23 + $0x18] sm:$0xff]   ;;  %v5281_v28 = vld [vmem:[%s6045_s23 + $0x10] sm:$0xff]  }
  0xd1   : > { %4710 = vmatpush3.bf16.msra.mxu0 %v5265_v12  ;;  %v5274_v21 = vld [vmem:[%s6045_s23 + $0xa0] sm:$0xff]   ;;  %v5278_v25 = vld [vmem:[%s6045_s23 + $0x98] sm:$0xff]   ;;  %v5282_v29 = vld [vmem:[%s6045_s23 + $0x90] sm:$0xff]  }
  0xd2   : > { %4774 = vmatpush3.bf16.msra.mxu1 %v5266_v13  ;;  %4711 = vmatprep.subr.bf16.mxu0 %v5267_v14  ;;  %v5283_v30 = vld [vmem:[%s6045_s23 + $0x48] sm:$0xff]   ;;  %v5287_v34 = vld [vmem:[%s6045_s23 + $0x40] sm:$0xff]   ;;  %v5291_v44 = vld [vmem:[%s6045_s23 + $0x178] sm:$0xff]  }
  0xd3   : > { %4775 = vmatprep.subr.bf16.mxu1 %v5268_v15  ;;  %v5284_v31 = vld [vmem:[%s6045_s23 + $0xc8] sm:$0xff]   ;;  %v1386_v36 = vld [vmem:[%s6824_s0 + $0xc0] sm:$0xff]  ;;  %v5292_v45 = vld [vmem:[%s6045_s23 + $0x138] sm:$0xff]  }
  0xd4   : > { %v5285_v32 = vld [vmem:[%s6045_s23 + $0x8] sm:$0xff]   ;;  %v5288_v37 = vld [vmem:[%s6045_s23 + $0xc0] sm:$0xff]   ;;  %v4385_v46 = vcombine.high %v1378_v35, %v1386_v36  ;;  %v5293_v47 = vld [vmem:[%s6045_s23 + $0x1f8] sm:$0xff]   ;;  %v4384_v54 = vcombine.low %v1378_v35, %v1386_v36 }
  0xd5   : > { %4712 = vmatpush3.bf16.msra.mxu0 %v5269_v16  ;;  %v5286_v33 = vld [vmem:[%s6045_s23 + $0x88] sm:$0xff]   ;;  %v5289_v40 = vld [vmem:[%s6045_s23] sm:$0xff]   ;;  %v5294_v49 = vld [vmem:[%s6045_s23 + $0x1b8] sm:$0xff]  }
  0xd6   : > { %4776 = vmatpush3.bf16.msra.mxu1 %v5270_v17  ;;  %4713 = vmatprep.subr.bf16.mxu0 %v5271_v18  ;;  %v1387_v39 = vld [vmem:[%s6824_s0 + $0xc8] sm:$0xff]  ;;  %v5290_v41 = vld [vmem:[%s6045_s23 + $0x80] sm:$0xff]   ;;  %v5295_v50 = vld [vmem:[%s6045_s23 + $0x170] sm:$0xff]  }
  0xd7   : > { %4777 = vmatprep.subr.bf16.mxu1 %v5272_v19  ;;  %v4387_v48 = vcombine.high %v1379_v38, %v1387_v39  ;;  %v1394_v51 = vld [vmem:[%s6824_s0 + $0x100] sm:$0xff]  ;;  %v5296_v52 = vld [vmem:[%s6045_s23 + $0x130] sm:$0xff]   ;;  %v4386_v56 = vcombine.low %v1379_v38, %v1387_v39  ;;  %v1395_v58 = vld [vmem:[%s6824_s0 + $0x108] sm:$0xff] }
  0xd8   : > { %v5297_v53 = vld [vmem:[%s6045_s23 + $0x1f0] sm:$0xff]   ;;  %v1402_v57 = vld [vmem:[%s6824_s0 + $0x140] sm:$0xff]  ;;  %v1403_v59 = vld [vmem:[%s6824_s0 + $0x148] sm:$0xff] }
  0xd9   : > { %4714 = vmatpush3.bf16.msra.mxu0 %v5273_v20  ;;  %v5298_v55 = vld [vmem:[%s6045_s23 + $0x1b0] sm:$0xff]   ;;  %v4401_v60 = vcombine.high %v1394_v51, %v1402_v57  ;;  %v4403_v61 = vcombine.high %v1395_v58, %v1403_v59  ;;  %v5299_v62 = vld [vmem:[%s6045_s23 + $0x168] sm:$0xff]   ;;  %v1410_v2 = vld [vmem:[%s6824_s0 + $0x180] sm:$0xff]  ;;  %v4400_v6 = vcombine.low %v1394_v51, %v1402_v57  ;;  %v4402_v8 = vcombine.low %v1395_v58, %v1403_v59 }
  0xda   : > { %4778 = vmatpush3.bf16.msra.mxu1 %v5274_v21  ;;  %4715 = vmatprep.subr.bf16.mxu0 %v5275_v22  ;;  %v5300_v63 = vld [vmem:[%s6045_s23 + $0x128] sm:$0xff]   ;;  %v1418_v3 = vld [vmem:[%s6824_s0 + $0x1c0] sm:$0xff]  ;;  %v5307_v18 = vld [vmem:[%s6045_s23 + $0x158] sm:$0xff]  }
  0xdb   : > { %4779 = vmatprep.subr.bf16.mxu1 %v5276_v23  ;;  %v5301_v0 = vld [vmem:[%s6045_s23 + $0x1e8] sm:$0xff]   ;;  %v5303_v7 = vld [vmem:[%s6045_s23 + $0x160] sm:$0xff]   ;;  %v4417_v9 = vcombine.high %v1410_v2, %v1418_v3  ;;  %v5308_v19 = vld [vmem:[%s6045_s23 + $0x118] sm:$0xff]   ;;  %v4416_v21 = vcombine.low %v1410_v2, %v1418_v3 }
  0xdc   : > { %v5302_v1 = vld [vmem:[%s6045_s23 + $0x1a8] sm:$0xff]   ;;  %v5304_v10 = vld [vmem:[%s6045_s23 + $0x120] sm:$0xff]   ;;  %v5309_v20 = vld [vmem:[%s6045_s23 + $0x1d8] sm:$0xff]  }
  0xdd   : > { %4716 = vmatpush3.bf16.msra.mxu0 %v5277_v24  ;;  %v1411_v4 = vld [vmem:[%s6824_s0 + $0x188] sm:$0xff]  ;;  %v5305_v12 = vld [vmem:[%s6045_s23 + $0x1e0] sm:$0xff]   ;;  %v5310_v22 = vld [vmem:[%s6045_s23 + $0x198] sm:$0xff]  }
  0xde   : > { %4780 = vmatpush3.bf16.msra.mxu1 %v5278_v25  ;;  %4717 = vmatprep.subr.bf16.mxu0 %v5279_v26  ;;  %v1419_v5 = vld [vmem:[%s6824_s0 + $0x1c8] sm:$0xff]  ;;  %v5306_v13 = vld [vmem:[%s6045_s23 + $0x1a0] sm:$0xff]   ;;  %v5311_v26 = vld [vmem:[%s6045_s23 + $0x150] sm:$0xff]  }
  0xdf   : > { %4781 = vmatprep.subr.bf16.mxu1 %v5280_v27  ;;  %v4419_v11 = vcombine.high %v1411_v4, %v1419_v5  ;;  %v1426_v14 = vld [vmem:[%s6824_s0 + $0x200] sm:$0xff]  ;;  %v1427_v16 = vld [vmem:[%s6824_s0 + $0x208] sm:$0xff]  ;;  %v4418_v23 = vcombine.low %v1411_v4, %v1419_v5  ;;  %v5312_v27 = vld [vmem:[%s6045_s23 + $0x110] sm:$0xff]  }
  0xe0   : > { %v1434_v15 = vld [vmem:[%s6824_s0 + $0x240] sm:$0xff]  ;;  %v1435_v17 = vld [vmem:[%s6824_s0 + $0x248] sm:$0xff]  ;;  %v1365_v2 = vld [vmem:[%s6824_s0 + $0x18] sm:$0xff] }
  0xe1   : > { %4718 = vmatpush3.bf16.msra.mxu0 %v5281_v28  ;;  %v4433_v24 = vcombine.high %v1426_v14, %v1434_v15  ;;  %v4435_v25 = vcombine.high %v1427_v16, %v1435_v17  ;;  %v5313_v28 = vld [vmem:[%s6045_s23 + $0x1d0] sm:$0xff]   ;;  %v5315_v35 = vld [vmem:[%s6045_s23 + $0x148] sm:$0xff]   ;;  %v4434_v36 = vcombine.low %v1427_v16, %v1435_v17  ;;  %v1482_v57 = vld [vmem:[%s6824_s0 + $0x3c0] sm:$0xff] }
  0xe2   : > { %4782 = vmatpush3.bf16.msra.mxu1 %v5282_v29  ;;  %4719 = vmatprep.subr.bf16.mxu0 %v5283_v30  ;;  %v5314_v29 = vld [vmem:[%s6045_s23 + $0x190] sm:$0xff]   ;;  %v1442_v30 = vld [vmem:[%s6824_s0 + $0x280] sm:$0xff]  ;;  %v5316_v38 = vld [vmem:[%s6045_s23 + $0x108] sm:$0xff]  }
  0xe3   : > { %4783 = vmatprep.subr.bf16.mxu1 %v5284_v31  ;;  %v1450_v31 = vld [vmem:[%s6824_s0 + $0x2c0] sm:$0xff]  ;;  %v1475_v58 = vld [vmem:[%s6824_s0 + $0x388] sm:$0xff]  ;;  %v1373_v3 = vld [vmem:[%s6824_s0 + $0x58] sm:$0xff] }
  0xe4   : > { %v1483_v59 = vld [vmem:[%s6824_s0 + $0x3c8] sm:$0xff] }
  0xe5   : > { %4720 = vmatpush3.bf16.msra.mxu0 %v5285_v32  ;;  %v1443_v32 = vld [vmem:[%s6824_s0 + $0x288] sm:$0xff]  ;;  %v4482_v5 = vcombine.low %v1475_v58, %v1483_v59 }
  0xe6   : > { %4784 = vmatpush3.bf16.msra.mxu1 %v5286_v33  ;;  %4721 = vmatprep.subr.bf16.mxu0 %v5287_v34  ;;  %v1451_v33 = vld [vmem:[%s6824_s0 + $0x2c8] sm:$0xff]  ;;  %v4432_v34 = vcombine.low %v1426_v14, %v1434_v15  ;;  %v5324_v14 = vld [vmem:[%s6045_s23 + $0x238] sm:$0xff]  }
  0xe7   : > { %4785 = vmatprep.subr.bf16.mxu1 %v5288_v37  ;;  %v4449_v37 = vcombine.high %v1442_v30, %v1450_v31  ;;  %v4451_v39 = vcombine.high %v1443_v32, %v1451_v33  ;;  %v4450_v51 = vcombine.low %v1443_v32, %v1451_v33  ;;  %v5326_v15 = vld [vmem:[%s6045_s23 + $0x2b8] sm:$0xff]   ;;  %v5334_v33 = vld [vmem:[%s6045_s23 + $0x2a8] sm:$0xff]  }
  0xe9   : > { %4722 = vmatpush3.bf16.msra.mxu0 %v5289_v40  ;;  %v5317_v40 = vld [vmem:[%s6045_s23 + $0x1c8] sm:$0xff]  }
  0xea   : > { %4786 = vmatpush3.bf16.msra.mxu1 %v5290_v41  ;;  %4835 = vmatprep.subr.bf16.mxu0 %v5291_v44  ;;  %v5318_v41 = vld [vmem:[%s6045_s23 + $0x188] sm:$0xff]  }
  0xeb   : > { %4899 = vmatprep.subr.bf16.mxu1 %v5293_v47  ;;  %v1459_v44 = vld [vmem:[%s6824_s0 + $0x308] sm:$0xff]  ;;  %v5320_v47 = vld [vmem:[%s6045_s23 + $0x100] sm:$0xff]  }
  0xec   : > { %3187 = vmatmul.mubr.bf16.vlgmr.msra.gmra.mxu0 %v4368_v42  ;;  %v1458_v42 = vld [vmem:[%s6824_s0 + $0x300] sm:$0xff] }
  0xed   : > { %3284 = vmatmul.mubr.bf16.vlgmr.msra.gmra.mxu1 %v4370_v43  ;;  %4836 = vmatpush3.bf16.msra.mxu0 %v5292_v45  ;;  %v1466_v43 = vld [vmem:[%s6824_s0 + $0x340] sm:$0xff]  ;;  %v1467_v45 = vld [vmem:[%s6824_s0 + $0x348] sm:$0xff] }
  0xee   : > { %3194 = vmatprep.mubr.bf16.mxu0 %v4385_v46  ;;  %4900 = vmatpush3.bf16.msra.mxu1 %v5294_v49  ;;  %v5319_v46 = vld [vmem:[%s6045_s23 + $0x140] sm:$0xff]   ;;  %v4448_v49 = vcombine.low %v1442_v30, %v1450_v31  ;;  %v5332_v31 = vld [vmem:[%s6045_s23 + $0x228] sm:$0xff]  }
  0xef   : > { %3291 = vmatprep.mubr.bf16.mxu1 %v4387_v48  ;;  %4837 = vmatprep.subr.bf16.mxu0 %v5295_v50  ;;  %v5321_v48 = vld [vmem:[%s6045_s23 + $0x1c0] sm:$0xff]  }
  0xf0   : > { %4901 = vmatprep.subr.bf16.mxu1 %v5297_v53  ;;  %v5322_v50 = vld [vmem:[%s6045_s23 + $0x180] sm:$0xff]   ;;  %v4467_v53 = vcombine.high %v1459_v44, %v1467_v45 }
  0xf1   : > { %4838 = vmatpush3.bf16.msra.mxu0 %v5296_v52  ;;  %v4465_v52 = vcombine.high %v1458_v42, %v1466_v43 }
  0xf2   : > { %4902 = vmatpush3.bf16.msra.mxu1 %v5298_v55  ;;  %4839 = vmatprep.subr.bf16.mxu0 %v5299_v62  ;;  %v5325_v55 = vld [vmem:[%s6045_s23 + $0x2f8] sm:$0xff]  }
  0xf3   : > { %4903 = vmatprep.subr.bf16.mxu1 %v5301_v0  ;;  %v1364_v0 = vld [vmem:[%s6824_s0 + $0x10] sm:$0xff] }
  0xf4   : > { %3195 = vmatmul.mubr.bf16.gmra.mxu0 %v4384_v54  ;;  %v5323_v54 = vld [vmem:[%s6045_s23 + $0x278] sm:$0xff]  }
  0xf5   : > { %3292 = vmatmul.mubr.bf16.gmra.mxu1 %v4386_v56  ;;  %3202 = vmatprep.mubr.bf16.mxu0 %v4401_v60  ;;  %v1474_v56 = vld [vmem:[%s6824_s0 + $0x380] sm:$0xff]  ;;  %v4464_v60 = vcombine.low %v1458_v42, %v1466_v43  ;;  %v5339_v42 = vld [vmem:[%s6045_s23 + $0x258] sm:$0xff]  }
  0xf6   : > { %3299 = vmatprep.mubr.bf16.mxu1 %v4403_v61  ;;  %4840 = vmatpush3.bf16.msra.mxu0 %v5300_v63  ;;  %v4466_v61 = vcombine.low %v1459_v44, %v1467_v45  ;;  %v4481_v62 = vcombine.high %v1474_v56, %v1482_v57  ;;  %v4483_v63 = vcombine.high %v1475_v58, %v1483_v59  ;;  %v5341_v44 = vld [vmem:[%s6045_s23 + $0x2d8] sm:$0xff]   ;;  %v5347_v58 = vld [vmem:[%s6045_s23 + $0x248] sm:$0xff]  }
  0xf7   : > { %4904 = vmatpush3.bf16.msra.mxu1 %v5302_v1  ;;  %4841 = vmatprep.subr.bf16.mxu0 %v5303_v7  ;;  %v1372_v1 = vld [vmem:[%s6824_s0 + $0x50] sm:$0xff]  ;;  %v4480_v4 = vcombine.low %v1474_v56, %v1482_v57  ;;  %v4375_v7 = vcombine.high %v1365_v2, %v1373_v3 }
  0xf8   : > { %4905 = vmatprep.subr.bf16.mxu1 %v5305_v12  ;;  %v1389_v12 = vld [vmem:[%s6824_s0 + $0xd8] sm:$0xff]  ;;  %v5344_v56 = vld [vmem:[%s6045_s23 + $0x210] sm:$0xff]  }
  0xf9   : > { %v5346_v57 = vld [vmem:[%s6045_s23 + $0x290] sm:$0xff]  }
  0xfa   : > { %4842 = vmatpush3.bf16.msra.mxu0 %v5304_v10  ;;  %v1381_v10 = vld [vmem:[%s6824_s0 + $0x98] sm:$0xff] }
  0xfb   : > { %4906 = vmatpush3.bf16.msra.mxu1 %v5306_v13  ;;  %4843 = vmatprep.subr.bf16.mxu0 %v5307_v18  ;;  %v4374_v13 = vcombine.low %v1365_v2, %v1373_v3  ;;  %v4391_v17 = vcombine.high %v1381_v10, %v1389_v12  ;;  %v5327_v18 = vld [vmem:[%s6045_s23 + $0x270] sm:$0xff]   ;;  %v5351_v2 = vld [vmem:[%s6045_s23 + $0x240] sm:$0xff]  }
  0xfc   : > { %3203 = vmatmul.mubr.bf16.gmra.mxu0 %v4400_v6  ;;  %4907 = vmatprep.subr.bf16.mxu1 %v5309_v20  ;;  %v4373_v6 = vcombine.high %v1364_v0, %v1372_v1  ;;  %v5329_v20 = vld [vmem:[%s6045_s23 + $0x2f0] sm:$0xff]  }
  0xfd   : > { %3300 = vmatmul.mubr.bf16.gmra.mxu1 %v4402_v8  ;;  %3210 = vmatprep.mubr.bf16.mxu0 %v4417_v9  ;;  %v1380_v8 = vld [vmem:[%s6824_s0 + $0x90] sm:$0xff] }
  0xfe   : > { %3307 = vmatprep.mubr.bf16.mxu1 %v4419_v11  ;;  %4844 = vmatpush3.bf16.msra.mxu0 %v5308_v19  ;;  %v1388_v9 = vld [vmem:[%s6824_s0 + $0xd0] sm:$0xff]  ;;  %v4372_v11 = vcombine.low %v1364_v0, %v1372_v1  ;;  %v5350_v1 = vld [vmem:[%s6045_s23 + $0x288] sm:$0xff]  }
  0xff   : > { %4908 = vmatpush3.bf16.msra.mxu1 %v5310_v22  ;;  %4845 = vmatprep.subr.bf16.mxu0 %v5311_v26  ;;  %v4389_v16 = vcombine.high %v1380_v8, %v1388_v9  ;;  %v5328_v19 = vld [vmem:[%s6045_s23 + $0x230] sm:$0xff]   ;;  %v5331_v26 = vld [vmem:[%s6045_s23 + $0x268] sm:$0xff]  }
 0x100   : > { %4909 = vmatprep.subr.bf16.mxu1 %v5313_v28  ;;  %v1396_v22 = vld [vmem:[%s6824_s0 + $0x110] sm:$0xff]  ;;  %v4388_v28 = vcombine.low %v1380_v8, %v1388_v9  ;;  %v5352_v8 = vld [vmem:[%s6045_s23 + $0x200] sm:$0xff]  }
 0x101   : > { %v1444_v3 = vld [vmem:[%s6824_s0 + $0x290] sm:$0xff]  ;;  %v5354_v9 = vld [vmem:[%s6045_s23 + $0x280] sm:$0xff]  }
 0x102   : > { %4846 = vmatpush3.bf16.msra.mxu0 %v5312_v27  ;;  %v5333_v27 = vld [vmem:[%s6045_s23 + $0x2e8] sm:$0xff]  }
 0x103   : > { %4910 = vmatpush3.bf16.msra.mxu1 %v5314_v29  ;;  %4847 = vmatprep.subr.bf16.mxu0 %v5315_v35  ;;  %v4390_v29 = vcombine.low %v1381_v10, %v1389_v12  ;;  %v1412_v35 = vld [vmem:[%s6824_s0 + $0x190] sm:$0xff]  ;;  %v5355_v10 = vld [vmem:[%s6045_s23 + $0x378] sm:$0xff]  }
 0x104   : > { %3211 = vmatmul.mubr.bf16.gmra.mxu0 %v4416_v21  ;;  %4911 = vmatprep.subr.bf16.mxu1 %v5317_v40  ;;  %v5330_v21 = vld [vmem:[%s6045_s23 + $0x2b0] sm:$0xff]   ;;  %v5336_v40 = vld [vmem:[%s6045_s23 + $0x220] sm:$0xff]   ;;  %v5357_v12 = vld [vmem:[%s6045_s23 + $0x3f8] sm:$0xff]  }
 0x105   : > { %3308 = vmatmul.mubr.bf16.gmra.mxu1 %v4418_v23  ;;  %3218 = vmatprep.mubr.bf16.mxu0 %v4433_v24  ;;  %v1404_v23 = vld [vmem:[%s6824_s0 + $0x150] sm:$0xff]  ;;  %v1397_v24 = vld [vmem:[%s6824_s0 + $0x118] sm:$0xff] }
 0x106   : > { %3315 = vmatprep.mubr.bf16.mxu1 %v4435_v25  ;;  %4848 = vmatpush3.bf16.msra.mxu0 %v5316_v38  ;;  %v1405_v25 = vld [vmem:[%s6824_s0 + $0x158] sm:$0xff]  ;;  %v4405_v30 = vcombine.high %v1396_v22, %v1404_v23  ;;  %v4404_v43 = vcombine.low %v1396_v22, %v1404_v23 }
 0x107   : > { %4912 = vmatpush3.bf16.msra.mxu1 %v5318_v41  ;;  %4849 = vmatprep.subr.bf16.mxu0 %v5319_v46  ;;  %v4407_v32 = vcombine.high %v1397_v24, %v1405_v25  ;;  %v1413_v38 = vld [vmem:[%s6824_s0 + $0x198] sm:$0xff]  ;;  %v5338_v41 = vld [vmem:[%s6045_s23 + $0x2a0] sm:$0xff]   ;;  %v4406_v45 = vcombine.low %v1397_v24, %v1405_v25  ;;  %v1476_v24 = vld [vmem:[%s6824_s0 + $0x390] sm:$0xff] }
 0x108   : > { %4913 = vmatprep.subr.bf16.mxu1 %v5321_v48  ;;  %v5340_v48 = vld [vmem:[%s6045_s23 + $0x218] sm:$0xff]   ;;  %v1484_v25 = vld [vmem:[%s6824_s0 + $0x3d0] sm:$0xff] }
 0x10a   : > { %4850 = vmatpush3.bf16.msra.mxu0 %v5320_v47 }
 0x10b   : > { %4914 = vmatpush3.bf16.msra.mxu1 %v5322_v50  ;;  %4963 = vmatprep.subr.bf16.mxu0 %v5323_v54  ;;  %v5343_v50 = vld [vmem:[%s6045_s23 + $0x250] sm:$0xff]   ;;  %v1429_v54 = vld [vmem:[%s6824_s0 + $0x218] sm:$0xff] }
 0x10c   : > { %3219 = vmatmul.mubr.bf16.gmra.mxu0 %v4432_v34  ;;  %5027 = vmatprep.subr.bf16.mxu1 %v5325_v55  ;;  %v5335_v34 = vld [vmem:[%s6045_s23 + $0x260] sm:$0xff]   ;;  %v1437_v55 = vld [vmem:[%s6824_s0 + $0x258] sm:$0xff] }
 0x10d   : > { %3316 = vmatmul.mubr.bf16.gmra.mxu1 %v4434_v36  ;;  %3226 = vmatprep.mubr.bf16.mxu0 %v4449_v37  ;;  %v1420_v36 = vld [vmem:[%s6824_s0 + $0x1d0] sm:$0xff]  ;;  %v5337_v37 = vld [vmem:[%s6045_s23 + $0x2e0] sm:$0xff]   ;;  %v4439_v0 = vcombine.high %v1429_v54, %v1437_v55 }
 0x10e   : > { %3323 = vmatprep.mubr.bf16.mxu1 %v4451_v39  ;;  %v1421_v39 = vld [vmem:[%s6824_s0 + $0x1d8] sm:$0xff]  ;;  %v4421_v46 = vcombine.high %v1412_v35, %v1420_v36  ;;  %v4420_v59 = vcombine.low %v1412_v35, %v1420_v36  ;;  %v1375_v35 = vld [vmem:[%s6824_s0 + $0x68] sm:$0xff]  ;;  %v4484_v36 = vcombine.low %v1476_v24, %v1484_v25 }
 0x10f   : > { %v4423_v47 = vcombine.high %v1413_v38, %v1421_v39 }
 0x114   : > { %3227 = vmatmul.mubr.bf16.gmra.mxu0 %v4448_v49  ;;  %v5342_v49 = vld [vmem:[%s6045_s23 + $0x298] sm:$0xff]  }
 0x115   : > { %3324 = vmatmul.mubr.bf16.gmra.mxu1 %v4450_v51  ;;  %3234 = vmatprep.mubr.bf16.mxu0 %v4465_v52  ;;  %v1428_v51 = vld [vmem:[%s6824_s0 + $0x210] sm:$0xff] }
 0x116   : > { %3331 = vmatprep.mubr.bf16.mxu1 %v4467_v53  ;;  %v1436_v52 = vld [vmem:[%s6824_s0 + $0x250] sm:$0xff] }
 0x117   : > { %v5345_v53 = vld [vmem:[%s6045_s23 + $0x2d0] sm:$0xff]  }
 0x11c   : > { %3235 = vmatmul.mubr.bf16.gmra.mxu0 %v4464_v60  ;;  %v5349_v60 = vld [vmem:[%s6045_s23 + $0x2c8] sm:$0xff]  }
 0x11d   : > { %3332 = vmatmul.mubr.bf16.gmra.mxu1 %v4466_v61  ;;  %3242 = vmatprep.mubr.bf16.mxu0 %v4481_v62  ;;  %v4422_v61 = vcombine.low %v1413_v38, %v1421_v39  ;;  %v4437_v62 = vcombine.high %v1428_v51, %v1436_v52 }
 0x11e   : > { %3339 = vmatprep.mubr.bf16.mxu1 %v4483_v63  ;;  %v5348_v63 = vld [vmem:[%s6045_s23 + $0x208] sm:$0xff]  }
 0x124   : > { %3243 = vmatmul.mubr.bf16.gmra.mxu0 %v4480_v4  ;;  %v1452_v4 = vld [vmem:[%s6824_s0 + $0x2d0] sm:$0xff] }
 0x125   : > { %3340 = vmatmul.mubr.bf16.gmra.mxu1 %v4482_v5  ;;  %3380 = vmatprep.mubr.bf16.mxu0 %v4373_v6  ;;  %v5353_v5 = vld [vmem:[%s6045_s23 + $0x2c0] sm:$0xff]   ;;  %v1445_v6 = vld [vmem:[%s6824_s0 + $0x298] sm:$0xff] }
 0x126   : > { %3477 = vmatprep.mubr.bf16.mxu1 %v4375_v7  ;;  %v1453_v7 = vld [vmem:[%s6824_s0 + $0x2d8] sm:$0xff] }
 0x12c   : > { %3381 = vmatmul.mubr.bf16.vlgmr.msra.gmra.mxu0 %v4372_v11  ;;  %v4436_v11 = vcombine.low %v1428_v51, %v1436_v52  ;;  %v5361_v51 = vld [vmem:[%s6045_s23 + $0x3f0] sm:$0xff]  }
 0x12d   : > { %3478 = vmatmul.mubr.bf16.vlgmr.msra.gmra.mxu1 %v4374_v13  ;;  %4964 = vmatpush3.bf16.msra.mxu0 %v5324_v14  ;;  %v4438_v13 = vcombine.low %v1429_v54, %v1437_v55  ;;  %v4453_v14 = vcombine.high %v1444_v3, %v1452_v4  ;;  %v5360_v52 = vld [vmem:[%s6045_s23 + $0x330] sm:$0xff]   ;;  %v1398_v54 = vld [vmem:[%s6824_s0 + $0x120] sm:$0xff] }
 0x12e   : > { %5028 = vmatpush3.bf16.msra.mxu1 %v5326_v15  ;;  %3388 = vmatprep.mubr.bf16.mxu0 %v4389_v16  ;;  %v4455_v15 = vcombine.high %v1445_v6, %v1453_v7  ;;  %v1460_v16 = vld [vmem:[%s6824_s0 + $0x310] sm:$0xff]  ;;  %v1406_v55 = vld [vmem:[%s6824_s0 + $0x160] sm:$0xff] }
 0x12f   : > { %3485 = vmatprep.mubr.bf16.mxu1 %v4391_v17  ;;  %4965 = vmatprep.subr.bf16.mxu0 %v5327_v18  ;;  %v1468_v17 = vld [vmem:[%s6824_s0 + $0x350] sm:$0xff]  ;;  %v1461_v18 = vld [vmem:[%s6824_s0 + $0x318] sm:$0xff] }
 0x130   : > { %5029 = vmatprep.subr.bf16.mxu1 %v5329_v20  ;;  %v4452_v20 = vcombine.low %v1444_v3, %v1452_v4  ;;  %v4469_v22 = vcombine.high %v1460_v16, %v1468_v17  ;;  %v5369_v3 = vld [vmem:[%s6045_s23 + $0x3e0] sm:$0xff]  }
 0x131   : > { %4966 = vmatpush3.bf16.msra.mxu0 %v5328_v19  ;;  %v1469_v19 = vld [vmem:[%s6824_s0 + $0x358] sm:$0xff]  ;;  %v1414_v4 = vld [vmem:[%s6824_s0 + $0x1a0] sm:$0xff] }
 0x132   : > { %5030 = vmatpush3.bf16.msra.mxu1 %v5330_v21  ;;  %4967 = vmatprep.subr.bf16.mxu0 %v5331_v26  ;;  %v4454_v21 = vcombine.low %v1445_v6, %v1453_v7  ;;  %v4471_v23 = vcombine.high %v1461_v18, %v1469_v19  ;;  %v1477_v26 = vld [vmem:[%s6824_s0 + $0x398] sm:$0xff]  ;;  %v1415_v6 = vld [vmem:[%s6824_s0 + $0x1a8] sm:$0xff]  ;;  %v5368_v7 = vld [vmem:[%s6045_s23 + $0x320] sm:$0xff]  }
 0x133   : > { %5031 = vmatprep.subr.bf16.mxu1 %v5333_v27  ;;  %v1485_v27 = vld [vmem:[%s6824_s0 + $0x3d8] sm:$0xff] }
 0x134   : > { %3389 = vmatmul.mubr.bf16.gmra.mxu0 %v4388_v28  ;;  %v4468_v28 = vcombine.low %v1460_v16, %v1468_v17  ;;  %v5372_v16 = vld [vmem:[%s6045_s23 + $0x318] sm:$0xff]  }
 0x135   : > { %3486 = vmatmul.mubr.bf16.gmra.mxu1 %v4390_v29  ;;  %3396 = vmatprep.mubr.bf16.mxu0 %v4405_v30  ;;  %v4470_v29 = vcombine.low %v1461_v18, %v1469_v19  ;;  %v4485_v30 = vcombine.high %v1476_v24, %v1484_v25  ;;  %v5374_v17 = vld [vmem:[%s6045_s23 + $0x398] sm:$0xff]   ;;  %v5375_v18 = vld [vmem:[%s6045_s23 + $0x350] sm:$0xff]   ;;  %v1439_v24 = vld [vmem:[%s6824_s0 + $0x268] sm:$0xff] }
 0x136   : > { %3493 = vmatprep.mubr.bf16.mxu1 %v4407_v32  ;;  %4968 = vmatpush3.bf16.msra.mxu0 %v5332_v31  ;;  %v4487_v31 = vcombine.high %v1477_v26, %v1485_v27  ;;  %v1366_v32 = vld [vmem:[%s6824_s0 + $0x20] sm:$0xff]  ;;  %v5377_v19 = vld [vmem:[%s6045_s23 + $0x3d0] sm:$0xff]  }
 0x137   : > { %5032 = vmatpush3.bf16.msra.mxu1 %v5334_v33  ;;  %4969 = vmatprep.subr.bf16.mxu0 %v5335_v34  ;;  %v1374_v33 = vld [vmem:[%s6824_s0 + $0x60] sm:$0xff]  ;;  %v1367_v34 = vld [vmem:[%s6824_s0 + $0x28] sm:$0xff]  ;;  %v5378_v25 = vld [vmem:[%s6045_s23 + $0x390] sm:$0xff]  }
 0x138   : > { %5033 = vmatprep.subr.bf16.mxu1 %v5337_v37  ;;  %v4486_v37 = vcombine.low %v1477_v26, %v1485_v27  ;;  %v4377_v38 = vcombine.high %v1366_v32, %v1374_v33  ;;  %v4379_v39 = vcombine.high %v1367_v34, %v1375_v35  ;;  %v5379_v26 = vld [vmem:[%s6045_s23 + $0x348] sm:$0xff]  }
 0x13a   : > { %4970 = vmatpush3.bf16.msra.mxu0 %v5336_v40  ;;  %v1382_v40 = vld [vmem:[%s6824_s0 + $0xa0] sm:$0xff] }
 0x13b   : > { %5034 = vmatpush3.bf16.msra.mxu1 %v5338_v41  ;;  %4971 = vmatprep.subr.bf16.mxu0 %v5339_v42  ;;  %v1390_v41 = vld [vmem:[%s6824_s0 + $0xe0] sm:$0xff]  ;;  %v4376_v42 = vcombine.low %v1366_v32, %v1374_v33  ;;  %v5380_v32 = vld [vmem:[%s6045_s23 + $0x308] sm:$0xff]  }
 0x13c   : > { %3397 = vmatmul.mubr.bf16.gmra.mxu0 %v4404_v43  ;;  %5035 = vmatprep.subr.bf16.mxu1 %v5341_v44  ;;  %v1383_v43 = vld [vmem:[%s6824_s0 + $0xa8] sm:$0xff] }
 0x13d   : > { %3494 = vmatmul.mubr.bf16.gmra.mxu1 %v4406_v45  ;;  %3404 = vmatprep.mubr.bf16.mxu0 %v4421_v46  ;;  %v1391_v44 = vld [vmem:[%s6824_s0 + $0xe8] sm:$0xff]  ;;  %v4378_v45 = vcombine.low %v1367_v34, %v1375_v35  ;;  %v5356_v46 = vld [vmem:[%s6045_s23 + $0x338] sm:$0xff]   ;;  %v5383_v34 = vld [vmem:[%s6045_s23 + $0x340] sm:$0xff]  }
 0x13e   : > { %3501 = vmatprep.mubr.bf16.mxu1 %v4423_v47  ;;  %4972 = vmatpush3.bf16.msra.mxu0 %v5340_v48  ;;  %v5358_v47 = vld [vmem:[%s6045_s23 + $0x3b8] sm:$0xff]   ;;  %v4393_v48 = vcombine.high %v1382_v40, %v1390_v41  ;;  %v5382_v33 = vld [vmem:[%s6045_s23 + $0x388] sm:$0xff]   ;;  %v5385_v35 = vld [vmem:[%s6045_s23 + $0x3c0] sm:$0xff]  }
 0x13f   : > { %5036 = vmatpush3.bf16.msra.mxu1 %v5342_v49  ;;  %4973 = vmatprep.subr.bf16.mxu0 %v5343_v50  ;;  %v4395_v49 = vcombine.high %v1383_v43, %v1391_v44  ;;  %v5359_v50 = vld [vmem:[%s6045_s23 + $0x370] sm:$0xff]  }
 0x140   : > { %5037 = vmatprep.subr.bf16.mxu1 %v5345_v53  ;;  %v5362_v53 = vld [vmem:[%s6045_s23 + $0x3b0] sm:$0xff]  }
 0x142   : > { %4974 = vmatpush3.bf16.msra.mxu0 %v5344_v56  ;;  %v5363_v56 = vld [vmem:[%s6045_s23 + $0x368] sm:$0xff]  }
 0x143   : > { %5038 = vmatpush3.bf16.msra.mxu1 %v5346_v57  ;;  %4975 = vmatprep.subr.bf16.mxu0 %v5347_v58  ;;  %v1399_v57 = vld [vmem:[%s6824_s0 + $0x128] sm:$0xff] }
 0x144   : > { %3405 = vmatmul.mubr.bf16.gmra.mxu0 %v4420_v59  ;;  %5039 = vmatprep.subr.bf16.mxu1 %v5349_v60  ;;  %v1407_v58 = vld [vmem:[%s6824_s0 + $0x168] sm:$0xff]  ;;  %v4392_v60 = vcombine.low %v1382_v40, %v1390_v41  ;;  %v5386_v41 = vld [vmem:[%s6045_s23 + $0x380] sm:$0xff]  }
 0x145   : > { %3502 = vmatmul.mubr.bf16.gmra.mxu1 %v4422_v61  ;;  %3412 = vmatprep.mubr.bf16.mxu0 %v4437_v62  ;;  %v5365_v59 = vld [vmem:[%s6045_s23 + $0x3e8] sm:$0xff]   ;;  %v4394_v61 = vcombine.low %v1383_v43, %v1391_v44  ;;  %v4409_v62 = vcombine.high %v1398_v54, %v1406_v55 }
 0x146   : > { %3509 = vmatprep.mubr.bf16.mxu1 %v4439_v0  ;;  %4976 = vmatpush3.bf16.msra.mxu0 %v5348_v63  ;;  %v4411_v63 = vcombine.high %v1399_v57, %v1407_v58  ;;  %v5364_v0 = vld [vmem:[%s6045_s23 + $0x328] sm:$0xff]  }
 0x147   : > { %5040 = vmatpush3.bf16.msra.mxu1 %v5350_v1  ;;  %4977 = vmatprep.subr.bf16.mxu0 %v5351_v2  ;;  %v5366_v1 = vld [vmem:[%s6045_s23 + $0x3a8] sm:$0xff]   ;;  %v5367_v2 = vld [vmem:[%s6045_s23 + $0x360] sm:$0xff]  }
 0x148   : > { %5041 = vmatprep.subr.bf16.mxu1 %v5353_v5  ;;  %v1422_v5 = vld [vmem:[%s6824_s0 + $0x1e0] sm:$0xff]  ;;  %v1455_v40 = vld [vmem:[%s6824_s0 + $0x2e8] sm:$0xff] }
 0x149   : > { %v4424_v27 = vcombine.low %v1414_v4, %v1422_v5 }
 0x14a   : > { %4978 = vmatpush3.bf16.msra.mxu0 %v5352_v8  ;;  %v1423_v8 = vld [vmem:[%s6824_s0 + $0x1e8] sm:$0xff] }
 0x14b   : > { %5042 = vmatpush3.bf16.msra.mxu1 %v5354_v9  ;;  %5091 = vmatprep.subr.bf16.mxu0 %v5355_v10  ;;  %v5370_v9 = vld [vmem:[%s6045_s23 + $0x3a0] sm:$0xff]   ;;  %v5371_v10 = vld [vmem:[%s6045_s23 + $0x358] sm:$0xff]  }
 0x14c   : > { %3413 = vmatmul.mubr.bf16.gmra.mxu0 %v4436_v11  ;;  %5155 = vmatprep.subr.bf16.mxu1 %v5357_v12  ;;  %v4408_v11 = vcombine.low %v1398_v54, %v1406_v55  ;;  %v5373_v12 = vld [vmem:[%s6045_s23 + $0x3d8] sm:$0xff]   ;;  %v1478_v54 = vld [vmem:[%s6824_s0 + $0x3a0] sm:$0xff] }
 0x14d   : > { %3510 = vmatmul.mubr.bf16.gmra.mxu1 %v4438_v13  ;;  %3420 = vmatprep.mubr.bf16.mxu0 %v4453_v14  ;;  %v4410_v13 = vcombine.low %v1399_v57, %v1407_v58  ;;  %v4425_v14 = vcombine.high %v1414_v4, %v1422_v5  ;;  %v1486_v55 = vld [vmem:[%s6824_s0 + $0x3e0] sm:$0xff]  ;;  %v1487_v57 = vld [vmem:[%s6824_s0 + $0x3e8] sm:$0xff] }
 0x14e   : > { %3517 = vmatprep.mubr.bf16.mxu1 %v4455_v15  ;;  %v4427_v15 = vcombine.high %v1415_v6, %v1423_v8 }
 0x154   : > { %3421 = vmatmul.mubr.bf16.gmra.mxu0 %v4452_v20  ;;  %v1430_v20 = vld [vmem:[%s6824_s0 + $0x220] sm:$0xff] }
 0x155   : > { %3518 = vmatmul.mubr.bf16.gmra.mxu1 %v4454_v21  ;;  %3428 = vmatprep.mubr.bf16.mxu0 %v4469_v22  ;;  %v1438_v21 = vld [vmem:[%s6824_s0 + $0x260] sm:$0xff]  ;;  %v1431_v22 = vld [vmem:[%s6824_s0 + $0x228] sm:$0xff] }
 0x156   : > { %3525 = vmatprep.mubr.bf16.mxu1 %v4471_v23  ;;  %v5376_v23 = vld [vmem:[%s6045_s23 + $0x310] sm:$0xff]   ;;  %v4442_v43 = vcombine.low %v1431_v22, %v1439_v24 }
 0x15c   : > { %3429 = vmatmul.mubr.bf16.gmra.mxu0 %v4468_v28  ;;  %v5381_v28 = vld [vmem:[%s6045_s23 + $0x3c8] sm:$0xff]  }
 0x15d   : > { %3526 = vmatmul.mubr.bf16.gmra.mxu1 %v4470_v29  ;;  %3436 = vmatprep.mubr.bf16.mxu0 %v4485_v30  ;;  %v4426_v29 = vcombine.low %v1415_v6, %v1423_v8  ;;  %v4441_v30 = vcombine.high %v1430_v20, %v1438_v21  ;;  %v1384_v6 = vld [vmem:[%s6824_s0 + $0xb0] sm:$0xff]  ;;  %v1385_v8 = vld [vmem:[%s6824_s0 + $0xb8] sm:$0xff] }
 0x15e   : > { %3533 = vmatprep.mubr.bf16.mxu1 %v4487_v31  ;;  %v4443_v31 = vcombine.high %v1431_v22, %v1439_v24  ;;  %v1409_v22 = vld [vmem:[%s6824_s0 + $0x178] sm:$0xff] }
 0x164   : > { %3437 = vmatmul.mubr.bf16.gmra.mxu0 %v4484_v36  ;;  %v1446_v36 = vld [vmem:[%s6824_s0 + $0x2a0] sm:$0xff] }
 0x165   : > { %3534 = vmatmul.mubr.bf16.gmra.mxu1 %v4486_v37  ;;  %3574 = vmatprep.mubr.bf16.mxu0 %v4377_v38  ;;  %v1454_v37 = vld [vmem:[%s6824_s0 + $0x2e0] sm:$0xff] }
 0x166   : > { %3671 = vmatprep.mubr.bf16.mxu1 %v4379_v39  ;;  %v5384_v38 = vld [vmem:[%s6045_s23 + $0x300] sm:$0xff]   ;;  %v1447_v39 = vld [vmem:[%s6824_s0 + $0x2a8] sm:$0xff]  ;;  %v4457_v44 = vcombine.high %v1446_v36, %v1454_v37 }
 0x16c   : > { %3575 = vmatmul.mubr.bf16.vlgmr.msra.gmra.mxu0 %v4376_v42  ;;  %v4440_v42 = vcombine.low %v1430_v20, %v1438_v21  ;;  %v1401_v21 = vld [vmem:[%s6824_s0 + $0x138] sm:$0xff] }
 0x16d   : > { %3672 = vmatmul.mubr.bf16.vlgmr.msra.gmra.mxu1 %v4378_v45  ;;  %5092 = vmatpush3.bf16.msra.mxu0 %v5356_v46  ;;  %v4459_v45 = vcombine.high %v1447_v39, %v1455_v40  ;;  %v1462_v46 = vld [vmem:[%s6824_s0 + $0x320] sm:$0xff] }
 0x16e   : > { %5156 = vmatpush3.bf16.msra.mxu1 %v5358_v47  ;;  %3582 = vmatprep.mubr.bf16.mxu0 %v4393_v48  ;;  %v1470_v47 = vld [vmem:[%s6824_s0 + $0x360] sm:$0xff]  ;;  %v1463_v48 = vld [vmem:[%s6824_s0 + $0x328] sm:$0xff] }
 0x16f   : > { %3679 = vmatprep.mubr.bf16.mxu1 %v4395_v49  ;;  %5093 = vmatprep.subr.bf16.mxu0 %v5359_v50  ;;  %v1471_v49 = vld [vmem:[%s6824_s0 + $0x368] sm:$0xff]  ;;  %v4456_v50 = vcombine.low %v1446_v36, %v1454_v37  ;;  %v4472_v58 = vcombine.low %v1462_v46, %v1470_v47 }
 0x170   : > { %5157 = vmatprep.subr.bf16.mxu1 %v5361_v51  ;;  %v4458_v51 = vcombine.low %v1447_v39, %v1455_v40  ;;  %v1416_v39 = vld [vmem:[%s6824_s0 + $0x1b0] sm:$0xff] }
 0x171   : > { %5094 = vmatpush3.bf16.msra.mxu0 %v5360_v52  ;;  %v4473_v52 = vcombine.high %v1462_v46, %v1470_v47  ;;  %v1424_v40 = vld [vmem:[%s6824_s0 + $0x1f0] sm:$0xff] }
 0x172   : > { %5158 = vmatpush3.bf16.msra.mxu1 %v5362_v53  ;;  %5095 = vmatprep.subr.bf16.mxu0 %v5363_v56  ;;  %v4475_v53 = vcombine.high %v1463_v48, %v1471_v49  ;;  %v1479_v56 = vld [vmem:[%s6824_s0 + $0x3a8] sm:$0xff] }
 0x173   : > { %5159 = vmatprep.subr.bf16.mxu1 %v5365_v59  ;;  %v4474_v59 = vcombine.low %v1463_v48, %v1471_v49  ;;  %v4414_v49 = vcombine.low %v1401_v21, %v1409_v22 }
 0x174   : > { %3583 = vmatmul.mubr.bf16.gmra.mxu0 %v4392_v60  ;;  %v4489_v60 = vcombine.high %v1478_v54, %v1486_v55 }
 0x175   : > { %3680 = vmatmul.mubr.bf16.gmra.mxu1 %v4394_v61  ;;  %3590 = vmatprep.mubr.bf16.mxu0 %v4409_v62  ;;  %v4491_v61 = vcombine.high %v1479_v56, %v1487_v57  ;;  %v1368_v62 = vld [vmem:[%s6824_s0 + $0x30] sm:$0xff] }
 0x176   : > { %3687 = vmatprep.mubr.bf16.mxu1 %v4411_v63  ;;  %5096 = vmatpush3.bf16.msra.mxu0 %v5364_v0  ;;  %v1376_v63 = vld [vmem:[%s6824_s0 + $0x70] sm:$0xff]  ;;  %v1369_v0 = vld [vmem:[%s6824_s0 + $0x38] sm:$0xff] }
 0x177   : > { %5160 = vmatpush3.bf16.msra.mxu1 %v5366_v1  ;;  %5097 = vmatprep.subr.bf16.mxu0 %v5367_v2  ;;  %v1377_v1 = vld [vmem:[%s6824_s0 + $0x78] sm:$0xff]  ;;  %v4488_v2 = vcombine.low %v1478_v54, %v1486_v55  ;;  %v4381_v4 = vcombine.high %v1368_v62, %v1376_v63 }
 0x178   : > { %5161 = vmatprep.subr.bf16.mxu1 %v5369_v3  ;;  %v4490_v3 = vcombine.low %v1479_v56, %v1487_v57  ;;  %v4383_v5 = vcombine.high %v1369_v0, %v1377_v1 }
 0x17a   : > { %5098 = vmatpush3.bf16.msra.mxu0 %v5368_v7  ;;  %v1392_v7 = vld [vmem:[%s6824_s0 + $0xf0] sm:$0xff] }
 0x17b   : > { %5162 = vmatpush3.bf16.msra.mxu1 %v5370_v9  ;;  %5099 = vmatprep.subr.bf16.mxu0 %v5371_v10  ;;  %v1393_v9 = vld [vmem:[%s6824_s0 + $0xf8] sm:$0xff]  ;;  %v4380_v10 = vcombine.low %v1368_v62, %v1376_v63  ;;  %v1440_v62 = vld [vmem:[%s6824_s0 + $0x270] sm:$0xff] }
 0x17c   : > { %3591 = vmatmul.mubr.bf16.gmra.mxu0 %v4408_v11  ;;  %5163 = vmatprep.subr.bf16.mxu1 %v5373_v12  ;;  %v4382_v11 = vcombine.low %v1369_v0, %v1377_v1  ;;  %v4397_v12 = vcombine.high %v1384_v6, %v1392_v7  ;;  %v1433_v1 = vld [vmem:[%s6824_s0 + $0x238] sm:$0xff] }
 0x17d   : > { %3688 = vmatmul.mubr.bf16.gmra.mxu1 %v4410_v13  ;;  %3598 = vmatprep.mubr.bf16.mxu0 %v4425_v14  ;;  %v4399_v13 = vcombine.high %v1385_v8, %v1393_v9 }
 0x17e   : > { %3695 = vmatprep.mubr.bf16.mxu1 %v4427_v15  ;;  %5100 = vmatpush3.bf16.msra.mxu0 %v5372_v16 }
 0x17f   : > { %5164 = vmatpush3.bf16.msra.mxu1 %v5374_v17  ;;  %5101 = vmatprep.subr.bf16.mxu0 %v5375_v18  ;;  %v1400_v17 = vld [vmem:[%s6824_s0 + $0x130] sm:$0xff] }
 0x180   : > { %5165 = vmatprep.subr.bf16.mxu1 %v5377_v19  ;;  %v1408_v18 = vld [vmem:[%s6824_s0 + $0x170] sm:$0xff] }
 0x181   : > { %v4412_v47 = vcombine.low %v1400_v17, %v1408_v18 }
 0x182   : > { %5102 = vmatpush3.bf16.msra.mxu0 %v5376_v23 }
 0x183   : > { %5166 = vmatpush3.bf16.msra.mxu1 %v5378_v25  ;;  %5103 = vmatprep.subr.bf16.mxu0 %v5379_v26  ;;  %v4396_v25 = vcombine.low %v1384_v6, %v1392_v7 }
 0x184   : > { %3599 = vmatmul.mubr.bf16.gmra.mxu0 %v4424_v27  ;;  %5167 = vmatprep.subr.bf16.mxu1 %v5381_v28  ;;  %v4398_v27 = vcombine.low %v1385_v8, %v1393_v9  ;;  %v4413_v28 = vcombine.high %v1400_v17, %v1408_v18 }
 0x185   : > { %3696 = vmatmul.mubr.bf16.gmra.mxu1 %v4426_v29  ;;  %3606 = vmatprep.mubr.bf16.mxu0 %v4441_v30 }
 0x186   : > { %3703 = vmatprep.mubr.bf16.mxu1 %v4443_v31  ;;  %5104 = vmatpush3.bf16.msra.mxu0 %v5380_v32  ;;  %v4415_v31 = vcombine.high %v1401_v21, %v1409_v22 }
 0x187   : > { %5168 = vmatpush3.bf16.msra.mxu1 %v5382_v33  ;;  %5105 = vmatprep.subr.bf16.mxu0 %v5383_v34 }
 0x188   : > { %5169 = vmatprep.subr.bf16.mxu1 %v5385_v35 }
 0x18a   : > { %5106 = vmatpush3.bf16.msra.mxu0 %v5384_v38 }
 0x18b   : > { %5170 = vmatpush3.bf16.msra.mxu1 %v5386_v41 }
 0x18c   : > { %3607 = vmatmul.mubr.bf16.gmra.mxu0 %v4440_v42 }
 0x18d   : > { %3704 = vmatmul.mubr.bf16.gmra.mxu1 %v4442_v43  ;;  %3614 = vmatprep.mubr.bf16.mxu0 %v4457_v44  ;;  %v1417_v43 = vld [vmem:[%s6824_s0 + $0x1b8] sm:$0xff] }
 0x18e   : > { %3711 = vmatprep.mubr.bf16.mxu1 %v4459_v45  ;;  %v1425_v44 = vld [vmem:[%s6824_s0 + $0x1f8] sm:$0xff] }
 0x18f   : > { %v4430_v7 = vcombine.low %v1417_v43, %v1425_v44 }
 0x194   : > { %3615 = vmatmul.mubr.bf16.gmra.mxu0 %v4456_v50  ;;  %v4429_v50 = vcombine.high %v1416_v39, %v1424_v40 }
 0x195   : > { %3712 = vmatmul.mubr.bf16.gmra.mxu1 %v4458_v51  ;;  %3622 = vmatprep.mubr.bf16.mxu0 %v4473_v52 }
 0x196   : > { %3719 = vmatprep.mubr.bf16.mxu1 %v4475_v53  ;;  %v4431_v53 = vcombine.high %v1417_v43, %v1425_v44  ;;  %v1464_v43 = vld [vmem:[%s6824_s0 + $0x330] sm:$0xff] }
 0x197   : > { %v1472_v44 = vld [vmem:[%s6824_s0 + $0x370] sm:$0xff] }
 0x19c   : > { %3623 = vmatmul.mubr.bf16.gmra.mxu0 %v4472_v58 }
 0x19d   : > { %3720 = vmatmul.mubr.bf16.gmra.mxu1 %v4474_v59  ;;  %3630 = vmatprep.mubr.bf16.mxu0 %v4489_v60 }
 0x19e   : > { %3727 = vmatprep.mubr.bf16.mxu1 %v4491_v61  ;;  %v1432_v61 = vld [vmem:[%s6824_s0 + $0x230] sm:$0xff] }
 0x19f   : > { %v4445_v8 = vcombine.high %v1432_v61, %v1440_v62 }
 0x1a4   : > { %3631 = vmatmul.mubr.bf16.gmra.mxu0 %v4488_v2  ;;  %v1441_v2 = vld [vmem:[%s6824_s0 + $0x278] sm:$0xff] }
 0x1a5   : > { %3728 = vmatmul.mubr.bf16.gmra.mxu1 %v4490_v3  ;;  %3768 = vmatprep.mubr.bf16.mxu0 %v4381_v4 }
 0x1a6   : > { %3865 = vmatprep.mubr.bf16.mxu1 %v4383_v5  ;;  %v4428_v5 = vcombine.low %v1416_v39, %v1424_v40 }
 0x1ac   : > { %v4723_v14 = vpop.f32.mrf.mxu0  ;;  %3769 = vmatmul.mubr.bf16.vlgmr.msra.gmra.mxu0 %v4380_v10 }
 0x1ad   : > { %v4787_v15 = vpop.f32.mrf.mxu1  ;;  %3866 = vmatmul.mubr.bf16.vlgmr.msra.gmra.mxu1 %v4382_v11  ;;  %3776 = vmatprep.mubr.bf16.mxu0 %v4397_v12  ;;  %v4447_v11 = vcombine.high %v1433_v1, %v1441_v2 }
 0x1ae   : > { %v4724_v16 = vpop.f32.mrf.mxu0  ;;  %3873 = vmatprep.mubr.bf16.mxu1 %v4399_v13 }
 0x1af   : > { %v4725_v19 = vadd.f32 %v4724_v16, %v4723_v14  ;;  %v4788_v20 = vpop.f32.mrf.mxu1 }
 0x1b0   : > { %v4789_v23 = vadd.f32 %v4788_v20, %v4787_v15  ;;  %v4726_v24 = vpop.f32.mrf.mxu0  ;;  %v1456_v20 = vld [vmem:[%s6824_s0 + $0x2f0] sm:$0xff] }
 0x1b1   : > { %v4790_v26 = vpop.f32.mrf.mxu1 }
 0x1b2   : > { %v6491_v29 = vadd.f32 %v4789_v23, %v4725_v19  ;;  %v4727_v30 = vpop.f32.mrf.mxu0  ;;  %v1448_v19 = vld [vmem:[%s6824_s0 + $0x2b0] sm:$0xff]  ;;  %v1449_v23 = vld [vmem:[%s6824_s0 + $0x2b8] sm:$0xff] }
 0x1b3   : > { %v4728_v32 = vadd.f32 %v4727_v30, %v4726_v24  ;;  %v4791_v33 = vpop.f32.mrf.mxu1  ;;  %v1457_v24 = vld [vmem:[%s6824_s0 + $0x2f8] sm:$0xff]  ;;  %v4446_v30 = vcombine.low %v1433_v1, %v1441_v2 }
 0x1b4   : > { %v4792_v34 = vadd.f32 %v4791_v33, %v4790_v26  ;;  %v4729_v35 = vpop.f32.mrf.mxu0  ;;  %3777 = vmatmul.mubr.bf16.gmra.mxu0 %v4396_v25 }
 0x1b5   : > { %v4793_v36 = vpop.f32.mrf.mxu1  ;;  %3874 = vmatmul.mubr.bf16.gmra.mxu1 %v4398_v27  ;;  %3784 = vmatprep.mubr.bf16.mxu0 %v4413_v28  ;;  %v4444_v27 = vcombine.low %v1432_v61, %v1440_v62 }
 0x1b6   : > { %v6493_v37 = vadd.f32 %v4792_v34, %v4728_v32  ;;  %v4730_v38 = vpop.f32.mrf.mxu0  ;;  %3881 = vmatprep.mubr.bf16.mxu1 %v4415_v31  ;;  %v4461_v31 = vcombine.high %v1448_v19, %v1456_v20  ;;  %v4463_v34 = vcombine.high %v1449_v23, %v1457_v24 }
 0x1b7   : > { %v4731_v41 = vadd.f32 %v4730_v38, %v4729_v35  ;;  %v4794_v42 = vpop.f32.mrf.mxu1 }
 0x1b8   : > { %v4795_v45 = vadd.f32 %v4794_v42, %v4793_v36  ;;  %v4732_v46 = vpop.f32.mrf.mxu0 }
 0x1b9   : > { %v4796_v48 = vpop.f32.mrf.mxu1 }
 0x1ba   : > { %v6507_v51 = vadd.f32 %v4795_v45, %v4731_v41  ;;  %v4733_v52 = vpop.f32.mrf.mxu0 }
 0x1bb   : > { %v4734_v54 = vadd.f32 %v4733_v52, %v4732_v46  ;;  %v4797_v55 = vpop.f32.mrf.mxu1  ;;  %v4460_v52 = vcombine.low %v1448_v19, %v1456_v20 }
 0x1bc   : > { %v4798_v56 = vadd.f32 %v4797_v55, %v4796_v48  ;;  %v4735_v57 = vpop.f32.mrf.mxu0  ;;  %3785 = vmatmul.mubr.bf16.gmra.mxu0 %v4412_v47  ;;  %v1465_v47 = vld [vmem:[%s6824_s0 + $0x338] sm:$0xff]  ;;  %v4477_v55 = vcombine.high %v1464_v43, %v1472_v44 }
 0x1bd   : > { %v4799_v58 = vpop.f32.mrf.mxu1  ;;  %3882 = vmatmul.mubr.bf16.gmra.mxu1 %v4414_v49  ;;  %3792 = vmatprep.mubr.bf16.mxu0 %v4429_v50  ;;  %v1473_v48 = vld [vmem:[%s6824_s0 + $0x378] sm:$0xff] }
 0x1be   : > { %v6509_v59 = vadd.f32 %v4798_v56, %v4734_v54  ;;  %v4736_v60 = vpop.f32.mrf.mxu0  ;;  %3889 = vmatprep.mubr.bf16.mxu1 %v4431_v53  ;;  %v4462_v54 = vcombine.low %v1449_v23, %v1457_v24 }
 0x1bf   : > { %v4737_v63 = vadd.f32 %v4736_v60, %v4735_v57  ;;  %v4800_v0 = vpop.f32.mrf.mxu1 }
 0x1c0   : > { %v4801_v3 = vadd.f32 %v4800_v0, %v4799_v58  ;;  %v4738_v4 = vpop.f32.mrf.mxu0  ;;  %v4479_v58 = vcombine.high %v1465_v47, %v1473_v48 }
 0x1c1   : > { %v4802_v6 = vpop.f32.mrf.mxu1 }
 0x1c2   : > { %v6523_v9 = vadd.f32 %v4801_v3, %v4737_v63  ;;  %v4739_v10 = vpop.f32.mrf.mxu0  ;;  %v1480_v3 = vld [vmem:[%s6824_s0 + $0x3b0] sm:$0xff] }
 0x1c3   : > { %v4740_v12 = vadd.f32 %v4739_v10, %v4738_v4  ;;  %v4803_v13 = vpop.f32.mrf.mxu1  ;;  %v1488_v4 = vld [vmem:[%s6824_s0 + $0x3f0] sm:$0xff] }
 0x1c4   : > { %v4804_v14 = vadd.f32 %v4803_v13, %v4802_v6  ;;  %v4741_v15 = vpop.f32.mrf.mxu0  ;;  %3793 = vmatmul.mubr.bf16.gmra.mxu0 %v4428_v5 }
 0x1c5   : > { %v4805_v16 = vpop.f32.mrf.mxu1  ;;  %3890 = vmatmul.mubr.bf16.gmra.mxu1 %v4430_v7  ;;  %3800 = vmatprep.mubr.bf16.mxu0 %v4445_v8  ;;  %v1481_v7 = vld [vmem:[%s6824_s0 + $0x3b8] sm:$0xff] }
 0x1c6   : > { %v6525_v17 = vadd.f32 %v4804_v14, %v4740_v12  ;;  %v4742_v18 = vpop.f32.mrf.mxu0  ;;  %3897 = vmatprep.mubr.bf16.mxu1 %v4447_v11  ;;  %v1489_v8 = vld [vmem:[%s6824_s0 + $0x3f8] sm:$0xff]  ;;  %v4476_v12 = vcombine.low %v1464_v43, %v1472_v44  ;;  %v4478_v14 = vcombine.low %v1465_v47, %v1473_v48 }
 0x1c7   : > { %v4743_v21 = vadd.f32 %v4742_v18, %v4741_v15  ;;  %v4806_v22 = vpop.f32.mrf.mxu1  ;;  %v4493_v15 = vcombine.high %v1480_v3, %v1488_v4  ;;  %v4495_v19 = vcombine.high %v1481_v7, %v1489_v8 }
 0x1c8   : > { %v4807_v25 = vadd.f32 %v4806_v22, %v4805_v16  ;;  %v4744_v26 = vpop.f32.mrf.mxu0 }
 0x1c9   : > { %v4808_v28 = vpop.f32.mrf.mxu1 }
 0x1ca   : > { %v6539_v32 = vadd.f32 %v4807_v25, %v4743_v21  ;;  %v4745_v33 = vpop.f32.mrf.mxu0 }
 0x1cb   : > { %v4746_v35 = vadd.f32 %v4745_v33, %v4744_v26  ;;  %v4809_v36 = vpop.f32.mrf.mxu1  ;;  %v4492_v33 = vcombine.low %v1480_v3, %v1488_v4 }
 0x1cc   : > { %v4810_v38 = vadd.f32 %v4809_v36, %v4808_v28  ;;  %v4747_v39 = vpop.f32.mrf.mxu0  ;;  %3801 = vmatmul.mubr.bf16.gmra.mxu0 %v4444_v27 }
 0x1cd   : > { %v4811_v40 = vpop.f32.mrf.mxu1  ;;  %3898 = vmatmul.mubr.bf16.gmra.mxu1 %v4446_v30  ;;  %3808 = vmatprep.mubr.bf16.mxu0 %v4461_v31 }
 0x1ce   : > { %v6541_v41 = vadd.f32 %v4810_v38, %v4746_v35  ;;  %v4748_v42 = vpop.f32.mrf.mxu0  ;;  %3905 = vmatprep.mubr.bf16.mxu1 %v4463_v34  ;;  %v4494_v35 = vcombine.low %v1481_v7, %v1489_v8 }
 0x1cf   : > { %v4749_v45 = vadd.f32 %v4748_v42, %v4747_v39  ;;  %v4812_v46 = vpop.f32.mrf.mxu1 }
 0x1d0   : > { %v4813_v49 = vadd.f32 %v4812_v46, %v4811_v40  ;;  %v4750_v50 = vpop.f32.mrf.mxu0 }
 0x1d1   : > { %v4814_v53 = vpop.f32.mrf.mxu1 }
 0x1d2   : > { %v6555_v56 = vadd.f32 %v4813_v49, %v4749_v45  ;;  %v4751_v57 = vpop.f32.mrf.mxu0 }
 0x1d3   : > { %v4752_v60 = vadd.f32 %v4751_v57, %v4750_v50  ;;  %v4815_v61 = vpop.f32.mrf.mxu1 }
 0x1d4   : > { %v4816_v62 = vadd.f32 %v4815_v61, %v4814_v53  ;;  %v4753_v63 = vpop.f32.mrf.mxu0  ;;  %3809 = vmatmul.mubr.bf16.gmra.mxu0 %v4460_v52 }
 0x1d5   : > { %v4817_v0 = vpop.f32.mrf.mxu1  ;;  %3906 = vmatmul.mubr.bf16.gmra.mxu1 %v4462_v54  ;;  %3816 = vmatprep.mubr.bf16.mxu0 %v4477_v55 }
 0x1d6   : > { %v6557_v1 = vadd.f32 %v4816_v62, %v4752_v60  ;;  %v4754_v2 = vpop.f32.mrf.mxu0  ;;  %3913 = vmatprep.mubr.bf16.mxu1 %v4479_v58 }
 0x1d7   : > { %v4755_v5 = vadd.f32 %v4754_v2, %v4753_v63  ;;  %v4818_v6 = vpop.f32.mrf.mxu1 }
 0x1d8   : > { %v4819_v10 = vadd.f32 %v4818_v6, %v4817_v0  ;;  %v4756_v11 = vpop.f32.mrf.mxu0 }
 0x1d9   : > { %v4820_v13 = vpop.f32.mrf.mxu1 }
 0x1da   : > { %v6571_v16 = vadd.f32 %v4819_v10, %v4755_v5  ;;  %v4757_v18 = vpop.f32.mrf.mxu0 }
 0x1db   : > { %v4758_v20 = vadd.f32 %v4757_v18, %v4756_v11  ;;  %v4821_v21 = vpop.f32.mrf.mxu1 }
 0x1dc   : > { %v4822_v22 = vadd.f32 %v4821_v21, %v4820_v13  ;;  %v4759_v23 = vpop.f32.mrf.mxu0  ;;  %3817 = vmatmul.mubr.bf16.gmra.mxu0 %v4476_v12 }
 0x1dd   : > { %v4823_v24 = vpop.f32.mrf.mxu1  ;;  %3914 = vmatmul.mubr.bf16.gmra.mxu1 %v4478_v14  ;;  %3824 = vmatprep.mubr.bf16.mxu0 %v4493_v15 }
 0x1de   : > { %v6573_v25 = vadd.f32 %v4822_v22, %v4758_v20  ;;  %v4760_v26 = vpop.f32.mrf.mxu0  ;;  %3921 = vmatprep.mubr.bf16.mxu1 %v4495_v19 }
 0x1df   : > { %v4761_v27 = vadd.f32 %v4760_v26, %v4759_v23  ;;  %v4824_v28 = vpop.f32.mrf.mxu1 }
 0x1e0   : > { %v4825_v30 = vadd.f32 %v4824_v28, %v4823_v24  ;;  %v4762_v31 = vpop.f32.mrf.mxu0 }
 0x1e1   : > { %v4826_v34 = vpop.f32.mrf.mxu1 }
 0x1e2   : > { %v6575_v36 = vadd.f32 %v4825_v30, %v4761_v27  ;;  %v4763_v38 = vpop.f32.mrf.mxu0 }
 0x1e3   : > { %v4764_v39 = vadd.f32 %v4763_v38, %v4762_v31  ;;  %v4827_v40 = vpop.f32.mrf.mxu1 }
 0x1e4   : > { %v4828_v42 = vadd.f32 %v4827_v40, %v4826_v34  ;;  %v4765_v43 = vpop.f32.mrf.mxu0  ;;  %3825 = vmatmul.mubr.bf16.gmra.mxu0 %v4492_v33 }
 0x1e5   : > { %v4829_v44 = vpop.f32.mrf.mxu1  ;;  %3922 = vmatmul.mubr.bf16.gmra.mxu1 %v4494_v35 }
 0x1e6   : > { %v6577_v45 = vadd.f32 %v4828_v42, %v4764_v39  ;;  %v4766_v46 = vpop.f32.mrf.mxu0 }
 0x1e7   : > { %v4767_v47 = vadd.f32 %v4766_v46, %v4765_v43  ;;  %v4830_v48 = vpop.f32.mrf.mxu1 }
 0x1e8   : > { %v4831_v49 = vadd.f32 %v4830_v48, %v4829_v44  ;;  %v4768_v50 = vpop.f32.mrf.mxu0 }
 0x1e9   : > { %v4832_v52 = vpop.f32.mrf.mxu1 }
 0x1ea   : > { %v6579_v53 = vadd.f32 %v4831_v49, %v4767_v47  ;;  %v4769_v54 = vpop.f32.mrf.mxu0 }
 0x1eb   : > { %v4770_v55 = vadd.f32 %v4769_v54, %v4768_v50  ;;  %v4833_v57 = vpop.f32.mrf.mxu1 }
 0x1ec   : > { %v4834_v58 = vadd.f32 %v4833_v57, %v4832_v52  ;;  %v4851_v60 = vpop.f32.mrf.mxu0 }
 0x1ed   : > { %v4915_v61 = vpop.f32.mrf.mxu1 }
 0x1ee   : > { %v6581_v62 = vadd.f32 %v4834_v58, %v4770_v55  ;;  %v4852_v63 = vpop.f32.mrf.mxu0 }
 0x1ef   : > { %v4853_v0 = vadd.f32 %v4852_v63, %v4851_v60  ;;  %v4916_v2 = vpop.f32.mrf.mxu1 }
 0x1f0   : > { %v4917_v3 = vadd.f32 %v4916_v2, %v4915_v61  ;;  %v4854_v4 = vpop.f32.mrf.mxu0 }
 0x1f1   : > { %v3383_v5 = vadd.f32 %v4853_v0, %v6491_v29  ;;  %v4918_v6 = vpop.f32.mrf.mxu1 }
 0x1f2   : > { %v4855_v7 = vpop.f32.mrf.mxu0 }
 0x1f3   : > { %v6584_v8 = vadd.f32 %v4917_v3, %v3383_v5  ;;  %v4856_v10 = vadd.f32 %v4855_v7, %v4854_v4  ;;  %v4919_v11 = vpop.f32.mrf.mxu1 }
 0x1f4   : > { %v4920_v12 = vadd.f32 %v4919_v11, %v4918_v6  ;;  %v4857_v13 = vpop.f32.mrf.mxu0 }
 0x1f5   : > { %v3386_v14 = vadd.f32 %v4856_v10, %v6493_v37  ;;  %v4921_v15 = vpop.f32.mrf.mxu1 }
 0x1f6   : > { %v4858_v18 = vpop.f32.mrf.mxu0 }
 0x1f7   : > { %v6587_v19 = vadd.f32 %v4920_v12, %v3386_v14  ;;  %v4859_v20 = vadd.f32 %v4858_v18, %v4857_v13  ;;  %v4922_v21 = vpop.f32.mrf.mxu1 }
 0x1f8   : > { %v4923_v22 = vadd.f32 %v4922_v21, %v4921_v15  ;;  %v4860_v23 = vpop.f32.mrf.mxu0 }
 0x1f9   : > { %v3391_v29 = vadd.f32 %v4859_v20, %v6507_v51  ;;  %v4924_v24 = vpop.f32.mrf.mxu1 }
 0x1fa   : > { %v4861_v26 = vpop.f32.mrf.mxu0 }
 0x1fb   : > { %v6590_v27 = vadd.f32 %v4923_v22, %v3391_v29  ;;  %v4862_v28 = vadd.f32 %v4861_v26, %v4860_v23  ;;  %v4925_v30 = vpop.f32.mrf.mxu1 }
 0x1fc   : > { %v4926_v31 = vadd.f32 %v4925_v30, %v4924_v24  ;;  %v4863_v33 = vpop.f32.mrf.mxu0 }
 0x1fd   : > { %v3394_v37 = vadd.f32 %v4862_v28, %v6509_v59  ;;  %v4927_v34 = vpop.f32.mrf.mxu1 }
 0x1fe   : > { %v4864_v35 = vpop.f32.mrf.mxu0 }
 0x1ff   : > { %v6593_v38 = vadd.f32 %v4926_v31, %v3394_v37  ;;  %v4865_v39 = vadd.f32 %v4864_v35, %v4863_v33  ;;  %v4928_v40 = vpop.f32.mrf.mxu1 }
 0x200   : > { %v4929_v42 = vadd.f32 %v4928_v40, %v4927_v34  ;;  %v4866_v43 = vpop.f32.mrf.mxu0 }
 0x201   : > { %v3399_v51 = vadd.f32 %v4865_v39, %v6523_v9  ;;  %v4930_v44 = vpop.f32.mrf.mxu1 }
 0x202   : > { %v4867_v46 = vpop.f32.mrf.mxu0 }
 0x203   : > { %v6596_v47 = vadd.f32 %v4929_v42, %v3399_v51  ;;  %v4868_v48 = vadd.f32 %v4867_v46, %v4866_v43  ;;  %v4931_v49 = vpop.f32.mrf.mxu1 }
 0x204   : > { %v4932_v50 = vadd.f32 %v4931_v49, %v4930_v44  ;;  %v4869_v52 = vpop.f32.mrf.mxu0 }
 0x205   : > { %v3402_v59 = vadd.f32 %v4868_v48, %v6525_v17  ;;  %v4933_v54 = vpop.f32.mrf.mxu1 }
 0x206   : > { %v4870_v55 = vpop.f32.mrf.mxu0 }
 0x207   : > { %v6599_v57 = vadd.f32 %v4932_v50, %v3402_v59  ;;  %v4871_v58 = vadd.f32 %v4870_v55, %v4869_v52  ;;  %v4934_v60 = vpop.f32.mrf.mxu1 }
 0x208   : > { %v4935_v61 = vadd.f32 %v4934_v60, %v4933_v54  ;;  %v4872_v63 = vpop.f32.mrf.mxu0 }
 0x209   : > { %v3407_v9 = vadd.f32 %v4871_v58, %v6539_v32  ;;  %v4936_v0 = vpop.f32.mrf.mxu1 }
 0x20a   : > { %v4873_v2 = vpop.f32.mrf.mxu0 }
 0x20b   : > { %v6602_v3 = vadd.f32 %v4935_v61, %v3407_v9  ;;  %v4874_v4 = vadd.f32 %v4873_v2, %v4872_v63  ;;  %v4937_v5 = vpop.f32.mrf.mxu1 }
 0x20c   : > { %v4938_v6 = vadd.f32 %v4937_v5, %v4936_v0  ;;  %v4875_v7 = vpop.f32.mrf.mxu0 }
 0x20d   : > { %v3410_v17 = vadd.f32 %v4874_v4, %v6541_v41  ;;  %v4939_v10 = vpop.f32.mrf.mxu1 }
 0x20e   : > { %v4876_v11 = vpop.f32.mrf.mxu0 }
 0x20f   : > { %v6605_v12 = vadd.f32 %v4938_v6, %v3410_v17  ;;  %v4877_v13 = vadd.f32 %v4876_v11, %v4875_v7  ;;  %v4940_v14 = vpop.f32.mrf.mxu1 }
 0x210   : > { %v4941_v15 = vadd.f32 %v4940_v14, %v4939_v10  ;;  %v4878_v18 = vpop.f32.mrf.mxu0 }
 0x211   : > { %v3415_v32 = vadd.f32 %v4877_v13, %v6555_v56  ;;  %v4942_v20 = vpop.f32.mrf.mxu1 }
 0x212   : > { %v4879_v21 = vpop.f32.mrf.mxu0 }
 0x213   : > { %v6608_v22 = vadd.f32 %v4941_v15, %v3415_v32  ;;  %v4880_v23 = vadd.f32 %v4879_v21, %v4878_v18  ;;  %v4943_v29 = vpop.f32.mrf.mxu1 }
 0x214   : > { %v4944_v24 = vadd.f32 %v4943_v29, %v4942_v20  ;;  %v4881_v26 = vpop.f32.mrf.mxu0 }
 0x215   : > { %v3418_v41 = vadd.f32 %v4880_v23, %v6557_v1  ;;  %v4945_v28 = vpop.f32.mrf.mxu1 }
 0x216   : > { %v4882_v30 = vpop.f32.mrf.mxu0 }
 0x217   : > { %v6611_v31 = vadd.f32 %v4944_v24, %v3418_v41  ;;  %v4883_v33 = vadd.f32 %v4882_v30, %v4881_v26  ;;  %v4946_v37 = vpop.f32.mrf.mxu1 }
 0x218   : > { %v4947_v34 = vadd.f32 %v4946_v37, %v4945_v28  ;;  %v4884_v35 = vpop.f32.mrf.mxu0 }
 0x219   : > { %v3423_v56 = vadd.f32 %v4883_v33, %v6571_v16  ;;  %v4948_v39 = vpop.f32.mrf.mxu1 }
 0x21a   : > { %v4885_v40 = vpop.f32.mrf.mxu0 }
 0x21b   : > { %v6614_v42 = vadd.f32 %v4947_v34, %v3423_v56  ;;  %v4886_v43 = vadd.f32 %v4885_v40, %v4884_v35  ;;  %v4949_v51 = vpop.f32.mrf.mxu1 }
 0x21c   : > { %v4950_v44 = vadd.f32 %v4949_v51, %v4948_v39  ;;  %v4887_v46 = vpop.f32.mrf.mxu0 }
 0x21d   : > { %v3426_v1 = vadd.f32 %v4886_v43, %v6573_v25  ;;  %v4951_v48 = vpop.f32.mrf.mxu1 }
 0x21e   : > { %v4888_v49 = vpop.f32.mrf.mxu0 }
 0x21f   : > { %v6617_v50 = vadd.f32 %v4950_v44, %v3426_v1  ;;  %v4889_v52 = vadd.f32 %v4888_v49, %v4887_v46  ;;  %v4952_v59 = vpop.f32.mrf.mxu1 }
 0x220   : > { %v4953_v54 = vadd.f32 %v4952_v59, %v4951_v48  ;;  %v4890_v55 = vpop.f32.mrf.mxu0 }
 0x221   : > { %v3431_v16 = vadd.f32 %v4889_v52, %v6575_v36  ;;  %v4954_v58 = vpop.f32.mrf.mxu1 }
 0x222   : > { %v4891_v60 = vpop.f32.mrf.mxu0 }
 0x223   : > { %v6620_v61 = vadd.f32 %v4953_v54, %v3431_v16  ;;  %v4892_v63 = vadd.f32 %v4891_v60, %v4890_v55  ;;  %v4955_v9 = vpop.f32.mrf.mxu1 }
 0x224   : > { %v4956_v0 = vadd.f32 %v4955_v9, %v4954_v58  ;;  %v4893_v2 = vpop.f32.mrf.mxu0 }
 0x225   : > { %v3434_v25 = vadd.f32 %v4892_v63, %v6577_v45  ;;  %v4957_v4 = vpop.f32.mrf.mxu1 }
 0x226   : > { %v4894_v5 = vpop.f32.mrf.mxu0 }
 0x227   : > { %v6623_v6 = vadd.f32 %v4956_v0, %v3434_v25  ;;  %v4895_v7 = vadd.f32 %v4894_v5, %v4893_v2  ;;  %v4958_v17 = vpop.f32.mrf.mxu1 }
 0x228   : > { %v4959_v10 = vadd.f32 %v4958_v17, %v4957_v4  ;;  %v4896_v11 = vpop.f32.mrf.mxu0 }
 0x229   : > { %v3439_v36 = vadd.f32 %v4895_v7, %v6579_v53  ;;  %v4960_v13 = vpop.f32.mrf.mxu1 }
 0x22a   : > { %v4897_v14 = vpop.f32.mrf.mxu0 }
 0x22b   : > { %v6626_v15 = vadd.f32 %v4959_v10, %v3439_v36  ;;  %v4898_v18 = vadd.f32 %v4897_v14, %v4896_v11  ;;  %v4961_v32 = vpop.f32.mrf.mxu1 }
 0x22c   : > { %v4962_v20 = vadd.f32 %v4961_v32, %v4960_v13  ;;  %v4979_v21 = vpop.f32.mrf.mxu0 }
 0x22d   : > { %v3442_v45 = vadd.f32 %v4898_v18, %v6581_v62  ;;  %v5043_v23 = vpop.f32.mrf.mxu1 }
 0x22e   : > { %v4980_v29 = vpop.f32.mrf.mxu0 }
 0x22f   : > { %v6629_v24 = vadd.f32 %v4962_v20, %v3442_v45  ;;  %v4981_v26 = vadd.f32 %v4980_v29, %v4979_v21  ;;  %v5044_v41 = vpop.f32.mrf.mxu1 }
 0x230   : > { %v5045_v28 = vadd.f32 %v5044_v41, %v5043_v23  ;;  %v6631_v30 = vpop.f32.mrf.mxu0 }
 0x231   : > { %v3577_v53 = vadd.f32 %v4981_v26, %v6584_v8  ;;  %v6634_v33 = vpop.f32.mrf.mxu1 }
 0x232   : > { %v6636_v37 = vpop.f32.mrf.mxu0 }
 0x233   : > { %v6638_v34 = vadd.f32 %v5045_v28, %v3577_v53  ;;  %v6640_v35 = vpop.f32.mrf.mxu1 }
 0x234   : > { %v4985_v62 = vpop.f32.mrf.mxu0 }
 0x235   : > { %v5049_v56 = vpop.f32.mrf.mxu1 }
 0x236   : > { %v4986_v39 = vpop.f32.mrf.mxu0 }
 0x237   : > { %v4987_v40 = vadd.f32 %v4986_v39, %v4985_v62  ;;  %v5050_v43 = vpop.f32.mrf.mxu1 }
 0x238   : > { %v5051_v51 = vadd.f32 %v5050_v43, %v5049_v56  ;;  %v6642_v44 = vpop.f32.mrf.mxu0 }
 0x239   : > { %v3585_v46 = vadd.f32 %v4987_v40, %v6590_v27  ;;  %v6645_v1 = vpop.f32.mrf.mxu1 }
 0x23a   : > { %v6647_v8 = vpop.f32.mrf.mxu0 }
 0x23b   : > { %v6649_v48 = vadd.f32 %v5051_v51, %v3585_v46  ;;  %v6651_v49 = vpop.f32.mrf.mxu1 }
 0x23c   : > { %v4991_v52 = vpop.f32.mrf.mxu0 }
 0x23d   : > { %v5055_v59 = vpop.f32.mrf.mxu1 }
 0x23e   : > { %v4992_v54 = vpop.f32.mrf.mxu0 }
 0x23f   : > { %v4993_v55 = vadd.f32 %v4992_v54, %v4991_v52  ;;  %v5056_v16 = vpop.f32.mrf.mxu1 }
 0x240   : > { %v5057_v58 = vadd.f32 %v5056_v16, %v5055_v59  ;;  %v6653_v60 = vpop.f32.mrf.mxu0 }
 0x241   : > { %v3593_v63 = vadd.f32 %v4993_v55, %v6596_v47  ;;  %v6656_v9 = vpop.f32.mrf.mxu1 }
 0x242   : > { %v6658_v27 = vpop.f32.mrf.mxu0 }
 0x243   : > { %v6660_v0 = vadd.f32 %v5057_v58, %v3593_v63  ;;  %v6662_v2 = vpop.f32.mrf.mxu1 }
 0x244   : > { %v4997_v25 = vpop.f32.mrf.mxu0 }
 0x245   : > { %v5061_v4 = vpop.f32.mrf.mxu1 }
 0x246   : > { %v4998_v5 = vpop.f32.mrf.mxu0 }
 0x247   : > { %v4999_v7 = vadd.f32 %v4998_v5, %v4997_v25  ;;  %v5062_v17 = vpop.f32.mrf.mxu1 }
 0x248   : > { %v5063_v10 = vadd.f32 %v5062_v17, %v5061_v4  ;;  %v6664_v11 = vpop.f32.mrf.mxu0 }
 0x249   : > { %v3601_v36 = vadd.f32 %v4999_v7, %v6602_v3  ;;  %v6667_v13 = vpop.f32.mrf.mxu1 }
 0x24a   : > { %v6669_v47 = vpop.f32.mrf.mxu0 }
 0x24b   : > { %v6671_v14 = vadd.f32 %v5063_v10, %v3601_v36  ;;  %v6673_v18 = vpop.f32.mrf.mxu1 }
 0x24c   : > { %v5003_v32 = vpop.f32.mrf.mxu0 }
 0x24d   : > { %v5067_v20 = vpop.f32.mrf.mxu1 }
 0x24e   : > { %v5004_v21 = vpop.f32.mrf.mxu0 }
 0x24f   : > { %v5005_v45 = vadd.f32 %v5004_v21, %v5003_v32  ;;  %v5068_v23 = vpop.f32.mrf.mxu1 }
 0x250   : > { %v5069_v29 = vadd.f32 %v5068_v23, %v5067_v20  ;;  %v6675_v26 = vpop.f32.mrf.mxu0 }
 0x251   : > { %v3609_v41 = vadd.f32 %v5005_v45, %v6608_v22  ;;  %v6678_v28 = vpop.f32.mrf.mxu1 }
 0x252   : > { %v6680_v3 = vpop.f32.mrf.mxu0 }
 0x253   : > { %v6682_v53 = vadd.f32 %v5069_v29, %v3609_v41  ;;  %v6684_v62 = vpop.f32.mrf.mxu1 }
 0x254   : > { %v5009_v56 = vpop.f32.mrf.mxu0 }
 0x255   : > { %v5073_v39 = vpop.f32.mrf.mxu1 }
 0x256   : > { %v5010_v40 = vpop.f32.mrf.mxu0 }
 0x257   : > { %v5011_v43 = vadd.f32 %v5010_v40, %v5009_v56  ;;  %v5074_v51 = vpop.f32.mrf.mxu1 }
 0x258   : > { %v5075_v46 = vadd.f32 %v5074_v51, %v5073_v39  ;;  %v6686_v52 = vpop.f32.mrf.mxu0  ;;  %v4984_v51 = vadd.f32 %v6636_v37, %v6631_v30 }
 0x259   : > { %v3617_v59 = vadd.f32 %v5011_v43, %v6614_v42  ;;  %v6689_v54 = vpop.f32.mrf.mxu1 }
 0x25a   : > { %v6691_v22 = vpop.f32.mrf.mxu0 }
 0x25b   : > { %v6693_v55 = vadd.f32 %v5075_v46, %v3617_v59  ;;  %v6695_v16 = vpop.f32.mrf.mxu1 }
 0x25c   : > { %v5015_v58 = vpop.f32.mrf.mxu0 }
 0x25d   : > { %v5079_v63 = vpop.f32.mrf.mxu1 }
 0x25e   : > { %v5016_v25 = vpop.f32.mrf.mxu0 }
 0x25f   : > { %v5017_v4 = vadd.f32 %v5016_v25, %v5015_v58  ;;  %v5080_v5 = vpop.f32.mrf.mxu1 }
 0x260   : > { %v5081_v7 = vadd.f32 %v5080_v5, %v5079_v63  ;;  %v6697_v17 = vpop.f32.mrf.mxu0 }
 0x261   : > { %v3625_v10 = vadd.f32 %v5017_v4, %v6620_v61  ;;  %v6700_v36 = vpop.f32.mrf.mxu1  ;;  %v3580_v4 = vadd.f32 %v4984_v51, %v6587_v19 }
 0x262   : > { %v6702_v42 = vpop.f32.mrf.mxu0 }
 0x263   : > { %v6704_v32 = vadd.f32 %v5081_v7, %v3625_v10  ;;  %v6706_v20 = vpop.f32.mrf.mxu1  ;;  %v5048_v10 = vadd.f32 %v6640_v35, %v6634_v33 }
 0x264   : > { %v5021_v21 = vpop.f32.mrf.mxu0 }
 0x265   : > { %v5085_v45 = vpop.f32.mrf.mxu1 }
 0x266   : > { %v5022_v23 = vpop.f32.mrf.mxu0 }
 0x267   : > { %v5023_v29 = vadd.f32 %v5022_v23, %v5021_v21  ;;  %v5086_v41 = vpop.f32.mrf.mxu1  ;;  %v3677_v23 = vadd.f32 %v5048_v10, %v3580_v4  ;;  %v5054_v4 = vadd.f32 %v6651_v49, %v6645_v1 }
 0x268   : > { %v6708_v56 = vpop.f32.mrf.mxu0  ;;  %v5087_v40 = vadd.f32 %v5086_v41, %v5085_v45 }
 0x269   : > { %v3633_v39 = vadd.f32 %v5023_v29, %v6626_v15  ;;  %v6711_v43 = vpop.f32.mrf.mxu1  ;;  %v4990_v29 = vadd.f32 %v6647_v8, %v6642_v44 }
 0x26a   : > { %v6713_v61 = vpop.f32.mrf.mxu0 }
 0x26b   : > { %v6717_v46 = vadd.f32 %v5087_v40, %v3633_v39  ;;  %v6719_v59 = vpop.f32.mrf.mxu1  ;;  %v3588_v33 = vadd.f32 %v4990_v29, %v6593_v38 }
 0x26c   : > { %v5107_v58 = vpop.f32.mrf.mxu0 }
 0x26d   : > { %6830 = vst [vmem:[#allocation4_spill] sm:$0xff] %v6717_v46  ;;  %v5171_v63 = vpop.f32.mrf.mxu1  ;;  %v3685_v38 = vadd.f32 %v5054_v4, %v3588_v33 }
 0x26e   : > { %v5108_v25 = vpop.f32.mrf.mxu0 }
 0x26f   : > { %v5109_v5 = vadd.f32 %v5108_v25, %v5107_v58  ;;  %v5172_v15 = vpop.f32.mrf.mxu1 }
 0x270   : > { %v5110_v7 = vpop.f32.mrf.mxu0  ;;  %v5173_v30 = vadd.f32 %v5172_v15, %v5171_v63 }
 0x271   : > { %v3771_v21 = vadd.f32 %v5109_v5, %v6638_v34  ;;  %v5174_v45 = vpop.f32.mrf.mxu1 }
 0x272   : > { %v5111_v37 = vpop.f32.mrf.mxu0 }
 0x273   : > { %v5112_v41 = vadd.f32 %v5111_v37, %v5110_v7  ;;  %v5175_v39 = vpop.f32.mrf.mxu1  ;;  %v3868_v40 = vadd.f32 %v5173_v30, %v3771_v21 }
 0x274   : > { %v5113_v19 = vpop.f32.mrf.mxu0  ;;  %v5176_v58 = vadd.f32 %v5175_v39, %v5174_v45  ;;  %v4996_v45 = vadd.f32 %v6658_v27, %v6653_v60 }
 0x275   : > { %v3774_v51 = vadd.f32 %v5112_v41, %v3677_v23  ;;  %v5177_v25 = vpop.f32.mrf.mxu1  ;;  %v3952_v5 = vmul.f32 %v3868_v40, %v3868_v40 }
 0x276   : > { %v5114_v46 = vpop.f32.mrf.mxu0 }
 0x277   : > { %v3871_v34 = vadd.f32 %v5176_v58, %v3774_v51  ;;  %v5115_v35 = vadd.f32 %v5114_v46, %v5113_v19  ;;  %v5178_v63 = vpop.f32.mrf.mxu1  ;;  %v3596_v51 = vadd.f32 %v4996_v45, %v6599_v57  ;;  %v5002_v57 = vadd.f32 %v6669_v47, %v6664_v11 }
 0x278   : > { %v5179_v44 = vadd.f32 %v5178_v63, %v5177_v25  ;;  %v5116_v8 = vpop.f32.mrf.mxu0  ;;  %v5066_v11 = vadd.f32 %v6673_v18, %v6667_v13 }
 0x279   : > { %v3930_v15 = vadd.f32 %v3871_v34, %v3868_v40  ;;  %v3953_v7 = vmul.f32 %v3871_v34, %v3871_v34  ;;  %v4663_v10 = vpack.c.bf16 %v3871_v34, %v3868_v40  ;;  %v3779_v21 = vadd.f32 %v5115_v35, %v6649_v48  ;;  %v5180_v30 = vpop.f32.mrf.mxu1 }
 0x27a   : > { %v5117_v37 = vpop.f32.mrf.mxu0  ;;  %v5060_v34 = vadd.f32 %v6662_v2, %v6656_v9 }
 0x27b   : > { %v3968_v23 = vadd.f32 %v3953_v7, %v3952_v5  ;;  %4664 = vst [vmem:[%s6735_s15] sm:$0xff] %v4663_v10   ;;  %v3876_v1 = vadd.f32 %v5179_v44, %v3779_v21  ;;  %v5118_v49 = vadd.f32 %v5117_v37, %v5116_v8  ;;  %v5181_v46 = vpop.f32.mrf.mxu1 }
 0x27c   : > { %v5119_v29 = vpop.f32.mrf.mxu0  ;;  %v5182_v19 = vadd.f32 %v5181_v46, %v5180_v30  ;;  %v3693_v7 = vadd.f32 %v5060_v34, %v3596_v51 }
 0x27d   : > { %v3931_v41 = vadd.f32 %v3930_v15, %v3876_v1  ;;  %v3954_v39 = vmul.f32 %v3876_v1, %v3876_v1  ;;  %v3782_v40 = vadd.f32 %v5118_v49, %v3685_v38  ;;  %v5183_v48 = vpop.f32.mrf.mxu1 }
 0x27e   : > { %v5120_v58 = vpop.f32.mrf.mxu0 }
 0x27f   : > { %v3969_v60 = vadd.f32 %v3968_v23, %v3954_v39  ;;  %v3879_v27 = vadd.f32 %v5182_v19, %v3782_v40  ;;  %v5121_v25 = vadd.f32 %v5120_v58, %v5119_v29  ;;  %v5184_v33 = vpop.f32.mrf.mxu1 }
 0x280   : > { %v5185_v35 = vadd.f32 %v5184_v33, %v5183_v48  ;;  %v5122_v63 = vpop.f32.mrf.mxu0 }
 0x281   : > { %v3932_v4 = vadd.f32 %v3931_v41, %v3879_v27  ;;  %v3955_v5 = vmul.f32 %v3879_v27, %v3879_v27  ;;  %v4668_v44 = vpack.c.bf16 %v3879_v27, %v3876_v1  ;;  %v3787_v8 = vadd.f32 %v5121_v25, %v6660_v0  ;;  %v5186_v15 = vpop.f32.mrf.mxu1 }
 0x282   : > { %v5123_v10 = vpop.f32.mrf.mxu0  ;;  %v3604_v0 = vadd.f32 %v5002_v57, %v6605_v12  ;;  %v5008_v25 = vadd.f32 %v6680_v3, %v6675_v26 }
 0x283   : > { %v3970_v21 = vadd.f32 %v3969_v60, %v3955_v5  ;;  %4700 = vst [vmem:[%s6735_s15 + $0x8] sm:$0xff] %v4668_v44   ;;  %v3884_v30 = vadd.f32 %v5185_v35, %v3787_v8  ;;  %v5124_v45 = vadd.f32 %v5123_v10, %v5122_v63  ;;  %v5187_v37 = vpop.f32.mrf.mxu1 }
 0x284   : > { %v5125_v38 = vpop.f32.mrf.mxu0  ;;  %v5188_v49 = vadd.f32 %v5187_v37, %v5186_v15  ;;  %v3701_v33 = vadd.f32 %v5066_v11, %v3604_v0 }
 0x285   : > { %v3933_v9 = vadd.f32 %v3932_v4, %v3884_v30  ;;  %v3956_v2 = vmul.f32 %v3884_v30, %v3884_v30  ;;  %v3790_v23 = vadd.f32 %v5124_v45, %v3693_v7  ;;  %v5189_v46 = vpop.f32.mrf.mxu1  ;;  %v3612_v7 = vadd.f32 %v5008_v25, %v6611_v31 }
 0x286   : > { %v5126_v1 = vpop.f32.mrf.mxu0  ;;  %v5014_v31 = vadd.f32 %v6691_v22, %v6686_v52  ;;  %v5078_v52 = vadd.f32 %v6695_v16, %v6689_v54 }
 0x287   : > { %v3971_v29 = vadd.f32 %v3970_v21, %v3956_v2  ;;  %v3887_v41 = vadd.f32 %v5188_v49, %v3790_v23  ;;  %v5127_v39 = vadd.f32 %v5126_v1, %v5125_v38  ;;  %v5190_v40 = vpop.f32.mrf.mxu1  ;;  %v5072_v21 = vadd.f32 %v6684_v62, %v6678_v28 }
 0x288   : > { %v5191_v47 = vadd.f32 %v5190_v40, %v5189_v46  ;;  %v5128_v19 = vpop.f32.mrf.mxu0 }
 0x289   : > { %v3934_v48 = vadd.f32 %v3933_v9, %v3887_v41  ;;  %v3957_v51 = vmul.f32 %v3887_v41, %v3887_v41  ;;  %v4673_v58 = vpack.c.bf16 %v3887_v41, %v3884_v30  ;;  %v3795_v60 = vadd.f32 %v5127_v39, %v6671_v14  ;;  %v5192_v27 = vpop.f32.mrf.mxu1 }
 0x28a   : > { %v5129_v12 = vpop.f32.mrf.mxu0  ;;  %v3709_v49 = vadd.f32 %v5072_v21, %v3612_v7 }
 0x28b   : > { %v3972_v34 = vadd.f32 %v3971_v29, %v3957_v51  ;;  %4701 = vst [vmem:[%s6735_s15 + $0x10] sm:$0xff] %v4673_v58   ;;  %v3892_v35 = vadd.f32 %v5191_v47, %v3795_v60  ;;  %v5130_v63 = vadd.f32 %v5129_v12, %v5128_v19  ;;  %v5193_v4 = vpop.f32.mrf.mxu1 }
 0x28c   : > { %v5131_v5 = vpop.f32.mrf.mxu0  ;;  %v5194_v8 = vadd.f32 %v5193_v4, %v5192_v27 }
 0x28d   : > { %v3935_v13 = vadd.f32 %v3934_v48, %v3892_v35  ;;  %v3958_v18 = vmul.f32 %v3892_v35, %v3892_v35  ;;  %v3798_v44 = vadd.f32 %v5130_v63, %v3701_v33  ;;  %v5195_v15 = vpop.f32.mrf.mxu1  ;;  %v5020_v63 = vadd.f32 %v6702_v42, %v6697_v17 }
 0x28e   : > { %v5132_v14 = vpop.f32.mrf.mxu0 }
 0x28f   : > { %v3973_v10 = vadd.f32 %v3972_v34, %v3958_v18  ;;  %v3895_v57 = vadd.f32 %v5194_v8, %v3798_v44  ;;  %v5133_v26 = vadd.f32 %v5132_v14, %v5131_v5  ;;  %v5196_v3 = vpop.f32.mrf.mxu1 }
 0x290   : > { %v5197_v30 = vadd.f32 %v5196_v3, %v5195_v15  ;;  %v5134_v45 = vpop.f32.mrf.mxu0  ;;  %v5084_v3 = vadd.f32 %v6706_v20, %v6700_v36 }
 0x291   : > { %v3936_v37 = vadd.f32 %v3935_v13, %v3895_v57  ;;  %v3959_v38 = vmul.f32 %v3895_v57, %v3895_v57  ;;  %v4678_v9 = vpack.c.bf16 %v3895_v57, %v3892_v35  ;;  %v3803_v2 = vadd.f32 %v5133_v26, %v6682_v53  ;;  %v5198_v23 = vpop.f32.mrf.mxu1 }
 0x292   : > { %v5135_v46 = vpop.f32.mrf.mxu0  ;;  %v3620_v53 = vadd.f32 %v5014_v31, %v6617_v50 }
 0x293   : > { %v3974_v1 = vadd.f32 %v3973_v10, %v3959_v38  ;;  %4702 = vst [vmem:[%s6735_s15 + $0x18] sm:$0xff] %v4678_v9   ;;  %v3900_v0 = vadd.f32 %v5197_v30, %v3803_v2  ;;  %v5136_v29 = vadd.f32 %v5135_v46, %v5134_v45  ;;  %v5199_v41 = vpop.f32.mrf.mxu1  ;;  %v3628_v10 = vadd.f32 %v5020_v63, %v6623_v6 }
 0x294   : > { %v5137_v39 = vpop.f32.mrf.mxu0  ;;  %v5200_v11 = vadd.f32 %v5199_v41, %v5198_v23  ;;  %v3717_v4 = vadd.f32 %v5078_v52, %v3620_v53  ;;  %v5026_v6 = vadd.f32 %v6713_v61, %v6708_v56  ;;  %v5090_v56 = vadd.f32 %v6719_v59, %v6711_v43 }
 0x295   : > { %v3937_v28 = vadd.f32 %v3936_v37, %v3900_v0  ;;  %v3960_v62 = vmul.f32 %v3900_v0, %v3900_v0  ;;  %v3806_v40 = vadd.f32 %v5136_v29, %v3709_v49  ;;  %v5201_v47 = vpop.f32.mrf.mxu1  ;;  %v3725_v23 = vadd.f32 %v5084_v3, %v3628_v10  ;;  %v4112_v3 = vld [vmem:[%s6735_s15] sm:$0xf] (%p5487_p6) }
 0x296   : > { %v5138_v19 = vpop.f32.mrf.mxu0  ;;  %4113 = vst [vmem:[%s4095_s13] sm:$0xf] (%p5487_p6), %v4112_v3 }
 0x297   : > { %v3975_v48 = vadd.f32 %v3974_v1, %v3960_v62  ;;  %v3903_v51 = vadd.f32 %v5200_v11, %v3806_v40  ;;  %v5139_v58 = vadd.f32 %v5138_v19, %v5137_v39  ;;  %v5202_v60 = vpop.f32.mrf.mxu1 }
 0x298   : > { %v5203_v22 = vadd.f32 %v5202_v60, %v5201_v47  ;;  %v5140_v27 = vpop.f32.mrf.mxu0  ;;  %v6831_v60 = vld [vmem:[#allocation4_spill] sm:$0xff] }
 0x299   : > { %v3938_v25 = vadd.f32 %v3937_v28, %v3903_v51  ;;  %v3961_v12 = vmul.f32 %v3903_v51, %v3903_v51  ;;  %v4683_v33 = vpack.c.bf16 %v3903_v51, %v3900_v0  ;;  %v3811_v34 = vadd.f32 %v5139_v58, %v6693_v55  ;;  %v5204_v35 = vpop.f32.mrf.mxu1 }
 0x29a   : > { %v5141_v50 = vpop.f32.mrf.mxu0 }
 0x29b   : > { %v3976_v5 = vadd.f32 %v3975_v48, %v3961_v12  ;;  %4703 = vst [vmem:[%s6735_s15 + $0x20] sm:$0xff] %v4683_v33   ;;  %v3908_v13 = vadd.f32 %v5203_v22, %v3811_v34  ;;  %v5142_v18 = vadd.f32 %v5141_v50, %v5140_v27  ;;  %v5205_v44 = vpop.f32.mrf.mxu1 }
 0x29c   : > { %v5143_v8 = vpop.f32.mrf.mxu0  ;;  %v5206_v7 = vadd.f32 %v5205_v44, %v5204_v35 }
 0x29d   : > { %v3939_v54 = vadd.f32 %v3938_v25, %v3908_v13  ;;  %v3962_v16 = vmul.f32 %v3908_v13, %v3908_v13  ;;  %v3814_v15 = vadd.f32 %v5142_v18, %v3717_v4  ;;  %v5207_v14 = vpop.f32.mrf.mxu1 }
 0x29e   : > { %v5144_v55 = vpop.f32.mrf.mxu0 }
 0x29f   : > { %v3977_v57 = vadd.f32 %v3976_v5, %v3962_v16  ;;  %v3911_v26 = vadd.f32 %v5206_v7, %v3814_v15  ;;  %v5145_v17 = vadd.f32 %v5144_v55, %v5143_v8  ;;  %v5208_v42 = vpop.f32.mrf.mxu1 }
 0x2a0   : > { %v5209_v21 = vadd.f32 %v5208_v42, %v5207_v14  ;;  %v5146_v30 = vpop.f32.mrf.mxu0 }
 0x2a1   : > { %v3940_v45 = vadd.f32 %v3939_v54, %v3911_v26  ;;  %v3963_v37 = vmul.f32 %v3911_v26, %v3911_v26  ;;  %v4688_v38 = vpack.c.bf16 %v3911_v26, %v3908_v13  ;;  %v3819_v9 = vadd.f32 %v5145_v17, %v6704_v32  ;;  %v5210_v2 = vpop.f32.mrf.mxu1 }
 0x2a2   : > { %v5147_v49 = vpop.f32.mrf.mxu0  ;;  %v3636_v32 = vadd.f32 %v5026_v6, %v6629_v24 }
 0x2a3   : > { %v3978_v46 = vadd.f32 %v3977_v57, %v3963_v37  ;;  %4704 = vst [vmem:[%s6735_s15 + $0x28] sm:$0xff] %v4688_v38   ;;  %v3916_v31 = vadd.f32 %v5209_v21, %v3819_v9  ;;  %v5148_v1 = vadd.f32 %v5147_v49, %v5146_v30  ;;  %v5211_v0 = vpop.f32.mrf.mxu1  ;;  %v4114_v21 = vld [vmem:[%s6735_s15 + $0x4] sm:$0xf] (%p5487_p6)  ;;  %v4116_v30 = vld [vmem:[%s6735_s15 + $0x8] sm:$0xf] (%p5487_p6) }
 0x2a4   : > { %v5149_v29 = vpop.f32.mrf.mxu0  ;;  %v5212_v39 = vadd.f32 %v5211_v0, %v5210_v2  ;;  %v3733_v25 = vadd.f32 %v5090_v56, %v3636_v32  ;;  %v4120_v37 = vld [vmem:[%s6735_s15 + $0x10] sm:$0xf] (%p5487_p6)  ;;  %4115 = vst [vmem:[%s4095_s13 + $0x8] sm:$0xf] (%p5487_p6), %v4114_v21  ;;  %4117 = vst [vmem:[%s4095_s13 + $0x10] sm:$0xf] (%p5487_p6), %v4116_v30 }
 0x2a5   : > { %v3941_v36 = vadd.f32 %v3940_v45, %v3916_v31  ;;  %v3964_v20 = vmul.f32 %v3916_v31, %v3916_v31  ;;  %v3822_v41 = vadd.f32 %v5148_v1, %v3725_v23  ;;  %v5213_v28 = vpop.f32.mrf.mxu1  ;;  %v4118_v45 = vld [vmem:[%s6735_s15 + $0xc] sm:$0xf] (%p5487_p6)  ;;  %4121 = vst [vmem:[%s4095_s13 + $0x20] sm:$0xf] (%p5487_p6), %v4120_v37  ;;  %v4122_v38 = vld [vmem:[%s6735_s15 + $0x14] sm:$0xf] (%p5487_p6) }
 0x2a6   : > { %v5150_v62 = vpop.f32.mrf.mxu0  ;;  %4119 = vst [vmem:[%s4095_s13 + $0x18] sm:$0xf] (%p5487_p6), %v4118_v45  ;;  %v4124_v9 = vld [vmem:[%s6735_s15 + $0x18] sm:$0xf] (%p5487_p6)  ;;  %v4126_v2 = vld [vmem:[%s6735_s15 + $0x1c] sm:$0xf] (%p5487_p6) }
 0x2a7   : > { %v3979_v40 = vadd.f32 %v3978_v46, %v3964_v20  ;;  %v3919_v11 = vadd.f32 %v5212_v39, %v3822_v41  ;;  %v5151_v47 = vadd.f32 %v5150_v62, %v5149_v29  ;;  %v5214_v19 = vpop.f32.mrf.mxu1  ;;  %4123 = vst [vmem:[%s4095_s13 + $0x28] sm:$0xf] (%p5487_p6), %v4122_v38  ;;  %4125 = vst [vmem:[%s4095_s13 + $0x30] sm:$0xf] (%p5487_p6), %v4124_v9  ;;  %v4128_v23 = vld [vmem:[%s6735_s15 + $0x20] sm:$0xf] (%p5487_p6) }
 0x2a8   : > { %v5215_v61 = vadd.f32 %v5214_v19, %v5213_v28  ;;  %v5152_v53 = vpop.f32.mrf.mxu0  ;;  %4127 = vst [vmem:[%s4095_s13 + $0x38] sm:$0xf] (%p5487_p6), %v4126_v2  ;;  %v4130_v49 = vld [vmem:[%s6735_s15 + $0x24] sm:$0xf] (%p5487_p6)  ;;  %4129 = vst [vmem:[%s4095_s13 + $0x40] sm:$0xf] (%p5487_p6), %v4128_v23 }
 0x2a9   : > { %v3942_v48 = vadd.f32 %v3941_v36, %v3919_v11  ;;  %v3965_v51 = vmul.f32 %v3919_v11, %v3919_v11  ;;  %v4693_v58 = vpack.c.bf16 %v3919_v11, %v3916_v31  ;;  %v3827_v52 = vadd.f32 %v5151_v47, %v6831_v60  ;;  %v5216_v22 = vpop.f32.mrf.mxu1  ;;  %4131 = vst [vmem:[%s4095_s13 + $0x48] sm:$0xf] (%p5487_p6), %v4130_v49 }
 0x2aa   : > { %v5153_v27 = vpop.f32.mrf.mxu0  ;;  %v4132_v6 = vld [vmem:[%s6735_s15 + $0x28] sm:$0xf] (%p5487_p6)  ;;  %v4134_v46 = vld [vmem:[%s6735_s15 + $0x2c] sm:$0xf] (%p5487_p6) }
 0x2ab   : > { %v3980_v12 = vadd.f32 %v3979_v40, %v3965_v51  ;;  %4705 = vst [vmem:[%s6735_s15 + $0x30] sm:$0xff] %v4693_v58   ;;  %v3924_v24 = vadd.f32 %v5215_v61, %v3827_v52  ;;  %v5154_v33 = vadd.f32 %v5153_v27, %v5152_v53  ;;  %v5217_v34 = vpop.f32.mrf.mxu1  ;;  %4133 = vst [vmem:[%s4095_s13 + $0x50] sm:$0xf] (%p5487_p6), %v4132_v6 }
 0x2ac   : > { %v5218_v59 = vadd.f32 %v5217_v34, %v5216_v22  ;;  %4135 = vst [vmem:[%s4095_s13 + $0x58] sm:$0xf] (%p5487_p6), %v4134_v46 }
 0x2ad   : > { %v3943_v35 = vadd.f32 %v3942_v48, %v3924_v24  ;;  %v3966_v63 = vmul.f32 %v3924_v24, %v3924_v24  ;;  %v3830_v43 = vadd.f32 %v5154_v33, %v3733_v25 }
 0x2af   : > { %v3981_v50 = vadd.f32 %v3980_v12, %v3966_v63  ;;  %v3927_v4 = vadd.f32 %v5218_v59, %v3830_v43 }
 0x2b1   : > { %v3944_v5 = vadd.f32 %v3943_v35, %v3927_v4  ;;  %v3967_v13 = vmul.f32 %v3927_v4, %v3927_v4  ;;  %v4698_v18 = vpack.c.bf16 %v3927_v4, %v3924_v24 }
 0x2b2   : > { %v4136_v31 = vld [vmem:[%s6735_s15 + $0x30] sm:$0xf] (%p5487_p6)  ;;  %v4138_v1 = vld [vmem:[%s6735_s15 + $0x34] sm:$0xf] (%p5487_p6) }
 0x2b3   : > { %v3945_v44 = vrot.slane %v3944_v5, 4  ;;  %v3982_v8 = vadd.f32 %v3981_v50, %v3967_v13  ;;  %4706 = vst [vmem:[%s6735_s15 + $0x38] sm:$0xff] %v4698_v18   ;;  %4137 = vst [vmem:[%s4095_s13 + $0x60] sm:$0xf] (%p5487_p6), %v4136_v31 }
 0x2b4   : > { %4139 = vst [vmem:[%s4095_s13 + $0x68] sm:$0xf] (%p5487_p6), %v4138_v1 }
 0x2b5   : > { %v3946_v54 = vadd.f32 %v3945_v44, %v3944_v5  ;;  %v3983_v16 = vrot.slane %v3982_v8, 4 }
 0x2b7   : > { %v3947_v15 = vrot.slane %v3946_v54, 2  ;;  %v3984_v7 = vadd.f32 %v3983_v16, %v3982_v8 }
 0x2b9   : > { %v3948_v14 = vadd.f32 %v3947_v15, %v3946_v54  ;;  %v3985_v10 = vrot.slane %v3984_v7, 2 }
 0x2ba   : > { %v4140_v0 = vld [vmem:[%s6735_s15 + $0x38] sm:$0xf] (%p5487_p6)  ;;  %v4142_v29 = vld [vmem:[%s6735_s15 + $0x3c] sm:$0xf] (%p5487_p6) }
 0x2bb   : > { %v3949_v55 = vrot.slane %v3948_v14, 1  ;;  %v3986_v57 = vadd.f32 %v3985_v10, %v3984_v7  ;;  %4141 = vst [vmem:[%s4095_s13 + $0x70] sm:$0xf] (%p5487_p6), %v4140_v0  ;;  %4143 = vst [vmem:[%s4095_s13 + $0x78] sm:$0xf] (%p5487_p6), %v4142_v29 }
 0x2bd   : > { %v3950_v26 = vadd.f32 %v3949_v55, %v3948_v14  ;;  %v3987_v17 = vrot.slane %v3986_v57, 1  ;;  %4090 = sbr.rel (!%p5487_p6) target bundleno = 706 (0x2c2), region = 73 }
 0x2bf   : > { %3951 = vst [vmem:[%s1353_s6] sm:$0x1] %v3950_v26  ;;  %v3988_v42 = vadd.f32 %v3987_v17, %v3986_v57 }
 0x2c1   : > { %3989 = vst [vmem:[%s1360_s10] sm:$0x1] %v3988_v42 }
 0x2c2 PF: > { %s15_s19 = sadd.s32 1, %s5425_s19   ;;  %s6832_s15 = smov %s5413_s16 }
 0x2c3   : > { %p12_p12 = scmp.ge.s32.totalorder %s15_s19, 4   ;;  %s6833_s16 = smov %s5492_s25 }
 0x2c4   : > { %s6834_s17 = smov %s5421_s18  ;;  %s6835_s18 = smov %s6837_s20 }
 0x2c5   :  { %14 = sbr.rel (!%p12_p12) target bundleno = 3 (0x3), region = 172 }

// kernel: classifier_content_forward.9
= control target key start
LH: loop header
LB: loop body
LE: loop exit
PB: predicated region body
PF: predicated region fallthrough
CT: control target
= control target key end

     0   :  { %s5055_s0 = inlined_call_operand.vmem [shape: bf16[32,4096], index: 0, kind: input, shape index: {}]   ;;  %s5056_s1 = inlined_call_operand.vmem [shape: bf16[4096,512], index: 1, kind: input, shape index: {}]   ;;  %s5057_s2 = inlined_call_operand.vmem [shape: bf16[32,512], index: 2, kind: output, shape index: {0}]   ;;  %s5058_s3 = inlined_call_operand.vmem [shape: f32[1,1,512], index: 3, kind: output, shape index: {1}]   ;;  %s5059_s4 = inlined_call_operand.vmem [shape: f32[1,1,512], index: 4, kind: output, shape index: {2}]  }
   0x1   :  { %5061 = sst [smem:[#allocation7_spill]] %s5055_s0 }
   0x2   :  { %s4113_s15 = smov 0   ;;  %s4115_s16 = smov 0  }
   0x3   :  { %s4117_s17 = smov 0   ;;  %s4119_s18 = smov 0  }
   0x4   :  { %s4121_s19 = smov 0   ;;  %s4123_s20 = smov 0  }
   0x5   :  { %s4125_s21 = smov 0   ;;  %s4127_s22 = smov 0  }
   0x6   :  { %s4129_s23 = smov 0   ;;  %s4131_s24 = smov 0  }
   0x7   :  { %s4133_s25 = smov 0  }
   0x8 LB: > { %s3357_s26 = sadd.s32 4294967295, %s4086_s25   ;;  %s27_s27 = sadd.s32 1, %s4078_s23  ;;  %s4086_s25 = sphi %s4133_s25, %s15_s25   ;;  %s4082_s24 = sphi %s4131_s24, %s5077_s24   ;;  %s4078_s23 = sphi %s4129_s23, %s5076_s23   ;;  %s4074_s22 = sphi %s4127_s22, %s5075_s22   ;;  %s4070_s21 = sphi %s4125_s21, %s5074_s21   ;;  %s4066_s20 = sphi %s4123_s20, %s5073_s20   ;;  %s4062_s19 = sphi %s4121_s19, %s5072_s19   ;;  %s4058_s18 = sphi %s4119_s18, %s5071_s18   ;;  %s4054_s17 = sphi %s4117_s17, %s5070_s17   ;;  %s4050_s16 = sphi %s4115_s16, %s5069_s16   ;;  %s4046_s15 = sphi %s4113_s15, %s5068_s15  }
   0x9   : > { %p28_p0 = scmp.ge.s32.totalorder %s27_s27, 2  ;;  %s30_s28 = sadd.s32 1, %s4082_s24 }
   0xa   : > { %s43_s29 = sadd.s32 1, %s4066_s20  ;;  %p50_p1 = scmp.ne.s32.totalorder %s4066_s20, %s4062_s19 }
   0xb   : > { %s5079_s27 = smov (%p28_p0, %s27_s27), 0  ;;  %s5081_s28 = smov (!%p28_p0, %s30_s28), %s4082_s24 }
   0xc   : > { %s39_s30 = ssub.s32 %s4078_s23, %s5079_s27  ;;  %p51_p2 = scmp.eq.s32.totalorder %s4086_s25, 0 }
   0xd   : > { %p32_p3 = scmp.ge.s32.totalorder %s5081_s28, 4  ;;  %p41_p4 = scmp.eq.s32.totalorder %s39_s30, 0 }
   0xe   : > { %p4180_p5 = por %p51_p2, %p50_p1  ;;  %s71_s6 = sadd.s32 1, %s4058_s18 }
   0xf   : > { %s5083_s28 = smov (%p32_p3, %s5081_s28), 0  ;;  %p78_p6 = scmp.ne.s32.totalorder %s4058_s18, %s4054_s17 }
  0x10   : > { %5063 = sst [smem:[#allocation6_spill]] %s5083_s28  ;;  %s67_s8 = ssub.s32 %s4082_s24, %s5083_s28 }
  0x11   : > { %s4188_s7 = scalar_select %p41_p4, %s4066_s20, %s43_s29  }
  0x12   : > { %s68_s9 = sor.u32 %s67_s8, %s39_s30  ;;  %p97_p7 = scmp.eq.s32.totalorder %s67_s8, 0 }
  0x13   : > { %p69_p8 = scmp.eq.s32.totalorder %s68_s9, 0  ;;  %p4194_p9 = por %p78_p6, %p51_p2 }
  0x14   : > { %s99_s11 = sadd.s32 1, %s4050_s16  ;;  %p109_p10 = scmp.ne.s32.totalorder %s4050_s16, %s4046_s15 }
  0x15   : > { %s4202_s12 = scalar_select %p69_p8, %s4058_s18, %s71_s6  }
  0x16   : > { %s4205_s13 = scalar_select %p97_p7, %s4050_s16, %s99_s11  }
  0x17   : > { %p110_p11 = scmp.eq.s32.totalorder %s3357_s26, 7  ;;  %p3360_p13 = scmp.ge.s32.totalorder %s4086_s25, 8 }
  0x19   : > { %p4207_p12 = por %p110_p11, %p109_p10  ;;  %188 = sbr.rel (%p3360_p13) target bundleno = 233 (0xe9), region = 16 }
  0x1e   : > { %191 = sbr.rel (!%p4180_p5) target bundleno = 56 (0x38), region = 20  ;;  %s193_s29 = sand.u32 (%p4180_p5), 1, %s4066_s20  }
  0x1f   : > { %s3543_s30 = sshll.u32 (%p4180_p5), %s4078_s23, 6  ;;  %s3361_s8 = sshll.u32 (%p4180_p5), %s193_s29, 8 }
  0x20   : > { %s5066_s0 = sld [smem:[#allocation7_spill]] (%p4180_p5)  ;;  %s4224_s26 = scalar_lea.vmem (%p4180_p5), [#allocation3], %s3361_s8 }
  0x26   : > { %s4219_s11 = scalar_lea.vmem %s5066_s0, %s3543_s30 }
  0x27   : > { %v214_v0 = vld [vmem:[%s4219_s11] sm:$0xff]  ;;  %v216_v1 = vld [vmem:[%s4219_s11 + $0x8] sm:$0xff]  ;;  %v218_v2 = vld [vmem:[%s4219_s11 + $0x10] sm:$0xff] }
  0x28   : > { %215 = vst [vmem:[%s4224_s26] sm:$0xff] %v214_v0  ;;  %217 = vst [vmem:[%s4224_s26 + $0x8] sm:$0xff] %v216_v1  ;;  %v220_v3 = vld [vmem:[%s4219_s11 + $0x18] sm:$0xff]  ;;  %v222_v4 = vld [vmem:[%s4219_s11 + $0x20] sm:$0xff] }
  0x29   : > { %219 = vst [vmem:[%s4224_s26 + $0x10] sm:$0xff] %v218_v2  ;;  %v224_v5 = vld [vmem:[%s4219_s11 + $0x28] sm:$0xff]  ;;  %221 = vst [vmem:[%s4224_s26 + $0x18] sm:$0xff] %v220_v3  ;;  %v226_v6 = vld [vmem:[%s4219_s11 + $0x30] sm:$0xff] }
  0x2a   : > { %223 = vst [vmem:[%s4224_s26 + $0x20] sm:$0xff] %v222_v4  ;;  %225 = vst [vmem:[%s4224_s26 + $0x28] sm:$0xff] %v224_v5  ;;  %v228_v7 = vld [vmem:[%s4219_s11 + $0x38] sm:$0xff]  ;;  %v230_v8 = vld [vmem:[%s4219_s11 + $0x80] sm:$0xff] }
  0x2b   : > { %227 = vst [vmem:[%s4224_s26 + $0x30] sm:$0xff] %v226_v6  ;;  %229 = vst [vmem:[%s4224_s26 + $0x38] sm:$0xff] %v228_v7  ;;  %v232_v9 = vld [vmem:[%s4219_s11 + $0x88] sm:$0xff]  ;;  %v234_v10 = vld [vmem:[%s4219_s11 + $0x90] sm:$0xff] }
  0x2c   : > { %231 = vst [vmem:[%s4224_s26 + $0x40] sm:$0xff] %v230_v8  ;;  %v236_v11 = vld [vmem:[%s4219_s11 + $0x98] sm:$0xff]  ;;  %233 = vst [vmem:[%s4224_s26 + $0x48] sm:$0xff] %v232_v9  ;;  %v238_v12 = vld [vmem:[%s4219_s11 + $0xa0] sm:$0xff] }
  0x2d   : > { %235 = vst [vmem:[%s4224_s26 + $0x50] sm:$0xff] %v234_v10  ;;  %237 = vst [vmem:[%s4224_s26 + $0x58] sm:$0xff] %v236_v11  ;;  %v240_v13 = vld [vmem:[%s4219_s11 + $0xa8] sm:$0xff]  ;;  %v242_v14 = vld [vmem:[%s4219_s11 + $0xb0] sm:$0xff] }
  0x2e   : > { %239 = vst [vmem:[%s4224_s26 + $0x60] sm:$0xff] %v238_v12  ;;  %241 = vst [vmem:[%s4224_s26 + $0x68] sm:$0xff] %v240_v13  ;;  %v244_v15 = vld [vmem:[%s4219_s11 + $0xb8] sm:$0xff]  ;;  %v246_v16 = vld [vmem:[%s4219_s11 + $0x100] sm:$0xff] }
  0x2f   : > { %243 = vst [vmem:[%s4224_s26 + $0x70] sm:$0xff] %v242_v14  ;;  %v248_v17 = vld [vmem:[%s4219_s11 + $0x108] sm:$0xff]  ;;  %245 = vst [vmem:[%s4224_s26 + $0x78] sm:$0xff] %v244_v15  ;;  %v250_v18 = vld [vmem:[%s4219_s11 + $0x110] sm:$0xff] }
  0x30   : > { %247 = vst [vmem:[%s4224_s26 + $0x80] sm:$0xff] %v246_v16  ;;  %249 = vst [vmem:[%s4224_s26 + $0x88] sm:$0xff] %v248_v17  ;;  %v252_v19 = vld [vmem:[%s4219_s11 + $0x118] sm:$0xff]  ;;  %v254_v20 = vld [vmem:[%s4219_s11 + $0x120] sm:$0xff] }
  0x31   : > { %251 = vst [vmem:[%s4224_s26 + $0x90] sm:$0xff] %v250_v18  ;;  %253 = vst [vmem:[%s4224_s26 + $0x98] sm:$0xff] %v252_v19  ;;  %v256_v21 = vld [vmem:[%s4219_s11 + $0x128] sm:$0xff]  ;;  %v258_v22 = vld [vmem:[%s4219_s11 + $0x130] sm:$0xff] }
  0x32   : > { %255 = vst [vmem:[%s4224_s26 + $0xa0] sm:$0xff] %v254_v20  ;;  %v260_v23 = vld [vmem:[%s4219_s11 + $0x138] sm:$0xff]  ;;  %257 = vst [vmem:[%s4224_s26 + $0xa8] sm:$0xff] %v256_v21  ;;  %v262_v24 = vld [vmem:[%s4219_s11 + $0x180] sm:$0xff] }
  0x33   : > { %259 = vst [vmem:[%s4224_s26 + $0xb0] sm:$0xff] %v258_v22  ;;  %261 = vst [vmem:[%s4224_s26 + $0xb8] sm:$0xff] %v260_v23  ;;  %v264_v25 = vld [vmem:[%s4219_s11 + $0x188] sm:$0xff]  ;;  %v266_v26 = vld [vmem:[%s4219_s11 + $0x190] sm:$0xff] }
  0x34   : > { %263 = vst [vmem:[%s4224_s26 + $0xc0] sm:$0xff] %v262_v24  ;;  %265 = vst [vmem:[%s4224_s26 + $0xc8] sm:$0xff] %v264_v25  ;;  %v268_v27 = vld [vmem:[%s4219_s11 + $0x198] sm:$0xff]  ;;  %v270_v28 = vld [vmem:[%s4219_s11 + $0x1a0] sm:$0xff] }
  0x35   : > { %267 = vst [vmem:[%s4224_s26 + $0xd0] sm:$0xff] %v266_v26  ;;  %v272_v29 = vld [vmem:[%s4219_s11 + $0x1a8] sm:$0xff]  ;;  %269 = vst [vmem:[%s4224_s26 + $0xd8] sm:$0xff] %v268_v27  ;;  %v274_v30 = vld [vmem:[%s4219_s11 + $0x1b0] sm:$0xff] }
  0x36   : > { %271 = vst [vmem:[%s4224_s26 + $0xe0] sm:$0xff] %v270_v28  ;;  %273 = vst [vmem:[%s4224_s26 + $0xe8] sm:$0xff] %v272_v29  ;;  %v276_v31 = vld [vmem:[%s4219_s11 + $0x1b8] sm:$0xff] }
  0x37   : > { %275 = vst [vmem:[%s4224_s26 + $0xf0] sm:$0xff] %v274_v30  ;;  %277 = vst [vmem:[%s4224_s26 + $0xf8] sm:$0xff] %v276_v31 }
  0x38 PF: > { %283 = sbr.rel (!%p4194_p9) target bundleno = 233 (0xe9), region = 43  ;;  %s285_s5 = sand.u32 (%p4194_p9), 1, %s4058_s18  }
  0x39   : > { %s3544_s29 = sshll.u32 (%p4194_p9), %s4078_s23, 10  ;;  %s3364_s30 = sshll.u32 (%p4194_p9), %s285_s5, 10 }
  0x3a   : > { %s290_s8 = sadd.s32 (%p4194_p9), %s4082_s24, %s3544_s29  ;;  %s4300_s10 = scalar_lea.vmem (%p4194_p9), [#allocation4], %s3364_s30 }
  0x3b   : > { %s3367_s6 = sshll.u32 (%p4194_p9), %s290_s8, 2 }
  0x3c   : > { %s4295_s28 = scalar_lea.vmem (%p4194_p9), %s5056_s1, %s3367_s6 }
  0x3d   : > { %v309_v32 = vld [vmem:[%s4295_s28] sm:$0xf]  ;;  %v311_v33 = vld [vmem:[%s4295_s28 + $0x10] sm:$0xf] }
  0x3e   : > { %v313_v34 = vld [vmem:[%s4295_s28 + $0x20] sm:$0xf]  ;;  %310 = vst [vmem:[%s4300_s10] sm:$0xf] %v309_v32  ;;  %312 = vst [vmem:[%s4300_s10 + $0x4] sm:$0xf] %v311_v33 }
  0x3f   : > { %314 = vst [vmem:[%s4300_s10 + $0x8] sm:$0xf] %v313_v34  ;;  %v315_v35 = vld [vmem:[%s4295_s28 + $0x30] sm:$0xf]  ;;  %v317_v36 = vld [vmem:[%s4295_s28 + $0x40] sm:$0xf] }
  0x40   : > { %v319_v37 = vld [vmem:[%s4295_s28 + $0x50] sm:$0xf]  ;;  %316 = vst [vmem:[%s4300_s10 + $0xc] sm:$0xf] %v315_v35  ;;  %318 = vst [vmem:[%s4300_s10 + $0x10] sm:$0xf] %v317_v36 }
  0x41   : > { %320 = vst [vmem:[%s4300_s10 + $0x14] sm:$0xf] %v319_v37  ;;  %v321_v38 = vld [vmem:[%s4295_s28 + $0x60] sm:$0xf]  ;;  %v323_v39 = vld [vmem:[%s4295_s28 + $0x70] sm:$0xf] }
  0x42   : > { %v325_v40 = vld [vmem:[%s4295_s28 + $0x80] sm:$0xf]  ;;  %322 = vst [vmem:[%s4300_s10 + $0x18] sm:$0xf] %v321_v38  ;;  %324 = vst [vmem:[%s4300_s10 + $0x1c] sm:$0xf] %v323_v39 }
  0x43   : > { %326 = vst [vmem:[%s4300_s10 + $0x20] sm:$0xf] %v325_v40  ;;  %v327_v41 = vld [vmem:[%s4295_s28 + $0x90] sm:$0xf]  ;;  %v329_v42 = vld [vmem:[%s4295_s28 + $0xa0] sm:$0xf] }
  0x44   : > { %v331_v43 = vld [vmem:[%s4295_s28 + $0xb0] sm:$0xf]  ;;  %328 = vst [vmem:[%s4300_s10 + $0x24] sm:$0xf] %v327_v41  ;;  %330 = vst [vmem:[%s4300_s10 + $0x28] sm:$0xf] %v329_v42 }
  0x45   : > { %332 = vst [vmem:[%s4300_s10 + $0x2c] sm:$0xf] %v331_v43  ;;  %v333_v44 = vld [vmem:[%s4295_s28 + $0xc0] sm:$0xf]  ;;  %v335_v45 = vld [vmem:[%s4295_s28 + $0xd0] sm:$0xf] }
  0x46   : > { %v337_v46 = vld [vmem:[%s4295_s28 + $0xe0] sm:$0xf]  ;;  %334 = vst [vmem:[%s4300_s10 + $0x30] sm:$0xf] %v333_v44  ;;  %336 = vst [vmem:[%s4300_s10 + $0x34] sm:$0xf] %v335_v45 }
  0x47   : > { %338 = vst [vmem:[%s4300_s10 + $0x38] sm:$0xf] %v337_v46  ;;  %v339_v47 = vld [vmem:[%s4295_s28 + $0xf0] sm:$0xf]  ;;  %v341_v48 = vld [vmem:[%s4295_s28 + $0x100] sm:$0xf] }
  0x48   : > { %v343_v49 = vld [vmem:[%s4295_s28 + $0x110] sm:$0xf]  ;;  %340 = vst [vmem:[%s4300_s10 + $0x3c] sm:$0xf] %v339_v47  ;;  %342 = vst [vmem:[%s4300_s10 + $0x40] sm:$0xf] %v341_v48 }
  0x49   : > { %344 = vst [vmem:[%s4300_s10 + $0x44] sm:$0xf] %v343_v49  ;;  %v345_v50 = vld [vmem:[%s4295_s28 + $0x120] sm:$0xf]  ;;  %v347_v51 = vld [vmem:[%s4295_s28 + $0x130] sm:$0xf] }
  0x4a   : > { %v349_v52 = vld [vmem:[%s4295_s28 + $0x140] sm:$0xf]  ;;  %346 = vst [vmem:[%s4300_s10 + $0x48] sm:$0xf] %v345_v50  ;;  %348 = vst [vmem:[%s4300_s10 + $0x4c] sm:$0xf] %v347_v51 }
  0x4b   : > { %350 = vst [vmem:[%s4300_s10 + $0x50] sm:$0xf] %v349_v52  ;;  %v351_v53 = vld [vmem:[%s4295_s28 + $0x150] sm:$0xf]  ;;  %v353_v54 = vld [vmem:[%s4295_s28 + $0x160] sm:$0xf] }
  0x4c   : > { %v355_v55 = vld [vmem:[%s4295_s28 + $0x170] sm:$0xf]  ;;  %352 = vst [vmem:[%s4300_s10 + $0x54] sm:$0xf] %v351_v53  ;;  %354 = vst [vmem:[%s4300_s10 + $0x58] sm:$0xf] %v353_v54 }
  0x4d   : > { %356 = vst [vmem:[%s4300_s10 + $0x5c] sm:$0xf] %v355_v55  ;;  %v357_v56 = vld [vmem:[%s4295_s28 + $0x180] sm:$0xf]  ;;  %v359_v57 = vld [vmem:[%s4295_s28 + $0x190] sm:$0xf] }
  0x4e   : > { %v361_v58 = vld [vmem:[%s4295_s28 + $0x1a0] sm:$0xf]  ;;  %358 = vst [vmem:[%s4300_s10 + $0x60] sm:$0xf] %v357_v56  ;;  %360 = vst [vmem:[%s4300_s10 + $0x64] sm:$0xf] %v359_v57 }
  0x4f   : > { %362 = vst [vmem:[%s4300_s10 + $0x68] sm:$0xf] %v361_v58  ;;  %v363_v59 = vld [vmem:[%s4295_s28 + $0x1b0] sm:$0xf]  ;;  %v365_v60 = vld [vmem:[%s4295_s28 + $0x1c0] sm:$0xf] }
  0x50   : > { %v367_v61 = vld [vmem:[%s4295_s28 + $0x1d0] sm:$0xf]  ;;  %364 = vst [vmem:[%s4300_s10 + $0x6c] sm:$0xf] %v363_v59  ;;  %366 = vst [vmem:[%s4300_s10 + $0x70] sm:$0xf] %v365_v60 }
  0x51   : > { %368 = vst [vmem:[%s4300_s10 + $0x74] sm:$0xf] %v367_v61  ;;  %v369_v62 = vld [vmem:[%s4295_s28 + $0x1e0] sm:$0xf]  ;;  %v371_v63 = vld [vmem:[%s4295_s28 + $0x1f0] sm:$0xf] }
  0x52   : > { %v373_v0 = vld [vmem:[%s4295_s28 + $0x200] sm:$0xf]  ;;  %370 = vst [vmem:[%s4300_s10 + $0x78] sm:$0xf] %v369_v62  ;;  %372 = vst [vmem:[%s4300_s10 + $0x7c] sm:$0xf] %v371_v63 }
  0x53   : > { %374 = vst [vmem:[%s4300_s10 + $0x80] sm:$0xf] %v373_v0  ;;  %v375_v1 = vld [vmem:[%s4295_s28 + $0x210] sm:$0xf]  ;;  %v377_v2 = vld [vmem:[%s4295_s28 + $0x220] sm:$0xf] }
  0x54   : > { %v379_v3 = vld [vmem:[%s4295_s28 + $0x230] sm:$0xf]  ;;  %376 = vst [vmem:[%s4300_s10 + $0x84] sm:$0xf] %v375_v1  ;;  %378 = vst [vmem:[%s4300_s10 + $0x88] sm:$0xf] %v377_v2 }
  0x55   : > { %380 = vst [vmem:[%s4300_s10 + $0x8c] sm:$0xf] %v379_v3  ;;  %v381_v4 = vld [vmem:[%s4295_s28 + $0x240] sm:$0xf]  ;;  %v383_v5 = vld [vmem:[%s4295_s28 + $0x250] sm:$0xf] }
  0x56   : > { %v385_v6 = vld [vmem:[%s4295_s28 + $0x260] sm:$0xf]  ;;  %382 = vst [vmem:[%s4300_s10 + $0x90] sm:$0xf] %v381_v4  ;;  %384 = vst [vmem:[%s4300_s10 + $0x94] sm:$0xf] %v383_v5 }
  0x57   : > { %386 = vst [vmem:[%s4300_s10 + $0x98] sm:$0xf] %v385_v6  ;;  %v387_v7 = vld [vmem:[%s4295_s28 + $0x270] sm:$0xf]  ;;  %v389_v8 = vld [vmem:[%s4295_s28 + $0x280] sm:$0xf] }
  0x58   : > { %v391_v9 = vld [vmem:[%s4295_s28 + $0x290] sm:$0xf]  ;;  %388 = vst [vmem:[%s4300_s10 + $0x9c] sm:$0xf] %v387_v7  ;;  %390 = vst [vmem:[%s4300_s10 + $0xa0] sm:$0xf] %v389_v8 }
  0x59   : > { %392 = vst [vmem:[%s4300_s10 + $0xa4] sm:$0xf] %v391_v9  ;;  %v393_v10 = vld [vmem:[%s4295_s28 + $0x2a0] sm:$0xf]  ;;  %v395_v11 = vld [vmem:[%s4295_s28 + $0x2b0] sm:$0xf] }
  0x5a   : > { %v397_v12 = vld [vmem:[%s4295_s28 + $0x2c0] sm:$0xf]  ;;  %394 = vst [vmem:[%s4300_s10 + $0xa8] sm:$0xf] %v393_v10  ;;  %396 = vst [vmem:[%s4300_s10 + $0xac] sm:$0xf] %v395_v11 }
  0x5b   : > { %398 = vst [vmem:[%s4300_s10 + $0xb0] sm:$0xf] %v397_v12  ;;  %v399_v13 = vld [vmem:[%s4295_s28 + $0x2d0] sm:$0xf]  ;;  %v401_v14 = vld [vmem:[%s4295_s28 + $0x2e0] sm:$0xf] }
  0x5c   : > { %v403_v15 = vld [vmem:[%s4295_s28 + $0x2f0] sm:$0xf]  ;;  %400 = vst [vmem:[%s4300_s10 + $0xb4] sm:$0xf] %v399_v13  ;;  %402 = vst [vmem:[%s4300_s10 + $0xb8] sm:$0xf] %v401_v14 }
  0x5d   : > { %404 = vst [vmem:[%s4300_s10 + $0xbc] sm:$0xf] %v403_v15  ;;  %v405_v16 = vld [vmem:[%s4295_s28 + $0x300] sm:$0xf]  ;;  %v407_v17 = vld [vmem:[%s4295_s28 + $0x310] sm:$0xf] }
  0x5e   : > { %v409_v18 = vld [vmem:[%s4295_s28 + $0x320] sm:$0xf]  ;;  %406 = vst [vmem:[%s4300_s10 + $0xc0] sm:$0xf] %v405_v16  ;;  %408 = vst [vmem:[%s4300_s10 + $0xc4] sm:$0xf] %v407_v17 }
  0x5f   : > { %410 = vst [vmem:[%s4300_s10 + $0xc8] sm:$0xf] %v409_v18  ;;  %v411_v19 = vld [vmem:[%s4295_s28 + $0x330] sm:$0xf]  ;;  %v413_v20 = vld [vmem:[%s4295_s28 + $0x340] sm:$0xf] }
  0x60   : > { %v415_v21 = vld [vmem:[%s4295_s28 + $0x350] sm:$0xf]  ;;  %412 = vst [vmem:[%s4300_s10 + $0xcc] sm:$0xf] %v411_v19  ;;  %414 = vst [vmem:[%s4300_s10 + $0xd0] sm:$0xf] %v413_v20 }
  0x61   : > { %416 = vst [vmem:[%s4300_s10 + $0xd4] sm:$0xf] %v415_v21  ;;  %v417_v22 = vld [vmem:[%s4295_s28 + $0x360] sm:$0xf]  ;;  %v419_v23 = vld [vmem:[%s4295_s28 + $0x370] sm:$0xf] }
  0x62   : > { %v421_v24 = vld [vmem:[%s4295_s28 + $0x380] sm:$0xf]  ;;  %418 = vst [vmem:[%s4300_s10 + $0xd8] sm:$0xf] %v417_v22  ;;  %420 = vst [vmem:[%s4300_s10 + $0xdc] sm:$0xf] %v419_v23 }
  0x63   : > { %422 = vst [vmem:[%s4300_s10 + $0xe0] sm:$0xf] %v421_v24  ;;  %v423_v25 = vld [vmem:[%s4295_s28 + $0x390] sm:$0xf]  ;;  %v425_v26 = vld [vmem:[%s4295_s28 + $0x3a0] sm:$0xf] }
  0x64   : > { %v427_v27 = vld [vmem:[%s4295_s28 + $0x3b0] sm:$0xf]  ;;  %424 = vst [vmem:[%s4300_s10 + $0xe4] sm:$0xf] %v423_v25  ;;  %426 = vst [vmem:[%s4300_s10 + $0xe8] sm:$0xf] %v425_v26 }
  0x65   : > { %428 = vst [vmem:[%s4300_s10 + $0xec] sm:$0xf] %v427_v27  ;;  %v429_v28 = vld [vmem:[%s4295_s28 + $0x3c0] sm:$0xf]  ;;  %v431_v29 = vld [vmem:[%s4295_s28 + $0x3d0] sm:$0xf] }
  0x66   : > { %v433_v30 = vld [vmem:[%s4295_s28 + $0x3e0] sm:$0xf]  ;;  %430 = vst [vmem:[%s4300_s10 + $0xf0] sm:$0xf] %v429_v28  ;;  %432 = vst [vmem:[%s4300_s10 + $0xf4] sm:$0xf] %v431_v29 }
  0x67   : > { %434 = vst [vmem:[%s4300_s10 + $0xf8] sm:$0xf] %v433_v30  ;;  %v435_v31 = vld [vmem:[%s4295_s28 + $0x3f0] sm:$0xf]  ;;  %v437_v32 = vld [vmem:[%s4295_s28 + $0x400] sm:$0xf] }
  0x68   : > { %v439_v33 = vld [vmem:[%s4295_s28 + $0x410] sm:$0xf]  ;;  %436 = vst [vmem:[%s4300_s10 + $0xfc] sm:$0xf] %v435_v31  ;;  %438 = vst [vmem:[%s4300_s10 + $0x100] sm:$0xf] %v437_v32 }
  0x69   : > { %440 = vst [vmem:[%s4300_s10 + $0x104] sm:$0xf] %v439_v33  ;;  %v441_v34 = vld [vmem:[%s4295_s28 + $0x420] sm:$0xf]  ;;  %v443_v35 = vld [vmem:[%s4295_s28 + $0x430] sm:$0xf] }
  0x6a   : > { %v445_v36 = vld [vmem:[%s4295_s28 + $0x440] sm:$0xf]  ;;  %442 = vst [vmem:[%s4300_s10 + $0x108] sm:$0xf] %v441_v34  ;;  %444 = vst [vmem:[%s4300_s10 + $0x10c] sm:$0xf] %v443_v35 }
  0x6b   : > { %446 = vst [vmem:[%s4300_s10 + $0x110] sm:$0xf] %v445_v36  ;;  %v447_v37 = vld [vmem:[%s4295_s28 + $0x450] sm:$0xf]  ;;  %v449_v38 = vld [vmem:[%s4295_s28 + $0x460] sm:$0xf] }
  0x6c   : > { %v451_v39 = vld [vmem:[%s4295_s28 + $0x470] sm:$0xf]  ;;  %448 = vst [vmem:[%s4300_s10 + $0x114] sm:$0xf] %v447_v37  ;;  %450 = vst [vmem:[%s4300_s10 + $0x118] sm:$0xf] %v449_v38 }
  0x6d   : > { %452 = vst [vmem:[%s4300_s10 + $0x11c] sm:$0xf] %v451_v39  ;;  %v453_v40 = vld [vmem:[%s4295_s28 + $0x480] sm:$0xf]  ;;  %v455_v41 = vld [vmem:[%s4295_s28 + $0x490] sm:$0xf] }
  0x6e   : > { %v457_v42 = vld [vmem:[%s4295_s28 + $0x4a0] sm:$0xf]  ;;  %454 = vst [vmem:[%s4300_s10 + $0x120] sm:$0xf] %v453_v40  ;;  %456 = vst [vmem:[%s4300_s10 + $0x124] sm:$0xf] %v455_v41 }
  0x6f   : > { %458 = vst [vmem:[%s4300_s10 + $0x128] sm:$0xf] %v457_v42  ;;  %v459_v43 = vld [vmem:[%s4295_s28 + $0x4b0] sm:$0xf]  ;;  %v461_v44 = vld [vmem:[%s4295_s28 + $0x4c0] sm:$0xf] }
  0x70   : > { %v463_v45 = vld [vmem:[%s4295_s28 + $0x4d0] sm:$0xf]  ;;  %460 = vst [vmem:[%s4300_s10 + $0x12c] sm:$0xf] %v459_v43  ;;  %462 = vst [vmem:[%s4300_s10 + $0x130] sm:$0xf] %v461_v44 }
  0x71   : > { %464 = vst [vmem:[%s4300_s10 + $0x134] sm:$0xf] %v463_v45  ;;  %v465_v46 = vld [vmem:[%s4295_s28 + $0x4e0] sm:$0xf]  ;;  %v467_v47 = vld [vmem:[%s4295_s28 + $0x4f0] sm:$0xf] }
  0x72   : > { %v469_v48 = vld [vmem:[%s4295_s28 + $0x500] sm:$0xf]  ;;  %466 = vst [vmem:[%s4300_s10 + $0x138] sm:$0xf] %v465_v46  ;;  %468 = vst [vmem:[%s4300_s10 + $0x13c] sm:$0xf] %v467_v47 }
  0x73   : > { %470 = vst [vmem:[%s4300_s10 + $0x140] sm:$0xf] %v469_v48  ;;  %v471_v49 = vld [vmem:[%s4295_s28 + $0x510] sm:$0xf]  ;;  %v473_v50 = vld [vmem:[%s4295_s28 + $0x520] sm:$0xf] }
  0x74   : > { %v475_v51 = vld [vmem:[%s4295_s28 + $0x530] sm:$0xf]  ;;  %472 = vst [vmem:[%s4300_s10 + $0x144] sm:$0xf] %v471_v49  ;;  %474 = vst [vmem:[%s4300_s10 + $0x148] sm:$0xf] %v473_v50 }
  0x75   : > { %476 = vst [vmem:[%s4300_s10 + $0x14c] sm:$0xf] %v475_v51  ;;  %v477_v52 = vld [vmem:[%s4295_s28 + $0x540] sm:$0xf]  ;;  %v479_v53 = vld [vmem:[%s4295_s28 + $0x550] sm:$0xf] }
  0x76   : > { %v481_v54 = vld [vmem:[%s4295_s28 + $0x560] sm:$0xf]  ;;  %478 = vst [vmem:[%s4300_s10 + $0x150] sm:$0xf] %v477_v52  ;;  %480 = vst [vmem:[%s4300_s10 + $0x154] sm:$0xf] %v479_v53 }
  0x77   : > { %482 = vst [vmem:[%s4300_s10 + $0x158] sm:$0xf] %v481_v54  ;;  %v483_v55 = vld [vmem:[%s4295_s28 + $0x570] sm:$0xf]  ;;  %v485_v56 = vld [vmem:[%s4295_s28 + $0x580] sm:$0xf] }
  0x78   : > { %v487_v57 = vld [vmem:[%s4295_s28 + $0x590] sm:$0xf]  ;;  %484 = vst [vmem:[%s4300_s10 + $0x15c] sm:$0xf] %v483_v55  ;;  %486 = vst [vmem:[%s4300_s10 + $0x160] sm:$0xf] %v485_v56 }
  0x79   : > { %488 = vst [vmem:[%s4300_s10 + $0x164] sm:$0xf] %v487_v57  ;;  %v489_v58 = vld [vmem:[%s4295_s28 + $0x5a0] sm:$0xf]  ;;  %v491_v59 = vld [vmem:[%s4295_s28 + $0x5b0] sm:$0xf] }
  0x7a   : > { %v493_v60 = vld [vmem:[%s4295_s28 + $0x5c0] sm:$0xf]  ;;  %490 = vst [vmem:[%s4300_s10 + $0x168] sm:$0xf] %v489_v58  ;;  %492 = vst [vmem:[%s4300_s10 + $0x16c] sm:$0xf] %v491_v59 }
  0x7b   : > { %494 = vst [vmem:[%s4300_s10 + $0x170] sm:$0xf] %v493_v60  ;;  %v495_v61 = vld [vmem:[%s4295_s28 + $0x5d0] sm:$0xf]  ;;  %v497_v62 = vld [vmem:[%s4295_s28 + $0x5e0] sm:$0xf] }
  0x7c   : > { %v499_v63 = vld [vmem:[%s4295_s28 + $0x5f0] sm:$0xf]  ;;  %496 = vst [vmem:[%s4300_s10 + $0x174] sm:$0xf] %v495_v61  ;;  %498 = vst [vmem:[%s4300_s10 + $0x178] sm:$0xf] %v497_v62 }
  0x7d   : > { %500 = vst [vmem:[%s4300_s10 + $0x17c] sm:$0xf] %v499_v63  ;;  %v501_v0 = vld [vmem:[%s4295_s28 + $0x600] sm:$0xf]  ;;  %v503_v1 = vld [vmem:[%s4295_s28 + $0x610] sm:$0xf] }
  0x7e   : > { %v505_v2 = vld [vmem:[%s4295_s28 + $0x620] sm:$0xf]  ;;  %502 = vst [vmem:[%s4300_s10 + $0x180] sm:$0xf] %v501_v0  ;;  %504 = vst [vmem:[%s4300_s10 + $0x184] sm:$0xf] %v503_v1 }
  0x7f   : > { %506 = vst [vmem:[%s4300_s10 + $0x188] sm:$0xf] %v505_v2  ;;  %v507_v3 = vld [vmem:[%s4295_s28 + $0x630] sm:$0xf]  ;;  %v509_v4 = vld [vmem:[%s4295_s28 + $0x640] sm:$0xf] }
  0x80   : > { %v511_v5 = vld [vmem:[%s4295_s28 + $0x650] sm:$0xf]  ;;  %508 = vst [vmem:[%s4300_s10 + $0x18c] sm:$0xf] %v507_v3  ;;  %510 = vst [vmem:[%s4300_s10 + $0x190] sm:$0xf] %v509_v4 }
  0x81   : > { %512 = vst [vmem:[%s4300_s10 + $0x194] sm:$0xf] %v511_v5  ;;  %v513_v6 = vld [vmem:[%s4295_s28 + $0x660] sm:$0xf]  ;;  %v515_v7 = vld [vmem:[%s4295_s28 + $0x670] sm:$0xf] }
  0x82   : > { %v517_v8 = vld [vmem:[%s4295_s28 + $0x680] sm:$0xf]  ;;  %514 = vst [vmem:[%s4300_s10 + $0x198] sm:$0xf] %v513_v6  ;;  %516 = vst [vmem:[%s4300_s10 + $0x19c] sm:$0xf] %v515_v7 }
  0x83   : > { %518 = vst [vmem:[%s4300_s10 + $0x1a0] sm:$0xf] %v517_v8  ;;  %v519_v9 = vld [vmem:[%s4295_s28 + $0x690] sm:$0xf]  ;;  %v521_v10 = vld [vmem:[%s4295_s28 + $0x6a0] sm:$0xf] }
  0x84   : > { %v523_v11 = vld [vmem:[%s4295_s28 + $0x6b0] sm:$0xf]  ;;  %520 = vst [vmem:[%s4300_s10 + $0x1a4] sm:$0xf] %v519_v9  ;;  %522 = vst [vmem:[%s4300_s10 + $0x1a8] sm:$0xf] %v521_v10 }
  0x85   : > { %524 = vst [vmem:[%s4300_s10 + $0x1ac] sm:$0xf] %v523_v11  ;;  %v525_v12 = vld [vmem:[%s4295_s28 + $0x6c0] sm:$0xf]  ;;  %v527_v13 = vld [vmem:[%s4295_s28 + $0x6d0] sm:$0xf] }
  0x86   : > { %v529_v14 = vld [vmem:[%s4295_s28 + $0x6e0] sm:$0xf]  ;;  %526 = vst [vmem:[%s4300_s10 + $0x1b0] sm:$0xf] %v525_v12  ;;  %528 = vst [vmem:[%s4300_s10 + $0x1b4] sm:$0xf] %v527_v13 }
  0x87   : > { %530 = vst [vmem:[%s4300_s10 + $0x1b8] sm:$0xf] %v529_v14  ;;  %v531_v15 = vld [vmem:[%s4295_s28 + $0x6f0] sm:$0xf]  ;;  %v533_v16 = vld [vmem:[%s4295_s28 + $0x700] sm:$0xf] }
  0x88   : > { %v535_v17 = vld [vmem:[%s4295_s28 + $0x710] sm:$0xf]  ;;  %532 = vst [vmem:[%s4300_s10 + $0x1bc] sm:$0xf] %v531_v15  ;;  %534 = vst [vmem:[%s4300_s10 + $0x1c0] sm:$0xf] %v533_v16 }
  0x89   : > { %536 = vst [vmem:[%s4300_s10 + $0x1c4] sm:$0xf] %v535_v17  ;;  %v537_v18 = vld [vmem:[%s4295_s28 + $0x720] sm:$0xf]  ;;  %v539_v19 = vld [vmem:[%s4295_s28 + $0x730] sm:$0xf] }
  0x8a   : > { %v541_v20 = vld [vmem:[%s4295_s28 + $0x740] sm:$0xf]  ;;  %538 = vst [vmem:[%s4300_s10 + $0x1c8] sm:$0xf] %v537_v18  ;;  %540 = vst [vmem:[%s4300_s10 + $0x1cc] sm:$0xf] %v539_v19 }
  0x8b   : > { %542 = vst [vmem:[%s4300_s10 + $0x1d0] sm:$0xf] %v541_v20  ;;  %v543_v21 = vld [vmem:[%s4295_s28 + $0x750] sm:$0xf]  ;;  %v545_v22 = vld [vmem:[%s4295_s28 + $0x760] sm:$0xf] }
  0x8c   : > { %v547_v23 = vld [vmem:[%s4295_s28 + $0x770] sm:$0xf]  ;;  %544 = vst [vmem:[%s4300_s10 + $0x1d4] sm:$0xf] %v543_v21  ;;  %546 = vst [vmem:[%s4300_s10 + $0x1d8] sm:$0xf] %v545_v22 }
  0x8d   : > { %548 = vst [vmem:[%s4300_s10 + $0x1dc] sm:$0xf] %v547_v23  ;;  %v549_v24 = vld [vmem:[%s4295_s28 + $0x780] sm:$0xf]  ;;  %v551_v25 = vld [vmem:[%s4295_s28 + $0x790] sm:$0xf] }
  0x8e   : > { %v553_v26 = vld [vmem:[%s4295_s28 + $0x7a0] sm:$0xf]  ;;  %550 = vst [vmem:[%s4300_s10 + $0x1e0] sm:$0xf] %v549_v24  ;;  %552 = vst [vmem:[%s4300_s10 + $0x1e4] sm:$0xf] %v551_v25 }
  0x8f   : > { %554 = vst [vmem:[%s4300_s10 + $0x1e8] sm:$0xf] %v553_v26  ;;  %v555_v27 = vld [vmem:[%s4295_s28 + $0x7b0] sm:$0xf]  ;;  %v557_v28 = vld [vmem:[%s4295_s28 + $0x7c0] sm:$0xf] }
  0x90   : > { %v559_v29 = vld [vmem:[%s4295_s28 + $0x7d0] sm:$0xf]  ;;  %556 = vst [vmem:[%s4300_s10 + $0x1ec] sm:$0xf] %v555_v27  ;;  %558 = vst [vmem:[%s4300_s10 + $0x1f0] sm:$0xf] %v557_v28 }
  0x91   : > { %560 = vst [vmem:[%s4300_s10 + $0x1f4] sm:$0xf] %v559_v29  ;;  %v561_v30 = vld [vmem:[%s4295_s28 + $0x7e0] sm:$0xf]  ;;  %v563_v31 = vld [vmem:[%s4295_s28 + $0x7f0] sm:$0xf] }
  0x92   : > { %v565_v32 = vld [vmem:[%s4295_s28 + $0x800] sm:$0xf]  ;;  %562 = vst [vmem:[%s4300_s10 + $0x1f8] sm:$0xf] %v561_v30  ;;  %564 = vst [vmem:[%s4300_s10 + $0x1fc] sm:$0xf] %v563_v31 }
  0x93   : > { %566 = vst [vmem:[%s4300_s10 + $0x200] sm:$0xf] %v565_v32  ;;  %v567_v33 = vld [vmem:[%s4295_s28 + $0x810] sm:$0xf]  ;;  %v569_v34 = vld [vmem:[%s4295_s28 + $0x820] sm:$0xf] }
  0x94   : > { %v571_v35 = vld [vmem:[%s4295_s28 + $0x830] sm:$0xf]  ;;  %568 = vst [vmem:[%s4300_s10 + $0x204] sm:$0xf] %v567_v33  ;;  %570 = vst [vmem:[%s4300_s10 + $0x208] sm:$0xf] %v569_v34 }
  0x95   : > { %572 = vst [vmem:[%s4300_s10 + $0x20c] sm:$0xf] %v571_v35  ;;  %v573_v36 = vld [vmem:[%s4295_s28 + $0x840] sm:$0xf]  ;;  %v575_v37 = vld [vmem:[%s4295_s28 + $0x850] sm:$0xf] }
  0x96   : > { %v577_v38 = vld [vmem:[%s4295_s28 + $0x860] sm:$0xf]  ;;  %574 = vst [vmem:[%s4300_s10 + $0x210] sm:$0xf] %v573_v36  ;;  %576 = vst [vmem:[%s4300_s10 + $0x214] sm:$0xf] %v575_v37 }
  0x97   : > { %578 = vst [vmem:[%s4300_s10 + $0x218] sm:$0xf] %v577_v38  ;;  %v579_v39 = vld [vmem:[%s4295_s28 + $0x870] sm:$0xf]  ;;  %v581_v40 = vld [vmem:[%s4295_s28 + $0x880] sm:$0xf] }
  0x98   : > { %v583_v41 = vld [vmem:[%s4295_s28 + $0x890] sm:$0xf]  ;;  %580 = vst [vmem:[%s4300_s10 + $0x21c] sm:$0xf] %v579_v39  ;;  %582 = vst [vmem:[%s4300_s10 + $0x220] sm:$0xf] %v581_v40 }
  0x99   : > { %584 = vst [vmem:[%s4300_s10 + $0x224] sm:$0xf] %v583_v41  ;;  %v585_v42 = vld [vmem:[%s4295_s28 + $0x8a0] sm:$0xf]  ;;  %v587_v43 = vld [vmem:[%s4295_s28 + $0x8b0] sm:$0xf] }
  0x9a   : > { %v589_v44 = vld [vmem:[%s4295_s28 + $0x8c0] sm:$0xf]  ;;  %586 = vst [vmem:[%s4300_s10 + $0x228] sm:$0xf] %v585_v42  ;;  %588 = vst [vmem:[%s4300_s10 + $0x22c] sm:$0xf] %v587_v43 }
  0x9b   : > { %590 = vst [vmem:[%s4300_s10 + $0x230] sm:$0xf] %v589_v44  ;;  %v591_v45 = vld [vmem:[%s4295_s28 + $0x8d0] sm:$0xf]  ;;  %v593_v46 = vld [vmem:[%s4295_s28 + $0x8e0] sm:$0xf] }
  0x9c   : > { %v595_v47 = vld [vmem:[%s4295_s28 + $0x8f0] sm:$0xf]  ;;  %592 = vst [vmem:[%s4300_s10 + $0x234] sm:$0xf] %v591_v45  ;;  %594 = vst [vmem:[%s4300_s10 + $0x238] sm:$0xf] %v593_v46 }
  0x9d   : > { %596 = vst [vmem:[%s4300_s10 + $0x23c] sm:$0xf] %v595_v47  ;;  %v597_v48 = vld [vmem:[%s4295_s28 + $0x900] sm:$0xf]  ;;  %v599_v49 = vld [vmem:[%s4295_s28 + $0x910] sm:$0xf] }
  0x9e   : > { %v601_v50 = vld [vmem:[%s4295_s28 + $0x920] sm:$0xf]  ;;  %598 = vst [vmem:[%s4300_s10 + $0x240] sm:$0xf] %v597_v48  ;;  %600 = vst [vmem:[%s4300_s10 + $0x244] sm:$0xf] %v599_v49 }
  0x9f   : > { %602 = vst [vmem:[%s4300_s10 + $0x248] sm:$0xf] %v601_v50  ;;  %v603_v51 = vld [vmem:[%s4295_s28 + $0x930] sm:$0xf]  ;;  %v605_v52 = vld [vmem:[%s4295_s28 + $0x940] sm:$0xf] }
  0xa0   : > { %v607_v53 = vld [vmem:[%s4295_s28 + $0x950] sm:$0xf]  ;;  %604 = vst [vmem:[%s4300_s10 + $0x24c] sm:$0xf] %v603_v51  ;;  %606 = vst [vmem:[%s4300_s10 + $0x250] sm:$0xf] %v605_v52 }
  0xa1   : > { %608 = vst [vmem:[%s4300_s10 + $0x254] sm:$0xf] %v607_v53  ;;  %v609_v54 = vld [vmem:[%s4295_s28 + $0x960] sm:$0xf]  ;;  %v611_v55 = vld [vmem:[%s4295_s28 + $0x970] sm:$0xf] }
  0xa2   : > { %v613_v56 = vld [vmem:[%s4295_s28 + $0x980] sm:$0xf]  ;;  %610 = vst [vmem:[%s4300_s10 + $0x258] sm:$0xf] %v609_v54  ;;  %612 = vst [vmem:[%s4300_s10 + $0x25c] sm:$0xf] %v611_v55 }
  0xa3   : > { %614 = vst [vmem:[%s4300_s10 + $0x260] sm:$0xf] %v613_v56  ;;  %v615_v57 = vld [vmem:[%s4295_s28 + $0x990] sm:$0xf]  ;;  %v617_v58 = vld [vmem:[%s4295_s28 + $0x9a0] sm:$0xf] }
  0xa4   : > { %v619_v59 = vld [vmem:[%s4295_s28 + $0x9b0] sm:$0xf]  ;;  %616 = vst [vmem:[%s4300_s10 + $0x264] sm:$0xf] %v615_v57  ;;  %618 = vst [vmem:[%s4300_s10 + $0x268] sm:$0xf] %v617_v58 }
  0xa5   : > { %620 = vst [vmem:[%s4300_s10 + $0x26c] sm:$0xf] %v619_v59  ;;  %v621_v60 = vld [vmem:[%s4295_s28 + $0x9c0] sm:$0xf]  ;;  %v623_v61 = vld [vmem:[%s4295_s28 + $0x9d0] sm:$0xf] }
  0xa6   : > { %v625_v62 = vld [vmem:[%s4295_s28 + $0x9e0] sm:$0xf]  ;;  %622 = vst [vmem:[%s4300_s10 + $0x270] sm:$0xf] %v621_v60  ;;  %624 = vst [vmem:[%s4300_s10 + $0x274] sm:$0xf] %v623_v61 }
  0xa7   : > { %626 = vst [vmem:[%s4300_s10 + $0x278] sm:$0xf] %v625_v62  ;;  %v627_v63 = vld [vmem:[%s4295_s28 + $0x9f0] sm:$0xf]  ;;  %v629_v0 = vld [vmem:[%s4295_s28 + $0xa00] sm:$0xf] }
  0xa8   : > { %v631_v1 = vld [vmem:[%s4295_s28 + $0xa10] sm:$0xf]  ;;  %628 = vst [vmem:[%s4300_s10 + $0x27c] sm:$0xf] %v627_v63  ;;  %630 = vst [vmem:[%s4300_s10 + $0x280] sm:$0xf] %v629_v0 }
  0xa9   : > { %632 = vst [vmem:[%s4300_s10 + $0x284] sm:$0xf] %v631_v1  ;;  %v633_v2 = vld [vmem:[%s4295_s28 + $0xa20] sm:$0xf]  ;;  %v635_v3 = vld [vmem:[%s4295_s28 + $0xa30] sm:$0xf] }
  0xaa   : > { %v637_v4 = vld [vmem:[%s4295_s28 + $0xa40] sm:$0xf]  ;;  %634 = vst [vmem:[%s4300_s10 + $0x288] sm:$0xf] %v633_v2  ;;  %636 = vst [vmem:[%s4300_s10 + $0x28c] sm:$0xf] %v635_v3 }
  0xab   : > { %638 = vst [vmem:[%s4300_s10 + $0x290] sm:$0xf] %v637_v4  ;;  %v639_v5 = vld [vmem:[%s4295_s28 + $0xa50] sm:$0xf]  ;;  %v641_v6 = vld [vmem:[%s4295_s28 + $0xa60] sm:$0xf] }
  0xac   : > { %v643_v7 = vld [vmem:[%s4295_s28 + $0xa70] sm:$0xf]  ;;  %640 = vst [vmem:[%s4300_s10 + $0x294] sm:$0xf] %v639_v5  ;;  %642 = vst [vmem:[%s4300_s10 + $0x298] sm:$0xf] %v641_v6 }
  0xad   : > { %644 = vst [vmem:[%s4300_s10 + $0x29c] sm:$0xf] %v643_v7  ;;  %v645_v8 = vld [vmem:[%s4295_s28 + $0xa80] sm:$0xf]  ;;  %v647_v9 = vld [vmem:[%s4295_s28 + $0xa90] sm:$0xf] }
  0xae   : > { %v649_v10 = vld [vmem:[%s4295_s28 + $0xaa0] sm:$0xf]  ;;  %646 = vst [vmem:[%s4300_s10 + $0x2a0] sm:$0xf] %v645_v8  ;;  %648 = vst [vmem:[%s4300_s10 + $0x2a4] sm:$0xf] %v647_v9 }
  0xaf   : > { %650 = vst [vmem:[%s4300_s10 + $0x2a8] sm:$0xf] %v649_v10  ;;  %v651_v11 = vld [vmem:[%s4295_s28 + $0xab0] sm:$0xf]  ;;  %v653_v12 = vld [vmem:[%s4295_s28 + $0xac0] sm:$0xf] }
  0xb0   : > { %v655_v13 = vld [vmem:[%s4295_s28 + $0xad0] sm:$0xf]  ;;  %652 = vst [vmem:[%s4300_s10 + $0x2ac] sm:$0xf] %v651_v11  ;;  %654 = vst [vmem:[%s4300_s10 + $0x2b0] sm:$0xf] %v653_v12 }
  0xb1   : > { %656 = vst [vmem:[%s4300_s10 + $0x2b4] sm:$0xf] %v655_v13  ;;  %v657_v14 = vld [vmem:[%s4295_s28 + $0xae0] sm:$0xf]  ;;  %v659_v15 = vld [vmem:[%s4295_s28 + $0xaf0] sm:$0xf] }
  0xb2   : > { %v661_v16 = vld [vmem:[%s4295_s28 + $0xb00] sm:$0xf]  ;;  %658 = vst [vmem:[%s4300_s10 + $0x2b8] sm:$0xf] %v657_v14  ;;  %660 = vst [vmem:[%s4300_s10 + $0x2bc] sm:$0xf] %v659_v15 }
  0xb3   : > { %662 = vst [vmem:[%s4300_s10 + $0x2c0] sm:$0xf] %v661_v16  ;;  %v663_v17 = vld [vmem:[%s4295_s28 + $0xb10] sm:$0xf]  ;;  %v665_v18 = vld [vmem:[%s4295_s28 + $0xb20] sm:$0xf] }
  0xb4   : > { %v667_v19 = vld [vmem:[%s4295_s28 + $0xb30] sm:$0xf]  ;;  %664 = vst [vmem:[%s4300_s10 + $0x2c4] sm:$0xf] %v663_v17  ;;  %666 = vst [vmem:[%s4300_s10 + $0x2c8] sm:$0xf] %v665_v18 }
  0xb5   : > { %668 = vst [vmem:[%s4300_s10 + $0x2cc] sm:$0xf] %v667_v19  ;;  %v669_v20 = vld [vmem:[%s4295_s28 + $0xb40] sm:$0xf]  ;;  %v671_v21 = vld [vmem:[%s4295_s28 + $0xb50] sm:$0xf] }
  0xb6   : > { %v673_v22 = vld [vmem:[%s4295_s28 + $0xb60] sm:$0xf]  ;;  %670 = vst [vmem:[%s4300_s10 + $0x2d0] sm:$0xf] %v669_v20  ;;  %672 = vst [vmem:[%s4300_s10 + $0x2d4] sm:$0xf] %v671_v21 }
  0xb7   : > { %674 = vst [vmem:[%s4300_s10 + $0x2d8] sm:$0xf] %v673_v22  ;;  %v675_v23 = vld [vmem:[%s4295_s28 + $0xb70] sm:$0xf]  ;;  %v677_v24 = vld [vmem:[%s4295_s28 + $0xb80] sm:$0xf] }
  0xb8   : > { %v679_v25 = vld [vmem:[%s4295_s28 + $0xb90] sm:$0xf]  ;;  %676 = vst [vmem:[%s4300_s10 + $0x2dc] sm:$0xf] %v675_v23  ;;  %678 = vst [vmem:[%s4300_s10 + $0x2e0] sm:$0xf] %v677_v24 }
  0xb9   : > { %680 = vst [vmem:[%s4300_s10 + $0x2e4] sm:$0xf] %v679_v25  ;;  %v681_v26 = vld [vmem:[%s4295_s28 + $0xba0] sm:$0xf]  ;;  %v683_v27 = vld [vmem:[%s4295_s28 + $0xbb0] sm:$0xf] }
  0xba   : > { %v685_v28 = vld [vmem:[%s4295_s28 + $0xbc0] sm:$0xf]  ;;  %682 = vst [vmem:[%s4300_s10 + $0x2e8] sm:$0xf] %v681_v26  ;;  %684 = vst [vmem:[%s4300_s10 + $0x2ec] sm:$0xf] %v683_v27 }
  0xbb   : > { %686 = vst [vmem:[%s4300_s10 + $0x2f0] sm:$0xf] %v685_v28  ;;  %v687_v29 = vld [vmem:[%s4295_s28 + $0xbd0] sm:$0xf]  ;;  %v689_v30 = vld [vmem:[%s4295_s28 + $0xbe0] sm:$0xf] }
  0xbc   : > { %v691_v31 = vld [vmem:[%s4295_s28 + $0xbf0] sm:$0xf]  ;;  %688 = vst [vmem:[%s4300_s10 + $0x2f4] sm:$0xf] %v687_v29  ;;  %690 = vst [vmem:[%s4300_s10 + $0x2f8] sm:$0xf] %v689_v30 }
  0xbd   : > { %692 = vst [vmem:[%s4300_s10 + $0x2fc] sm:$0xf] %v691_v31  ;;  %v693_v32 = vld [vmem:[%s4295_s28 + $0xc00] sm:$0xf]  ;;  %v695_v33 = vld [vmem:[%s4295_s28 + $0xc10] sm:$0xf] }
  0xbe   : > { %v697_v34 = vld [vmem:[%s4295_s28 + $0xc20] sm:$0xf]  ;;  %694 = vst [vmem:[%s4300_s10 + $0x300] sm:$0xf] %v693_v32  ;;  %696 = vst [vmem:[%s4300_s10 + $0x304] sm:$0xf] %v695_v33 }
  0xbf   : > { %698 = vst [vmem:[%s4300_s10 + $0x308] sm:$0xf] %v697_v34  ;;  %v699_v35 = vld [vmem:[%s4295_s28 + $0xc30] sm:$0xf]  ;;  %v701_v36 = vld [vmem:[%s4295_s28 + $0xc40] sm:$0xf] }
  0xc0   : > { %v703_v37 = vld [vmem:[%s4295_s28 + $0xc50] sm:$0xf]  ;;  %700 = vst [vmem:[%s4300_s10 + $0x30c] sm:$0xf] %v699_v35  ;;  %702 = vst [vmem:[%s4300_s10 + $0x310] sm:$0xf] %v701_v36 }
  0xc1   : > { %704 = vst [vmem:[%s4300_s10 + $0x314] sm:$0xf] %v703_v37  ;;  %v705_v38 = vld [vmem:[%s4295_s28 + $0xc60] sm:$0xf]  ;;  %v707_v39 = vld [vmem:[%s4295_s28 + $0xc70] sm:$0xf] }
  0xc2   : > { %v709_v40 = vld [vmem:[%s4295_s28 + $0xc80] sm:$0xf]  ;;  %706 = vst [vmem:[%s4300_s10 + $0x318] sm:$0xf] %v705_v38  ;;  %708 = vst [vmem:[%s4300_s10 + $0x31c] sm:$0xf] %v707_v39 }
  0xc3   : > { %710 = vst [vmem:[%s4300_s10 + $0x320] sm:$0xf] %v709_v40  ;;  %v711_v41 = vld [vmem:[%s4295_s28 + $0xc90] sm:$0xf]  ;;  %v713_v42 = vld [vmem:[%s4295_s28 + $0xca0] sm:$0xf] }
  0xc4   : > { %v715_v43 = vld [vmem:[%s4295_s28 + $0xcb0] sm:$0xf]  ;;  %712 = vst [vmem:[%s4300_s10 + $0x324] sm:$0xf] %v711_v41  ;;  %714 = vst [vmem:[%s4300_s10 + $0x328] sm:$0xf] %v713_v42 }
  0xc5   : > { %716 = vst [vmem:[%s4300_s10 + $0x32c] sm:$0xf] %v715_v43  ;;  %v717_v44 = vld [vmem:[%s4295_s28 + $0xcc0] sm:$0xf]  ;;  %v719_v45 = vld [vmem:[%s4295_s28 + $0xcd0] sm:$0xf] }
  0xc6   : > { %v721_v46 = vld [vmem:[%s4295_s28 + $0xce0] sm:$0xf]  ;;  %718 = vst [vmem:[%s4300_s10 + $0x330] sm:$0xf] %v717_v44  ;;  %720 = vst [vmem:[%s4300_s10 + $0x334] sm:$0xf] %v719_v45 }
  0xc7   : > { %722 = vst [vmem:[%s4300_s10 + $0x338] sm:$0xf] %v721_v46  ;;  %v723_v47 = vld [vmem:[%s4295_s28 + $0xcf0] sm:$0xf]  ;;  %v725_v48 = vld [vmem:[%s4295_s28 + $0xd00] sm:$0xf] }
  0xc8   : > { %v727_v49 = vld [vmem:[%s4295_s28 + $0xd10] sm:$0xf]  ;;  %724 = vst [vmem:[%s4300_s10 + $0x33c] sm:$0xf] %v723_v47  ;;  %726 = vst [vmem:[%s4300_s10 + $0x340] sm:$0xf] %v725_v48 }
  0xc9   : > { %728 = vst [vmem:[%s4300_s10 + $0x344] sm:$0xf] %v727_v49  ;;  %v729_v50 = vld [vmem:[%s4295_s28 + $0xd20] sm:$0xf]  ;;  %v731_v51 = vld [vmem:[%s4295_s28 + $0xd30] sm:$0xf] }
  0xca   : > { %v733_v52 = vld [vmem:[%s4295_s28 + $0xd40] sm:$0xf]  ;;  %730 = vst [vmem:[%s4300_s10 + $0x348] sm:$0xf] %v729_v50  ;;  %732 = vst [vmem:[%s4300_s10 + $0x34c] sm:$0xf] %v731_v51 }
  0xcb   : > { %734 = vst [vmem:[%s4300_s10 + $0x350] sm:$0xf] %v733_v52  ;;  %v735_v53 = vld [vmem:[%s4295_s28 + $0xd50] sm:$0xf]  ;;  %v737_v54 = vld [vmem:[%s4295_s28 + $0xd60] sm:$0xf] }
  0xcc   : > { %v739_v55 = vld [vmem:[%s4295_s28 + $0xd70] sm:$0xf]  ;;  %736 = vst [vmem:[%s4300_s10 + $0x354] sm:$0xf] %v735_v53  ;;  %738 = vst [vmem:[%s4300_s10 + $0x358] sm:$0xf] %v737_v54 }
  0xcd   : > { %740 = vst [vmem:[%s4300_s10 + $0x35c] sm:$0xf] %v739_v55  ;;  %v741_v56 = vld [vmem:[%s4295_s28 + $0xd80] sm:$0xf]  ;;  %v743_v57 = vld [vmem:[%s4295_s28 + $0xd90] sm:$0xf] }
  0xce   : > { %v745_v58 = vld [vmem:[%s4295_s28 + $0xda0] sm:$0xf]  ;;  %742 = vst [vmem:[%s4300_s10 + $0x360] sm:$0xf] %v741_v56  ;;  %744 = vst [vmem:[%s4300_s10 + $0x364] sm:$0xf] %v743_v57 }
  0xcf   : > { %746 = vst [vmem:[%s4300_s10 + $0x368] sm:$0xf] %v745_v58  ;;  %v747_v59 = vld [vmem:[%s4295_s28 + $0xdb0] sm:$0xf]  ;;  %v749_v60 = vld [vmem:[%s4295_s28 + $0xdc0] sm:$0xf] }
  0xd0   : > { %v751_v61 = vld [vmem:[%s4295_s28 + $0xdd0] sm:$0xf]  ;;  %748 = vst [vmem:[%s4300_s10 + $0x36c] sm:$0xf] %v747_v59  ;;  %750 = vst [vmem:[%s4300_s10 + $0x370] sm:$0xf] %v749_v60 }
  0xd1   : > { %752 = vst [vmem:[%s4300_s10 + $0x374] sm:$0xf] %v751_v61  ;;  %v753_v62 = vld [vmem:[%s4295_s28 + $0xde0] sm:$0xf]  ;;  %v755_v63 = vld [vmem:[%s4295_s28 + $0xdf0] sm:$0xf] }
  0xd2   : > { %v757_v0 = vld [vmem:[%s4295_s28 + $0xe00] sm:$0xf]  ;;  %754 = vst [vmem:[%s4300_s10 + $0x378] sm:$0xf] %v753_v62  ;;  %756 = vst [vmem:[%s4300_s10 + $0x37c] sm:$0xf] %v755_v63 }
  0xd3   : > { %758 = vst [vmem:[%s4300_s10 + $0x380] sm:$0xf] %v757_v0  ;;  %v759_v1 = vld [vmem:[%s4295_s28 + $0xe10] sm:$0xf]  ;;  %v761_v2 = vld [vmem:[%s4295_s28 + $0xe20] sm:$0xf] }
  0xd4   : > { %v763_v3 = vld [vmem:[%s4295_s28 + $0xe30] sm:$0xf]  ;;  %760 = vst [vmem:[%s4300_s10 + $0x384] sm:$0xf] %v759_v1  ;;  %762 = vst [vmem:[%s4300_s10 + $0x388] sm:$0xf] %v761_v2 }
  0xd5   : > { %764 = vst [vmem:[%s4300_s10 + $0x38c] sm:$0xf] %v763_v3  ;;  %v765_v4 = vld [vmem:[%s4295_s28 + $0xe40] sm:$0xf]  ;;  %v767_v5 = vld [vmem:[%s4295_s28 + $0xe50] sm:$0xf] }
  0xd6   : > { %v769_v6 = vld [vmem:[%s4295_s28 + $0xe60] sm:$0xf]  ;;  %766 = vst [vmem:[%s4300_s10 + $0x390] sm:$0xf] %v765_v4  ;;  %768 = vst [vmem:[%s4300_s10 + $0x394] sm:$0xf] %v767_v5 }
  0xd7   : > { %770 = vst [vmem:[%s4300_s10 + $0x398] sm:$0xf] %v769_v6  ;;  %v771_v7 = vld [vmem:[%s4295_s28 + $0xe70] sm:$0xf]  ;;  %v773_v8 = vld [vmem:[%s4295_s28 + $0xe80] sm:$0xf] }
  0xd8   : > { %v775_v9 = vld [vmem:[%s4295_s28 + $0xe90] sm:$0xf]  ;;  %772 = vst [vmem:[%s4300_s10 + $0x39c] sm:$0xf] %v771_v7  ;;  %774 = vst [vmem:[%s4300_s10 + $0x3a0] sm:$0xf] %v773_v8 }
  0xd9   : > { %776 = vst [vmem:[%s4300_s10 + $0x3a4] sm:$0xf] %v775_v9  ;;  %v777_v10 = vld [vmem:[%s4295_s28 + $0xea0] sm:$0xf]  ;;  %v779_v11 = vld [vmem:[%s4295_s28 + $0xeb0] sm:$0xf] }
  0xda   : > { %v781_v12 = vld [vmem:[%s4295_s28 + $0xec0] sm:$0xf]  ;;  %778 = vst [vmem:[%s4300_s10 + $0x3a8] sm:$0xf] %v777_v10  ;;  %780 = vst [vmem:[%s4300_s10 + $0x3ac] sm:$0xf] %v779_v11 }
  0xdb   : > { %782 = vst [vmem:[%s4300_s10 + $0x3b0] sm:$0xf] %v781_v12  ;;  %v783_v13 = vld [vmem:[%s4295_s28 + $0xed0] sm:$0xf]  ;;  %v785_v14 = vld [vmem:[%s4295_s28 + $0xee0] sm:$0xf] }
  0xdc   : > { %v787_v15 = vld [vmem:[%s4295_s28 + $0xef0] sm:$0xf]  ;;  %784 = vst [vmem:[%s4300_s10 + $0x3b4] sm:$0xf] %v783_v13  ;;  %786 = vst [vmem:[%s4300_s10 + $0x3b8] sm:$0xf] %v785_v14 }
  0xdd   : > { %788 = vst [vmem:[%s4300_s10 + $0x3bc] sm:$0xf] %v787_v15  ;;  %v789_v16 = vld [vmem:[%s4295_s28 + $0xf00] sm:$0xf]  ;;  %v791_v17 = vld [vmem:[%s4295_s28 + $0xf10] sm:$0xf] }
  0xde   : > { %v793_v18 = vld [vmem:[%s4295_s28 + $0xf20] sm:$0xf]  ;;  %790 = vst [vmem:[%s4300_s10 + $0x3c0] sm:$0xf] %v789_v16  ;;  %792 = vst [vmem:[%s4300_s10 + $0x3c4] sm:$0xf] %v791_v17 }
  0xdf   : > { %794 = vst [vmem:[%s4300_s10 + $0x3c8] sm:$0xf] %v793_v18  ;;  %v795_v19 = vld [vmem:[%s4295_s28 + $0xf30] sm:$0xf]  ;;  %v797_v20 = vld [vmem:[%s4295_s28 + $0xf40] sm:$0xf] }
  0xe0   : > { %v799_v21 = vld [vmem:[%s4295_s28 + $0xf50] sm:$0xf]  ;;  %796 = vst [vmem:[%s4300_s10 + $0x3cc] sm:$0xf] %v795_v19  ;;  %798 = vst [vmem:[%s4300_s10 + $0x3d0] sm:$0xf] %v797_v20 }
  0xe1   : > { %800 = vst [vmem:[%s4300_s10 + $0x3d4] sm:$0xf] %v799_v21  ;;  %v801_v22 = vld [vmem:[%s4295_s28 + $0xf60] sm:$0xf]  ;;  %v803_v23 = vld [vmem:[%s4295_s28 + $0xf70] sm:$0xf] }
  0xe2   : > { %v805_v24 = vld [vmem:[%s4295_s28 + $0xf80] sm:$0xf]  ;;  %802 = vst [vmem:[%s4300_s10 + $0x3d8] sm:$0xf] %v801_v22  ;;  %804 = vst [vmem:[%s4300_s10 + $0x3dc] sm:$0xf] %v803_v23 }
  0xe3   : > { %806 = vst [vmem:[%s4300_s10 + $0x3e0] sm:$0xf] %v805_v24  ;;  %v807_v25 = vld [vmem:[%s4295_s28 + $0xf90] sm:$0xf]  ;;  %v809_v26 = vld [vmem:[%s4295_s28 + $0xfa0] sm:$0xf] }
  0xe4   : > { %v811_v27 = vld [vmem:[%s4295_s28 + $0xfb0] sm:$0xf]  ;;  %808 = vst [vmem:[%s4300_s10 + $0x3e4] sm:$0xf] %v807_v25  ;;  %810 = vst [vmem:[%s4300_s10 + $0x3e8] sm:$0xf] %v809_v26 }
  0xe5   : > { %812 = vst [vmem:[%s4300_s10 + $0x3ec] sm:$0xf] %v811_v27  ;;  %v813_v28 = vld [vmem:[%s4295_s28 + $0xfc0] sm:$0xf]  ;;  %v815_v29 = vld [vmem:[%s4295_s28 + $0xfd0] sm:$0xf] }
  0xe6   : > { %v817_v30 = vld [vmem:[%s4295_s28 + $0xfe0] sm:$0xf]  ;;  %814 = vst [vmem:[%s4300_s10 + $0x3f0] sm:$0xf] %v813_v28  ;;  %816 = vst [vmem:[%s4300_s10 + $0x3f4] sm:$0xf] %v815_v29 }
  0xe7   : > { %818 = vst [vmem:[%s4300_s10 + $0x3f8] sm:$0xf] %v817_v30  ;;  %v819_v31 = vld [vmem:[%s4295_s28 + $0xff0] sm:$0xf] }
  0xe8   : > { %820 = vst [vmem:[%s4300_s10 + $0x3fc] sm:$0xf] %v819_v31 }
  0xe9 PF: > { %p3368_p0 = scmp.ge.s32.totalorder %s4086_s25, 1  ;;  %p1355_p1 = scmp.lt.s32.totalorder %s4086_s25, 9 }
  0xeb   : > { %p1356_p2 = pnand %p3368_p0, %p1355_p1 }
  0xec   : > { %s1369_s0 = sand.u32 (!%p1356_p2), 1, %s4054_s17   ;;  %s1390_s11 = sand.u32 (!%p1356_p2), 1, %s4046_s15  }
  0xed   : > { %1359 = sbr.rel (%p1356_p2) target bundleno = 632 (0x278), region = 84  ;;  %s3370_s26 = sshll.u32 (!%p1356_p2), %s1369_s0, 10 }
  0xee   : > { %s4815_s5 = sshll.u32 (!%p1356_p2), %s1390_s11, 4  ;;  %p1417_p3 = scmp.lt.s32.totalorder (!%p1356_p2), %s4074_s22, 3 }
  0xef   : > { %s4818_s28 = scalar_lea.vmem (!%p1356_p2), [#allocation4], %s3370_s26  ;;  %s1362_s10 = sand.u32 (!%p1356_p2), 1, %s4062_s19  }
  0xf0   : > { %s3369_s0 = sshll.u32 (!%p1356_p2), %s1362_s10, 8  ;;  %s4995_s11 = scalar_lea.vmem (!%p1356_p2), [#allocation5], %s4815_s5 }
  0xf1   : > { %s4864_s19 = scalar_lea.vmem (!%p1356_p2), [#allocation3], %s3369_s0  ;;  %p3532_p4 = scmp.ne.s32.totalorder (!%p1356_p2), %s4070_s21, 0 }
  0xf2   : > { %v3872_v32 = vld [vmem:[%s4818_s28 + $0x78] sm:$0xff]   ;;  %s4823_s29 = scalar_select %p1417_p3, %s4074_s22, 3  ;;  %v3876_v36 = vld [vmem:[%s4818_s28 + $0x70] sm:$0xff]   ;;  %v3880_v40 = vld [vmem:[%s4818_s28 + $0x68] sm:$0xff]  }
  0xf3   : > { %v3873_v33 = vld [vmem:[%s4818_s28 + $0xf8] sm:$0xff]   ;;  %3560 = vmatprep.subr.bf16.mxu0 %v3872_v32  ;;  %v3877_v37 = vld [vmem:[%s4818_s28 + $0xf0] sm:$0xff]   ;;  %v3881_v41 = vld [vmem:[%s4818_s28 + $0xe8] sm:$0xff]  }
  0xf4   : > { %v3874_v34 = vld [vmem:[%s4818_s28 + $0x38] sm:$0xff]   ;;  %3588 = vmatprep.subr.bf16.mxu1 %v3873_v33  ;;  %s1421_s30 = scalar_lea.vmem %s5058_s3, %s4823_s29  ;;  %s1428_s9 = scalar_lea.vmem %s5059_s4, %s4823_s29  ;;  %v3878_v38 = vld [vmem:[%s4818_s28 + $0x30] sm:$0xff]   ;;  %v3882_v42 = vld [vmem:[%s4818_s28 + $0x28] sm:$0xff]  }
  0xf5   : > { %v3875_v35 = vld [vmem:[%s4818_s28 + $0xb8] sm:$0xff]   ;;  %3561 = vmatpush3.bf16.msra.mxu0 %v3874_v34  ;;  %v3879_v39 = vld [vmem:[%s4818_s28 + $0xb0] sm:$0xff]   ;;  %v3883_v43 = vld [vmem:[%s4818_s28 + $0xa8] sm:$0xff]  }
  0xf6   : > { %3589 = vmatpush3.bf16.msra.mxu1 %v3875_v35  ;;  %3562 = vmatprep.subr.bf16.mxu0 %v3876_v36  ;;  %v3884_v44 = vld [vmem:[%s4818_s28 + $0x60] sm:$0xff]   ;;  %v3888_v48 = vld [vmem:[%s4818_s28 + $0x58] sm:$0xff]   ;;  %v3892_v52 = vld [vmem:[%s4818_s28 + $0x50] sm:$0xff]  }
  0xf7   : > { %3590 = vmatprep.subr.bf16.mxu1 %v3877_v37  ;;  %v3885_v45 = vld [vmem:[%s4818_s28 + $0xe0] sm:$0xff]   ;;  %v3889_v49 = vld [vmem:[%s4818_s28 + $0xd8] sm:$0xff]   ;;  %v3893_v53 = vld [vmem:[%s4818_s28 + $0xd0] sm:$0xff]  }
  0xf8   : > { %v3886_v46 = vld [vmem:[%s4818_s28 + $0x20] sm:$0xff]   ;;  %v3890_v50 = vld [vmem:[%s4818_s28 + $0x18] sm:$0xff]   ;;  %v3894_v54 = vld [vmem:[%s4818_s28 + $0x10] sm:$0xff]  }
  0xf9   : > { %3563 = vmatpush3.bf16.msra.mxu0 %v3878_v38  ;;  %v3887_v47 = vld [vmem:[%s4818_s28 + $0xa0] sm:$0xff]   ;;  %v3891_v51 = vld [vmem:[%s4818_s28 + $0x98] sm:$0xff]   ;;  %v3895_v55 = vld [vmem:[%s4818_s28 + $0x90] sm:$0xff]  }
  0xfa   : > { %3591 = vmatpush3.bf16.msra.mxu1 %v3879_v39  ;;  %3564 = vmatprep.subr.bf16.mxu0 %v3880_v40  ;;  %v3896_v56 = vld [vmem:[%s4818_s28 + $0x48] sm:$0xff]   ;;  %v3900_v60 = vld [vmem:[%s4818_s28 + $0x40] sm:$0xff]   ;;  %v3904_v8 = vld [vmem:[%s4818_s28 + $0x178] sm:$0xff]  }
  0xfb   : > { %3592 = vmatprep.subr.bf16.mxu1 %v3881_v41  ;;  %v3897_v57 = vld [vmem:[%s4818_s28 + $0xc8] sm:$0xff]   ;;  %v3901_v61 = vld [vmem:[%s4818_s28 + $0xc0] sm:$0xff]   ;;  %v3905_v9 = vld [vmem:[%s4818_s28 + $0x1f8] sm:$0xff]  }
  0xfc   : > { %v3898_v58 = vld [vmem:[%s4818_s28 + $0x8] sm:$0xff]   ;;  %v3902_v62 = vld [vmem:[%s4818_s28] sm:$0xff]   ;;  %v3906_v10 = vld [vmem:[%s4818_s28 + $0x138] sm:$0xff]  }
  0xfd   : > { %3565 = vmatpush3.bf16.msra.mxu0 %v3882_v42  ;;  %v3899_v59 = vld [vmem:[%s4818_s28 + $0x88] sm:$0xff]   ;;  %v3903_v63 = vld [vmem:[%s4818_s28 + $0x80] sm:$0xff]   ;;  %v3907_v11 = vld [vmem:[%s4818_s28 + $0x1b8] sm:$0xff]  }
  0xfe   : > { %3593 = vmatpush3.bf16.msra.mxu1 %v3883_v43  ;;  %3566 = vmatprep.subr.bf16.mxu0 %v3884_v44  ;;  %v1430_v0 = vld [vmem:[%s4864_s19] sm:$0xff]  ;;  %v1431_v2 = vld [vmem:[%s4864_s19 + $0x8] sm:$0xff]  ;;  %v3908_v12 = vld [vmem:[%s4818_s28 + $0x170] sm:$0xff]  }
  0xff   : > { %3594 = vmatprep.subr.bf16.mxu1 %v3885_v45  ;;  %v1438_v1 = vld [vmem:[%s4864_s19 + $0x40] sm:$0xff]  ;;  %v1439_v5 = vld [vmem:[%s4864_s19 + $0x48] sm:$0xff]  ;;  %v3909_v13 = vld [vmem:[%s4818_s28 + $0x1f0] sm:$0xff]  }
 0x100   : > { %v3372_v3 = vcombine.low %v1430_v0, %v1438_v1  ;;  %v3373_v4 = vcombine.high %v1430_v0, %v1438_v1  ;;  %v3374_v6 = vcombine.low %v1431_v2, %v1439_v5  ;;  %v3375_v7 = vcombine.high %v1431_v2, %v1439_v5  ;;  %v3910_v14 = vld [vmem:[%s4818_s28 + $0x130] sm:$0xff]   ;;  %v3912_v16 = vld [vmem:[%s4818_s28 + $0x168] sm:$0xff]   ;;  %v3916_v20 = vld [vmem:[%s4818_s28 + $0x160] sm:$0xff]  }
 0x101   : > { %3567 = vmatpush3.bf16.msra.mxu0 %v3886_v46  ;;  %v3911_v15 = vld [vmem:[%s4818_s28 + $0x1b0] sm:$0xff]   ;;  %v3913_v17 = vld [vmem:[%s4818_s28 + $0x1e8] sm:$0xff]   ;;  %v3917_v21 = vld [vmem:[%s4818_s28 + $0x1e0] sm:$0xff]  }
 0x102   : > { %3595 = vmatpush3.bf16.msra.mxu1 %v3887_v47  ;;  %3568 = vmatprep.subr.bf16.mxu0 %v3888_v48  ;;  %v3914_v18 = vld [vmem:[%s4818_s28 + $0x128] sm:$0xff]   ;;  %v3918_v22 = vld [vmem:[%s4818_s28 + $0x120] sm:$0xff]   ;;  %v3920_v24 = vld [vmem:[%s4818_s28 + $0x158] sm:$0xff]  }
 0x103   : > { %3596 = vmatprep.subr.bf16.mxu1 %v3889_v49  ;;  %2678 = vmatprep.mubr.bf16.mxu0 %v3373_v4  ;;  %v3915_v19 = vld [vmem:[%s4818_s28 + $0x1a8] sm:$0xff]   ;;  %v3919_v23 = vld [vmem:[%s4818_s28 + $0x1a0] sm:$0xff]   ;;  %v3921_v25 = vld [vmem:[%s4818_s28 + $0x1d8] sm:$0xff]  }
 0x104   : > { %2727 = vmatprep.mubr.bf16.mxu1 %v3375_v7  ;;  %v3922_v26 = vld [vmem:[%s4818_s28 + $0x118] sm:$0xff]   ;;  %v1446_v28 = vld [vmem:[%s4864_s19 + $0x80] sm:$0xff]  ;;  %v1447_v31 = vld [vmem:[%s4864_s19 + $0x88] sm:$0xff] }
 0x105   : > { %3569 = vmatpush3.bf16.msra.mxu0 %v3890_v50  ;;  %v3923_v27 = vld [vmem:[%s4818_s28 + $0x198] sm:$0xff]   ;;  %v1454_v29 = vld [vmem:[%s4864_s19 + $0xc0] sm:$0xff]  ;;  %v1455_v32 = vld [vmem:[%s4864_s19 + $0xc8] sm:$0xff] }
 0x106   : > { %3597 = vmatpush3.bf16.msra.mxu1 %v3891_v51  ;;  %3570 = vmatprep.subr.bf16.mxu0 %v3892_v52  ;;  %v3389_v30 = vcombine.high %v1446_v28, %v1454_v29  ;;  %v3388_v33 = vcombine.low %v1446_v28, %v1454_v29  ;;  %v3391_v34 = vcombine.high %v1447_v31, %v1455_v32  ;;  %v3924_v36 = vld [vmem:[%s4818_s28 + $0x150] sm:$0xff]   ;;  %v3928_v40 = vld [vmem:[%s4818_s28 + $0x148] sm:$0xff]   ;;  %v3932_v44 = vld [vmem:[%s4818_s28 + $0x140] sm:$0xff]  }
 0x107   : > { %3598 = vmatprep.subr.bf16.mxu1 %v3893_v53  ;;  %v3390_v35 = vcombine.low %v1447_v31, %v1455_v32  ;;  %v3925_v37 = vld [vmem:[%s4818_s28 + $0x1d0] sm:$0xff]   ;;  %v3929_v41 = vld [vmem:[%s4818_s28 + $0x1c8] sm:$0xff]   ;;  %v3933_v45 = vld [vmem:[%s4818_s28 + $0x1c0] sm:$0xff]  }
 0x108   : > { %v3926_v38 = vld [vmem:[%s4818_s28 + $0x110] sm:$0xff]   ;;  %v3930_v42 = vld [vmem:[%s4818_s28 + $0x108] sm:$0xff]   ;;  %v3934_v46 = vld [vmem:[%s4818_s28 + $0x100] sm:$0xff]  }
 0x109   : > { %3571 = vmatpush3.bf16.msra.mxu0 %v3894_v54  ;;  %v3927_v39 = vld [vmem:[%s4818_s28 + $0x190] sm:$0xff]   ;;  %v3931_v43 = vld [vmem:[%s4818_s28 + $0x188] sm:$0xff]   ;;  %v3935_v47 = vld [vmem:[%s4818_s28 + $0x180] sm:$0xff]  }
 0x10a   : > { %3599 = vmatpush3.bf16.msra.mxu1 %v3895_v55  ;;  %3572 = vmatprep.subr.bf16.mxu0 %v3896_v56  ;;  %v1432_v48 = vld [vmem:[%s4864_s19 + $0x10] sm:$0xff]  ;;  %v1433_v50 = vld [vmem:[%s4864_s19 + $0x18] sm:$0xff]  ;;  %v3944_v4 = vld [vmem:[%s4818_s28 + $0x268] sm:$0xff]  }
 0x10b   : > { %3600 = vmatprep.subr.bf16.mxu1 %v3897_v57  ;;  %v1440_v49 = vld [vmem:[%s4864_s19 + $0x50] sm:$0xff]  ;;  %v1441_v51 = vld [vmem:[%s4864_s19 + $0x58] sm:$0xff]  ;;  %v3945_v5 = vld [vmem:[%s4818_s28 + $0x2e8] sm:$0xff]  }
 0x10c   : > { %v3376_v52 = vcombine.low %v1432_v48, %v1440_v49  ;;  %v3377_v53 = vcombine.high %v1432_v48, %v1440_v49  ;;  %v3378_v54 = vcombine.low %v1433_v50, %v1441_v51  ;;  %v3379_v55 = vcombine.high %v1433_v50, %v1441_v51  ;;  %v3936_v56 = vld [vmem:[%s4818_s28 + $0x278] sm:$0xff]   ;;  %v1448_v0 = vld [vmem:[%s4864_s19 + $0x90] sm:$0xff]  ;;  %v3964_v28 = vld [vmem:[%s4818_s28 + $0x240] sm:$0xff]  }
 0x10d   : > { %3573 = vmatpush3.bf16.msra.mxu0 %v3898_v58  ;;  %v3937_v57 = vld [vmem:[%s4818_s28 + $0x2f8] sm:$0xff]   ;;  %v1456_v1 = vld [vmem:[%s4864_s19 + $0xd0] sm:$0xff]  ;;  %v3965_v29 = vld [vmem:[%s4818_s28 + $0x2c0] sm:$0xff]  }
 0x10e   : > { %3601 = vmatpush3.bf16.msra.mxu1 %v3899_v59  ;;  %3574 = vmatprep.subr.bf16.mxu0 %v3900_v60  ;;  %v3938_v58 = vld [vmem:[%s4818_s28 + $0x238] sm:$0xff]   ;;  %v3940_v60 = vld [vmem:[%s4818_s28 + $0x270] sm:$0xff]   ;;  %v3393_v2 = vcombine.high %v1448_v0, %v1456_v1  ;;  %v3967_v31 = vld [vmem:[%s4818_s28 + $0x280] sm:$0xff]  }
 0x10f   : > { %3602 = vmatprep.subr.bf16.mxu1 %v3901_v61  ;;  %v3939_v59 = vld [vmem:[%s4818_s28 + $0x2b8] sm:$0xff]   ;;  %v3941_v61 = vld [vmem:[%s4818_s28 + $0x2f0] sm:$0xff]   ;;  %v1434_v32 = vld [vmem:[%s4864_s19 + $0x20] sm:$0xff] }
 0x110   : > { %v1457_v7 = vld [vmem:[%s4864_s19 + $0xd8] sm:$0xff]  ;;  %v1450_v48 = vld [vmem:[%s4864_s19 + $0xa0] sm:$0xff] }
 0x111   : > { %3575 = vmatpush3.bf16.msra.mxu0 %v3902_v62  ;;  %v3942_v62 = vld [vmem:[%s4818_s28 + $0x230] sm:$0xff]   ;;  %v1458_v49 = vld [vmem:[%s4864_s19 + $0xe0] sm:$0xff] }
 0x112   : > { %3603 = vmatpush3.bf16.msra.mxu1 %v3903_v63  ;;  %3616 = vmatprep.subr.bf16.mxu0 %v3904_v8  ;;  %v3943_v63 = vld [vmem:[%s4818_s28 + $0x2b0] sm:$0xff]   ;;  %v3397_v50 = vcombine.high %v1450_v48, %v1458_v49  ;;  %v3396_v51 = vcombine.low %v1450_v48, %v1458_v49 }
 0x113   : > { %3644 = vmatprep.subr.bf16.mxu1 %v3905_v9  ;;  %v3946_v9 = vld [vmem:[%s4818_s28 + $0x228] sm:$0xff]  }
 0x114   : > { %2679 = vmatmul.mubr.bf16.vlgmr.msra.gmra.mxu0 %v3372_v3  ;;  %v3392_v3 = vcombine.low %v1448_v0, %v1456_v1  ;;  %v3984_v0 = vld [vmem:[%s4818_s28 + $0x358] sm:$0xff]  }
 0x115   : > { %2728 = vmatmul.mubr.bf16.vlgmr.msra.gmra.mxu1 %v3374_v6  ;;  %3617 = vmatpush3.bf16.msra.mxu0 %v3906_v10  ;;  %v1449_v6 = vld [vmem:[%s4864_s19 + $0x98] sm:$0xff] }
 0x116   : > { %3645 = vmatpush3.bf16.msra.mxu1 %v3907_v11  ;;  %3618 = vmatprep.subr.bf16.mxu0 %v3908_v12  ;;  %v3395_v8 = vcombine.high %v1449_v6, %v1457_v7  ;;  %v3394_v10 = vcombine.low %v1449_v6, %v1457_v7  ;;  %v3947_v11 = vld [vmem:[%s4818_s28 + $0x2a8] sm:$0xff]   ;;  %v3948_v12 = vld [vmem:[%s4818_s28 + $0x260] sm:$0xff]   ;;  %v3985_v1 = vld [vmem:[%s4818_s28 + $0x3d8] sm:$0xff]  }
 0x117   : > { %3646 = vmatprep.subr.bf16.mxu1 %v3909_v13  ;;  %2686 = vmatprep.mubr.bf16.mxu0 %v3389_v30  ;;  %v3949_v13 = vld [vmem:[%s4818_s28 + $0x2e0] sm:$0xff]   ;;  %v3990_v6 = vld [vmem:[%s4818_s28 + $0x310] sm:$0xff]  }
 0x118   : > { %2735 = vmatprep.mubr.bf16.mxu1 %v3391_v34  ;;  %v3966_v30 = vld [vmem:[%s4818_s28 + $0x200] sm:$0xff]   ;;  %v3991_v7 = vld [vmem:[%s4818_s28 + $0x390] sm:$0xff]  }
 0x119   : > { %3619 = vmatpush3.bf16.msra.mxu0 %v3910_v14  ;;  %v3950_v14 = vld [vmem:[%s4818_s28 + $0x220] sm:$0xff]  }
 0x11a   : > { %3647 = vmatpush3.bf16.msra.mxu1 %v3911_v15  ;;  %3620 = vmatprep.subr.bf16.mxu0 %v3912_v16  ;;  %v3951_v15 = vld [vmem:[%s4818_s28 + $0x2a0] sm:$0xff]   ;;  %v3952_v16 = vld [vmem:[%s4818_s28 + $0x258] sm:$0xff]  }
 0x11b   : > { %3648 = vmatprep.subr.bf16.mxu1 %v3913_v17  ;;  %v3953_v17 = vld [vmem:[%s4818_s28 + $0x2d8] sm:$0xff]  }
 0x11c   : > { %2687 = vmatmul.mubr.bf16.gmra.mxu0 %v3388_v33  ;;  %v1442_v33 = vld [vmem:[%s4864_s19 + $0x60] sm:$0xff] }
 0x11d   : > { %3621 = vmatpush3.bf16.msra.mxu0 %v3914_v18  ;;  %2736 = vmatmul.mubr.bf16.gmra.mxu1 %v3390_v35  ;;  %v3954_v18 = vld [vmem:[%s4818_s28 + $0x218] sm:$0xff]   ;;  %v3380_v34 = vcombine.low %v1434_v32, %v1442_v33  ;;  %v3381_v35 = vcombine.high %v1434_v32, %v1442_v33 }
 0x11e   : > { %3649 = vmatpush3.bf16.msra.mxu1 %v3915_v19  ;;  %3622 = vmatprep.subr.bf16.mxu0 %v3916_v20  ;;  %v3955_v19 = vld [vmem:[%s4818_s28 + $0x298] sm:$0xff]   ;;  %v3956_v20 = vld [vmem:[%s4818_s28 + $0x250] sm:$0xff]  }
 0x11f   : > { %3650 = vmatprep.subr.bf16.mxu1 %v3917_v21  ;;  %2776 = vmatprep.mubr.bf16.mxu0 %v3377_v53  ;;  %v3957_v21 = vld [vmem:[%s4818_s28 + $0x2d0] sm:$0xff]   ;;  %v3977_v53 = vld [vmem:[%s4818_s28 + $0x3e8] sm:$0xff]  }
 0x120   : > { %2825 = vmatprep.mubr.bf16.mxu1 %v3379_v55  ;;  %v1459_v55 = vld [vmem:[%s4864_s19 + $0xe8] sm:$0xff] }
 0x121   : > { %3623 = vmatpush3.bf16.msra.mxu0 %v3918_v22  ;;  %v3958_v22 = vld [vmem:[%s4818_s28 + $0x210] sm:$0xff]  }
 0x122   : > { %3651 = vmatpush3.bf16.msra.mxu1 %v3919_v23  ;;  %3624 = vmatprep.subr.bf16.mxu0 %v3920_v24  ;;  %v3959_v23 = vld [vmem:[%s4818_s28 + $0x290] sm:$0xff]   ;;  %v3960_v24 = vld [vmem:[%s4818_s28 + $0x248] sm:$0xff]  }
 0x123   : > { %3652 = vmatprep.subr.bf16.mxu1 %v3921_v25  ;;  %v3961_v25 = vld [vmem:[%s4818_s28 + $0x2c8] sm:$0xff]  }
 0x125   : > { %3625 = vmatpush3.bf16.msra.mxu0 %v3922_v26  ;;  %v3962_v26 = vld [vmem:[%s4818_s28 + $0x208] sm:$0xff]  }
 0x126   : > { %3653 = vmatpush3.bf16.msra.mxu1 %v3923_v27  ;;  %3626 = vmatprep.subr.bf16.mxu0 %v3924_v36  ;;  %v3963_v27 = vld [vmem:[%s4818_s28 + $0x288] sm:$0xff]  }
 0x127   : > { %3654 = vmatprep.subr.bf16.mxu1 %v3925_v37  ;;  %v1435_v36 = vld [vmem:[%s4864_s19 + $0x28] sm:$0xff] }
 0x128   : > { %v1443_v37 = vld [vmem:[%s4864_s19 + $0x68] sm:$0xff] }
 0x129   : > { %3627 = vmatpush3.bf16.msra.mxu0 %v3926_v38  ;;  %v3382_v38 = vcombine.low %v1435_v36, %v1443_v37 }
 0x12a   : > { %3655 = vmatpush3.bf16.msra.mxu1 %v3927_v39  ;;  %3628 = vmatprep.subr.bf16.mxu0 %v3928_v40  ;;  %v3383_v39 = vcombine.high %v1435_v36, %v1443_v37  ;;  %v3968_v40 = vld [vmem:[%s4818_s28 + $0x378] sm:$0xff]  }
 0x12b   : > { %3656 = vmatprep.subr.bf16.mxu1 %v3929_v41  ;;  %v3969_v41 = vld [vmem:[%s4818_s28 + $0x3f8] sm:$0xff]  }
 0x12d   : > { %3629 = vmatpush3.bf16.msra.mxu0 %v3930_v42  ;;  %v3970_v42 = vld [vmem:[%s4818_s28 + $0x338] sm:$0xff]  }
 0x12e   : > { %3657 = vmatpush3.bf16.msra.mxu1 %v3931_v43  ;;  %3630 = vmatprep.subr.bf16.mxu0 %v3932_v44  ;;  %v3971_v43 = vld [vmem:[%s4818_s28 + $0x3b8] sm:$0xff]   ;;  %v3972_v44 = vld [vmem:[%s4818_s28 + $0x370] sm:$0xff]  }
 0x12f   : > { %3658 = vmatprep.subr.bf16.mxu1 %v3933_v45  ;;  %v3973_v45 = vld [vmem:[%s4818_s28 + $0x3f0] sm:$0xff]  }
 0x131   : > { %3631 = vmatpush3.bf16.msra.mxu0 %v3934_v46  ;;  %v3974_v46 = vld [vmem:[%s4818_s28 + $0x330] sm:$0xff]  }
 0x132   : > { %3659 = vmatpush3.bf16.msra.mxu1 %v3935_v47  ;;  %3672 = vmatprep.subr.bf16.mxu0 %v3936_v56  ;;  %v3975_v47 = vld [vmem:[%s4818_s28 + $0x3b0] sm:$0xff]  }
 0x133   : > { %3700 = vmatprep.subr.bf16.mxu1 %v3937_v57  ;;  %v3978_v57 = vld [vmem:[%s4818_s28 + $0x328] sm:$0xff]  }
 0x134   : > { %2777 = vmatmul.mubr.bf16.vlgmr.msra.gmra.mxu0 %v3376_v52  ;;  %v3976_v52 = vld [vmem:[%s4818_s28 + $0x368] sm:$0xff]  }
 0x135   : > { %2826 = vmatmul.mubr.bf16.vlgmr.msra.gmra.mxu1 %v3378_v54  ;;  %3673 = vmatpush3.bf16.msra.mxu0 %v3938_v58  ;;  %v1451_v54 = vld [vmem:[%s4864_s19 + $0xa8] sm:$0xff] }
 0x136   : > { %3701 = vmatpush3.bf16.msra.mxu1 %v3939_v59  ;;  %3674 = vmatprep.subr.bf16.mxu0 %v3940_v60  ;;  %v3399_v56 = vcombine.high %v1451_v54, %v1459_v55  ;;  %v3398_v58 = vcombine.low %v1451_v54, %v1459_v55  ;;  %v3979_v59 = vld [vmem:[%s4818_s28 + $0x3a8] sm:$0xff]   ;;  %v3980_v60 = vld [vmem:[%s4818_s28 + $0x360] sm:$0xff]  }
 0x137   : > { %3702 = vmatprep.subr.bf16.mxu1 %v3941_v61  ;;  %2784 = vmatprep.mubr.bf16.mxu0 %v3393_v2  ;;  %v3981_v61 = vld [vmem:[%s4818_s28 + $0x3e0] sm:$0xff]   ;;  %v3986_v2 = vld [vmem:[%s4818_s28 + $0x318] sm:$0xff]  }
 0x138   : > { %2833 = vmatprep.mubr.bf16.mxu1 %v3395_v8  ;;  %v3992_v8 = vld [vmem:[%s4818_s28 + $0x348] sm:$0xff]  }
 0x139   : > { %3675 = vmatpush3.bf16.msra.mxu0 %v3942_v62  ;;  %v3982_v62 = vld [vmem:[%s4818_s28 + $0x320] sm:$0xff]  }
 0x13a   : > { %3703 = vmatpush3.bf16.msra.mxu1 %v3943_v63  ;;  %3676 = vmatprep.subr.bf16.mxu0 %v3944_v4  ;;  %v3983_v63 = vld [vmem:[%s4818_s28 + $0x3a0] sm:$0xff]   ;;  %v3988_v4 = vld [vmem:[%s4818_s28 + $0x350] sm:$0xff]  }
 0x13b   : > { %3704 = vmatprep.subr.bf16.mxu1 %v3945_v5  ;;  %v3989_v5 = vld [vmem:[%s4818_s28 + $0x3d0] sm:$0xff]  }
 0x13c   : > { %2785 = vmatmul.mubr.bf16.gmra.mxu0 %v3392_v3  ;;  %v3987_v3 = vld [vmem:[%s4818_s28 + $0x398] sm:$0xff]  }
 0x13d   : > { %3677 = vmatpush3.bf16.msra.mxu0 %v3946_v9  ;;  %2834 = vmatmul.mubr.bf16.gmra.mxu1 %v3394_v10  ;;  %v3993_v9 = vld [vmem:[%s4818_s28 + $0x3c8] sm:$0xff]  }
 0x13e   : > { %3705 = vmatpush3.bf16.msra.mxu1 %v3947_v11  ;;  %3678 = vmatprep.subr.bf16.mxu0 %v3948_v12  ;;  %v3994_v10 = vld [vmem:[%s4818_s28 + $0x308] sm:$0xff]   ;;  %v3996_v12 = vld [vmem:[%s4818_s28 + $0x340] sm:$0xff]  }
 0x13f   : > { %3706 = vmatprep.subr.bf16.mxu1 %v3949_v13  ;;  %2874 = vmatprep.mubr.bf16.mxu0 %v3381_v35  ;;  %v3995_v11 = vld [vmem:[%s4818_s28 + $0x388] sm:$0xff]   ;;  %v3997_v13 = vld [vmem:[%s4818_s28 + $0x3c0] sm:$0xff]  }
 0x140   : > { %2923 = vmatprep.mubr.bf16.mxu1 %v3383_v39 }
 0x141   : > { %3679 = vmatpush3.bf16.msra.mxu0 %v3950_v14  ;;  %v3998_v14 = vld [vmem:[%s4818_s28 + $0x300] sm:$0xff]  }
 0x142   : > { %3707 = vmatpush3.bf16.msra.mxu1 %v3951_v15  ;;  %3680 = vmatprep.subr.bf16.mxu0 %v3952_v16  ;;  %v3999_v15 = vld [vmem:[%s4818_s28 + $0x380] sm:$0xff]   ;;  %v1436_v16 = vld [vmem:[%s4864_s19 + $0x30] sm:$0xff] }
 0x143   : > { %3708 = vmatprep.subr.bf16.mxu1 %v3953_v17  ;;  %v1444_v17 = vld [vmem:[%s4864_s19 + $0x70] sm:$0xff] }
 0x145   : > { %3681 = vmatpush3.bf16.msra.mxu0 %v3954_v18  ;;  %v1437_v18 = vld [vmem:[%s4864_s19 + $0x38] sm:$0xff] }
 0x146   : > { %3709 = vmatpush3.bf16.msra.mxu1 %v3955_v19  ;;  %3682 = vmatprep.subr.bf16.mxu0 %v3956_v20  ;;  %v3384_v19 = vcombine.low %v1436_v16, %v1444_v17  ;;  %v3385_v20 = vcombine.high %v1436_v16, %v1444_v17 }
 0x147   : > { %3710 = vmatprep.subr.bf16.mxu1 %v3957_v21  ;;  %v1445_v21 = vld [vmem:[%s4864_s19 + $0x78] sm:$0xff] }
 0x149   : > { %3683 = vmatpush3.bf16.msra.mxu0 %v3958_v22  ;;  %v1452_v22 = vld [vmem:[%s4864_s19 + $0xb0] sm:$0xff] }
 0x14a   : > { %3711 = vmatpush3.bf16.msra.mxu1 %v3959_v23  ;;  %3684 = vmatprep.subr.bf16.mxu0 %v3960_v24  ;;  %v1460_v23 = vld [vmem:[%s4864_s19 + $0xf0] sm:$0xff]  ;;  %v3386_v24 = vcombine.low %v1437_v18, %v1445_v21 }
 0x14b   : > { %3712 = vmatprep.subr.bf16.mxu1 %v3961_v25  ;;  %v3387_v25 = vcombine.high %v1437_v18, %v1445_v21 }
 0x14d   : > { %3685 = vmatpush3.bf16.msra.mxu0 %v3962_v26  ;;  %v3401_v26 = vcombine.high %v1452_v22, %v1460_v23 }
 0x14e   : > { %3713 = vmatpush3.bf16.msra.mxu1 %v3963_v27  ;;  %3686 = vmatprep.subr.bf16.mxu0 %v3964_v28  ;;  %v1453_v27 = vld [vmem:[%s4864_s19 + $0xb8] sm:$0xff] }
 0x14f   : > { %3714 = vmatprep.subr.bf16.mxu1 %v3965_v29  ;;  %v1461_v28 = vld [vmem:[%s4864_s19 + $0xf8] sm:$0xff] }
 0x150   : > { %v3403_v29 = vcombine.high %v1453_v27, %v1461_v28 }
 0x151   : > { %3687 = vmatpush3.bf16.msra.mxu0 %v3966_v30  ;;  %v3400_v30 = vcombine.low %v1452_v22, %v1460_v23 }
 0x152   : > { %3715 = vmatpush3.bf16.msra.mxu1 %v3967_v31  ;;  %3728 = vmatprep.subr.bf16.mxu0 %v3968_v40  ;;  %v3402_v31 = vcombine.low %v1453_v27, %v1461_v28 }
 0x153   : > { %3756 = vmatprep.subr.bf16.mxu1 %v3969_v41 }
 0x154   : > { %2875 = vmatmul.mubr.bf16.vlgmr.msra.gmra.mxu0 %v3380_v34 }
 0x155   : > { %2924 = vmatmul.mubr.bf16.vlgmr.msra.gmra.mxu1 %v3382_v38  ;;  %3729 = vmatpush3.bf16.msra.mxu0 %v3970_v42 }
 0x156   : > { %3757 = vmatpush3.bf16.msra.mxu1 %v3971_v43  ;;  %3730 = vmatprep.subr.bf16.mxu0 %v3972_v44 }
 0x157   : > { %3758 = vmatprep.subr.bf16.mxu1 %v3973_v45  ;;  %2882 = vmatprep.mubr.bf16.mxu0 %v3397_v50 }
 0x158   : > { %2931 = vmatprep.mubr.bf16.mxu1 %v3399_v56 }
 0x159   : > { %3731 = vmatpush3.bf16.msra.mxu0 %v3974_v46 }
 0x15a   : > { %3759 = vmatpush3.bf16.msra.mxu1 %v3975_v47  ;;  %3732 = vmatprep.subr.bf16.mxu0 %v3976_v52 }
 0x15b   : > { %3760 = vmatprep.subr.bf16.mxu1 %v3977_v53 }
 0x15c   : > { %2883 = vmatmul.mubr.bf16.gmra.mxu0 %v3396_v51 }
 0x15d   : > { %3733 = vmatpush3.bf16.msra.mxu0 %v3978_v57  ;;  %2932 = vmatmul.mubr.bf16.gmra.mxu1 %v3398_v58 }
 0x15e   : > { %3761 = vmatpush3.bf16.msra.mxu1 %v3979_v59  ;;  %3734 = vmatprep.subr.bf16.mxu0 %v3980_v60 }
 0x15f   : > { %3762 = vmatprep.subr.bf16.mxu1 %v3981_v61  ;;  %2972 = vmatprep.mubr.bf16.mxu0 %v3385_v20 }
 0x160   : > { %3021 = vmatprep.mubr.bf16.mxu1 %v3387_v25 }
 0x161   : > { %3735 = vmatpush3.bf16.msra.mxu0 %v3982_v62 }
 0x162   : > { %3763 = vmatpush3.bf16.msra.mxu1 %v3983_v63  ;;  %3736 = vmatprep.subr.bf16.mxu0 %v3984_v0 }
 0x163   : > { %3764 = vmatprep.subr.bf16.mxu1 %v3985_v1 }
 0x165   : > { %3737 = vmatpush3.bf16.msra.mxu0 %v3986_v2 }
 0x166   : > { %3765 = vmatpush3.bf16.msra.mxu1 %v3987_v3  ;;  %3738 = vmatprep.subr.bf16.mxu0 %v3988_v4 }
 0x167   : > { %3766 = vmatprep.subr.bf16.mxu1 %v3989_v5 }
 0x169   : > { %3739 = vmatpush3.bf16.msra.mxu0 %v3990_v6 }
 0x16a   : > { %3767 = vmatpush3.bf16.msra.mxu1 %v3991_v7  ;;  %3740 = vmatprep.subr.bf16.mxu0 %v3992_v8 }
 0x16b   : > { %3768 = vmatprep.subr.bf16.mxu1 %v3993_v9 }
 0x16d   : > { %3741 = vmatpush3.bf16.msra.mxu0 %v3994_v10 }
 0x16e   : > { %3769 = vmatpush3.bf16.msra.mxu1 %v3995_v11  ;;  %3742 = vmatprep.subr.bf16.mxu0 %v3996_v12 }
 0x16f   : > { %3770 = vmatprep.subr.bf16.mxu1 %v3997_v13 }
 0x171   : > { %3743 = vmatpush3.bf16.msra.mxu0 %v3998_v14 }
 0x172   : > { %3771 = vmatpush3.bf16.msra.mxu1 %v3999_v15 }
 0x174   : > { %2973 = vmatmul.mubr.bf16.vlgmr.msra.gmra.mxu0 %v3384_v19 }
 0x175   : > { %3022 = vmatmul.mubr.bf16.vlgmr.msra.gmra.mxu1 %v3386_v24  ;;  %2980 = vmatprep.mubr.bf16.mxu0 %v3401_v26 }
 0x176   : > { %3029 = vmatprep.mubr.bf16.mxu1 %v3403_v29 }
 0x17c   : > { %2981 = vmatmul.mubr.bf16.gmra.mxu0 %v3400_v30 }
 0x17d   : > { %3030 = vmatmul.mubr.bf16.gmra.mxu1 %v3402_v31 }
 0x1d4   : > { %v3576_v32 = vpop.f32.mrf.mxu0 }
 0x1d5   : > { %v3604_v34 = vpop.f32.mrf.mxu1 }
 0x1d6   : > { %v3577_v33 = vpop.f32.mrf.mxu0 }
 0x1d7   : > { %v3605_v36 = vpop.f32.mrf.mxu1  ;;  %v3578_v9 = vadd.f32 %v3577_v33, %v3576_v32 }
 0x1d8   : > { %v3579_v35 = vpop.f32.mrf.mxu0  ;;  %v3606_v10 = vadd.f32 %v3605_v36, %v3604_v34 }
 0x1d9   : > { %v3607_v38 = vpop.f32.mrf.mxu1 }
 0x1da   : > { %v3580_v37 = vpop.f32.mrf.mxu0  ;;  %v2730_v14 = vadd.f32 %v3606_v10, %v3578_v9 }
 0x1db   : > { %v3608_v40 = vpop.f32.mrf.mxu1  ;;  %v3581_v15 = vadd.f32 %v3580_v37, %v3579_v35 }
 0x1dc   : > { %v3582_v39 = vpop.f32.mrf.mxu0  ;;  %v3609_v16 = vadd.f32 %v3608_v40, %v3607_v38 }
 0x1dd   : > { %v3610_v42 = vpop.f32.mrf.mxu1 }
 0x1de   : > { %v3583_v41 = vpop.f32.mrf.mxu0  ;;  %v2733_v24 = vadd.f32 %v3609_v16, %v3581_v15 }
 0x1df   : > { %v3611_v44 = vpop.f32.mrf.mxu1  ;;  %v3584_v21 = vadd.f32 %v3583_v41, %v3582_v39 }
 0x1e0   : > { %v3585_v43 = vpop.f32.mrf.mxu0  ;;  %v3612_v22 = vadd.f32 %v3611_v44, %v3610_v42 }
 0x1e1   : > { %v3613_v46 = vpop.f32.mrf.mxu1 }
 0x1e2   : > { %v3586_v45 = vpop.f32.mrf.mxu0  ;;  %v2738_v30 = vadd.f32 %v3612_v22, %v3584_v21 }
 0x1e3   : > { %v3614_v48 = vpop.f32.mrf.mxu1  ;;  %v3587_v31 = vadd.f32 %v3586_v45, %v3585_v43 }
 0x1e4   : > { %v3615_v32 = vadd.f32 %v3614_v48, %v3613_v46 }
 0x1f4   : > { %v3632_v47 = vpop.f32.mrf.mxu0 }
 0x1f5   : > { %v3660_v50 = vpop.f32.mrf.mxu1 }
 0x1f6   : > { %v3633_v49 = vpop.f32.mrf.mxu0 }
 0x1f7   : > { %v3661_v52 = vpop.f32.mrf.mxu1  ;;  %v3634_v12 = vadd.f32 %v3633_v49, %v3632_v47  ;;  %v2741_v49 = vadd.f32 %v3615_v32, %v3587_v31 }
 0x1f8   : > { %v3635_v51 = vpop.f32.mrf.mxu0  ;;  %v3662_v19 = vadd.f32 %v3661_v52, %v3660_v50 }
 0x1f9   : > { %v3663_v54 = vpop.f32.mrf.mxu1  ;;  %v2779_v18 = vadd.f32 %v3634_v12, %v2730_v14 }
 0x1fa   : > { %v3636_v53 = vpop.f32.mrf.mxu0 }
 0x1fb   : > { %v3664_v56 = vpop.f32.mrf.mxu1  ;;  %v3637_v20 = vadd.f32 %v3636_v53, %v3635_v51  ;;  %v2828_v28 = vadd.f32 %v3662_v19, %v2779_v18 }
 0x1fc   : > { %v3638_v55 = vpop.f32.mrf.mxu0  ;;  %v3665_v34 = vadd.f32 %v3664_v56, %v3663_v54 }
 0x1fd   : > { %v3666_v57 = vpop.f32.mrf.mxu1  ;;  %v2782_v29 = vadd.f32 %v3637_v20, %v2733_v24 }
 0x1fe   : > { %v3639_v58 = vpop.f32.mrf.mxu0 }
 0x1ff   : > { %v3667_v59 = vpop.f32.mrf.mxu1  ;;  %v3640_v27 = vadd.f32 %v3639_v58, %v3638_v55  ;;  %v2831_v42 = vadd.f32 %v3665_v34, %v2782_v29 }
 0x200   : > { %v3641_v60 = vpop.f32.mrf.mxu0  ;;  %v3668_v47 = vadd.f32 %v3667_v59, %v3666_v57 }
 0x201   : > { %v3669_v61 = vpop.f32.mrf.mxu1  ;;  %v2787_v40 = vadd.f32 %v3640_v27, %v2738_v30 }
 0x202   : > { %v3642_v62 = vpop.f32.mrf.mxu0 }
 0x203   : > { %v3670_v0 = vpop.f32.mrf.mxu1  ;;  %v3643_v39 = vadd.f32 %v3642_v62, %v3641_v60  ;;  %v2836_v45 = vadd.f32 %v3668_v47, %v2787_v40 }
 0x204   : > { %v3671_v54 = vadd.f32 %v3670_v0, %v3669_v61 }
 0x205   : > { %v2790_v46 = vadd.f32 %v3643_v39, %v2741_v49 }
 0x207   : > { %v2839_v9 = vadd.f32 %v3671_v54, %v2790_v46 }
 0x214   : > { %v3688_v63 = vpop.f32.mrf.mxu0 }
 0x215   : > { %v3716_v1 = vpop.f32.mrf.mxu1 }
 0x216   : > { %v3689_v2 = vpop.f32.mrf.mxu0 }
 0x217   : > { %v3717_v3 = vpop.f32.mrf.mxu1  ;;  %v3690_v25 = vadd.f32 %v3689_v2, %v3688_v63 }
 0x218   : > { %v3691_v4 = vpop.f32.mrf.mxu0  ;;  %v3718_v36 = vadd.f32 %v3717_v3, %v3716_v1 }
 0x219   : > { %v3719_v5 = vpop.f32.mrf.mxu1  ;;  %v2877_v35 = vadd.f32 %v3690_v25, %v2828_v28 }
 0x21a   : > { %v3692_v6 = vpop.f32.mrf.mxu0 }
 0x21b   : > { %v3720_v7 = vpop.f32.mrf.mxu1  ;;  %v3693_v37 = vadd.f32 %v3692_v6, %v3691_v4  ;;  %v2926_v52 = vadd.f32 %v3718_v36, %v2877_v35 }
 0x21c   : > { %v3694_v8 = vpop.f32.mrf.mxu0  ;;  %v3721_v56 = vadd.f32 %v3720_v7, %v3719_v5 }
 0x21d   : > { %v3722_v11 = vpop.f32.mrf.mxu1  ;;  %v2880_v53 = vadd.f32 %v3693_v37, %v2831_v42 }
 0x21e   : > { %v3695_v13 = vpop.f32.mrf.mxu0 }
 0x21f   : > { %v3723_v17 = vpop.f32.mrf.mxu1  ;;  %v3696_v50 = vadd.f32 %v3695_v13, %v3694_v8  ;;  %v2929_v62 = vadd.f32 %v3721_v56, %v2880_v53 }
 0x220   : > { %v3697_v23 = vpop.f32.mrf.mxu0  ;;  %v3724_v59 = vadd.f32 %v3723_v17, %v3722_v11 }
 0x221   : > { %v3725_v26 = vpop.f32.mrf.mxu1  ;;  %v2885_v57 = vadd.f32 %v3696_v50, %v2836_v45 }
 0x222   : > { %v3698_v33 = vpop.f32.mrf.mxu0 }
 0x223   : > { %v3726_v38 = vpop.f32.mrf.mxu1  ;;  %v3699_v2 = vadd.f32 %v3698_v33, %v3697_v23  ;;  %v2934_v14 = vadd.f32 %v3724_v59, %v2885_v57 }
 0x224   : > { %v3727_v0 = vadd.f32 %v3726_v38, %v3725_v26 }
 0x225   : > { %v2888_v61 = vadd.f32 %v3699_v2, %v2839_v9 }
 0x227   : > { %v2937_v21 = vadd.f32 %v3727_v0, %v2888_v61 }
 0x234   : > { %v3744_v41 = vpop.f32.mrf.mxu0 }
 0x235   : > { %v3772_v44 = vpop.f32.mrf.mxu1 }
 0x236   : > { %v3745_v51 = vpop.f32.mrf.mxu0 }
 0x237   : > { %v3746_v55 = vadd.f32 %v3745_v51, %v3744_v41  ;;  %v3773_v43 = vpop.f32.mrf.mxu1 }
 0x238   : > { %v3747_v48 = vpop.f32.mrf.mxu0  ;;  %v3774_v63 = vadd.f32 %v3773_v43, %v3772_v44 }
 0x239   : > { %v2975_v58 = vadd.f32 %v3746_v55, %v2926_v52  ;;  %v3775_v1 = vpop.f32.mrf.mxu1 }
 0x23a   : > { %v3748_v60 = vpop.f32.mrf.mxu0 }
 0x23b   : > { %v3024_v3 = vadd.f32 %v3774_v63, %v2975_v58  ;;  %v3749_v4 = vadd.f32 %v3748_v60, %v3747_v48  ;;  %v3776_v6 = vpop.f32.mrf.mxu1 }
 0x23c   : > { %v3750_v8 = vpop.f32.mrf.mxu0  ;;  %v3777_v12 = vadd.f32 %v3776_v6, %v3775_v1 }
 0x23d   : > { %v2978_v10 = vadd.f32 %v3749_v4, %v2929_v62  ;;  %v3778_v13 = vpop.f32.mrf.mxu1 }
 0x23e   : > { %v3751_v15 = vpop.f32.mrf.mxu0 }
 0x23f   : > { %v3027_v5 = vadd.f32 %v3777_v12, %v2978_v10  ;;  %v3752_v7 = vadd.f32 %v3751_v15, %v3750_v8  ;;  %v3779_v16 = vpop.f32.mrf.mxu1 }
 0x240   : > { %v3753_v11 = vpop.f32.mrf.mxu0  ;;  %v3780_v18 = vadd.f32 %v3779_v16, %v3778_v13 }
 0x241   : > { %v2983_v17 = vadd.f32 %v3752_v7, %v2934_v14  ;;  %v3781_v19 = vpop.f32.mrf.mxu1 }
 0x242   : > { %v3754_v20 = vpop.f32.mrf.mxu0 }
 0x243   : > { %v3032_v22 = vadd.f32 %v3780_v18, %v2983_v17  ;;  %v3755_v23 = vadd.f32 %v3754_v20, %v3753_v11  ;;  %v3782_v24 = vpop.f32.mrf.mxu1  ;;  %3041 = sbr.rel (%p3532_p4) target bundleno = 586 (0x24a), region = 96 }
 0x244   : > { %v3783_v27 = vadd.f32 %v3782_v24, %v3781_v19 }
 0x245   : > { %v2986_v25 = vadd.f32 %v3755_v23, %v2937_v21 }
 0x247   : > { %v3035_v28 = vadd.f32 %v3783_v27, %v2986_v25 }
 0x248   : > { %3042 = vst [vmem:[#allocation2 + $0x10] sm:$0xff] %v3024_v3  ;;  %3043 = vst [vmem:[#allocation2] sm:$0xff] %v3027_v5 }
 0x249   : > { %3044 = vst [vmem:[#allocation2 + $0x18] sm:$0xff] %v3032_v22  ;;  %3045 = vst [vmem:[#allocation2 + $0x8] sm:$0xff] %v3035_v28 }
 0x24a PF: > { %p3533_p5 = scmp.le.s32.totalorder %s4070_s21, 0 }
 0x24c   : > { %3049 = sbr.rel (%p3533_p5) target bundleno = 598 (0x256), region = 100 }
 0x251   : > { %v3050_v26 = vld [vmem:[#allocation2 + $0x10] sm:$0xff]  ;;  %v3051_v29 = vld [vmem:[#allocation2] sm:$0xff]  ;;  %v3052_v30 = vld [vmem:[#allocation2 + $0x18] sm:$0xff] }
 0x252   : > { %v3054_v31 = vadd.f32 %v3050_v26, %v3024_v3  ;;  %v3055_v32 = vadd.f32 %v3051_v29, %v3027_v5  ;;  %v3056_v33 = vadd.f32 %v3052_v30, %v3032_v22  ;;  %v3053_v34 = vld [vmem:[#allocation2 + $0x8] sm:$0xff] }
 0x253   : > { %v3057_v35 = vadd.f32 %v3053_v34, %v3035_v28 }
 0x254   : > { %3058 = vst [vmem:[#allocation2 + $0x10] sm:$0xff] %v3054_v31  ;;  %3059 = vst [vmem:[#allocation2] sm:$0xff] %v3055_v32 }
 0x255   : > { %3060 = vst [vmem:[#allocation2 + $0x18] sm:$0xff] %v3056_v33  ;;  %3061 = vst [vmem:[#allocation2 + $0x8] sm:$0xff] %v3057_v35 }
 0x256 PF: > { %p3534_p6 = scmp.ne.s32.totalorder %s4070_s21, 1 }
 0x258   : > { %3065 = sbr.rel (%p3534_p6) target bundleno = 627 (0x273), region = 104 }
 0x25d   : > { %v3066_v36 = vld [vmem:[#allocation2 + $0x10] sm:$0xff]  ;;  %v3067_v37 = vld [vmem:[#allocation2] sm:$0xff]  ;;  %v3068_v38 = vld [vmem:[#allocation2 + $0x18] sm:$0xff] }
 0x25e   : > { %v3069_v40 = vld [vmem:[#allocation2 + $0x8] sm:$0xff]  ;;  %v3070_v47 = vadd.f32 %v3067_v37, %v3066_v36  ;;  %v3080_v39 = vmul.f32 %v3066_v36, %v3066_v36  ;;  %v3081_v41 = vmul.f32 %v3067_v37, %v3067_v37  ;;  %v3082_v42 = vmul.f32 %v3068_v38, %v3068_v38 }
 0x25f   : > { %v3552_v44 = vpack.c.bf16 %v3067_v37, %v3066_v36  ;;  %v3557_v49 = vpack.c.bf16 %v3069_v40, %v3068_v38  ;;  %v3083_v51 = vmul.f32 %v3069_v40, %v3069_v40 }
 0x260   : > { %v3071_v50 = vadd.f32 %v3070_v47, %v3068_v38  ;;  %v3084_v52 = vadd.f32 %v3081_v41, %v3080_v39 }
 0x261   : > { %3553 = vst [vmem:[%s4995_s11] sm:$0xff] %v3552_v44   ;;  %3559 = vst [vmem:[%s4995_s11 + $0x8] sm:$0xff] %v3557_v49  }
 0x262   : > { %v3072_v53 = vadd.f32 %v3071_v50, %v3069_v40  ;;  %v3085_v55 = vadd.f32 %v3084_v52, %v3082_v42 }
 0x264   : > { %v3073_v43 = vrot.slane %v3072_v53, 4  ;;  %v3086_v45 = vadd.f32 %v3085_v55, %v3083_v51 }
 0x266   : > { %v3074_v46 = vadd.f32 %v3073_v43, %v3072_v53  ;;  %v3087_v48 = vrot.slane %v3086_v45, 4 }
 0x268   : > { %v3075_v54 = vrot.slane %v3074_v46, 2  ;;  %v3088_v56 = vadd.f32 %v3087_v48, %v3086_v45 }
 0x26a   : > { %v3076_v58 = vadd.f32 %v3075_v54, %v3074_v46  ;;  %v3089_v63 = vrot.slane %v3088_v56, 2 }
 0x26c   : > { %v3077_v1 = vrot.slane %v3076_v58, 1  ;;  %v3090_v57 = vadd.f32 %v3089_v63, %v3088_v56 }
 0x26e   : > { %v3078_v59 = vadd.f32 %v3077_v1, %v3076_v58  ;;  %v3091_v60 = vrot.slane %v3090_v57, 1 }
 0x270   : > { %3079 = vst [vmem:[%s1421_s30] sm:$0x1] %v3078_v59  ;;  %v3092_v62 = vadd.f32 %v3091_v60, %v3090_v57 }
 0x272   : > { %3093 = vst [vmem:[%s1428_s9] sm:$0x1] %v3092_v62 }
 0x273 PF: > { %3134 = sbr.rel (!%p4207_p12) target bundleno = 632 (0x278), region = 108  ;;  %s3540_s15 = sshll.u32 (%p4207_p12), %s4074_s22, 2  ;;  %v3156_v2 = vld [vmem:[%s4995_s11] sm:$0xf] (%p4207_p12)  ;;  %v3158_v3 = vld [vmem:[%s4995_s11 + $0x4] sm:$0xf] (%p4207_p12) }
 0x274   : > { %s3139_s8 = scalar_lea.vmem (%p4207_p12), %s5057_s2, %s3540_s15  ;;  %v3160_v4 = vld [vmem:[%s4995_s11 + $0x8] sm:$0xf] (%p4207_p12)  ;;  %v3162_v6 = vld [vmem:[%s4995_s11 + $0xc] sm:$0xf] (%p4207_p12) }
 0x275   : > { %3157 = vst [vmem:[%s3139_s8] sm:$0xf] (%p4207_p12), %v3156_v2  ;;  %3159 = vst [vmem:[%s3139_s8 + $0x10] sm:$0xf] (%p4207_p12), %v3158_v3 }
 0x276   : > { %3161 = vst [vmem:[%s3139_s8 + $0x20] sm:$0xf] (%p4207_p12), %v3160_v4  ;;  %3163 = vst [vmem:[%s3139_s8 + $0x30] sm:$0xf] (%p4207_p12), %v3162_v6 }
 0x278 PF: > { %s15_s25 = sadd.s32 1, %s4086_s25   ;;  %s5067_s14 = sld [smem:[#allocation6_spill]] }
 0x279   : > { %p12_p7 = scmp.ge.s32.totalorder %s15_s25, 10   ;;  %s5068_s15 = smov %s4050_s16 }
 0x27a   : > { %s5069_s16 = smov %s4205_s13  ;;  %s5070_s17 = smov %s4058_s18 }
 0x27b   : > { %s5071_s18 = smov %s4202_s12  ;;  %s5072_s19 = smov %s4066_s20 }
 0x27c   : > { %s5073_s20 = smov %s4188_s7  ;;  %s5074_s21 = smov %s4078_s23 }
 0x27d   : > { %s5075_s22 = smov %s4082_s24  ;;  %s5076_s23 = smov %s5079_s27 }
 0x27e   : > { %s5077_s24 = smov %s5067_s14  ;;  %14 = sbr.rel (!%p12_p7) target bundleno = 8 (0x8), region = 212 }

// kernel: classifier_content_forward.10
= control target key start
LH: loop header
LB: loop body
LE: loop exit
PB: predicated region body
PF: predicated region fallthrough
CT: control target
= control target key end

     0   :  { %s3621_s15 = smov 0   ;;  %s3623_s16 = smov 0   ;;  %s4397_s0 = inlined_call_operand.vmem [shape: bf16[8,8192], index: 0, kind: input, shape index: {}]   ;;  %s4398_s1 = inlined_call_operand.vmem [shape: bf16[8192,512], index: 1, kind: input, shape index: {}]   ;;  %s4399_s2 = inlined_call_operand.vmem [shape: bf16[8,512], index: 2, kind: output, shape index: {0}]   ;;  %s4400_s3 = inlined_call_operand.vmem [shape: f32[1,1,512], index: 3, kind: output, shape index: {1}]   ;;  %s4401_s4 = inlined_call_operand.vmem [shape: f32[1,1,512], index: 4, kind: output, shape index: {2}]  }
   0x1   :  { %s3625_s17 = smov 0   ;;  %s3627_s18 = smov 0  }
   0x2   :  { %s3629_s19 = smov 0   ;;  %s3631_s20 = smov 0  }
   0x3   :  { %s3633_s21 = smov 0  }
   0x4 LB: > { %s27_s22 = sadd.s32 1, %s3586_s19  ;;  %s30_s23 = sadd.s32 1, %s3590_s20  ;;  %s3594_s21 = sphi %s3633_s21, %s15_s21   ;;  %s3590_s20 = sphi %s3631_s20, %s4407_s20   ;;  %s3586_s19 = sphi %s3629_s19, %s4406_s19   ;;  %s3582_s18 = sphi %s3627_s18, %s4405_s18   ;;  %s3578_s17 = sphi %s3625_s17, %s4404_s17   ;;  %s3574_s16 = sphi %s3623_s16, %s4403_s16   ;;  %s3570_s15 = sphi %s3621_s15, %s4402_s15  }
   0x5   : > { %p28_p0 = scmp.ge.s32.totalorder %s27_s22, 4  ;;  %p78_p1 = scmp.ne.s32.totalorder %s3574_s16, %s3570_s15 }
   0x6   : > { %p79_p2 = scmp.eq.s32.totalorder %s3594_s21, 0  ;;  %s71_s27 = sadd.s32 1, %s3574_s16 }
   0x7   : > { %s4409_s22 = smov (%p28_p0, %s27_s22), 0  ;;  %s4411_s23 = smov (!%p28_p0, %s30_s23), %s3590_s20 }
   0x8   : > { %p80_p3 = por %p79_p2, %p78_p1  ;;  %p32_p4 = scmp.ge.s32.totalorder %s4411_s23, 4 }
   0x9   : > { %s66_s24 = ssub.s32 %s3586_s19, %s4409_s22  ;;  %p3004_p6 = scmp.ge.s32.totalorder %s3594_s21, 16 }
   0xa   : > { %s4413_s23 = smov (%p32_p4, %s4411_s23), 0 }
   0xb   : > { %s67_s25 = ssub.s32 %s3590_s20, %s4413_s23  ;;  %188 = sbr.rel (%p3004_p6) target bundleno = 193 (0xc1), region = 16 }
   0xc   : > { %s68_s26 = sor.u32 %s67_s25, %s66_s24 }
   0xd   : > { %p69_p5 = scmp.eq.s32.totalorder %s68_s26, 0 }
   0xf   : > { %s3672_s28 = scalar_select %p69_p5, %s3574_s16, %s71_s27  }
  0x10   : > { %204 = sbr.rel (!%p80_p3) target bundleno = 193 (0xc1), region = 24  ;;  %s206_s29 = sand.u32 (%p80_p3), 1, %s3574_s16  }
  0x11   : > { %s3163_s30 = sshll.u32 (%p80_p3), %s3586_s19, 10  ;;  %s3005_s5 = sshll.u32 (%p80_p3), %s206_s29, 10 }
  0x12   : > { %s211_s6 = sadd.s32 (%p80_p3), %s3590_s20, %s3163_s30  ;;  %s3686_s11 = scalar_lea.vmem (%p80_p3), [#allocation3], %s3005_s5 }
  0x13   : > { %s3008_s7 = sshll.u32 (%p80_p3), %s211_s6, 2 }
  0x14   : > { %s3681_s10 = scalar_lea.vmem (%p80_p3), %s4398_s1, %s3008_s7 }
  0x15   : > { %v230_v0 = vld [vmem:[%s3681_s10] sm:$0xf]  ;;  %v232_v1 = vld [vmem:[%s3681_s10 + $0x10] sm:$0xf] }
  0x16   : > { %v234_v2 = vld [vmem:[%s3681_s10 + $0x20] sm:$0xf]  ;;  %231 = vst [vmem:[%s3686_s11] sm:$0xf] %v230_v0  ;;  %233 = vst [vmem:[%s3686_s11 + $0x4] sm:$0xf] %v232_v1 }
  0x17   : > { %235 = vst [vmem:[%s3686_s11 + $0x8] sm:$0xf] %v234_v2  ;;  %v236_v3 = vld [vmem:[%s3681_s10 + $0x30] sm:$0xf]  ;;  %v238_v4 = vld [vmem:[%s3681_s10 + $0x40] sm:$0xf] }
  0x18   : > { %v240_v5 = vld [vmem:[%s3681_s10 + $0x50] sm:$0xf]  ;;  %237 = vst [vmem:[%s3686_s11 + $0xc] sm:$0xf] %v236_v3  ;;  %239 = vst [vmem:[%s3686_s11 + $0x10] sm:$0xf] %v238_v4 }
  0x19   : > { %241 = vst [vmem:[%s3686_s11 + $0x14] sm:$0xf] %v240_v5  ;;  %v242_v6 = vld [vmem:[%s3681_s10 + $0x60] sm:$0xf]  ;;  %v244_v7 = vld [vmem:[%s3681_s10 + $0x70] sm:$0xf] }
  0x1a   : > { %v246_v8 = vld [vmem:[%s3681_s10 + $0x80] sm:$0xf]  ;;  %243 = vst [vmem:[%s3686_s11 + $0x18] sm:$0xf] %v242_v6  ;;  %245 = vst [vmem:[%s3686_s11 + $0x1c] sm:$0xf] %v244_v7 }
  0x1b   : > { %247 = vst [vmem:[%s3686_s11 + $0x20] sm:$0xf] %v246_v8  ;;  %v248_v9 = vld [vmem:[%s3681_s10 + $0x90] sm:$0xf]  ;;  %v250_v10 = vld [vmem:[%s3681_s10 + $0xa0] sm:$0xf] }
  0x1c   : > { %v252_v11 = vld [vmem:[%s3681_s10 + $0xb0] sm:$0xf]  ;;  %249 = vst [vmem:[%s3686_s11 + $0x24] sm:$0xf] %v248_v9  ;;  %251 = vst [vmem:[%s3686_s11 + $0x28] sm:$0xf] %v250_v10 }
  0x1d   : > { %253 = vst [vmem:[%s3686_s11 + $0x2c] sm:$0xf] %v252_v11  ;;  %v254_v12 = vld [vmem:[%s3681_s10 + $0xc0] sm:$0xf]  ;;  %v256_v13 = vld [vmem:[%s3681_s10 + $0xd0] sm:$0xf] }
  0x1e   : > { %v258_v14 = vld [vmem:[%s3681_s10 + $0xe0] sm:$0xf]  ;;  %255 = vst [vmem:[%s3686_s11 + $0x30] sm:$0xf] %v254_v12  ;;  %257 = vst [vmem:[%s3686_s11 + $0x34] sm:$0xf] %v256_v13 }
  0x1f   : > { %259 = vst [vmem:[%s3686_s11 + $0x38] sm:$0xf] %v258_v14  ;;  %v260_v15 = vld [vmem:[%s3681_s10 + $0xf0] sm:$0xf]  ;;  %v262_v16 = vld [vmem:[%s3681_s10 + $0x100] sm:$0xf] }
  0x20   : > { %v264_v17 = vld [vmem:[%s3681_s10 + $0x110] sm:$0xf]  ;;  %261 = vst [vmem:[%s3686_s11 + $0x3c] sm:$0xf] %v260_v15  ;;  %263 = vst [vmem:[%s3686_s11 + $0x40] sm:$0xf] %v262_v16 }
  0x21   : > { %265 = vst [vmem:[%s3686_s11 + $0x44] sm:$0xf] %v264_v17  ;;  %v266_v18 = vld [vmem:[%s3681_s10 + $0x120] sm:$0xf]  ;;  %v268_v19 = vld [vmem:[%s3681_s10 + $0x130] sm:$0xf] }
  0x22   : > { %v270_v20 = vld [vmem:[%s3681_s10 + $0x140] sm:$0xf]  ;;  %267 = vst [vmem:[%s3686_s11 + $0x48] sm:$0xf] %v266_v18  ;;  %269 = vst [vmem:[%s3686_s11 + $0x4c] sm:$0xf] %v268_v19 }
  0x23   : > { %271 = vst [vmem:[%s3686_s11 + $0x50] sm:$0xf] %v270_v20  ;;  %v272_v21 = vld [vmem:[%s3681_s10 + $0x150] sm:$0xf]  ;;  %v274_v22 = vld [vmem:[%s3681_s10 + $0x160] sm:$0xf] }
  0x24   : > { %v276_v23 = vld [vmem:[%s3681_s10 + $0x170] sm:$0xf]  ;;  %273 = vst [vmem:[%s3686_s11 + $0x54] sm:$0xf] %v272_v21  ;;  %275 = vst [vmem:[%s3686_s11 + $0x58] sm:$0xf] %v274_v22 }
  0x25   : > { %277 = vst [vmem:[%s3686_s11 + $0x5c] sm:$0xf] %v276_v23  ;;  %v278_v24 = vld [vmem:[%s3681_s10 + $0x180] sm:$0xf]  ;;  %v280_v25 = vld [vmem:[%s3681_s10 + $0x190] sm:$0xf] }
  0x26   : > { %v282_v26 = vld [vmem:[%s3681_s10 + $0x1a0] sm:$0xf]  ;;  %279 = vst [vmem:[%s3686_s11 + $0x60] sm:$0xf] %v278_v24  ;;  %281 = vst [vmem:[%s3686_s11 + $0x64] sm:$0xf] %v280_v25 }
  0x27   : > { %283 = vst [vmem:[%s3686_s11 + $0x68] sm:$0xf] %v282_v26  ;;  %v284_v27 = vld [vmem:[%s3681_s10 + $0x1b0] sm:$0xf]  ;;  %v286_v28 = vld [vmem:[%s3681_s10 + $0x1c0] sm:$0xf] }
  0x28   : > { %v288_v29 = vld [vmem:[%s3681_s10 + $0x1d0] sm:$0xf]  ;;  %285 = vst [vmem:[%s3686_s11 + $0x6c] sm:$0xf] %v284_v27  ;;  %287 = vst [vmem:[%s3686_s11 + $0x70] sm:$0xf] %v286_v28 }
  0x29   : > { %289 = vst [vmem:[%s3686_s11 + $0x74] sm:$0xf] %v288_v29  ;;  %v290_v30 = vld [vmem:[%s3681_s10 + $0x1e0] sm:$0xf]  ;;  %v292_v31 = vld [vmem:[%s3681_s10 + $0x1f0] sm:$0xf] }
  0x2a   : > { %v294_v32 = vld [vmem:[%s3681_s10 + $0x200] sm:$0xf]  ;;  %291 = vst [vmem:[%s3686_s11 + $0x78] sm:$0xf] %v290_v30  ;;  %293 = vst [vmem:[%s3686_s11 + $0x7c] sm:$0xf] %v292_v31 }
  0x2b   : > { %295 = vst [vmem:[%s3686_s11 + $0x80] sm:$0xf] %v294_v32  ;;  %v296_v33 = vld [vmem:[%s3681_s10 + $0x210] sm:$0xf]  ;;  %v298_v34 = vld [vmem:[%s3681_s10 + $0x220] sm:$0xf] }
  0x2c   : > { %v300_v35 = vld [vmem:[%s3681_s10 + $0x230] sm:$0xf]  ;;  %297 = vst [vmem:[%s3686_s11 + $0x84] sm:$0xf] %v296_v33  ;;  %299 = vst [vmem:[%s3686_s11 + $0x88] sm:$0xf] %v298_v34 }
  0x2d   : > { %301 = vst [vmem:[%s3686_s11 + $0x8c] sm:$0xf] %v300_v35  ;;  %v302_v36 = vld [vmem:[%s3681_s10 + $0x240] sm:$0xf]  ;;  %v304_v37 = vld [vmem:[%s3681_s10 + $0x250] sm:$0xf] }
  0x2e   : > { %v306_v38 = vld [vmem:[%s3681_s10 + $0x260] sm:$0xf]  ;;  %303 = vst [vmem:[%s3686_s11 + $0x90] sm:$0xf] %v302_v36  ;;  %305 = vst [vmem:[%s3686_s11 + $0x94] sm:$0xf] %v304_v37 }
  0x2f   : > { %307 = vst [vmem:[%s3686_s11 + $0x98] sm:$0xf] %v306_v38  ;;  %v308_v39 = vld [vmem:[%s3681_s10 + $0x270] sm:$0xf]  ;;  %v310_v40 = vld [vmem:[%s3681_s10 + $0x280] sm:$0xf] }
  0x30   : > { %v312_v41 = vld [vmem:[%s3681_s10 + $0x290] sm:$0xf]  ;;  %309 = vst [vmem:[%s3686_s11 + $0x9c] sm:$0xf] %v308_v39  ;;  %311 = vst [vmem:[%s3686_s11 + $0xa0] sm:$0xf] %v310_v40 }
  0x31   : > { %313 = vst [vmem:[%s3686_s11 + $0xa4] sm:$0xf] %v312_v41  ;;  %v314_v42 = vld [vmem:[%s3681_s10 + $0x2a0] sm:$0xf]  ;;  %v316_v43 = vld [vmem:[%s3681_s10 + $0x2b0] sm:$0xf] }
  0x32   : > { %v318_v44 = vld [vmem:[%s3681_s10 + $0x2c0] sm:$0xf]  ;;  %315 = vst [vmem:[%s3686_s11 + $0xa8] sm:$0xf] %v314_v42  ;;  %317 = vst [vmem:[%s3686_s11 + $0xac] sm:$0xf] %v316_v43 }
  0x33   : > { %319 = vst [vmem:[%s3686_s11 + $0xb0] sm:$0xf] %v318_v44  ;;  %v320_v45 = vld [vmem:[%s3681_s10 + $0x2d0] sm:$0xf]  ;;  %v322_v46 = vld [vmem:[%s3681_s10 + $0x2e0] sm:$0xf] }
  0x34   : > { %v324_v47 = vld [vmem:[%s3681_s10 + $0x2f0] sm:$0xf]  ;;  %321 = vst [vmem:[%s3686_s11 + $0xb4] sm:$0xf] %v320_v45  ;;  %323 = vst [vmem:[%s3686_s11 + $0xb8] sm:$0xf] %v322_v46 }
  0x35   : > { %325 = vst [vmem:[%s3686_s11 + $0xbc] sm:$0xf] %v324_v47  ;;  %v326_v48 = vld [vmem:[%s3681_s10 + $0x300] sm:$0xf]  ;;  %v328_v49 = vld [vmem:[%s3681_s10 + $0x310] sm:$0xf] }
  0x36   : > { %v330_v50 = vld [vmem:[%s3681_s10 + $0x320] sm:$0xf]  ;;  %327 = vst [vmem:[%s3686_s11 + $0xc0] sm:$0xf] %v326_v48  ;;  %329 = vst [vmem:[%s3686_s11 + $0xc4] sm:$0xf] %v328_v49 }
  0x37   : > { %331 = vst [vmem:[%s3686_s11 + $0xc8] sm:$0xf] %v330_v50  ;;  %v332_v51 = vld [vmem:[%s3681_s10 + $0x330] sm:$0xf]  ;;  %v334_v52 = vld [vmem:[%s3681_s10 + $0x340] sm:$0xf] }
  0x38   : > { %v336_v53 = vld [vmem:[%s3681_s10 + $0x350] sm:$0xf]  ;;  %333 = vst [vmem:[%s3686_s11 + $0xcc] sm:$0xf] %v332_v51  ;;  %335 = vst [vmem:[%s3686_s11 + $0xd0] sm:$0xf] %v334_v52 }
  0x39   : > { %337 = vst [vmem:[%s3686_s11 + $0xd4] sm:$0xf] %v336_v53  ;;  %v338_v54 = vld [vmem:[%s3681_s10 + $0x360] sm:$0xf]  ;;  %v340_v55 = vld [vmem:[%s3681_s10 + $0x370] sm:$0xf] }
  0x3a   : > { %v342_v56 = vld [vmem:[%s3681_s10 + $0x380] sm:$0xf]  ;;  %339 = vst [vmem:[%s3686_s11 + $0xd8] sm:$0xf] %v338_v54  ;;  %341 = vst [vmem:[%s3686_s11 + $0xdc] sm:$0xf] %v340_v55 }
  0x3b   : > { %343 = vst [vmem:[%s3686_s11 + $0xe0] sm:$0xf] %v342_v56  ;;  %v344_v57 = vld [vmem:[%s3681_s10 + $0x390] sm:$0xf]  ;;  %v346_v58 = vld [vmem:[%s3681_s10 + $0x3a0] sm:$0xf] }
  0x3c   : > { %v348_v59 = vld [vmem:[%s3681_s10 + $0x3b0] sm:$0xf]  ;;  %345 = vst [vmem:[%s3686_s11 + $0xe4] sm:$0xf] %v344_v57  ;;  %347 = vst [vmem:[%s3686_s11 + $0xe8] sm:$0xf] %v346_v58 }
  0x3d   : > { %349 = vst [vmem:[%s3686_s11 + $0xec] sm:$0xf] %v348_v59  ;;  %v350_v60 = vld [vmem:[%s3681_s10 + $0x3c0] sm:$0xf]  ;;  %v352_v61 = vld [vmem:[%s3681_s10 + $0x3d0] sm:$0xf] }
  0x3e   : > { %v354_v62 = vld [vmem:[%s3681_s10 + $0x3e0] sm:$0xf]  ;;  %351 = vst [vmem:[%s3686_s11 + $0xf0] sm:$0xf] %v350_v60  ;;  %353 = vst [vmem:[%s3686_s11 + $0xf4] sm:$0xf] %v352_v61 }
  0x3f   : > { %355 = vst [vmem:[%s3686_s11 + $0xf8] sm:$0xf] %v354_v62  ;;  %v356_v63 = vld [vmem:[%s3681_s10 + $0x3f0] sm:$0xf]  ;;  %v358_v0 = vld [vmem:[%s3681_s10 + $0x400] sm:$0xf] }
  0x40   : > { %v360_v1 = vld [vmem:[%s3681_s10 + $0x410] sm:$0xf]  ;;  %357 = vst [vmem:[%s3686_s11 + $0xfc] sm:$0xf] %v356_v63  ;;  %359 = vst [vmem:[%s3686_s11 + $0x100] sm:$0xf] %v358_v0 }
  0x41   : > { %361 = vst [vmem:[%s3686_s11 + $0x104] sm:$0xf] %v360_v1  ;;  %v362_v2 = vld [vmem:[%s3681_s10 + $0x420] sm:$0xf]  ;;  %v364_v3 = vld [vmem:[%s3681_s10 + $0x430] sm:$0xf] }
  0x42   : > { %v366_v4 = vld [vmem:[%s3681_s10 + $0x440] sm:$0xf]  ;;  %363 = vst [vmem:[%s3686_s11 + $0x108] sm:$0xf] %v362_v2  ;;  %365 = vst [vmem:[%s3686_s11 + $0x10c] sm:$0xf] %v364_v3 }
  0x43   : > { %367 = vst [vmem:[%s3686_s11 + $0x110] sm:$0xf] %v366_v4  ;;  %v368_v5 = vld [vmem:[%s3681_s10 + $0x450] sm:$0xf]  ;;  %v370_v6 = vld [vmem:[%s3681_s10 + $0x460] sm:$0xf] }
  0x44   : > { %v372_v7 = vld [vmem:[%s3681_s10 + $0x470] sm:$0xf]  ;;  %369 = vst [vmem:[%s3686_s11 + $0x114] sm:$0xf] %v368_v5  ;;  %371 = vst [vmem:[%s3686_s11 + $0x118] sm:$0xf] %v370_v6 }
  0x45   : > { %373 = vst [vmem:[%s3686_s11 + $0x11c] sm:$0xf] %v372_v7  ;;  %v374_v8 = vld [vmem:[%s3681_s10 + $0x480] sm:$0xf]  ;;  %v376_v9 = vld [vmem:[%s3681_s10 + $0x490] sm:$0xf] }
  0x46   : > { %v378_v10 = vld [vmem:[%s3681_s10 + $0x4a0] sm:$0xf]  ;;  %375 = vst [vmem:[%s3686_s11 + $0x120] sm:$0xf] %v374_v8  ;;  %377 = vst [vmem:[%s3686_s11 + $0x124] sm:$0xf] %v376_v9 }
  0x47   : > { %379 = vst [vmem:[%s3686_s11 + $0x128] sm:$0xf] %v378_v10  ;;  %v380_v11 = vld [vmem:[%s3681_s10 + $0x4b0] sm:$0xf]  ;;  %v382_v12 = vld [vmem:[%s3681_s10 + $0x4c0] sm:$0xf] }
  0x48   : > { %v384_v13 = vld [vmem:[%s3681_s10 + $0x4d0] sm:$0xf]  ;;  %381 = vst [vmem:[%s3686_s11 + $0x12c] sm:$0xf] %v380_v11  ;;  %383 = vst [vmem:[%s3686_s11 + $0x130] sm:$0xf] %v382_v12 }
  0x49   : > { %385 = vst [vmem:[%s3686_s11 + $0x134] sm:$0xf] %v384_v13  ;;  %v386_v14 = vld [vmem:[%s3681_s10 + $0x4e0] sm:$0xf]  ;;  %v388_v15 = vld [vmem:[%s3681_s10 + $0x4f0] sm:$0xf] }
  0x4a   : > { %v390_v16 = vld [vmem:[%s3681_s10 + $0x500] sm:$0xf]  ;;  %387 = vst [vmem:[%s3686_s11 + $0x138] sm:$0xf] %v386_v14  ;;  %389 = vst [vmem:[%s3686_s11 + $0x13c] sm:$0xf] %v388_v15 }
  0x4b   : > { %391 = vst [vmem:[%s3686_s11 + $0x140] sm:$0xf] %v390_v16  ;;  %v392_v17 = vld [vmem:[%s3681_s10 + $0x510] sm:$0xf]  ;;  %v394_v18 = vld [vmem:[%s3681_s10 + $0x520] sm:$0xf] }
  0x4c   : > { %v396_v19 = vld [vmem:[%s3681_s10 + $0x530] sm:$0xf]  ;;  %393 = vst [vmem:[%s3686_s11 + $0x144] sm:$0xf] %v392_v17  ;;  %395 = vst [vmem:[%s3686_s11 + $0x148] sm:$0xf] %v394_v18 }
  0x4d   : > { %397 = vst [vmem:[%s3686_s11 + $0x14c] sm:$0xf] %v396_v19  ;;  %v398_v20 = vld [vmem:[%s3681_s10 + $0x540] sm:$0xf]  ;;  %v400_v21 = vld [vmem:[%s3681_s10 + $0x550] sm:$0xf] }
  0x4e   : > { %v402_v22 = vld [vmem:[%s3681_s10 + $0x560] sm:$0xf]  ;;  %399 = vst [vmem:[%s3686_s11 + $0x150] sm:$0xf] %v398_v20  ;;  %401 = vst [vmem:[%s3686_s11 + $0x154] sm:$0xf] %v400_v21 }
  0x4f   : > { %403 = vst [vmem:[%s3686_s11 + $0x158] sm:$0xf] %v402_v22  ;;  %v404_v23 = vld [vmem:[%s3681_s10 + $0x570] sm:$0xf]  ;;  %v406_v24 = vld [vmem:[%s3681_s10 + $0x580] sm:$0xf] }
  0x50   : > { %v408_v25 = vld [vmem:[%s3681_s10 + $0x590] sm:$0xf]  ;;  %405 = vst [vmem:[%s3686_s11 + $0x15c] sm:$0xf] %v404_v23  ;;  %407 = vst [vmem:[%s3686_s11 + $0x160] sm:$0xf] %v406_v24 }
  0x51   : > { %409 = vst [vmem:[%s3686_s11 + $0x164] sm:$0xf] %v408_v25  ;;  %v410_v26 = vld [vmem:[%s3681_s10 + $0x5a0] sm:$0xf]  ;;  %v412_v27 = vld [vmem:[%s3681_s10 + $0x5b0] sm:$0xf] }
  0x52   : > { %v414_v28 = vld [vmem:[%s3681_s10 + $0x5c0] sm:$0xf]  ;;  %411 = vst [vmem:[%s3686_s11 + $0x168] sm:$0xf] %v410_v26  ;;  %413 = vst [vmem:[%s3686_s11 + $0x16c] sm:$0xf] %v412_v27 }
  0x53   : > { %415 = vst [vmem:[%s3686_s11 + $0x170] sm:$0xf] %v414_v28  ;;  %v416_v29 = vld [vmem:[%s3681_s10 + $0x5d0] sm:$0xf]  ;;  %v418_v30 = vld [vmem:[%s3681_s10 + $0x5e0] sm:$0xf] }
  0x54   : > { %v420_v31 = vld [vmem:[%s3681_s10 + $0x5f0] sm:$0xf]  ;;  %417 = vst [vmem:[%s3686_s11 + $0x174] sm:$0xf] %v416_v29  ;;  %419 = vst [vmem:[%s3686_s11 + $0x178] sm:$0xf] %v418_v30 }
  0x55   : > { %421 = vst [vmem:[%s3686_s11 + $0x17c] sm:$0xf] %v420_v31  ;;  %v422_v32 = vld [vmem:[%s3681_s10 + $0x600] sm:$0xf]  ;;  %v424_v33 = vld [vmem:[%s3681_s10 + $0x610] sm:$0xf] }
  0x56   : > { %v426_v34 = vld [vmem:[%s3681_s10 + $0x620] sm:$0xf]  ;;  %423 = vst [vmem:[%s3686_s11 + $0x180] sm:$0xf] %v422_v32  ;;  %425 = vst [vmem:[%s3686_s11 + $0x184] sm:$0xf] %v424_v33 }
  0x57   : > { %427 = vst [vmem:[%s3686_s11 + $0x188] sm:$0xf] %v426_v34  ;;  %v428_v35 = vld [vmem:[%s3681_s10 + $0x630] sm:$0xf]  ;;  %v430_v36 = vld [vmem:[%s3681_s10 + $0x640] sm:$0xf] }
  0x58   : > { %v432_v37 = vld [vmem:[%s3681_s10 + $0x650] sm:$0xf]  ;;  %429 = vst [vmem:[%s3686_s11 + $0x18c] sm:$0xf] %v428_v35  ;;  %431 = vst [vmem:[%s3686_s11 + $0x190] sm:$0xf] %v430_v36 }
  0x59   : > { %433 = vst [vmem:[%s3686_s11 + $0x194] sm:$0xf] %v432_v37  ;;  %v434_v38 = vld [vmem:[%s3681_s10 + $0x660] sm:$0xf]  ;;  %v436_v39 = vld [vmem:[%s3681_s10 + $0x670] sm:$0xf] }
  0x5a   : > { %v438_v40 = vld [vmem:[%s3681_s10 + $0x680] sm:$0xf]  ;;  %435 = vst [vmem:[%s3686_s11 + $0x198] sm:$0xf] %v434_v38  ;;  %437 = vst [vmem:[%s3686_s11 + $0x19c] sm:$0xf] %v436_v39 }
  0x5b   : > { %439 = vst [vmem:[%s3686_s11 + $0x1a0] sm:$0xf] %v438_v40  ;;  %v440_v41 = vld [vmem:[%s3681_s10 + $0x690] sm:$0xf]  ;;  %v442_v42 = vld [vmem:[%s3681_s10 + $0x6a0] sm:$0xf] }
  0x5c   : > { %v444_v43 = vld [vmem:[%s3681_s10 + $0x6b0] sm:$0xf]  ;;  %441 = vst [vmem:[%s3686_s11 + $0x1a4] sm:$0xf] %v440_v41  ;;  %443 = vst [vmem:[%s3686_s11 + $0x1a8] sm:$0xf] %v442_v42 }
  0x5d   : > { %445 = vst [vmem:[%s3686_s11 + $0x1ac] sm:$0xf] %v444_v43  ;;  %v446_v44 = vld [vmem:[%s3681_s10 + $0x6c0] sm:$0xf]  ;;  %v448_v45 = vld [vmem:[%s3681_s10 + $0x6d0] sm:$0xf] }
  0x5e   : > { %v450_v46 = vld [vmem:[%s3681_s10 + $0x6e0] sm:$0xf]  ;;  %447 = vst [vmem:[%s3686_s11 + $0x1b0] sm:$0xf] %v446_v44  ;;  %449 = vst [vmem:[%s3686_s11 + $0x1b4] sm:$0xf] %v448_v45 }
  0x5f   : > { %451 = vst [vmem:[%s3686_s11 + $0x1b8] sm:$0xf] %v450_v46  ;;  %v452_v47 = vld [vmem:[%s3681_s10 + $0x6f0] sm:$0xf]  ;;  %v454_v48 = vld [vmem:[%s3681_s10 + $0x700] sm:$0xf] }
  0x60   : > { %v456_v49 = vld [vmem:[%s3681_s10 + $0x710] sm:$0xf]  ;;  %453 = vst [vmem:[%s3686_s11 + $0x1bc] sm:$0xf] %v452_v47  ;;  %455 = vst [vmem:[%s3686_s11 + $0x1c0] sm:$0xf] %v454_v48 }
  0x61   : > { %457 = vst [vmem:[%s3686_s11 + $0x1c4] sm:$0xf] %v456_v49  ;;  %v458_v50 = vld [vmem:[%s3681_s10 + $0x720] sm:$0xf]  ;;  %v460_v51 = vld [vmem:[%s3681_s10 + $0x730] sm:$0xf] }
  0x62   : > { %v462_v52 = vld [vmem:[%s3681_s10 + $0x740] sm:$0xf]  ;;  %459 = vst [vmem:[%s3686_s11 + $0x1c8] sm:$0xf] %v458_v50  ;;  %461 = vst [vmem:[%s3686_s11 + $0x1cc] sm:$0xf] %v460_v51 }
  0x63   : > { %463 = vst [vmem:[%s3686_s11 + $0x1d0] sm:$0xf] %v462_v52  ;;  %v464_v53 = vld [vmem:[%s3681_s10 + $0x750] sm:$0xf]  ;;  %v466_v54 = vld [vmem:[%s3681_s10 + $0x760] sm:$0xf] }
  0x64   : > { %v468_v55 = vld [vmem:[%s3681_s10 + $0x770] sm:$0xf]  ;;  %465 = vst [vmem:[%s3686_s11 + $0x1d4] sm:$0xf] %v464_v53  ;;  %467 = vst [vmem:[%s3686_s11 + $0x1d8] sm:$0xf] %v466_v54 }
  0x65   : > { %469 = vst [vmem:[%s3686_s11 + $0x1dc] sm:$0xf] %v468_v55  ;;  %v470_v56 = vld [vmem:[%s3681_s10 + $0x780] sm:$0xf]  ;;  %v472_v57 = vld [vmem:[%s3681_s10 + $0x790] sm:$0xf] }
  0x66   : > { %v474_v58 = vld [vmem:[%s3681_s10 + $0x7a0] sm:$0xf]  ;;  %471 = vst [vmem:[%s3686_s11 + $0x1e0] sm:$0xf] %v470_v56  ;;  %473 = vst [vmem:[%s3686_s11 + $0x1e4] sm:$0xf] %v472_v57 }
  0x67   : > { %475 = vst [vmem:[%s3686_s11 + $0x1e8] sm:$0xf] %v474_v58  ;;  %v476_v59 = vld [vmem:[%s3681_s10 + $0x7b0] sm:$0xf]  ;;  %v478_v60 = vld [vmem:[%s3681_s10 + $0x7c0] sm:$0xf] }
  0x68   : > { %v480_v61 = vld [vmem:[%s3681_s10 + $0x7d0] sm:$0xf]  ;;  %477 = vst [vmem:[%s3686_s11 + $0x1ec] sm:$0xf] %v476_v59  ;;  %479 = vst [vmem:[%s3686_s11 + $0x1f0] sm:$0xf] %v478_v60 }
  0x69   : > { %481 = vst [vmem:[%s3686_s11 + $0x1f4] sm:$0xf] %v480_v61  ;;  %v482_v62 = vld [vmem:[%s3681_s10 + $0x7e0] sm:$0xf]  ;;  %v484_v63 = vld [vmem:[%s3681_s10 + $0x7f0] sm:$0xf] }
  0x6a   : > { %v486_v0 = vld [vmem:[%s3681_s10 + $0x800] sm:$0xf]  ;;  %483 = vst [vmem:[%s3686_s11 + $0x1f8] sm:$0xf] %v482_v62  ;;  %485 = vst [vmem:[%s3686_s11 + $0x1fc] sm:$0xf] %v484_v63 }
  0x6b   : > { %487 = vst [vmem:[%s3686_s11 + $0x200] sm:$0xf] %v486_v0  ;;  %v488_v1 = vld [vmem:[%s3681_s10 + $0x810] sm:$0xf]  ;;  %v490_v2 = vld [vmem:[%s3681_s10 + $0x820] sm:$0xf] }
  0x6c   : > { %v492_v3 = vld [vmem:[%s3681_s10 + $0x830] sm:$0xf]  ;;  %489 = vst [vmem:[%s3686_s11 + $0x204] sm:$0xf] %v488_v1  ;;  %491 = vst [vmem:[%s3686_s11 + $0x208] sm:$0xf] %v490_v2 }
  0x6d   : > { %493 = vst [vmem:[%s3686_s11 + $0x20c] sm:$0xf] %v492_v3  ;;  %v494_v4 = vld [vmem:[%s3681_s10 + $0x840] sm:$0xf]  ;;  %v496_v5 = vld [vmem:[%s3681_s10 + $0x850] sm:$0xf] }
  0x6e   : > { %v498_v6 = vld [vmem:[%s3681_s10 + $0x860] sm:$0xf]  ;;  %495 = vst [vmem:[%s3686_s11 + $0x210] sm:$0xf] %v494_v4  ;;  %497 = vst [vmem:[%s3686_s11 + $0x214] sm:$0xf] %v496_v5 }
  0x6f   : > { %499 = vst [vmem:[%s3686_s11 + $0x218] sm:$0xf] %v498_v6  ;;  %v500_v7 = vld [vmem:[%s3681_s10 + $0x870] sm:$0xf]  ;;  %v502_v8 = vld [vmem:[%s3681_s10 + $0x880] sm:$0xf] }
  0x70   : > { %v504_v9 = vld [vmem:[%s3681_s10 + $0x890] sm:$0xf]  ;;  %501 = vst [vmem:[%s3686_s11 + $0x21c] sm:$0xf] %v500_v7  ;;  %503 = vst [vmem:[%s3686_s11 + $0x220] sm:$0xf] %v502_v8 }
  0x71   : > { %505 = vst [vmem:[%s3686_s11 + $0x224] sm:$0xf] %v504_v9  ;;  %v506_v10 = vld [vmem:[%s3681_s10 + $0x8a0] sm:$0xf]  ;;  %v508_v11 = vld [vmem:[%s3681_s10 + $0x8b0] sm:$0xf] }
  0x72   : > { %v510_v12 = vld [vmem:[%s3681_s10 + $0x8c0] sm:$0xf]  ;;  %507 = vst [vmem:[%s3686_s11 + $0x228] sm:$0xf] %v506_v10  ;;  %509 = vst [vmem:[%s3686_s11 + $0x22c] sm:$0xf] %v508_v11 }
  0x73   : > { %511 = vst [vmem:[%s3686_s11 + $0x230] sm:$0xf] %v510_v12  ;;  %v512_v13 = vld [vmem:[%s3681_s10 + $0x8d0] sm:$0xf]  ;;  %v514_v14 = vld [vmem:[%s3681_s10 + $0x8e0] sm:$0xf] }
  0x74   : > { %v516_v15 = vld [vmem:[%s3681_s10 + $0x8f0] sm:$0xf]  ;;  %513 = vst [vmem:[%s3686_s11 + $0x234] sm:$0xf] %v512_v13  ;;  %515 = vst [vmem:[%s3686_s11 + $0x238] sm:$0xf] %v514_v14 }
  0x75   : > { %517 = vst [vmem:[%s3686_s11 + $0x23c] sm:$0xf] %v516_v15  ;;  %v518_v16 = vld [vmem:[%s3681_s10 + $0x900] sm:$0xf]  ;;  %v520_v17 = vld [vmem:[%s3681_s10 + $0x910] sm:$0xf] }
  0x76   : > { %v522_v18 = vld [vmem:[%s3681_s10 + $0x920] sm:$0xf]  ;;  %519 = vst [vmem:[%s3686_s11 + $0x240] sm:$0xf] %v518_v16  ;;  %521 = vst [vmem:[%s3686_s11 + $0x244] sm:$0xf] %v520_v17 }
  0x77   : > { %523 = vst [vmem:[%s3686_s11 + $0x248] sm:$0xf] %v522_v18  ;;  %v524_v19 = vld [vmem:[%s3681_s10 + $0x930] sm:$0xf]  ;;  %v526_v20 = vld [vmem:[%s3681_s10 + $0x940] sm:$0xf] }
  0x78   : > { %v528_v21 = vld [vmem:[%s3681_s10 + $0x950] sm:$0xf]  ;;  %525 = vst [vmem:[%s3686_s11 + $0x24c] sm:$0xf] %v524_v19  ;;  %527 = vst [vmem:[%s3686_s11 + $0x250] sm:$0xf] %v526_v20 }
  0x79   : > { %529 = vst [vmem:[%s3686_s11 + $0x254] sm:$0xf] %v528_v21  ;;  %v530_v22 = vld [vmem:[%s3681_s10 + $0x960] sm:$0xf]  ;;  %v532_v23 = vld [vmem:[%s3681_s10 + $0x970] sm:$0xf] }
  0x7a   : > { %v534_v24 = vld [vmem:[%s3681_s10 + $0x980] sm:$0xf]  ;;  %531 = vst [vmem:[%s3686_s11 + $0x258] sm:$0xf] %v530_v22  ;;  %533 = vst [vmem:[%s3686_s11 + $0x25c] sm:$0xf] %v532_v23 }
  0x7b   : > { %535 = vst [vmem:[%s3686_s11 + $0x260] sm:$0xf] %v534_v24  ;;  %v536_v25 = vld [vmem:[%s3681_s10 + $0x990] sm:$0xf]  ;;  %v538_v26 = vld [vmem:[%s3681_s10 + $0x9a0] sm:$0xf] }
  0x7c   : > { %v540_v27 = vld [vmem:[%s3681_s10 + $0x9b0] sm:$0xf]  ;;  %537 = vst [vmem:[%s3686_s11 + $0x264] sm:$0xf] %v536_v25  ;;  %539 = vst [vmem:[%s3686_s11 + $0x268] sm:$0xf] %v538_v26 }
  0x7d   : > { %541 = vst [vmem:[%s3686_s11 + $0x26c] sm:$0xf] %v540_v27  ;;  %v542_v28 = vld [vmem:[%s3681_s10 + $0x9c0] sm:$0xf]  ;;  %v544_v29 = vld [vmem:[%s3681_s10 + $0x9d0] sm:$0xf] }
  0x7e   : > { %v546_v30 = vld [vmem:[%s3681_s10 + $0x9e0] sm:$0xf]  ;;  %543 = vst [vmem:[%s3686_s11 + $0x270] sm:$0xf] %v542_v28  ;;  %545 = vst [vmem:[%s3686_s11 + $0x274] sm:$0xf] %v544_v29 }
  0x7f   : > { %547 = vst [vmem:[%s3686_s11 + $0x278] sm:$0xf] %v546_v30  ;;  %v548_v31 = vld [vmem:[%s3681_s10 + $0x9f0] sm:$0xf]  ;;  %v550_v32 = vld [vmem:[%s3681_s10 + $0xa00] sm:$0xf] }
  0x80   : > { %v552_v33 = vld [vmem:[%s3681_s10 + $0xa10] sm:$0xf]  ;;  %549 = vst [vmem:[%s3686_s11 + $0x27c] sm:$0xf] %v548_v31  ;;  %551 = vst [vmem:[%s3686_s11 + $0x280] sm:$0xf] %v550_v32 }
  0x81   : > { %553 = vst [vmem:[%s3686_s11 + $0x284] sm:$0xf] %v552_v33  ;;  %v554_v34 = vld [vmem:[%s3681_s10 + $0xa20] sm:$0xf]  ;;  %v556_v35 = vld [vmem:[%s3681_s10 + $0xa30] sm:$0xf] }
  0x82   : > { %v558_v36 = vld [vmem:[%s3681_s10 + $0xa40] sm:$0xf]  ;;  %555 = vst [vmem:[%s3686_s11 + $0x288] sm:$0xf] %v554_v34  ;;  %557 = vst [vmem:[%s3686_s11 + $0x28c] sm:$0xf] %v556_v35 }
  0x83   : > { %559 = vst [vmem:[%s3686_s11 + $0x290] sm:$0xf] %v558_v36  ;;  %v560_v37 = vld [vmem:[%s3681_s10 + $0xa50] sm:$0xf]  ;;  %v562_v38 = vld [vmem:[%s3681_s10 + $0xa60] sm:$0xf] }
  0x84   : > { %v564_v39 = vld [vmem:[%s3681_s10 + $0xa70] sm:$0xf]  ;;  %561 = vst [vmem:[%s3686_s11 + $0x294] sm:$0xf] %v560_v37  ;;  %563 = vst [vmem:[%s3686_s11 + $0x298] sm:$0xf] %v562_v38 }
  0x85   : > { %565 = vst [vmem:[%s3686_s11 + $0x29c] sm:$0xf] %v564_v39  ;;  %v566_v40 = vld [vmem:[%s3681_s10 + $0xa80] sm:$0xf]  ;;  %v568_v41 = vld [vmem:[%s3681_s10 + $0xa90] sm:$0xf] }
  0x86   : > { %v570_v42 = vld [vmem:[%s3681_s10 + $0xaa0] sm:$0xf]  ;;  %567 = vst [vmem:[%s3686_s11 + $0x2a0] sm:$0xf] %v566_v40  ;;  %569 = vst [vmem:[%s3686_s11 + $0x2a4] sm:$0xf] %v568_v41 }
  0x87   : > { %571 = vst [vmem:[%s3686_s11 + $0x2a8] sm:$0xf] %v570_v42  ;;  %v572_v43 = vld [vmem:[%s3681_s10 + $0xab0] sm:$0xf]  ;;  %v574_v44 = vld [vmem:[%s3681_s10 + $0xac0] sm:$0xf] }
  0x88   : > { %v576_v45 = vld [vmem:[%s3681_s10 + $0xad0] sm:$0xf]  ;;  %573 = vst [vmem:[%s3686_s11 + $0x2ac] sm:$0xf] %v572_v43  ;;  %575 = vst [vmem:[%s3686_s11 + $0x2b0] sm:$0xf] %v574_v44 }
  0x89   : > { %577 = vst [vmem:[%s3686_s11 + $0x2b4] sm:$0xf] %v576_v45  ;;  %v578_v46 = vld [vmem:[%s3681_s10 + $0xae0] sm:$0xf]  ;;  %v580_v47 = vld [vmem:[%s3681_s10 + $0xaf0] sm:$0xf] }
  0x8a   : > { %v582_v48 = vld [vmem:[%s3681_s10 + $0xb00] sm:$0xf]  ;;  %579 = vst [vmem:[%s3686_s11 + $0x2b8] sm:$0xf] %v578_v46  ;;  %581 = vst [vmem:[%s3686_s11 + $0x2bc] sm:$0xf] %v580_v47 }
  0x8b   : > { %583 = vst [vmem:[%s3686_s11 + $0x2c0] sm:$0xf] %v582_v48  ;;  %v584_v49 = vld [vmem:[%s3681_s10 + $0xb10] sm:$0xf]  ;;  %v586_v50 = vld [vmem:[%s3681_s10 + $0xb20] sm:$0xf] }
  0x8c   : > { %v588_v51 = vld [vmem:[%s3681_s10 + $0xb30] sm:$0xf]  ;;  %585 = vst [vmem:[%s3686_s11 + $0x2c4] sm:$0xf] %v584_v49  ;;  %587 = vst [vmem:[%s3686_s11 + $0x2c8] sm:$0xf] %v586_v50 }
  0x8d   : > { %589 = vst [vmem:[%s3686_s11 + $0x2cc] sm:$0xf] %v588_v51  ;;  %v590_v52 = vld [vmem:[%s3681_s10 + $0xb40] sm:$0xf]  ;;  %v592_v53 = vld [vmem:[%s3681_s10 + $0xb50] sm:$0xf] }
  0x8e   : > { %v594_v54 = vld [vmem:[%s3681_s10 + $0xb60] sm:$0xf]  ;;  %591 = vst [vmem:[%s3686_s11 + $0x2d0] sm:$0xf] %v590_v52  ;;  %593 = vst [vmem:[%s3686_s11 + $0x2d4] sm:$0xf] %v592_v53 }
  0x8f   : > { %595 = vst [vmem:[%s3686_s11 + $0x2d8] sm:$0xf] %v594_v54  ;;  %v596_v55 = vld [vmem:[%s3681_s10 + $0xb70] sm:$0xf]  ;;  %v598_v56 = vld [vmem:[%s3681_s10 + $0xb80] sm:$0xf] }
  0x90   : > { %v600_v57 = vld [vmem:[%s3681_s10 + $0xb90] sm:$0xf]  ;;  %597 = vst [vmem:[%s3686_s11 + $0x2dc] sm:$0xf] %v596_v55  ;;  %599 = vst [vmem:[%s3686_s11 + $0x2e0] sm:$0xf] %v598_v56 }
  0x91   : > { %601 = vst [vmem:[%s3686_s11 + $0x2e4] sm:$0xf] %v600_v57  ;;  %v602_v58 = vld [vmem:[%s3681_s10 + $0xba0] sm:$0xf]  ;;  %v604_v59 = vld [vmem:[%s3681_s10 + $0xbb0] sm:$0xf] }
  0x92   : > { %v606_v60 = vld [vmem:[%s3681_s10 + $0xbc0] sm:$0xf]  ;;  %603 = vst [vmem:[%s3686_s11 + $0x2e8] sm:$0xf] %v602_v58  ;;  %605 = vst [vmem:[%s3686_s11 + $0x2ec] sm:$0xf] %v604_v59 }
  0x93   : > { %607 = vst [vmem:[%s3686_s11 + $0x2f0] sm:$0xf] %v606_v60  ;;  %v608_v61 = vld [vmem:[%s3681_s10 + $0xbd0] sm:$0xf]  ;;  %v610_v62 = vld [vmem:[%s3681_s10 + $0xbe0] sm:$0xf] }
  0x94   : > { %v612_v63 = vld [vmem:[%s3681_s10 + $0xbf0] sm:$0xf]  ;;  %609 = vst [vmem:[%s3686_s11 + $0x2f4] sm:$0xf] %v608_v61  ;;  %611 = vst [vmem:[%s3686_s11 + $0x2f8] sm:$0xf] %v610_v62 }
  0x95   : > { %613 = vst [vmem:[%s3686_s11 + $0x2fc] sm:$0xf] %v612_v63  ;;  %v614_v0 = vld [vmem:[%s3681_s10 + $0xc00] sm:$0xf]  ;;  %v616_v1 = vld [vmem:[%s3681_s10 + $0xc10] sm:$0xf] }
  0x96   : > { %v618_v2 = vld [vmem:[%s3681_s10 + $0xc20] sm:$0xf]  ;;  %615 = vst [vmem:[%s3686_s11 + $0x300] sm:$0xf] %v614_v0  ;;  %617 = vst [vmem:[%s3686_s11 + $0x304] sm:$0xf] %v616_v1 }
  0x97   : > { %619 = vst [vmem:[%s3686_s11 + $0x308] sm:$0xf] %v618_v2  ;;  %v620_v3 = vld [vmem:[%s3681_s10 + $0xc30] sm:$0xf]  ;;  %v622_v4 = vld [vmem:[%s3681_s10 + $0xc40] sm:$0xf] }
  0x98   : > { %v624_v5 = vld [vmem:[%s3681_s10 + $0xc50] sm:$0xf]  ;;  %621 = vst [vmem:[%s3686_s11 + $0x30c] sm:$0xf] %v620_v3  ;;  %623 = vst [vmem:[%s3686_s11 + $0x310] sm:$0xf] %v622_v4 }
  0x99   : > { %625 = vst [vmem:[%s3686_s11 + $0x314] sm:$0xf] %v624_v5  ;;  %v626_v6 = vld [vmem:[%s3681_s10 + $0xc60] sm:$0xf]  ;;  %v628_v7 = vld [vmem:[%s3681_s10 + $0xc70] sm:$0xf] }
  0x9a   : > { %v630_v8 = vld [vmem:[%s3681_s10 + $0xc80] sm:$0xf]  ;;  %627 = vst [vmem:[%s3686_s11 + $0x318] sm:$0xf] %v626_v6  ;;  %629 = vst [vmem:[%s3686_s11 + $0x31c] sm:$0xf] %v628_v7 }
  0x9b   : > { %631 = vst [vmem:[%s3686_s11 + $0x320] sm:$0xf] %v630_v8  ;;  %v632_v9 = vld [vmem:[%s3681_s10 + $0xc90] sm:$0xf]  ;;  %v634_v10 = vld [vmem:[%s3681_s10 + $0xca0] sm:$0xf] }
  0x9c   : > { %v636_v11 = vld [vmem:[%s3681_s10 + $0xcb0] sm:$0xf]  ;;  %633 = vst [vmem:[%s3686_s11 + $0x324] sm:$0xf] %v632_v9  ;;  %635 = vst [vmem:[%s3686_s11 + $0x328] sm:$0xf] %v634_v10 }
  0x9d   : > { %637 = vst [vmem:[%s3686_s11 + $0x32c] sm:$0xf] %v636_v11  ;;  %v638_v12 = vld [vmem:[%s3681_s10 + $0xcc0] sm:$0xf]  ;;  %v640_v13 = vld [vmem:[%s3681_s10 + $0xcd0] sm:$0xf] }
  0x9e   : > { %v642_v14 = vld [vmem:[%s3681_s10 + $0xce0] sm:$0xf]  ;;  %639 = vst [vmem:[%s3686_s11 + $0x330] sm:$0xf] %v638_v12  ;;  %641 = vst [vmem:[%s3686_s11 + $0x334] sm:$0xf] %v640_v13 }
  0x9f   : > { %643 = vst [vmem:[%s3686_s11 + $0x338] sm:$0xf] %v642_v14  ;;  %v644_v15 = vld [vmem:[%s3681_s10 + $0xcf0] sm:$0xf]  ;;  %v646_v16 = vld [vmem:[%s3681_s10 + $0xd00] sm:$0xf] }
  0xa0   : > { %v648_v17 = vld [vmem:[%s3681_s10 + $0xd10] sm:$0xf]  ;;  %645 = vst [vmem:[%s3686_s11 + $0x33c] sm:$0xf] %v644_v15  ;;  %647 = vst [vmem:[%s3686_s11 + $0x340] sm:$0xf] %v646_v16 }
  0xa1   : > { %649 = vst [vmem:[%s3686_s11 + $0x344] sm:$0xf] %v648_v17  ;;  %v650_v18 = vld [vmem:[%s3681_s10 + $0xd20] sm:$0xf]  ;;  %v652_v19 = vld [vmem:[%s3681_s10 + $0xd30] sm:$0xf] }
  0xa2   : > { %v654_v20 = vld [vmem:[%s3681_s10 + $0xd40] sm:$0xf]  ;;  %651 = vst [vmem:[%s3686_s11 + $0x348] sm:$0xf] %v650_v18  ;;  %653 = vst [vmem:[%s3686_s11 + $0x34c] sm:$0xf] %v652_v19 }
  0xa3   : > { %655 = vst [vmem:[%s3686_s11 + $0x350] sm:$0xf] %v654_v20  ;;  %v656_v21 = vld [vmem:[%s3681_s10 + $0xd50] sm:$0xf]  ;;  %v658_v22 = vld [vmem:[%s3681_s10 + $0xd60] sm:$0xf] }
  0xa4   : > { %v660_v23 = vld [vmem:[%s3681_s10 + $0xd70] sm:$0xf]  ;;  %657 = vst [vmem:[%s3686_s11 + $0x354] sm:$0xf] %v656_v21  ;;  %659 = vst [vmem:[%s3686_s11 + $0x358] sm:$0xf] %v658_v22 }
  0xa5   : > { %661 = vst [vmem:[%s3686_s11 + $0x35c] sm:$0xf] %v660_v23  ;;  %v662_v24 = vld [vmem:[%s3681_s10 + $0xd80] sm:$0xf]  ;;  %v664_v25 = vld [vmem:[%s3681_s10 + $0xd90] sm:$0xf] }
  0xa6   : > { %v666_v26 = vld [vmem:[%s3681_s10 + $0xda0] sm:$0xf]  ;;  %663 = vst [vmem:[%s3686_s11 + $0x360] sm:$0xf] %v662_v24  ;;  %665 = vst [vmem:[%s3686_s11 + $0x364] sm:$0xf] %v664_v25 }
  0xa7   : > { %667 = vst [vmem:[%s3686_s11 + $0x368] sm:$0xf] %v666_v26  ;;  %v668_v27 = vld [vmem:[%s3681_s10 + $0xdb0] sm:$0xf]  ;;  %v670_v28 = vld [vmem:[%s3681_s10 + $0xdc0] sm:$0xf] }
  0xa8   : > { %v672_v29 = vld [vmem:[%s3681_s10 + $0xdd0] sm:$0xf]  ;;  %669 = vst [vmem:[%s3686_s11 + $0x36c] sm:$0xf] %v668_v27  ;;  %671 = vst [vmem:[%s3686_s11 + $0x370] sm:$0xf] %v670_v28 }
  0xa9   : > { %673 = vst [vmem:[%s3686_s11 + $0x374] sm:$0xf] %v672_v29  ;;  %v674_v30 = vld [vmem:[%s3681_s10 + $0xde0] sm:$0xf]  ;;  %v676_v31 = vld [vmem:[%s3681_s10 + $0xdf0] sm:$0xf] }
  0xaa   : > { %v678_v32 = vld [vmem:[%s3681_s10 + $0xe00] sm:$0xf]  ;;  %675 = vst [vmem:[%s3686_s11 + $0x378] sm:$0xf] %v674_v30  ;;  %677 = vst [vmem:[%s3686_s11 + $0x37c] sm:$0xf] %v676_v31 }
  0xab   : > { %679 = vst [vmem:[%s3686_s11 + $0x380] sm:$0xf] %v678_v32  ;;  %v680_v33 = vld [vmem:[%s3681_s10 + $0xe10] sm:$0xf]  ;;  %v682_v34 = vld [vmem:[%s3681_s10 + $0xe20] sm:$0xf] }
  0xac   : > { %v684_v35 = vld [vmem:[%s3681_s10 + $0xe30] sm:$0xf]  ;;  %681 = vst [vmem:[%s3686_s11 + $0x384] sm:$0xf] %v680_v33  ;;  %683 = vst [vmem:[%s3686_s11 + $0x388] sm:$0xf] %v682_v34 }
  0xad   : > { %685 = vst [vmem:[%s3686_s11 + $0x38c] sm:$0xf] %v684_v35  ;;  %v686_v36 = vld [vmem:[%s3681_s10 + $0xe40] sm:$0xf]  ;;  %v688_v37 = vld [vmem:[%s3681_s10 + $0xe50] sm:$0xf] }
  0xae   : > { %v690_v38 = vld [vmem:[%s3681_s10 + $0xe60] sm:$0xf]  ;;  %687 = vst [vmem:[%s3686_s11 + $0x390] sm:$0xf] %v686_v36  ;;  %689 = vst [vmem:[%s3686_s11 + $0x394] sm:$0xf] %v688_v37 }
  0xaf   : > { %691 = vst [vmem:[%s3686_s11 + $0x398] sm:$0xf] %v690_v38  ;;  %v692_v39 = vld [vmem:[%s3681_s10 + $0xe70] sm:$0xf]  ;;  %v694_v40 = vld [vmem:[%s3681_s10 + $0xe80] sm:$0xf] }
  0xb0   : > { %v696_v41 = vld [vmem:[%s3681_s10 + $0xe90] sm:$0xf]  ;;  %693 = vst [vmem:[%s3686_s11 + $0x39c] sm:$0xf] %v692_v39  ;;  %695 = vst [vmem:[%s3686_s11 + $0x3a0] sm:$0xf] %v694_v40 }
  0xb1   : > { %697 = vst [vmem:[%s3686_s11 + $0x3a4] sm:$0xf] %v696_v41  ;;  %v698_v42 = vld [vmem:[%s3681_s10 + $0xea0] sm:$0xf]  ;;  %v700_v43 = vld [vmem:[%s3681_s10 + $0xeb0] sm:$0xf] }
  0xb2   : > { %v702_v44 = vld [vmem:[%s3681_s10 + $0xec0] sm:$0xf]  ;;  %699 = vst [vmem:[%s3686_s11 + $0x3a8] sm:$0xf] %v698_v42  ;;  %701 = vst [vmem:[%s3686_s11 + $0x3ac] sm:$0xf] %v700_v43 }
  0xb3   : > { %703 = vst [vmem:[%s3686_s11 + $0x3b0] sm:$0xf] %v702_v44  ;;  %v704_v45 = vld [vmem:[%s3681_s10 + $0xed0] sm:$0xf]  ;;  %v706_v46 = vld [vmem:[%s3681_s10 + $0xee0] sm:$0xf] }
  0xb4   : > { %v708_v47 = vld [vmem:[%s3681_s10 + $0xef0] sm:$0xf]  ;;  %705 = vst [vmem:[%s3686_s11 + $0x3b4] sm:$0xf] %v704_v45  ;;  %707 = vst [vmem:[%s3686_s11 + $0x3b8] sm:$0xf] %v706_v46 }
  0xb5   : > { %709 = vst [vmem:[%s3686_s11 + $0x3bc] sm:$0xf] %v708_v47  ;;  %v710_v48 = vld [vmem:[%s3681_s10 + $0xf00] sm:$0xf]  ;;  %v712_v49 = vld [vmem:[%s3681_s10 + $0xf10] sm:$0xf] }
  0xb6   : > { %v714_v50 = vld [vmem:[%s3681_s10 + $0xf20] sm:$0xf]  ;;  %711 = vst [vmem:[%s3686_s11 + $0x3c0] sm:$0xf] %v710_v48  ;;  %713 = vst [vmem:[%s3686_s11 + $0x3c4] sm:$0xf] %v712_v49 }
  0xb7   : > { %715 = vst [vmem:[%s3686_s11 + $0x3c8] sm:$0xf] %v714_v50  ;;  %v716_v51 = vld [vmem:[%s3681_s10 + $0xf30] sm:$0xf]  ;;  %v718_v52 = vld [vmem:[%s3681_s10 + $0xf40] sm:$0xf] }
  0xb8   : > { %v720_v53 = vld [vmem:[%s3681_s10 + $0xf50] sm:$0xf]  ;;  %717 = vst [vmem:[%s3686_s11 + $0x3cc] sm:$0xf] %v716_v51  ;;  %719 = vst [vmem:[%s3686_s11 + $0x3d0] sm:$0xf] %v718_v52 }
  0xb9   : > { %721 = vst [vmem:[%s3686_s11 + $0x3d4] sm:$0xf] %v720_v53  ;;  %v722_v54 = vld [vmem:[%s3681_s10 + $0xf60] sm:$0xf]  ;;  %v724_v55 = vld [vmem:[%s3681_s10 + $0xf70] sm:$0xf] }
  0xba   : > { %v726_v56 = vld [vmem:[%s3681_s10 + $0xf80] sm:$0xf]  ;;  %723 = vst [vmem:[%s3686_s11 + $0x3d8] sm:$0xf] %v722_v54  ;;  %725 = vst [vmem:[%s3686_s11 + $0x3dc] sm:$0xf] %v724_v55 }
  0xbb   : > { %727 = vst [vmem:[%s3686_s11 + $0x3e0] sm:$0xf] %v726_v56  ;;  %v728_v57 = vld [vmem:[%s3681_s10 + $0xf90] sm:$0xf]  ;;  %v730_v58 = vld [vmem:[%s3681_s10 + $0xfa0] sm:$0xf] }
  0xbc   : > { %v732_v59 = vld [vmem:[%s3681_s10 + $0xfb0] sm:$0xf]  ;;  %729 = vst [vmem:[%s3686_s11 + $0x3e4] sm:$0xf] %v728_v57  ;;  %731 = vst [vmem:[%s3686_s11 + $0x3e8] sm:$0xf] %v730_v58 }
  0xbd   : > { %733 = vst [vmem:[%s3686_s11 + $0x3ec] sm:$0xf] %v732_v59  ;;  %v734_v60 = vld [vmem:[%s3681_s10 + $0xfc0] sm:$0xf]  ;;  %v736_v61 = vld [vmem:[%s3681_s10 + $0xfd0] sm:$0xf] }
  0xbe   : > { %v738_v62 = vld [vmem:[%s3681_s10 + $0xfe0] sm:$0xf]  ;;  %735 = vst [vmem:[%s3686_s11 + $0x3f0] sm:$0xf] %v734_v60  ;;  %737 = vst [vmem:[%s3686_s11 + $0x3f4] sm:$0xf] %v736_v61 }
  0xbf   : > { %739 = vst [vmem:[%s3686_s11 + $0x3f8] sm:$0xf] %v738_v62  ;;  %v740_v63 = vld [vmem:[%s3681_s10 + $0xff0] sm:$0xf] }
  0xc0   : > { %741 = vst [vmem:[%s3686_s11 + $0x3fc] sm:$0xf] %v740_v63 }
  0xc1 PF: > { %p3009_p7 = scmp.ge.s32.totalorder %s3594_s21, 1  ;;  %p1276_p8 = scmp.lt.s32.totalorder %s3594_s21, 17 }
  0xc3   : > { %p1277_p9 = pnand %p3009_p7, %p1276_p8 }
  0xc4   : > { %s1283_s12 = sand.u32 (!%p1277_p9), 1, %s3570_s15   ;;  %p1347_p10 = scmp.lt.s32.totalorder (!%p1277_p9), %s3582_s18, 3 }
  0xc5   : > { %1280 = sbr.rel (%p1277_p9) target bundleno = 568 (0x238), region = 65  ;;  %s3010_s13 = sshll.u32 (!%p1277_p9), %s1283_s12, 10 }
  0xc6   : > { %s4204_s14 = scalar_lea.vmem (!%p1277_p9), [#allocation3], %s3010_s13  ;;  %s3011_s8 = sshll.u32 (!%p1277_p9), %s3578_s17, 4 }
  0xc7   : > { %p1337_p11 = scmp.lt.s32.totalorder (!%p1277_p9), %s3011_s8, 63  ;;  %p3158_p12 = scmp.ne.s32.totalorder (!%p1277_p9), %s3578_s17, 0 }
  0xca   : > { %s4415_s18 = smov (!%p1347_p10, %s3582_s18), 3  ;;  %v3396_v0 = vld [vmem:[%s4204_s14 + $0x78] sm:$0xff]   ;;  %v3400_v4 = vld [vmem:[%s4204_s14 + $0x70] sm:$0xff]   ;;  %v3404_v8 = vld [vmem:[%s4204_s14 + $0x68] sm:$0xff]   ;;  %s4417_s8 = smov (!%p1337_p11, %s3011_s8), 63 }
  0xcb   : > { %v3397_v1 = vld [vmem:[%s4204_s14 + $0xf8] sm:$0xff]   ;;  %s3013_s15 = sshll.u32 %s4415_s18, 2  ;;  %s1359_s26 = scalar_lea.vmem %s4400_s3, %s4415_s18  ;;  %3164 = vmatprep.subr.bf16.mxu0 %v3396_v0  ;;  %v3401_v5 = vld [vmem:[%s4204_s14 + $0xf0] sm:$0xff]   ;;  %v3405_v9 = vld [vmem:[%s4204_s14 + $0xe8] sm:$0xff]  }
  0xcc   : > { %v3398_v2 = vld [vmem:[%s4204_s14 + $0x38] sm:$0xff]   ;;  %s4217_s30 = scalar_lea.vmem %s4399_s2, %s3013_s15  ;;  %s1366_s7 = scalar_lea.vmem %s4401_s4, %s4415_s18  ;;  %3186 = vmatprep.subr.bf16.mxu1 %v3397_v1  ;;  %v3402_v6 = vld [vmem:[%s4204_s14 + $0x30] sm:$0xff]   ;;  %v3406_v10 = vld [vmem:[%s4204_s14 + $0x28] sm:$0xff]  }
  0xcd   : > { %v3399_v3 = vld [vmem:[%s4204_s14 + $0xb8] sm:$0xff]   ;;  %3165 = vmatpush3.bf16.msra.mxu0 %v3398_v2  ;;  %v3403_v7 = vld [vmem:[%s4204_s14 + $0xb0] sm:$0xff]   ;;  %v3407_v11 = vld [vmem:[%s4204_s14 + $0xa8] sm:$0xff]   ;;  %s3012_s9 = sshll.u32 %s4417_s8, 2 }
  0xce   : > { %3187 = vmatpush3.bf16.msra.mxu1 %v3399_v3  ;;  %3166 = vmatprep.subr.bf16.mxu0 %v3400_v4  ;;  %v3408_v12 = vld [vmem:[%s4204_s14 + $0x60] sm:$0xff]   ;;  %v3412_v16 = vld [vmem:[%s4204_s14 + $0x58] sm:$0xff]   ;;  %v3416_v20 = vld [vmem:[%s4204_s14 + $0x50] sm:$0xff]   ;;  %s4254_s12 = scalar_lea.vmem %s4397_s0, %s3012_s9 }
  0xcf   : > { %3188 = vmatprep.subr.bf16.mxu1 %v3401_v5  ;;  %v3409_v13 = vld [vmem:[%s4204_s14 + $0xe0] sm:$0xff]   ;;  %v3413_v17 = vld [vmem:[%s4204_s14 + $0xd8] sm:$0xff]   ;;  %v3417_v21 = vld [vmem:[%s4204_s14 + $0xd0] sm:$0xff]  }
  0xd0   : > { %v3410_v14 = vld [vmem:[%s4204_s14 + $0x20] sm:$0xff]   ;;  %v3414_v18 = vld [vmem:[%s4204_s14 + $0x18] sm:$0xff]   ;;  %v3418_v22 = vld [vmem:[%s4204_s14 + $0x10] sm:$0xff]  }
  0xd1   : > { %3167 = vmatpush3.bf16.msra.mxu0 %v3402_v6  ;;  %v3411_v15 = vld [vmem:[%s4204_s14 + $0xa0] sm:$0xff]   ;;  %v3415_v19 = vld [vmem:[%s4204_s14 + $0x98] sm:$0xff]   ;;  %v3419_v23 = vld [vmem:[%s4204_s14 + $0x90] sm:$0xff]  }
  0xd2   : > { %3189 = vmatpush3.bf16.msra.mxu1 %v3403_v7  ;;  %3168 = vmatprep.subr.bf16.mxu0 %v3404_v8  ;;  %v3420_v24 = vld [vmem:[%s4204_s14 + $0x48] sm:$0xff]   ;;  %v3424_v28 = vld [vmem:[%s4204_s14 + $0x40] sm:$0xff]   ;;  %v1368_v32 = vld [vmem:[%s4254_s12] sm:$0xff] }
  0xd3   : > { %3190 = vmatprep.subr.bf16.mxu1 %v3405_v9  ;;  %v3421_v25 = vld [vmem:[%s4204_s14 + $0xc8] sm:$0xff]   ;;  %v3425_v29 = vld [vmem:[%s4204_s14 + $0xc0] sm:$0xff]   ;;  %v3014_v34 = vcombine.low %v1368_v32, %v1368_v32  ;;  %v3015_v35 = vcombine.high %v1368_v32, %v1368_v32  ;;  %v3432_v38 = vld [vmem:[%s4204_s14 + $0x178] sm:$0xff]  }
  0xd4   : > { %v3422_v26 = vld [vmem:[%s4204_s14 + $0x8] sm:$0xff]   ;;  %v3426_v30 = vld [vmem:[%s4204_s14] sm:$0xff]   ;;  %v3433_v39 = vld [vmem:[%s4204_s14 + $0x1f8] sm:$0xff]  }
  0xd5   : > { %3169 = vmatpush3.bf16.msra.mxu0 %v3406_v10  ;;  %v3423_v27 = vld [vmem:[%s4204_s14 + $0x88] sm:$0xff]   ;;  %v3427_v31 = vld [vmem:[%s4204_s14 + $0x80] sm:$0xff]   ;;  %2488 = vmatprep.mubr.bf16.mxu0 %v3015_v35  ;;  %v3434_v40 = vld [vmem:[%s4204_s14 + $0x138] sm:$0xff]  }
  0xd6   : > { %3191 = vmatpush3.bf16.msra.mxu1 %v3407_v11  ;;  %3170 = vmatprep.subr.bf16.mxu0 %v3408_v12  ;;  %v1369_v33 = vld [vmem:[%s4254_s12 + $0x8] sm:$0xff]  ;;  %v3435_v41 = vld [vmem:[%s4204_s14 + $0x1b8] sm:$0xff]   ;;  %v3436_v42 = vld [vmem:[%s4204_s14 + $0x170] sm:$0xff]  }
  0xd7   : > { %3192 = vmatprep.subr.bf16.mxu1 %v3409_v13  ;;  %v3016_v36 = vcombine.low %v1369_v33, %v1369_v33  ;;  %v3017_v37 = vcombine.high %v1369_v33, %v1369_v33  ;;  %v3437_v43 = vld [vmem:[%s4204_s14 + $0x1f0] sm:$0xff]   ;;  %v3440_v46 = vld [vmem:[%s4204_s14 + $0x168] sm:$0xff]   ;;  %v3444_v50 = vld [vmem:[%s4204_s14 + $0x160] sm:$0xff]  }
  0xd8   : > { %v3438_v44 = vld [vmem:[%s4204_s14 + $0x130] sm:$0xff]   ;;  %v3441_v47 = vld [vmem:[%s4204_s14 + $0x1e8] sm:$0xff]   ;;  %v3445_v51 = vld [vmem:[%s4204_s14 + $0x1e0] sm:$0xff]  }
  0xd9   : > { %3171 = vmatpush3.bf16.msra.mxu0 %v3410_v14  ;;  %2528 = vmatprep.mubr.bf16.mxu1 %v3017_v37  ;;  %v3439_v45 = vld [vmem:[%s4204_s14 + $0x1b0] sm:$0xff]   ;;  %v3442_v48 = vld [vmem:[%s4204_s14 + $0x128] sm:$0xff]   ;;  %v3446_v52 = vld [vmem:[%s4204_s14 + $0x120] sm:$0xff]  }
  0xda   : > { %3193 = vmatpush3.bf16.msra.mxu1 %v3411_v15  ;;  %3172 = vmatprep.subr.bf16.mxu0 %v3412_v16  ;;  %v3443_v49 = vld [vmem:[%s4204_s14 + $0x1a8] sm:$0xff]   ;;  %v3447_v53 = vld [vmem:[%s4204_s14 + $0x1a0] sm:$0xff]   ;;  %v3448_v54 = vld [vmem:[%s4204_s14 + $0x158] sm:$0xff]  }
  0xdb   : > { %3194 = vmatprep.subr.bf16.mxu1 %v3413_v17  ;;  %v3449_v55 = vld [vmem:[%s4204_s14 + $0x1d8] sm:$0xff]   ;;  %v3452_v58 = vld [vmem:[%s4204_s14 + $0x150] sm:$0xff]   ;;  %v3456_v62 = vld [vmem:[%s4204_s14 + $0x148] sm:$0xff]  }
  0xdc   : > { %v3450_v56 = vld [vmem:[%s4204_s14 + $0x118] sm:$0xff]   ;;  %v3453_v59 = vld [vmem:[%s4204_s14 + $0x1d0] sm:$0xff]   ;;  %v3457_v63 = vld [vmem:[%s4204_s14 + $0x1c8] sm:$0xff]  }
  0xdd   : > { %3173 = vmatpush3.bf16.msra.mxu0 %v3414_v18  ;;  %v3451_v57 = vld [vmem:[%s4204_s14 + $0x198] sm:$0xff]   ;;  %v3454_v60 = vld [vmem:[%s4204_s14 + $0x110] sm:$0xff]   ;;  %v3458_v0 = vld [vmem:[%s4204_s14 + $0x108] sm:$0xff]  }
  0xde   : > { %3195 = vmatpush3.bf16.msra.mxu1 %v3415_v19  ;;  %3174 = vmatprep.subr.bf16.mxu0 %v3416_v20  ;;  %v3455_v61 = vld [vmem:[%s4204_s14 + $0x190] sm:$0xff]   ;;  %v3459_v1 = vld [vmem:[%s4204_s14 + $0x188] sm:$0xff]   ;;  %v3460_v2 = vld [vmem:[%s4204_s14 + $0x140] sm:$0xff]  }
  0xdf   : > { %3196 = vmatprep.subr.bf16.mxu1 %v3417_v21  ;;  %v3461_v3 = vld [vmem:[%s4204_s14 + $0x1c0] sm:$0xff]   ;;  %v1370_v6 = vld [vmem:[%s4254_s12 + $0x10] sm:$0xff]  ;;  %v1371_v9 = vld [vmem:[%s4254_s12 + $0x18] sm:$0xff] }
  0xe0   : > { %v3462_v4 = vld [vmem:[%s4204_s14 + $0x100] sm:$0xff]   ;;  %v3018_v7 = vcombine.low %v1370_v6, %v1370_v6  ;;  %v3019_v8 = vcombine.high %v1370_v6, %v1370_v6  ;;  %v3020_v10 = vcombine.low %v1371_v9, %v1371_v9  ;;  %v3021_v11 = vcombine.high %v1371_v9, %v1371_v9  ;;  %v3468_v12 = vld [vmem:[%s4204_s14 + $0x278] sm:$0xff]   ;;  %v3472_v16 = vld [vmem:[%s4204_s14 + $0x270] sm:$0xff]  }
  0xe1   : > { %3175 = vmatpush3.bf16.msra.mxu0 %v3418_v22  ;;  %v3463_v5 = vld [vmem:[%s4204_s14 + $0x180] sm:$0xff]   ;;  %v3469_v13 = vld [vmem:[%s4204_s14 + $0x2f8] sm:$0xff]   ;;  %v3473_v17 = vld [vmem:[%s4204_s14 + $0x2f0] sm:$0xff]  }
  0xe2   : > { %3197 = vmatpush3.bf16.msra.mxu1 %v3419_v23  ;;  %3176 = vmatprep.subr.bf16.mxu0 %v3420_v24  ;;  %v3470_v14 = vld [vmem:[%s4204_s14 + $0x238] sm:$0xff]   ;;  %v3474_v18 = vld [vmem:[%s4204_s14 + $0x230] sm:$0xff]   ;;  %v3476_v20 = vld [vmem:[%s4204_s14 + $0x268] sm:$0xff]  }
  0xe3   : > { %3198 = vmatprep.subr.bf16.mxu1 %v3421_v25  ;;  %v3471_v15 = vld [vmem:[%s4204_s14 + $0x2b8] sm:$0xff]   ;;  %v3475_v19 = vld [vmem:[%s4204_s14 + $0x2b0] sm:$0xff]   ;;  %v3477_v21 = vld [vmem:[%s4204_s14 + $0x2e8] sm:$0xff]  }
  0xe4   : > { %v3478_v22 = vld [vmem:[%s4204_s14 + $0x228] sm:$0xff]   ;;  %v3480_v24 = vld [vmem:[%s4204_s14 + $0x260] sm:$0xff]   ;;  %v3488_v32 = vld [vmem:[%s4204_s14 + $0x250] sm:$0xff]  }
  0xe5   : > { %3177 = vmatpush3.bf16.msra.mxu0 %v3422_v26  ;;  %v3479_v23 = vld [vmem:[%s4204_s14 + $0x2a8] sm:$0xff]   ;;  %v3481_v25 = vld [vmem:[%s4204_s14 + $0x2e0] sm:$0xff]   ;;  %v3489_v33 = vld [vmem:[%s4204_s14 + $0x2d0] sm:$0xff]  }
  0xe6   : > { %3199 = vmatpush3.bf16.msra.mxu1 %v3423_v27  ;;  %3178 = vmatprep.subr.bf16.mxu0 %v3424_v28  ;;  %v3482_v26 = vld [vmem:[%s4204_s14 + $0x220] sm:$0xff]   ;;  %v3484_v28 = vld [vmem:[%s4204_s14 + $0x258] sm:$0xff]   ;;  %v3491_v35 = vld [vmem:[%s4204_s14 + $0x290] sm:$0xff]  }
  0xe7   : > { %3200 = vmatprep.subr.bf16.mxu1 %v3425_v29  ;;  %v3483_v27 = vld [vmem:[%s4204_s14 + $0x2a0] sm:$0xff]   ;;  %v3485_v29 = vld [vmem:[%s4204_s14 + $0x2d8] sm:$0xff]   ;;  %v3493_v37 = vld [vmem:[%s4204_s14 + $0x2c8] sm:$0xff]  }
  0xe8   : > { %v3524_v6 = vld [vmem:[%s4204_s14 + $0x350] sm:$0xff]  }
  0xe9   : > { %3179 = vmatpush3.bf16.msra.mxu0 %v3426_v30  ;;  %v3486_v30 = vld [vmem:[%s4204_s14 + $0x218] sm:$0xff]   ;;  %v3527_v9 = vld [vmem:[%s4204_s14 + $0x390] sm:$0xff]  }
  0xea   : > { %3201 = vmatpush3.bf16.msra.mxu1 %v3427_v31  ;;  %3208 = vmatprep.subr.bf16.mxu0 %v3432_v38  ;;  %v3487_v31 = vld [vmem:[%s4204_s14 + $0x298] sm:$0xff]   ;;  %v3494_v38 = vld [vmem:[%s4204_s14 + $0x208] sm:$0xff]  }
  0xeb   : > { %3230 = vmatprep.subr.bf16.mxu1 %v3433_v39  ;;  %v3495_v39 = vld [vmem:[%s4204_s14 + $0x288] sm:$0xff]  }
  0xec   : > { %2489 = vmatmul.mubr.bf16.vlgmr.msra.gmra.mxu0 %v3014_v34  ;;  %v3490_v34 = vld [vmem:[%s4204_s14 + $0x210] sm:$0xff]  }
  0xed   : > { %2529 = vmatmul.mubr.bf16.vlgmr.msra.gmra.mxu1 %v3016_v36  ;;  %3209 = vmatpush3.bf16.msra.mxu0 %v3434_v40  ;;  %v3492_v36 = vld [vmem:[%s4204_s14 + $0x248] sm:$0xff]   ;;  %v3496_v40 = vld [vmem:[%s4204_s14 + $0x240] sm:$0xff]  }
  0xee   : > { %3231 = vmatpush3.bf16.msra.mxu1 %v3435_v41  ;;  %3210 = vmatprep.subr.bf16.mxu0 %v3436_v42  ;;  %v3497_v41 = vld [vmem:[%s4204_s14 + $0x2c0] sm:$0xff]  }
  0xef   : > { %3232 = vmatprep.subr.bf16.mxu1 %v3437_v43  ;;  %2568 = vmatprep.mubr.bf16.mxu0 %v3019_v8  ;;  %v3498_v42 = vld [vmem:[%s4204_s14 + $0x200] sm:$0xff]   ;;  %v3526_v8 = vld [vmem:[%s4204_s14 + $0x310] sm:$0xff]  }
  0xf0   : > { %2608 = vmatprep.mubr.bf16.mxu1 %v3021_v11  ;;  %v3499_v43 = vld [vmem:[%s4204_s14 + $0x280] sm:$0xff]   ;;  %v3529_v11 = vld [vmem:[%s4204_s14 + $0x3c8] sm:$0xff]  }
  0xf1   : > { %3211 = vmatpush3.bf16.msra.mxu0 %v3438_v44  ;;  %v1372_v44 = vld [vmem:[%s4254_s12 + $0x20] sm:$0xff] }
  0xf2   : > { %3233 = vmatpush3.bf16.msra.mxu1 %v3439_v45  ;;  %3212 = vmatprep.subr.bf16.mxu0 %v3440_v46  ;;  %v1373_v45 = vld [vmem:[%s4254_s12 + $0x28] sm:$0xff]  ;;  %v3022_v46 = vcombine.low %v1372_v44, %v1372_v44 }
  0xf3   : > { %3234 = vmatprep.subr.bf16.mxu1 %v3441_v47  ;;  %v3023_v47 = vcombine.high %v1372_v44, %v1372_v44 }
  0xf5   : > { %3213 = vmatpush3.bf16.msra.mxu0 %v3442_v48  ;;  %v3024_v48 = vcombine.low %v1373_v45, %v1373_v45 }
  0xf6   : > { %3235 = vmatpush3.bf16.msra.mxu1 %v3443_v49  ;;  %3214 = vmatprep.subr.bf16.mxu0 %v3444_v50  ;;  %v3025_v49 = vcombine.high %v1373_v45, %v1373_v45  ;;  %v3504_v50 = vld [vmem:[%s4204_s14 + $0x378] sm:$0xff]  }
  0xf7   : > { %3236 = vmatprep.subr.bf16.mxu1 %v3445_v51  ;;  %v3505_v51 = vld [vmem:[%s4204_s14 + $0x3f8] sm:$0xff]  }
  0xf9   : > { %3215 = vmatpush3.bf16.msra.mxu0 %v3446_v52  ;;  %v3506_v52 = vld [vmem:[%s4204_s14 + $0x338] sm:$0xff]  }
  0xfa   : > { %3237 = vmatpush3.bf16.msra.mxu1 %v3447_v53  ;;  %3216 = vmatprep.subr.bf16.mxu0 %v3448_v54  ;;  %v3507_v53 = vld [vmem:[%s4204_s14 + $0x3b8] sm:$0xff]   ;;  %v3508_v54 = vld [vmem:[%s4204_s14 + $0x370] sm:$0xff]  }
  0xfb   : > { %3238 = vmatprep.subr.bf16.mxu1 %v3449_v55  ;;  %v3509_v55 = vld [vmem:[%s4204_s14 + $0x3f0] sm:$0xff]  }
  0xfd   : > { %3217 = vmatpush3.bf16.msra.mxu0 %v3450_v56  ;;  %v3510_v56 = vld [vmem:[%s4204_s14 + $0x330] sm:$0xff]  }
  0xfe   : > { %3239 = vmatpush3.bf16.msra.mxu1 %v3451_v57  ;;  %3218 = vmatprep.subr.bf16.mxu0 %v3452_v58  ;;  %v3511_v57 = vld [vmem:[%s4204_s14 + $0x3b0] sm:$0xff]   ;;  %v3512_v58 = vld [vmem:[%s4204_s14 + $0x368] sm:$0xff]  }
  0xff   : > { %3240 = vmatprep.subr.bf16.mxu1 %v3453_v59  ;;  %v3513_v59 = vld [vmem:[%s4204_s14 + $0x3e8] sm:$0xff]  }
 0x101   : > { %3219 = vmatpush3.bf16.msra.mxu0 %v3454_v60  ;;  %v3514_v60 = vld [vmem:[%s4204_s14 + $0x328] sm:$0xff]  }
 0x102   : > { %3241 = vmatpush3.bf16.msra.mxu1 %v3455_v61  ;;  %3220 = vmatprep.subr.bf16.mxu0 %v3456_v62  ;;  %v3515_v61 = vld [vmem:[%s4204_s14 + $0x3a8] sm:$0xff]   ;;  %v3516_v62 = vld [vmem:[%s4204_s14 + $0x360] sm:$0xff]  }
 0x103   : > { %3242 = vmatprep.subr.bf16.mxu1 %v3457_v63  ;;  %v3517_v63 = vld [vmem:[%s4204_s14 + $0x3e0] sm:$0xff]  }
 0x105   : > { %3221 = vmatpush3.bf16.msra.mxu0 %v3458_v0  ;;  %v3518_v0 = vld [vmem:[%s4204_s14 + $0x320] sm:$0xff]  }
 0x106   : > { %3243 = vmatpush3.bf16.msra.mxu1 %v3459_v1  ;;  %3222 = vmatprep.subr.bf16.mxu0 %v3460_v2  ;;  %v3519_v1 = vld [vmem:[%s4204_s14 + $0x3a0] sm:$0xff]   ;;  %v3520_v2 = vld [vmem:[%s4204_s14 + $0x358] sm:$0xff]  }
 0x107   : > { %3244 = vmatprep.subr.bf16.mxu1 %v3461_v3  ;;  %v3521_v3 = vld [vmem:[%s4204_s14 + $0x3d8] sm:$0xff]  }
 0x109   : > { %3223 = vmatpush3.bf16.msra.mxu0 %v3462_v4  ;;  %v3522_v4 = vld [vmem:[%s4204_s14 + $0x318] sm:$0xff]  }
 0x10a   : > { %3245 = vmatpush3.bf16.msra.mxu1 %v3463_v5  ;;  %3252 = vmatprep.subr.bf16.mxu0 %v3468_v12  ;;  %v3523_v5 = vld [vmem:[%s4204_s14 + $0x398] sm:$0xff]   ;;  %v3530_v12 = vld [vmem:[%s4204_s14 + $0x308] sm:$0xff]  }
 0x10b   : > { %3274 = vmatprep.subr.bf16.mxu1 %v3469_v13  ;;  %v3531_v13 = vld [vmem:[%s4204_s14 + $0x388] sm:$0xff]  }
 0x10c   : > { %2569 = vmatmul.mubr.bf16.vlgmr.msra.gmra.mxu0 %v3018_v7  ;;  %v3525_v7 = vld [vmem:[%s4204_s14 + $0x3d0] sm:$0xff]  }
 0x10d   : > { %2609 = vmatmul.mubr.bf16.vlgmr.msra.gmra.mxu1 %v3020_v10  ;;  %3253 = vmatpush3.bf16.msra.mxu0 %v3470_v14  ;;  %v3528_v10 = vld [vmem:[%s4204_s14 + $0x348] sm:$0xff]   ;;  %v3532_v14 = vld [vmem:[%s4204_s14 + $0x340] sm:$0xff]  }
 0x10e   : > { %3275 = vmatpush3.bf16.msra.mxu1 %v3471_v15  ;;  %3254 = vmatprep.subr.bf16.mxu0 %v3472_v16  ;;  %v3533_v15 = vld [vmem:[%s4204_s14 + $0x3c0] sm:$0xff]  }
 0x10f   : > { %3276 = vmatprep.subr.bf16.mxu1 %v3473_v17  ;;  %2648 = vmatprep.mubr.bf16.mxu0 %v3023_v47  ;;  %v3534_v16 = vld [vmem:[%s4204_s14 + $0x300] sm:$0xff]  }
 0x110   : > { %2688 = vmatprep.mubr.bf16.mxu1 %v3025_v49  ;;  %v3535_v17 = vld [vmem:[%s4204_s14 + $0x380] sm:$0xff]  }
 0x111   : > { %3255 = vmatpush3.bf16.msra.mxu0 %v3474_v18  ;;  %v1374_v18 = vld [vmem:[%s4254_s12 + $0x30] sm:$0xff] }
 0x112   : > { %3277 = vmatpush3.bf16.msra.mxu1 %v3475_v19  ;;  %3256 = vmatprep.subr.bf16.mxu0 %v3476_v20  ;;  %v1375_v19 = vld [vmem:[%s4254_s12 + $0x38] sm:$0xff]  ;;  %v3026_v20 = vcombine.low %v1374_v18, %v1374_v18 }
 0x113   : > { %3278 = vmatprep.subr.bf16.mxu1 %v3477_v21  ;;  %v3027_v21 = vcombine.high %v1374_v18, %v1374_v18 }
 0x115   : > { %3257 = vmatpush3.bf16.msra.mxu0 %v3478_v22  ;;  %v3028_v22 = vcombine.low %v1375_v19, %v1375_v19 }
 0x116   : > { %3279 = vmatpush3.bf16.msra.mxu1 %v3479_v23  ;;  %3258 = vmatprep.subr.bf16.mxu0 %v3480_v24  ;;  %v3029_v23 = vcombine.high %v1375_v19, %v1375_v19 }
 0x117   : > { %3280 = vmatprep.subr.bf16.mxu1 %v3481_v25 }
 0x119   : > { %3259 = vmatpush3.bf16.msra.mxu0 %v3482_v26 }
 0x11a   : > { %3281 = vmatpush3.bf16.msra.mxu1 %v3483_v27  ;;  %3260 = vmatprep.subr.bf16.mxu0 %v3484_v28 }
 0x11b   : > { %3282 = vmatprep.subr.bf16.mxu1 %v3485_v29 }
 0x11d   : > { %3261 = vmatpush3.bf16.msra.mxu0 %v3486_v30 }
 0x11e   : > { %3283 = vmatpush3.bf16.msra.mxu1 %v3487_v31  ;;  %3262 = vmatprep.subr.bf16.mxu0 %v3488_v32 }
 0x11f   : > { %3284 = vmatprep.subr.bf16.mxu1 %v3489_v33 }
 0x121   : > { %3263 = vmatpush3.bf16.msra.mxu0 %v3490_v34 }
 0x122   : > { %3285 = vmatpush3.bf16.msra.mxu1 %v3491_v35  ;;  %3264 = vmatprep.subr.bf16.mxu0 %v3492_v36 }
 0x123   : > { %3286 = vmatprep.subr.bf16.mxu1 %v3493_v37 }
 0x125   : > { %3265 = vmatpush3.bf16.msra.mxu0 %v3494_v38 }
 0x126   : > { %3287 = vmatpush3.bf16.msra.mxu1 %v3495_v39  ;;  %3266 = vmatprep.subr.bf16.mxu0 %v3496_v40 }
 0x127   : > { %3288 = vmatprep.subr.bf16.mxu1 %v3497_v41 }
 0x129   : > { %3267 = vmatpush3.bf16.msra.mxu0 %v3498_v42 }
 0x12a   : > { %3289 = vmatpush3.bf16.msra.mxu1 %v3499_v43  ;;  %3296 = vmatprep.subr.bf16.mxu0 %v3504_v50 }
 0x12b   : > { %3318 = vmatprep.subr.bf16.mxu1 %v3505_v51 }
 0x12c   : > { %2649 = vmatmul.mubr.bf16.vlgmr.msra.gmra.mxu0 %v3022_v46 }
 0x12d   : > { %2689 = vmatmul.mubr.bf16.vlgmr.msra.gmra.mxu1 %v3024_v48  ;;  %3297 = vmatpush3.bf16.msra.mxu0 %v3506_v52 }
 0x12e   : > { %3319 = vmatpush3.bf16.msra.mxu1 %v3507_v53  ;;  %3298 = vmatprep.subr.bf16.mxu0 %v3508_v54 }
 0x12f   : > { %3320 = vmatprep.subr.bf16.mxu1 %v3509_v55  ;;  %2728 = vmatprep.mubr.bf16.mxu0 %v3027_v21 }
 0x130   : > { %2768 = vmatprep.mubr.bf16.mxu1 %v3029_v23 }
 0x131   : > { %3299 = vmatpush3.bf16.msra.mxu0 %v3510_v56 }
 0x132   : > { %3321 = vmatpush3.bf16.msra.mxu1 %v3511_v57  ;;  %3300 = vmatprep.subr.bf16.mxu0 %v3512_v58 }
 0x133   : > { %3322 = vmatprep.subr.bf16.mxu1 %v3513_v59 }
 0x135   : > { %3301 = vmatpush3.bf16.msra.mxu0 %v3514_v60 }
 0x136   : > { %3323 = vmatpush3.bf16.msra.mxu1 %v3515_v61  ;;  %3302 = vmatprep.subr.bf16.mxu0 %v3516_v62 }
 0x137   : > { %3324 = vmatprep.subr.bf16.mxu1 %v3517_v63 }
 0x139   : > { %3303 = vmatpush3.bf16.msra.mxu0 %v3518_v0 }
 0x13a   : > { %3325 = vmatpush3.bf16.msra.mxu1 %v3519_v1  ;;  %3304 = vmatprep.subr.bf16.mxu0 %v3520_v2 }
 0x13b   : > { %3326 = vmatprep.subr.bf16.mxu1 %v3521_v3 }
 0x13d   : > { %3305 = vmatpush3.bf16.msra.mxu0 %v3522_v4 }
 0x13e   : > { %3327 = vmatpush3.bf16.msra.mxu1 %v3523_v5  ;;  %3306 = vmatprep.subr.bf16.mxu0 %v3524_v6 }
 0x13f   : > { %3328 = vmatprep.subr.bf16.mxu1 %v3525_v7 }
 0x141   : > { %3307 = vmatpush3.bf16.msra.mxu0 %v3526_v8 }
 0x142   : > { %3329 = vmatpush3.bf16.msra.mxu1 %v3527_v9  ;;  %3308 = vmatprep.subr.bf16.mxu0 %v3528_v10 }
 0x143   : > { %3330 = vmatprep.subr.bf16.mxu1 %v3529_v11 }
 0x145   : > { %3309 = vmatpush3.bf16.msra.mxu0 %v3530_v12 }
 0x146   : > { %3331 = vmatpush3.bf16.msra.mxu1 %v3531_v13  ;;  %3310 = vmatprep.subr.bf16.mxu0 %v3532_v14 }
 0x147   : > { %3332 = vmatprep.subr.bf16.mxu1 %v3533_v15 }
 0x149   : > { %3311 = vmatpush3.bf16.msra.mxu0 %v3534_v16 }
 0x14a   : > { %3333 = vmatpush3.bf16.msra.mxu1 %v3535_v17 }
 0x14c   : > { %2729 = vmatmul.mubr.bf16.vlgmr.msra.gmra.mxu0 %v3026_v20 }
 0x14d   : > { %2769 = vmatmul.mubr.bf16.vlgmr.msra.gmra.mxu1 %v3028_v22 }
 0x1ac   : > { %v3180_v24 = vpop.f32.mrf.mxu0 }
 0x1ad   : > { %v3202_v25 = vpop.f32.mrf.mxu1 }
 0x1ae   : > { %v3181_v26 = vpop.f32.mrf.mxu0 }
 0x1af   : > { %v3203_v27 = vpop.f32.mrf.mxu1  ;;  %v3182_v28 = vadd.f32 %v3181_v26, %v3180_v24 }
 0x1b0   : > { %v3204_v29 = vadd.f32 %v3203_v27, %v3202_v25  ;;  %v3183_v30 = vpop.f32.mrf.mxu0 }
 0x1b1   : > { %v3205_v31 = vpop.f32.mrf.mxu1 }
 0x1b2   : > { %v2531_v32 = vadd.f32 %v3204_v29, %v3182_v28  ;;  %v3184_v33 = vpop.f32.mrf.mxu0 }
 0x1b3   : > { %v3206_v34 = vpop.f32.mrf.mxu1 }
 0x1cc   : > { %v3224_v35 = vpop.f32.mrf.mxu0 }
 0x1cd   : > { %v3246_v36 = vpop.f32.mrf.mxu1 }
 0x1ce   : > { %v3225_v37 = vpop.f32.mrf.mxu0 }
 0x1cf   : > { %v3247_v38 = vpop.f32.mrf.mxu1  ;;  %v3226_v51 = vadd.f32 %v3225_v37, %v3224_v35 }
 0x1d0   : > { %v3227_v39 = vpop.f32.mrf.mxu0  ;;  %v3248_v53 = vadd.f32 %v3247_v38, %v3246_v36 }
 0x1d1   : > { %v3249_v40 = vpop.f32.mrf.mxu1  ;;  %v2571_v52 = vadd.f32 %v3226_v51, %v2531_v32 }
 0x1d2   : > { %v3228_v41 = vpop.f32.mrf.mxu0 }
 0x1d3   : > { %v3250_v42 = vpop.f32.mrf.mxu1  ;;  %v2611_v55 = vadd.f32 %v3248_v53, %v2571_v52 }
 0x1ec   : > { %v3268_v43 = vpop.f32.mrf.mxu0 }
 0x1ed   : > { %v3290_v44 = vpop.f32.mrf.mxu1 }
 0x1ee   : > { %v3269_v45 = vpop.f32.mrf.mxu0 }
 0x1ef   : > { %v3291_v46 = vpop.f32.mrf.mxu1  ;;  %v3270_v54 = vadd.f32 %v3269_v45, %v3268_v43 }
 0x1f0   : > { %v3271_v47 = vpop.f32.mrf.mxu0  ;;  %v3292_v58 = vadd.f32 %v3291_v46, %v3290_v44 }
 0x1f1   : > { %v3293_v48 = vpop.f32.mrf.mxu1  ;;  %v2651_v56 = vadd.f32 %v3270_v54, %v2611_v55 }
 0x1f2   : > { %v3272_v49 = vpop.f32.mrf.mxu0 }
 0x1f3   : > { %v3294_v50 = vpop.f32.mrf.mxu1  ;;  %v2691_v61 = vadd.f32 %v3292_v58, %v2651_v56 }
 0x20c   : > { %v3312_v57 = vpop.f32.mrf.mxu0 }
 0x20d   : > { %v3334_v59 = vpop.f32.mrf.mxu1 }
 0x20e   : > { %v3313_v60 = vpop.f32.mrf.mxu0 }
 0x20f   : > { %v3314_v62 = vadd.f32 %v3313_v60, %v3312_v57  ;;  %v3335_v63 = vpop.f32.mrf.mxu1  ;;  %2779 = sbr.rel (%p3158_p12) target bundleno = 534 (0x216), region = 73 }
 0x210   : > { %v3315_v0 = vpop.f32.mrf.mxu0  ;;  %v3336_v2 = vadd.f32 %v3335_v63, %v3334_v59 }
 0x211   : > { %v2731_v1 = vadd.f32 %v3314_v62, %v2691_v61  ;;  %v3337_v3 = vpop.f32.mrf.mxu1 }
 0x212   : > { %v3316_v4 = vpop.f32.mrf.mxu0 }
 0x213   : > { %v2771_v5 = vadd.f32 %v3336_v2, %v2731_v1  ;;  %v3338_v6 = vpop.f32.mrf.mxu1 }
 0x215   : > { %2780 = vst [vmem:[#allocation2] sm:$0xff] %v2771_v5 }
 0x216 PF: > { %p3159_p13 = scmp.le.s32.totalorder %s3578_s17, 0 }
 0x218   : > { %2784 = sbr.rel (%p3159_p13) target bundleno = 545 (0x221), region = 77 }
 0x21d   : > { %v2785_v7 = vld [vmem:[#allocation2] sm:$0xff] }
 0x21e   : > { %v2786_v8 = vadd.f32 %v2785_v7, %v2771_v5 }
 0x220   : > { %2787 = vst [vmem:[#allocation2] sm:$0xff] %v2786_v8 }
 0x221 PF: > { %p3160_p0 = scmp.ne.s32.totalorder %s3578_s17, 3 }
 0x223   : > { %2791 = sbr.rel (%p3160_p0) target bundleno = 568 (0x238), region = 81 }
 0x228   : > { %v2792_v9 = vld [vmem:[#allocation2] sm:$0xff] }
 0x229   : > { %v2793_v10 = vrot.slane %v2792_v9, 4  ;;  %v2800_v11 = vmul.f32 %v2792_v9, %v2792_v9  ;;  %v2808_v12 = vpack.c.bf16 %v2792_v9, %v2792_v9 }
 0x22b   : > { %v2794_v13 = vadd.f32 %v2793_v10, %v2792_v9  ;;  %v2801_v14 = vrot.slane %v2800_v11, 4  ;;  %2809 = vst [vmem:[%s4217_s30] sm:$0xf] %v2808_v12 }
 0x22d   : > { %v2795_v15 = vrot.slane %v2794_v13, 2  ;;  %v2802_v16 = vadd.f32 %v2801_v14, %v2800_v11 }
 0x22f   : > { %v2796_v17 = vadd.f32 %v2795_v15, %v2794_v13  ;;  %v2803_v18 = vrot.slane %v2802_v16, 2 }
 0x231   : > { %v2797_v19 = vrot.slane %v2796_v17, 1  ;;  %v2804_v20 = vadd.f32 %v2803_v18, %v2802_v16 }
 0x233   : > { %v2798_v21 = vadd.f32 %v2797_v19, %v2796_v17  ;;  %v2805_v22 = vrot.slane %v2804_v20, 1 }
 0x235   : > { %2799 = vst [vmem:[%s1359_s26] sm:$0x1] %v2798_v21  ;;  %v2806_v23 = vadd.f32 %v2805_v22, %v2804_v20 }
 0x237   : > { %2807 = vst [vmem:[%s1366_s7] sm:$0x1] %v2806_v23 }
 0x238 PF: > { %s15_s21 = sadd.s32 1, %s3594_s21   ;;  %s4402_s15 = smov %s3574_s16 }
 0x239   : > { %p12_p1 = scmp.ge.s32.totalorder %s15_s21, 18   ;;  %s4403_s16 = smov %s3672_s28 }
 0x23a   : > { %s4404_s17 = smov %s3586_s19  ;;  %s4405_s18 = smov %s3590_s20 }
 0x23b   : > { %s4406_s19 = smov %s4409_s22  ;;  %s4407_s20 = smov %s4413_s23 }
 0x23c   :  { %14 = sbr.rel (!%p12_p1) target bundleno = 4 (0x4), region = 143 }

// kernel: classifier_content_forward.11
= control target key start
LH: loop header
LB: loop body
LE: loop exit
PB: predicated region body
PF: predicated region fallthrough
CT: control target
= control target key end

     0   :  { %s2347_s12 = smov 0   ;;  %s2349_s13 = smov 0   ;;  %s2533_s0 = inlined_call_operand.vmem [shape: bf16[8,6144], index: 0, kind: input, shape index: {}]   ;;  %s2534_s1 = inlined_call_operand.vmem [shape: bf16[6144,128], index: 1, kind: input, shape index: {}]   ;;  %s2535_s2 = inlined_call_operand.vmem [shape: f32[1,128], index: 2, kind: input, shape index: {}]   ;;  %s2536_s3 = inlined_call_operand.vmem [shape: f32[8,128], index: 3, kind: output, shape index: {}]  }
   0x1   :  { %s2351_s14 = smov 0  }
   0x2 LB: > { %s25_s15 = sadd.s32 1, %s2321_s13  ;;  %p1803_p0 = scmp.ge.s32.totalorder %s2325_s14, 1  ;;  %s2325_s14 = sphi %s2351_s14, %s13_s14   ;;  %s2321_s13 = sphi %s2349_s13, %s2538_s13   ;;  %s2317_s12 = sphi %s2347_s12, %s2537_s12  }
   0x3   : > { %p26_p1 = scmp.ge.s32.totalorder %s25_s15, 3  ;;  %p189_p2 = scmp.lt.s32.totalorder %s2325_s14, 4 }
   0x5   : > { %s2540_s15 = smov (%p26_p1, %s25_s15), 0  ;;  %p190_p3 = pnand %p1803_p0, %p189_p2 }
   0x6   : > { %s1806_s16 = sshll.u32 (!%p190_p3), %s2317_s12, 8  ;;  %s1804_s21 = sshll.u32 (!%p190_p3), %s2317_s12, 4 }
   0x7   : > { %193 = sbr.rel (%p190_p3) target bundleno = 370 (0x172), region = 32  ;;  %p241_p4 = scmp.lt.s32.totalorder (!%p190_p3), %s1806_s16, 767 }
   0x8   : > { %p233_p5 = scmp.lt.s32.totalorder (!%p190_p3), %s1804_s21, 47  ;;  %p1952_p6 = scmp.ne.s32.totalorder (!%p190_p3), %s2317_s12, 0 }
   0xc   : > { %s2542_s16 = smov (!%p241_p4, %s1806_s16), 767  ;;  %s2544_s21 = smov (!%p233_p5, %s1804_s21), 47 }
   0xd   : > { %s1807_s17 = sshll.u32 %s2542_s16, 2  ;;  %s1805_s22 = sshll.u32 %s2544_s21, 2 }
   0xe   : > { %s2371_s20 = scalar_lea.vmem %s2534_s1, %s1807_s17  ;;  %s2407_s25 = scalar_lea.vmem %s2533_s0, %s1805_s22 }
   0xf   : > { %v2159_v0 = vld [vmem:[%s2371_s20 + $0x78] sm:$0xff]   ;;  %v2163_v4 = vld [vmem:[%s2371_s20 + $0x70] sm:$0xff]   ;;  %v2167_v8 = vld [vmem:[%s2371_s20 + $0x68] sm:$0xff]  }
  0x10   : > { %v2160_v1 = vld [vmem:[%s2371_s20 + $0xf8] sm:$0xff]   ;;  %1959 = vmatprep.subr.bf16.mxu0 %v2159_v0  ;;  %v2164_v5 = vld [vmem:[%s2371_s20 + $0xf0] sm:$0xff]   ;;  %v2168_v9 = vld [vmem:[%s2371_s20 + $0xe8] sm:$0xff]  }
  0x11   : > { %v2161_v2 = vld [vmem:[%s2371_s20 + $0x38] sm:$0xff]   ;;  %1981 = vmatprep.subr.bf16.mxu1 %v2160_v1  ;;  %v2165_v6 = vld [vmem:[%s2371_s20 + $0x30] sm:$0xff]   ;;  %v2169_v10 = vld [vmem:[%s2371_s20 + $0x28] sm:$0xff]  }
  0x12   : > { %v2162_v3 = vld [vmem:[%s2371_s20 + $0xb8] sm:$0xff]   ;;  %1960 = vmatpush3.bf16.msra.mxu0 %v2161_v2  ;;  %v2166_v7 = vld [vmem:[%s2371_s20 + $0xb0] sm:$0xff]   ;;  %v2170_v11 = vld [vmem:[%s2371_s20 + $0xa8] sm:$0xff]  }
  0x13   : > { %1982 = vmatpush3.bf16.msra.mxu1 %v2162_v3  ;;  %1961 = vmatprep.subr.bf16.mxu0 %v2163_v4  ;;  %v2171_v12 = vld [vmem:[%s2371_s20 + $0x60] sm:$0xff]   ;;  %v2175_v16 = vld [vmem:[%s2371_s20 + $0x58] sm:$0xff]   ;;  %v2179_v20 = vld [vmem:[%s2371_s20 + $0x50] sm:$0xff]  }
  0x14   : > { %1983 = vmatprep.subr.bf16.mxu1 %v2164_v5  ;;  %v2172_v13 = vld [vmem:[%s2371_s20 + $0xe0] sm:$0xff]   ;;  %v2176_v17 = vld [vmem:[%s2371_s20 + $0xd8] sm:$0xff]   ;;  %v2180_v21 = vld [vmem:[%s2371_s20 + $0xd0] sm:$0xff]  }
  0x15   : > { %v2173_v14 = vld [vmem:[%s2371_s20 + $0x20] sm:$0xff]   ;;  %v2177_v18 = vld [vmem:[%s2371_s20 + $0x18] sm:$0xff]   ;;  %v2181_v22 = vld [vmem:[%s2371_s20 + $0x10] sm:$0xff]  }
  0x16   : > { %1962 = vmatpush3.bf16.msra.mxu0 %v2165_v6  ;;  %v2174_v15 = vld [vmem:[%s2371_s20 + $0xa0] sm:$0xff]   ;;  %v2178_v19 = vld [vmem:[%s2371_s20 + $0x98] sm:$0xff]   ;;  %v2182_v23 = vld [vmem:[%s2371_s20 + $0x90] sm:$0xff]  }
  0x17   : > { %1984 = vmatpush3.bf16.msra.mxu1 %v2166_v7  ;;  %1963 = vmatprep.subr.bf16.mxu0 %v2167_v8  ;;  %v2183_v24 = vld [vmem:[%s2371_s20 + $0x48] sm:$0xff]   ;;  %v2187_v28 = vld [vmem:[%s2371_s20 + $0x40] sm:$0xff]   ;;  %v2195_v38 = vld [vmem:[%s2371_s20 + $0x178] sm:$0xff]  }
  0x18   : > { %1985 = vmatprep.subr.bf16.mxu1 %v2168_v9  ;;  %v2184_v25 = vld [vmem:[%s2371_s20 + $0xc8] sm:$0xff]   ;;  %v2188_v29 = vld [vmem:[%s2371_s20 + $0xc0] sm:$0xff]   ;;  %v2196_v39 = vld [vmem:[%s2371_s20 + $0x1f8] sm:$0xff]  }
  0x19   : > { %v2185_v26 = vld [vmem:[%s2371_s20 + $0x8] sm:$0xff]   ;;  %v2189_v30 = vld [vmem:[%s2371_s20] sm:$0xff]   ;;  %v2197_v40 = vld [vmem:[%s2371_s20 + $0x138] sm:$0xff]  }
  0x1a   : > { %1964 = vmatpush3.bf16.msra.mxu0 %v2169_v10  ;;  %v2186_v27 = vld [vmem:[%s2371_s20 + $0x88] sm:$0xff]   ;;  %v2190_v31 = vld [vmem:[%s2371_s20 + $0x80] sm:$0xff]   ;;  %v2198_v41 = vld [vmem:[%s2371_s20 + $0x1b8] sm:$0xff]  }
  0x1b   : > { %1986 = vmatpush3.bf16.msra.mxu1 %v2170_v11  ;;  %1965 = vmatprep.subr.bf16.mxu0 %v2171_v12  ;;  %v260_v32 = vld [vmem:[%s2407_s25] sm:$0xff]  ;;  %v261_v33 = vld [vmem:[%s2407_s25 + $0x8] sm:$0xff]  ;;  %v2199_v42 = vld [vmem:[%s2371_s20 + $0x170] sm:$0xff]  }
  0x1c   : > { %1987 = vmatprep.subr.bf16.mxu1 %v2172_v13  ;;  %v1808_v34 = vcombine.low %v260_v32, %v260_v32  ;;  %v1809_v35 = vcombine.high %v260_v32, %v260_v32  ;;  %v1810_v36 = vcombine.low %v261_v33, %v261_v33  ;;  %v1811_v37 = vcombine.high %v261_v33, %v261_v33  ;;  %v2200_v43 = vld [vmem:[%s2371_s20 + $0x1f0] sm:$0xff]   ;;  %v2203_v46 = vld [vmem:[%s2371_s20 + $0x168] sm:$0xff]   ;;  %v2207_v50 = vld [vmem:[%s2371_s20 + $0x160] sm:$0xff]  }
  0x1d   : > { %v2201_v44 = vld [vmem:[%s2371_s20 + $0x130] sm:$0xff]   ;;  %v2204_v47 = vld [vmem:[%s2371_s20 + $0x1e8] sm:$0xff]   ;;  %v2208_v51 = vld [vmem:[%s2371_s20 + $0x1e0] sm:$0xff]  }
  0x1e   : > { %1966 = vmatpush3.bf16.msra.mxu0 %v2173_v14  ;;  %1380 = vmatprep.mubr.bf16.mxu0 %v1809_v35  ;;  %v2202_v45 = vld [vmem:[%s2371_s20 + $0x1b0] sm:$0xff]   ;;  %v2205_v48 = vld [vmem:[%s2371_s20 + $0x128] sm:$0xff]   ;;  %v2209_v52 = vld [vmem:[%s2371_s20 + $0x120] sm:$0xff]  }
  0x1f   : > { %1988 = vmatpush3.bf16.msra.mxu1 %v2174_v15  ;;  %1967 = vmatprep.subr.bf16.mxu0 %v2175_v16  ;;  %v2206_v49 = vld [vmem:[%s2371_s20 + $0x1a8] sm:$0xff]   ;;  %v2210_v53 = vld [vmem:[%s2371_s20 + $0x1a0] sm:$0xff]   ;;  %v2211_v54 = vld [vmem:[%s2371_s20 + $0x158] sm:$0xff]  }
  0x20   : > { %1989 = vmatprep.subr.bf16.mxu1 %v2176_v17  ;;  %1420 = vmatprep.mubr.bf16.mxu1 %v1811_v37  ;;  %v2212_v55 = vld [vmem:[%s2371_s20 + $0x1d8] sm:$0xff]   ;;  %v2215_v58 = vld [vmem:[%s2371_s20 + $0x150] sm:$0xff]   ;;  %v2219_v62 = vld [vmem:[%s2371_s20 + $0x148] sm:$0xff]  }
  0x21   : > { %v2213_v56 = vld [vmem:[%s2371_s20 + $0x118] sm:$0xff]   ;;  %v2216_v59 = vld [vmem:[%s2371_s20 + $0x1d0] sm:$0xff]   ;;  %v2220_v63 = vld [vmem:[%s2371_s20 + $0x1c8] sm:$0xff]  }
  0x22   : > { %1968 = vmatpush3.bf16.msra.mxu0 %v2177_v18  ;;  %v2214_v57 = vld [vmem:[%s2371_s20 + $0x198] sm:$0xff]   ;;  %v2217_v60 = vld [vmem:[%s2371_s20 + $0x110] sm:$0xff]   ;;  %v2221_v0 = vld [vmem:[%s2371_s20 + $0x108] sm:$0xff]  }
  0x23   : > { %1990 = vmatpush3.bf16.msra.mxu1 %v2178_v19  ;;  %1969 = vmatprep.subr.bf16.mxu0 %v2179_v20  ;;  %v2218_v61 = vld [vmem:[%s2371_s20 + $0x190] sm:$0xff]   ;;  %v2222_v1 = vld [vmem:[%s2371_s20 + $0x188] sm:$0xff]   ;;  %v2223_v2 = vld [vmem:[%s2371_s20 + $0x140] sm:$0xff]  }
  0x24   : > { %1991 = vmatprep.subr.bf16.mxu1 %v2180_v21  ;;  %v2224_v3 = vld [vmem:[%s2371_s20 + $0x1c0] sm:$0xff]   ;;  %v262_v6 = vld [vmem:[%s2407_s25 + $0x10] sm:$0xff]  ;;  %v263_v9 = vld [vmem:[%s2407_s25 + $0x18] sm:$0xff] }
  0x25   : > { %v2225_v4 = vld [vmem:[%s2371_s20 + $0x100] sm:$0xff]   ;;  %v1812_v7 = vcombine.low %v262_v6, %v262_v6  ;;  %v1813_v8 = vcombine.high %v262_v6, %v262_v6  ;;  %v1814_v10 = vcombine.low %v263_v9, %v263_v9  ;;  %v1815_v11 = vcombine.high %v263_v9, %v263_v9  ;;  %v2231_v12 = vld [vmem:[%s2371_s20 + $0x278] sm:$0xff]   ;;  %v2235_v16 = vld [vmem:[%s2371_s20 + $0x270] sm:$0xff]  }
  0x26   : > { %1970 = vmatpush3.bf16.msra.mxu0 %v2181_v22  ;;  %v2226_v5 = vld [vmem:[%s2371_s20 + $0x180] sm:$0xff]   ;;  %v2232_v13 = vld [vmem:[%s2371_s20 + $0x2f8] sm:$0xff]   ;;  %v2236_v17 = vld [vmem:[%s2371_s20 + $0x2f0] sm:$0xff]  }
  0x27   : > { %1992 = vmatpush3.bf16.msra.mxu1 %v2182_v23  ;;  %1971 = vmatprep.subr.bf16.mxu0 %v2183_v24  ;;  %v2233_v14 = vld [vmem:[%s2371_s20 + $0x238] sm:$0xff]   ;;  %v2237_v18 = vld [vmem:[%s2371_s20 + $0x230] sm:$0xff]   ;;  %v2239_v20 = vld [vmem:[%s2371_s20 + $0x268] sm:$0xff]  }
  0x28   : > { %1993 = vmatprep.subr.bf16.mxu1 %v2184_v25  ;;  %v2234_v15 = vld [vmem:[%s2371_s20 + $0x2b8] sm:$0xff]   ;;  %v2238_v19 = vld [vmem:[%s2371_s20 + $0x2b0] sm:$0xff]   ;;  %v2240_v21 = vld [vmem:[%s2371_s20 + $0x2e8] sm:$0xff]  }
  0x29   : > { %v2241_v22 = vld [vmem:[%s2371_s20 + $0x228] sm:$0xff]   ;;  %v2243_v24 = vld [vmem:[%s2371_s20 + $0x260] sm:$0xff]   ;;  %v2251_v32 = vld [vmem:[%s2371_s20 + $0x250] sm:$0xff]  }
  0x2a   : > { %1972 = vmatpush3.bf16.msra.mxu0 %v2185_v26  ;;  %v2242_v23 = vld [vmem:[%s2371_s20 + $0x2a8] sm:$0xff]   ;;  %v2244_v25 = vld [vmem:[%s2371_s20 + $0x2e0] sm:$0xff]   ;;  %v2252_v33 = vld [vmem:[%s2371_s20 + $0x2d0] sm:$0xff]  }
  0x2b   : > { %1994 = vmatpush3.bf16.msra.mxu1 %v2186_v27  ;;  %1973 = vmatprep.subr.bf16.mxu0 %v2187_v28  ;;  %v2245_v26 = vld [vmem:[%s2371_s20 + $0x220] sm:$0xff]   ;;  %v2247_v28 = vld [vmem:[%s2371_s20 + $0x258] sm:$0xff]   ;;  %v2254_v35 = vld [vmem:[%s2371_s20 + $0x290] sm:$0xff]  }
  0x2c   : > { %1995 = vmatprep.subr.bf16.mxu1 %v2188_v29  ;;  %v2246_v27 = vld [vmem:[%s2371_s20 + $0x2a0] sm:$0xff]   ;;  %v2248_v29 = vld [vmem:[%s2371_s20 + $0x2d8] sm:$0xff]   ;;  %v2256_v37 = vld [vmem:[%s2371_s20 + $0x2c8] sm:$0xff]  }
  0x2d   : > { %v2287_v6 = vld [vmem:[%s2371_s20 + $0x350] sm:$0xff]  }
  0x2e   : > { %1974 = vmatpush3.bf16.msra.mxu0 %v2189_v30  ;;  %v2249_v30 = vld [vmem:[%s2371_s20 + $0x218] sm:$0xff]   ;;  %v2290_v9 = vld [vmem:[%s2371_s20 + $0x390] sm:$0xff]  }
  0x2f   : > { %1996 = vmatpush3.bf16.msra.mxu1 %v2190_v31  ;;  %2003 = vmatprep.subr.bf16.mxu0 %v2195_v38  ;;  %v2250_v31 = vld [vmem:[%s2371_s20 + $0x298] sm:$0xff]   ;;  %v2257_v38 = vld [vmem:[%s2371_s20 + $0x208] sm:$0xff]  }
  0x30   : > { %2025 = vmatprep.subr.bf16.mxu1 %v2196_v39  ;;  %v2258_v39 = vld [vmem:[%s2371_s20 + $0x288] sm:$0xff]  }
  0x31   : > { %1381 = vmatmul.mubr.bf16.vlgmr.msra.gmra.mxu0 %v1808_v34  ;;  %v2253_v34 = vld [vmem:[%s2371_s20 + $0x210] sm:$0xff]  }
  0x32   : > { %1421 = vmatmul.mubr.bf16.vlgmr.msra.gmra.mxu1 %v1810_v36  ;;  %2004 = vmatpush3.bf16.msra.mxu0 %v2197_v40  ;;  %v2255_v36 = vld [vmem:[%s2371_s20 + $0x248] sm:$0xff]   ;;  %v2259_v40 = vld [vmem:[%s2371_s20 + $0x240] sm:$0xff]  }
  0x33   : > { %2026 = vmatpush3.bf16.msra.mxu1 %v2198_v41  ;;  %2005 = vmatprep.subr.bf16.mxu0 %v2199_v42  ;;  %v2260_v41 = vld [vmem:[%s2371_s20 + $0x2c0] sm:$0xff]  }
  0x34   : > { %2027 = vmatprep.subr.bf16.mxu1 %v2200_v43  ;;  %1460 = vmatprep.mubr.bf16.mxu0 %v1813_v8  ;;  %v2261_v42 = vld [vmem:[%s2371_s20 + $0x200] sm:$0xff]   ;;  %v2289_v8 = vld [vmem:[%s2371_s20 + $0x310] sm:$0xff]  }
  0x35   : > { %1500 = vmatprep.mubr.bf16.mxu1 %v1815_v11  ;;  %v2262_v43 = vld [vmem:[%s2371_s20 + $0x280] sm:$0xff]   ;;  %v2292_v11 = vld [vmem:[%s2371_s20 + $0x3c8] sm:$0xff]  }
  0x36   : > { %2006 = vmatpush3.bf16.msra.mxu0 %v2201_v44  ;;  %v264_v44 = vld [vmem:[%s2407_s25 + $0x20] sm:$0xff] }
  0x37   : > { %2028 = vmatpush3.bf16.msra.mxu1 %v2202_v45  ;;  %2007 = vmatprep.subr.bf16.mxu0 %v2203_v46  ;;  %v265_v45 = vld [vmem:[%s2407_s25 + $0x28] sm:$0xff]  ;;  %v1816_v46 = vcombine.low %v264_v44, %v264_v44 }
  0x38   : > { %2029 = vmatprep.subr.bf16.mxu1 %v2204_v47  ;;  %v1817_v47 = vcombine.high %v264_v44, %v264_v44 }
  0x3a   : > { %2008 = vmatpush3.bf16.msra.mxu0 %v2205_v48  ;;  %v1818_v48 = vcombine.low %v265_v45, %v265_v45 }
  0x3b   : > { %2030 = vmatpush3.bf16.msra.mxu1 %v2206_v49  ;;  %2009 = vmatprep.subr.bf16.mxu0 %v2207_v50  ;;  %v1819_v49 = vcombine.high %v265_v45, %v265_v45  ;;  %v2267_v50 = vld [vmem:[%s2371_s20 + $0x378] sm:$0xff]  }
  0x3c   : > { %2031 = vmatprep.subr.bf16.mxu1 %v2208_v51  ;;  %v2268_v51 = vld [vmem:[%s2371_s20 + $0x3f8] sm:$0xff]  }
  0x3e   : > { %2010 = vmatpush3.bf16.msra.mxu0 %v2209_v52  ;;  %v2269_v52 = vld [vmem:[%s2371_s20 + $0x338] sm:$0xff]  }
  0x3f   : > { %2032 = vmatpush3.bf16.msra.mxu1 %v2210_v53  ;;  %2011 = vmatprep.subr.bf16.mxu0 %v2211_v54  ;;  %v2270_v53 = vld [vmem:[%s2371_s20 + $0x3b8] sm:$0xff]   ;;  %v2271_v54 = vld [vmem:[%s2371_s20 + $0x370] sm:$0xff]  }
  0x40   : > { %2033 = vmatprep.subr.bf16.mxu1 %v2212_v55  ;;  %v2272_v55 = vld [vmem:[%s2371_s20 + $0x3f0] sm:$0xff]  }
  0x42   : > { %2012 = vmatpush3.bf16.msra.mxu0 %v2213_v56  ;;  %v2273_v56 = vld [vmem:[%s2371_s20 + $0x330] sm:$0xff]  }
  0x43   : > { %2034 = vmatpush3.bf16.msra.mxu1 %v2214_v57  ;;  %2013 = vmatprep.subr.bf16.mxu0 %v2215_v58  ;;  %v2274_v57 = vld [vmem:[%s2371_s20 + $0x3b0] sm:$0xff]   ;;  %v2275_v58 = vld [vmem:[%s2371_s20 + $0x368] sm:$0xff]  }
  0x44   : > { %2035 = vmatprep.subr.bf16.mxu1 %v2216_v59  ;;  %v2276_v59 = vld [vmem:[%s2371_s20 + $0x3e8] sm:$0xff]  }
  0x46   : > { %2014 = vmatpush3.bf16.msra.mxu0 %v2217_v60  ;;  %v2277_v60 = vld [vmem:[%s2371_s20 + $0x328] sm:$0xff]  }
  0x47   : > { %2036 = vmatpush3.bf16.msra.mxu1 %v2218_v61  ;;  %2015 = vmatprep.subr.bf16.mxu0 %v2219_v62  ;;  %v2278_v61 = vld [vmem:[%s2371_s20 + $0x3a8] sm:$0xff]   ;;  %v2279_v62 = vld [vmem:[%s2371_s20 + $0x360] sm:$0xff]  }
  0x48   : > { %2037 = vmatprep.subr.bf16.mxu1 %v2220_v63  ;;  %v2280_v63 = vld [vmem:[%s2371_s20 + $0x3e0] sm:$0xff]  }
  0x4a   : > { %2016 = vmatpush3.bf16.msra.mxu0 %v2221_v0  ;;  %v2281_v0 = vld [vmem:[%s2371_s20 + $0x320] sm:$0xff]  }
  0x4b   : > { %2038 = vmatpush3.bf16.msra.mxu1 %v2222_v1  ;;  %2017 = vmatprep.subr.bf16.mxu0 %v2223_v2  ;;  %v2282_v1 = vld [vmem:[%s2371_s20 + $0x3a0] sm:$0xff]   ;;  %v2283_v2 = vld [vmem:[%s2371_s20 + $0x358] sm:$0xff]  }
  0x4c   : > { %2039 = vmatprep.subr.bf16.mxu1 %v2224_v3  ;;  %v2284_v3 = vld [vmem:[%s2371_s20 + $0x3d8] sm:$0xff]  }
  0x4e   : > { %2018 = vmatpush3.bf16.msra.mxu0 %v2225_v4  ;;  %v2285_v4 = vld [vmem:[%s2371_s20 + $0x318] sm:$0xff]  }
  0x4f   : > { %2040 = vmatpush3.bf16.msra.mxu1 %v2226_v5  ;;  %2047 = vmatprep.subr.bf16.mxu0 %v2231_v12  ;;  %v2286_v5 = vld [vmem:[%s2371_s20 + $0x398] sm:$0xff]   ;;  %v2293_v12 = vld [vmem:[%s2371_s20 + $0x308] sm:$0xff]  }
  0x50   : > { %2069 = vmatprep.subr.bf16.mxu1 %v2232_v13  ;;  %v2294_v13 = vld [vmem:[%s2371_s20 + $0x388] sm:$0xff]  }
  0x51   : > { %1461 = vmatmul.mubr.bf16.vlgmr.msra.gmra.mxu0 %v1812_v7  ;;  %v2288_v7 = vld [vmem:[%s2371_s20 + $0x3d0] sm:$0xff]  }
  0x52   : > { %1501 = vmatmul.mubr.bf16.vlgmr.msra.gmra.mxu1 %v1814_v10  ;;  %2048 = vmatpush3.bf16.msra.mxu0 %v2233_v14  ;;  %v2291_v10 = vld [vmem:[%s2371_s20 + $0x348] sm:$0xff]   ;;  %v2295_v14 = vld [vmem:[%s2371_s20 + $0x340] sm:$0xff]  }
  0x53   : > { %2070 = vmatpush3.bf16.msra.mxu1 %v2234_v15  ;;  %2049 = vmatprep.subr.bf16.mxu0 %v2235_v16  ;;  %v2296_v15 = vld [vmem:[%s2371_s20 + $0x3c0] sm:$0xff]  }
  0x54   : > { %2071 = vmatprep.subr.bf16.mxu1 %v2236_v17  ;;  %1540 = vmatprep.mubr.bf16.mxu0 %v1817_v47  ;;  %v2297_v16 = vld [vmem:[%s2371_s20 + $0x300] sm:$0xff]  }
  0x55   : > { %1580 = vmatprep.mubr.bf16.mxu1 %v1819_v49  ;;  %v2298_v17 = vld [vmem:[%s2371_s20 + $0x380] sm:$0xff]  }
  0x56   : > { %2050 = vmatpush3.bf16.msra.mxu0 %v2237_v18  ;;  %v266_v18 = vld [vmem:[%s2407_s25 + $0x30] sm:$0xff] }
  0x57   : > { %2072 = vmatpush3.bf16.msra.mxu1 %v2238_v19  ;;  %2051 = vmatprep.subr.bf16.mxu0 %v2239_v20  ;;  %v267_v19 = vld [vmem:[%s2407_s25 + $0x38] sm:$0xff]  ;;  %v1820_v20 = vcombine.low %v266_v18, %v266_v18 }
  0x58   : > { %2073 = vmatprep.subr.bf16.mxu1 %v2240_v21  ;;  %v1821_v21 = vcombine.high %v266_v18, %v266_v18 }
  0x5a   : > { %2052 = vmatpush3.bf16.msra.mxu0 %v2241_v22  ;;  %v1822_v22 = vcombine.low %v267_v19, %v267_v19 }
  0x5b   : > { %2074 = vmatpush3.bf16.msra.mxu1 %v2242_v23  ;;  %2053 = vmatprep.subr.bf16.mxu0 %v2243_v24  ;;  %v1823_v23 = vcombine.high %v267_v19, %v267_v19 }
  0x5c   : > { %2075 = vmatprep.subr.bf16.mxu1 %v2244_v25 }
  0x5e   : > { %2054 = vmatpush3.bf16.msra.mxu0 %v2245_v26 }
  0x5f   : > { %2076 = vmatpush3.bf16.msra.mxu1 %v2246_v27  ;;  %2055 = vmatprep.subr.bf16.mxu0 %v2247_v28 }
  0x60   : > { %2077 = vmatprep.subr.bf16.mxu1 %v2248_v29 }
  0x62   : > { %2056 = vmatpush3.bf16.msra.mxu0 %v2249_v30 }
  0x63   : > { %2078 = vmatpush3.bf16.msra.mxu1 %v2250_v31  ;;  %2057 = vmatprep.subr.bf16.mxu0 %v2251_v32 }
  0x64   : > { %2079 = vmatprep.subr.bf16.mxu1 %v2252_v33 }
  0x66   : > { %2058 = vmatpush3.bf16.msra.mxu0 %v2253_v34 }
  0x67   : > { %2080 = vmatpush3.bf16.msra.mxu1 %v2254_v35  ;;  %2059 = vmatprep.subr.bf16.mxu0 %v2255_v36 }
  0x68   : > { %2081 = vmatprep.subr.bf16.mxu1 %v2256_v37 }
  0x6a   : > { %2060 = vmatpush3.bf16.msra.mxu0 %v2257_v38 }
  0x6b   : > { %2082 = vmatpush3.bf16.msra.mxu1 %v2258_v39  ;;  %2061 = vmatprep.subr.bf16.mxu0 %v2259_v40 }
  0x6c   : > { %2083 = vmatprep.subr.bf16.mxu1 %v2260_v41 }
  0x6e   : > { %2062 = vmatpush3.bf16.msra.mxu0 %v2261_v42 }
  0x6f   : > { %2084 = vmatpush3.bf16.msra.mxu1 %v2262_v43  ;;  %2091 = vmatprep.subr.bf16.mxu0 %v2267_v50 }
  0x70   : > { %2113 = vmatprep.subr.bf16.mxu1 %v2268_v51 }
  0x71   : > { %1541 = vmatmul.mubr.bf16.vlgmr.msra.gmra.mxu0 %v1816_v46 }
  0x72   : > { %1581 = vmatmul.mubr.bf16.vlgmr.msra.gmra.mxu1 %v1818_v48  ;;  %2092 = vmatpush3.bf16.msra.mxu0 %v2269_v52 }
  0x73   : > { %2114 = vmatpush3.bf16.msra.mxu1 %v2270_v53  ;;  %2093 = vmatprep.subr.bf16.mxu0 %v2271_v54 }
  0x74   : > { %2115 = vmatprep.subr.bf16.mxu1 %v2272_v55  ;;  %1620 = vmatprep.mubr.bf16.mxu0 %v1821_v21 }
  0x75   : > { %1660 = vmatprep.mubr.bf16.mxu1 %v1823_v23 }
  0x76   : > { %2094 = vmatpush3.bf16.msra.mxu0 %v2273_v56 }
  0x77   : > { %2116 = vmatpush3.bf16.msra.mxu1 %v2274_v57  ;;  %2095 = vmatprep.subr.bf16.mxu0 %v2275_v58 }
  0x78   : > { %2117 = vmatprep.subr.bf16.mxu1 %v2276_v59 }
  0x7a   : > { %2096 = vmatpush3.bf16.msra.mxu0 %v2277_v60 }
  0x7b   : > { %2118 = vmatpush3.bf16.msra.mxu1 %v2278_v61  ;;  %2097 = vmatprep.subr.bf16.mxu0 %v2279_v62 }
  0x7c   : > { %2119 = vmatprep.subr.bf16.mxu1 %v2280_v63 }
  0x7e   : > { %2098 = vmatpush3.bf16.msra.mxu0 %v2281_v0 }
  0x7f   : > { %2120 = vmatpush3.bf16.msra.mxu1 %v2282_v1  ;;  %2099 = vmatprep.subr.bf16.mxu0 %v2283_v2 }
  0x80   : > { %2121 = vmatprep.subr.bf16.mxu1 %v2284_v3 }
  0x82   : > { %2100 = vmatpush3.bf16.msra.mxu0 %v2285_v4 }
  0x83   : > { %2122 = vmatpush3.bf16.msra.mxu1 %v2286_v5  ;;  %2101 = vmatprep.subr.bf16.mxu0 %v2287_v6 }
  0x84   : > { %2123 = vmatprep.subr.bf16.mxu1 %v2288_v7 }
  0x86   : > { %2102 = vmatpush3.bf16.msra.mxu0 %v2289_v8 }
  0x87   : > { %2124 = vmatpush3.bf16.msra.mxu1 %v2290_v9  ;;  %2103 = vmatprep.subr.bf16.mxu0 %v2291_v10 }
  0x88   : > { %2125 = vmatprep.subr.bf16.mxu1 %v2292_v11 }
  0x8a   : > { %2104 = vmatpush3.bf16.msra.mxu0 %v2293_v12 }
  0x8b   : > { %2126 = vmatpush3.bf16.msra.mxu1 %v2294_v13  ;;  %2105 = vmatprep.subr.bf16.mxu0 %v2295_v14 }
  0x8c   : > { %2127 = vmatprep.subr.bf16.mxu1 %v2296_v15 }
  0x8e   : > { %2106 = vmatpush3.bf16.msra.mxu0 %v2297_v16 }
  0x8f   : > { %2128 = vmatpush3.bf16.msra.mxu1 %v2298_v17 }
  0x91   : > { %1621 = vmatmul.mubr.bf16.vlgmr.msra.gmra.mxu0 %v1820_v20 }
  0x92   : > { %1661 = vmatmul.mubr.bf16.vlgmr.msra.gmra.mxu1 %v1822_v22 }
  0xf1   : > { %v1975_v24 = vpop.f32.mrf.mxu0 }
  0xf2   : > { %v1997_v25 = vpop.f32.mrf.mxu1 }
  0xf3   : > { %v1976_v26 = vpop.f32.mrf.mxu0 }
  0xf4   : > { %v1998_v27 = vpop.f32.mrf.mxu1  ;;  %v1977_v28 = vadd.f32 %v1976_v26, %v1975_v24 }
  0xf5   : > { %v1999_v29 = vadd.f32 %v1998_v27, %v1997_v25  ;;  %v1978_v30 = vpop.f32.mrf.mxu0 }
  0xf6   : > { %v2000_v31 = vpop.f32.mrf.mxu1 }
  0xf7   : > { %v1423_v32 = vadd.f32 %v1999_v29, %v1977_v28  ;;  %v1979_v33 = vpop.f32.mrf.mxu0 }
  0xf8   : > { %v2001_v34 = vpop.f32.mrf.mxu1 }
 0x111   : > { %v2019_v35 = vpop.f32.mrf.mxu0 }
 0x112   : > { %v2041_v36 = vpop.f32.mrf.mxu1 }
 0x113   : > { %v2020_v37 = vpop.f32.mrf.mxu0 }
 0x114   : > { %v2042_v38 = vpop.f32.mrf.mxu1  ;;  %v2021_v51 = vadd.f32 %v2020_v37, %v2019_v35 }
 0x115   : > { %v2022_v39 = vpop.f32.mrf.mxu0  ;;  %v2043_v53 = vadd.f32 %v2042_v38, %v2041_v36 }
 0x116   : > { %v2044_v40 = vpop.f32.mrf.mxu1  ;;  %v1463_v52 = vadd.f32 %v2021_v51, %v1423_v32 }
 0x117   : > { %v2023_v41 = vpop.f32.mrf.mxu0 }
 0x118   : > { %v2045_v42 = vpop.f32.mrf.mxu1  ;;  %v1503_v55 = vadd.f32 %v2043_v53, %v1463_v52 }
 0x131   : > { %v2063_v43 = vpop.f32.mrf.mxu0 }
 0x132   : > { %v2085_v44 = vpop.f32.mrf.mxu1 }
 0x133   : > { %v2064_v45 = vpop.f32.mrf.mxu0 }
 0x134   : > { %v2086_v46 = vpop.f32.mrf.mxu1  ;;  %v2065_v54 = vadd.f32 %v2064_v45, %v2063_v43 }
 0x135   : > { %v2066_v47 = vpop.f32.mrf.mxu0  ;;  %v2087_v58 = vadd.f32 %v2086_v46, %v2085_v44 }
 0x136   : > { %v2088_v48 = vpop.f32.mrf.mxu1  ;;  %v1543_v56 = vadd.f32 %v2065_v54, %v1503_v55 }
 0x137   : > { %v2067_v49 = vpop.f32.mrf.mxu0 }
 0x138   : > { %v2089_v50 = vpop.f32.mrf.mxu1  ;;  %v1583_v61 = vadd.f32 %v2087_v58, %v1543_v56 }
 0x151   : > { %v2107_v57 = vpop.f32.mrf.mxu0 }
 0x152   : > { %v2129_v59 = vpop.f32.mrf.mxu1 }
 0x153   : > { %v2108_v60 = vpop.f32.mrf.mxu0 }
 0x154   : > { %v2109_v62 = vadd.f32 %v2108_v60, %v2107_v57  ;;  %v2130_v63 = vpop.f32.mrf.mxu1  ;;  %1671 = sbr.rel (%p1952_p6) target bundleno = 347 (0x15b), region = 36 }
 0x155   : > { %v2110_v0 = vpop.f32.mrf.mxu0  ;;  %v2131_v2 = vadd.f32 %v2130_v63, %v2129_v59 }
 0x156   : > { %v1623_v1 = vadd.f32 %v2109_v62, %v1583_v61  ;;  %v2132_v3 = vpop.f32.mrf.mxu1 }
 0x157   : > { %v2111_v4 = vpop.f32.mrf.mxu0 }
 0x158   : > { %v1663_v5 = vadd.f32 %v2131_v2, %v1623_v1  ;;  %v2133_v6 = vpop.f32.mrf.mxu1 }
 0x15a   : > { %1672 = vst [vmem:[#allocation2] sm:$0xff] %v1663_v5 }
 0x15b PF: > { %p1953_p7 = scmp.le.s32.totalorder %s2317_s12, 0 }
 0x15d   : > { %1676 = sbr.rel (%p1953_p7) target bundleno = 358 (0x166), region = 40 }
 0x162   : > { %v1677_v7 = vld [vmem:[#allocation2] sm:$0xff] }
 0x163   : > { %v1678_v8 = vadd.f32 %v1677_v7, %v1663_v5 }
 0x165   : > { %1679 = vst [vmem:[#allocation2] sm:$0xff] %v1678_v8 }
 0x166 PF: > { %p1954_p8 = scmp.ne.s32.totalorder %s2317_s12, 2 }
 0x168   : > { %1683 = sbr.rel (%p1954_p8) target bundleno = 370 (0x172), region = 44 }
 0x16d   : > { %v1684_v9 = vld [vmem:[#allocation2] sm:$0xff] }
 0x16e   : > { %v1955_v10 = vld [vmem:[%s2535_s2] ss:$0 sm:$0xff] }
 0x16f   : > { %v1692_v11 = vadd.f32 %v1955_v10, %v1684_v9 }
 0x171   : > { %1693 = vst [vmem:[%s2536_s3] sm:$0xff] %v1692_v11 }
 0x172 PF: > { %s13_s14 = sadd.s32 1, %s2325_s14   ;;  %s2537_s12 = smov %s2321_s13 }
 0x173   : > { %p10_p9 = scmp.ge.s32.totalorder %s13_s14, 5   ;;  %s2538_s13 = smov %s2540_s15 }
 0x175   :  { %12 = sbr.rel (!%p10_p9) target bundleno = 2 (0x2), region = 80 }

</bundles_post_ra>
